<compile_context>
chip_gen: v7x
topology: tpu7x:2x2x1
jax: 0.10.0
libtpu: 0.0.40
codegen_flags: <defaults>
</compile_context>

<pallas_src>
import functools

import jax
import jax.numpy as jnp
from jax.experimental import pallas as pl
from jax.experimental.pallas import tpu as pltpu

BN_EPS = 1e-3


# ----------------------------------------------------------------------------
# In-kernel helpers. Canonical activation layout: rows = (h, w) spatial
# positions, lanes = (n, c) batch*channel pairs.
# ----------------------------------------------------------------------------
def _conv3x3(pad_ref, w_ref, H, W):
    """3x3 'valid' conv on a reflection-padded (H+2, W+2, K) ref.

    w_ref is (3, 3, K, M) batch-block-diagonal weights. Returns (H*W, M) f32."""
    K = pad_ref.shape[-1]
    M = w_ref.shape[-1]
    acc = jnp.zeros((H * W, M), dtype=jnp.float32)
    for dy in range(3):
        for dx in range(3):
            tap = pad_ref[dy:dy + H, dx:dx + W, :]               # (H, W, K)
            acc = acc + jnp.dot(tap.reshape(H * W, K), w_ref[dy, dx],
                                preferred_element_type=jnp.float32)
    return acc


def _bn_relu(y, pool_ref, gamma_ref, beta_ref, count):
    """Training-mode BatchNorm + ReLU on (R, N*C).

    Per-channel stats are pooled across the N batch lane-groups (and broadcast
    back to every lane) with one matmul against the (N*C, N*C) pooling matrix."""
    s1 = jnp.sum(y, axis=0, keepdims=True)                        # (1, N*C)
    mean = jnp.dot(s1, pool_ref[...],
                   preferred_element_type=jnp.float32) / count
    d = y - mean
    s2 = jnp.sum(d * d, axis=0, keepdims=True)
    var = jnp.dot(s2, pool_ref[...],
                  preferred_element_type=jnp.float32) / count
    yhat = d * jax.lax.rsqrt(var + BN_EPS) * gamma_ref[...] + beta_ref[...]
    return jnp.maximum(yhat, 0.0)


def _reflect_pad_into(pad_ref, x3d, H, W):
    """Write ReflectionPad2d(1) of x3d (H, W, K) into the (H+2, W+2, K) scratch."""
    pad_ref[1:H + 1, 1:W + 1, :] = x3d
    pad_ref[0:1, 1:W + 1, :] = x3d[1:2]                    # top    <- row 1
    pad_ref[H + 1:H + 2, 1:W + 1, :] = x3d[H - 2:H - 1]    # bottom <- row H-2
    pad_ref[:, 0:1, :] = pad_ref[:, 2:3, :]                # left   <- col 1
    pad_ref[:, W + 1:W + 2, :] = pad_ref[:, W - 1:W, :]    # right  <- col W-2


# ----------------------------------------------------------------------------
# The fused generator kernel (single pallas_call, no grid).
# ----------------------------------------------------------------------------
def _generator_kernel(xpad1_ref, wk1_ref, g1_ref, b1_ref,
                      wk2_ref, g2_ref, b2_ref,
                      wk3t_ref, g3_ref, b3_ref,
                      up1_ref, up2_ref, pool_ref, pool3_ref,
                      out_ref, pad2_ref, pad3_ref, *, n_batch):
    H1 = xpad1_ref.shape[0] - 2
    W1 = xpad1_ref.shape[1] - 2
    NC = wk1_ref.shape[-1]                    # N * hidden channels (lane width)
    H2, W2 = 2 * H1, 2 * W1
    H3, W3 = 2 * H2, 2 * W2
    NC3 = out_ref.shape[0]                    # N * output channels

    # ---- block 1: (pad done in wrapper) conv + BN + ReLU --------------------
    y1 = _conv3x3(xpad1_ref, wk1_ref, H1, W1)                     # (H1*W1, NC)
    y1 = _bn_relu(y1, pool_ref, g1_ref, b1_ref, float(n_batch * H1 * W1))

    # ---- bilinear x2 upsample #1: ONE matmul with kron(Uh, Uw) --------------
    u1 = jnp.dot(up1_ref[...], y1, preferred_element_type=jnp.float32)

    # ---- block 2: reflect-pad (scratch) + conv + BN + ReLU ------------------
    _reflect_pad_into(pad2_ref, u1.reshape(H2, W2, NC), H2, W2)
    y2 = _conv3x3(pad2_ref, wk2_ref, H2, W2)                      # (H2*W2, NC)
    y2 = _bn_relu(y2, pool_ref, g2_ref, b2_ref, float(n_batch * H2 * W2))

    # ---- bilinear x2 upsample #2 --------------------------------------------
    u2 = jnp.dot(up2_ref[...], y2, preferred_element_type=jnp.float32)

    # ---- block 3: conv (16 -> 1) accumulated in (N*Cout, H*W) orientation ----
    # A @ B^T dot_general so the result is already lane-dense for the final
    # store (no transposes, no narrow masked stores).
    _reflect_pad_into(pad3_ref, u2.reshape(H3, W3, NC), H3, W3)
    acc = jnp.zeros((NC3, H3 * W3), dtype=jnp.float32)
    for dy in range(3):
        for dx in range(3):
            tap = pad3_ref[dy:dy + H3, dx:dx + W3, :].reshape(H3 * W3, NC)
            acc = acc + jax.lax.dot_general(
                wk3t_ref[dy, dx], tap,
                dimension_numbers=(((1,), (1,)), ((), ())),
                preferred_element_type=jnp.float32)               # (NC3, H3*W3)

    # BatchNorm (stats pooled over batch + spatial, per output channel) + Tanh.
    count = float(n_batch * H3 * W3)
    s1 = jnp.sum(acc, axis=1, keepdims=True)                      # (NC3, 1)
    mean = jnp.dot(pool3_ref[...], s1,
                   preferred_element_type=jnp.float32) / count
    d = acc - mean
    s2 = jnp.sum(d * d, axis=1, keepdims=True)
    var = jnp.dot(pool3_ref[...], s2,
                  preferred_element_type=jnp.float32) / count
    out_ref[...] = jnp.tanh(d * jax.lax.rsqrt(var + BN_EPS) * g3_ref[...]
                            + b3_ref[...])


# ----------------------------------------------------------------------------
# Wrapper: builds the constant matrices (once, under jit) and launches the
# single fused kernel. Public interface is NCHW in / NCHW out like PyTorch.
# ----------------------------------------------------------------------------
def _upsample_matrix(n):
    """(2n, n) matrix matching torch Upsample(2, bilinear, align_corners=False)."""
    o = jnp.arange(2 * n, dtype=jnp.float32)
    src = jnp.maximum((o + 0.5) / 2.0 - 0.5, 0.0)     # half-pixel centers, clamp
    i0 = jnp.floor(src).astype(jnp.int32)
    i1 = jnp.minimum(i0 + 1, n - 1)
    w1 = src - i0.astype(jnp.float32)
    w0 = 1.0 - w1
    u = jnp.zeros((2 * n, n), dtype=jnp.float32)
    idx = jnp.arange(2 * n)
    u = u.at[idx, i0].add(w0)
    u = u.at[idx, i1].add(w1)
    return u


def _block_diag_weights(w, n):
    """(3,3,cin,cout) conv weights -> (3,3,n*cin,n*cout) batch-block-diagonal."""
    eye = jnp.eye(n, dtype=w.dtype)
    out = jnp.einsum("ab,yxij->yxaibj", eye, w)
    return out.reshape(3, 3, n * w.shape[2], n * w.shape[3])


def _pool_matrix(n, c):
    """(n*c, n*c) matrix: sums @ P pools per-(n,c) sums across the n batch
    groups and broadcasts the pooled value back to every (n,c) lane."""
    lane = jnp.arange(n * c)
    return (lane[:, None] % c == lane[None, :] % c).astype(jnp.float32)


def generator_forward(x_nchw, params):
    N, C0, H1, W1 = x_nchw.shape
    C1 = params["w1"].shape[-1]         # hidden channels
    C3 = params["w3"].shape[-1]         # output channels
    H2, W2, H3, W3 = 2 * H1, 2 * W1, 4 * H1, 4 * W1
    NC, NC3 = N * C1, N * C3

    # Layout plumbing (tiny one-off XLA ops): activations enter the kernel as
    # (H, W, N*C) -- batch folded onto the channel / lane axis.
    x_hwnc = jnp.transpose(x_nchw, (2, 3, 0, 1)).reshape(H1, W1, N * C0)
    xpad1 = jnp.pad(x_hwnc, ((1, 1), (1, 1), (0, 0)), mode="reflect")

    wk1 = _block_diag_weights(params["w1"], N)                   # (3,3,N*C0,NC)
    wk2 = _block_diag_weights(params["w2"], N)                   # (3,3,NC,NC)
    wk3t = jnp.swapaxes(_block_diag_weights(params["w3"], N), 2, 3)  # (3,3,NC3,NC)

    g1 = jnp.tile(params["g1"], N)[None, :]
    b1 = jnp.tile(params["b1"], N)[None, :]
    g2 = jnp.tile(params["g2"], N)[None, :]
    b2 = jnp.tile(params["b2"], N)[None, :]
    g3 = jnp.tile(params["g3"], N).reshape(NC3, 1)
    b3 = jnp.tile(params["b3"], N).reshape(NC3, 1)

    up1 = jnp.kron(_upsample_matrix(H1), _upsample_matrix(W1))   # (H2*W2, H1*W1)
    up2 = jnp.kron(_upsample_matrix(H2), _upsample_matrix(W2))   # (H3*W3, H2*W2)
    pool = _pool_matrix(N, C1)
    pool3 = _pool_matrix(N, C3)

    kernel = functools.partial(_generator_kernel, n_batch=N)
    out2d = pl.pallas_call(
        kernel,
        out_shape=jax.ShapeDtypeStruct((NC3, H3 * W3), jnp.float32),
        in_specs=[pl.BlockSpec(memory_space=pltpu.MemorySpace.VMEM)] * 14,
        out_specs=pl.BlockSpec(memory_space=pltpu.MemorySpace.VMEM),
        scratch_shapes=[
            pltpu.VMEM((H2 + 2, W2 + 2, NC), jnp.float32),   # reflect-pad buf 2
            pltpu.VMEM((H3 + 2, W3 + 2, NC), jnp.float32),   # reflect-pad buf 3
        ],
        # TODO(synk): on v7x a 2-way "parallel" grid split could use both
        # TensorCores, but the BN batch statistics couple the whole batch and
        # the kernel is latency-bound at this size, so it is kept single-core.
    )(xpad1, wk1, g1, b1, wk2, g2, b2, wk3t, g3, b3, up1, up2, pool, pool3)

    # Rows of out2d are (n, c_out) pairs; columns are (h, w).
    return out2d.reshape(N, C3, H3, W3)


# ----------------------------------------------------------------------------
# Pure-JAX reference (same math, XLA ops) used only as a sanity check.
# ----------------------------------------------------------------------------
def _ref_conv_bn_act(x_nhwc, w, gamma, beta, act):
    N, H, W, _ = x_nhwc.shape
    Cout = w.shape[-1]
    xpad = jnp.pad(x_nhwc, ((0, 0), (1, 1), (1, 1), (0, 0)), mode="reflect")
    y = jnp.zeros((N, H, W, Cout), jnp.float32)
    for dy in range(3):
        for dx in range(3):
            y = y + jnp.einsum("nhwc,cd->nhwd",
                               xpad[:, dy:dy + H, dx:dx + W, :], w[dy, dx],
                               precision=jax.lax.Precision.HIGHEST)
    mean = jnp.mean(y, axis=(0, 1, 2), keepdims=True)
    var = jnp.mean((y - mean) ** 2, axis=(0, 1, 2), keepdims=True)
    y = (y - mean) * jax.lax.rsqrt(var + BN_EPS) * gamma + beta
    return jnp.maximum(y, 0.0) if act == "relu" else jnp.tanh(y)


def _ref_upsample(x_nchw):
    _, _, H, W = x_nchw.shape
    return jnp.einsum("ph,nchw,qw->ncpq", _upsample_matrix(H), x_nchw,
                      _upsample_matrix(W), precision=jax.lax.Precision.HIGHEST)


def reference_forward(x_nchw, params):
    x = jnp.transpose(x_nchw, (0, 2, 3, 1))
    x = _ref_conv_bn_act(x, params["w1"], params["g1"], params["b1"], "relu")
    x = _ref_upsample(jnp.transpose(x, (0, 3, 1, 2)))
    x = jnp.transpose(x, (0, 2, 3, 1))
    x = _ref_conv_bn_act(x, params["w2"], params["g2"], params["b2"], "relu")
    x = _ref_upsample(jnp.transpose(x, (0, 3, 1, 2)))
    x = jnp.transpose(x, (0, 2, 3, 1))
    x = _ref_conv_bn_act(x, params["w3"], params["g3"], params["b3"], "tanh")
    return jnp.transpose(x, (0, 3, 1, 2))


if __name__ == "__main__":
    key = jax.random.PRNGKey(0)
    N, Cin, Chid, Cout = 2, 4, 16, 1
    H = W = 8

    k_x, k_w1, k_w2, k_w3 = jax.random.split(key, 4)
    x = jax.random.normal(k_x, (N, Cin, H, W), dtype=jnp.float32)

    # Conv weights stored as (kh, kw, Cin, Cout) (torch weight transposed
    # (2, 3, 1, 0)). BatchNorm affine params use torch defaults (1, 0).
    params = {
        "w1": jax.random.normal(k_w1, (3, 3, Cin, Chid), jnp.float32) * 0.1,
        "g1": jnp.ones((Chid,), jnp.float32), "b1": jnp.zeros((Chid,), jnp.float32),
        "w2": jax.random.normal(k_w2, (3, 3, Chid, Chid), jnp.float32) * 0.1,
        "g2": jnp.ones((Chid,), jnp.float32), "b2": jnp.zeros((Chid,), jnp.float32),
        "w3": jax.random.normal(k_w3, (3, 3, Chid, Cout), jnp.float32) * 0.1,
        "g3": jnp.ones((Cout,), jnp.float32), "b3": jnp.zeros((Cout,), jnp.float32),
    }

    out = jax.jit(generator_forward)(x, params)
    out = jax.block_until_ready(out)

    assert out.shape == (N, Cout, 4 * H, 4 * W), out.shape
    assert bool(jnp.all(jnp.isfinite(out)))

    # Sanity check against a pure-JAX reference (catches layout/pad/BN bugs;
    # tolerance is generous because MXU vs HIGHEST-precision matmuls differ).
    ref = jax.jit(reference_forward)(x, params)
    assert float(jnp.max(jnp.abs(out - ref))) < 0.1

    print("KERNEL_OK")
</pallas_src>

<mosaic_0001>
module attributes {stable_mosaic.version = 11 : i64} {
  func.func private @main(%arg0: i32) attributes {dimension_semantics = [#tpu.dimension_semantics<core_parallel>], iteration_bounds = array<i64: 2>, tpu.core_type = #tpu.core_type<sc_scalar_subcore>, window_params = []} {
    return
  }
}

module attributes {stable_mosaic.version = 11 : i64} {
  func.func private @main(%arg0: i32) attributes {dimension_semantics = [#tpu.dimension_semantics<core_parallel>], iteration_bounds = array<i64: 2>, tpu.core_type = #tpu.core_type<sc_scalar_subcore>, window_params = []} {
    return
  }
}

module attributes {stable_mosaic.version = 11 : i64} {
  func.func @_generator_kernel(%arg0: memref<10x10x8xf32, #tpu.memory_space<vmem>>, %arg1: memref<3x3x8x32xf32, #tpu.memory_space<vmem>>, %arg2: memref<1x32xf32, #tpu.memory_space<vmem>>, %arg3: memref<1x32xf32, #tpu.memory_space<vmem>>, %arg4: memref<3x3x32x32xf32, #tpu.memory_space<vmem>>, %arg5: memref<1x32xf32, #tpu.memory_space<vmem>>, %arg6: memref<1x32xf32, #tpu.memory_space<vmem>>, %arg7: memref<3x3x2x32xf32, #tpu.memory_space<vmem>>, %arg8: memref<2x1xf32, #tpu.memory_space<vmem>>, %arg9: memref<2x1xf32, #tpu.memory_space<vmem>>, %arg10: memref<256x64xf32, #tpu.memory_space<vmem>>, %arg11: memref<1024x256xf32, #tpu.memory_space<vmem>>, %arg12: memref<32x32xf32, #tpu.memory_space<vmem>>, %arg13: memref<2x2xf32, #tpu.memory_space<vmem>>, %arg14: memref<2x1024xf32, #tpu.memory_space<vmem>>, %arg15: memref<18x18x32xf32, #tpu.memory_space<vmem>>, %arg16: memref<34x34x32xf32, #tpu.memory_space<vmem>>) attributes {dimension_semantics = [], scalar_prefetch = 0 : i64, scratch_operands = 2 : i64, tpu.core_type = #tpu.core_type<tc>} {
    %cst = arith.constant 0.000000e+00 : f32
    %0 = vector.broadcast %cst : f32 to vector<64x32xf32>
    %c0 = arith.constant 0 : index
    %c0_0 = arith.constant 0 : index
    %c0_1 = arith.constant 0 : index
    %1 = vector.load %arg0[%c0, %c0_0, %c0_1] : memref<10x10x8xf32, #tpu.memory_space<vmem>>, vector<8x8x8xf32>
    %2 = vector.shape_cast %1 : vector<8x8x8xf32> to vector<64x8xf32>
    %c0_2 = arith.constant 0 : index
    %c0_3 = arith.constant 0 : index
    %c0_4 = arith.constant 0 : index
    %c0_5 = arith.constant 0 : index
    %3 = vector.load %arg1[%c0_2, %c0_3, %c0_4, %c0_5] : memref<3x3x8x32xf32, #tpu.memory_space<vmem>>, vector<1x1x8x32xf32>
    %4 = vector.shape_cast %3 : vector<1x1x8x32xf32> to vector<8x32xf32>
    %cst_6 = arith.constant dense<0.000000e+00> : vector<64x32xf32>
    %5 = tpu.matmul %2, %4, %cst_6 {dimension_numbers = #tpu.dot_dimension_numbers<[1], [0], [0], [1], [0, 0, 1, 1], [], []>} : vector<64x8xf32>, vector<8x32xf32>, vector<64x32xf32> -> vector<64x32xf32>
    %6 = arith.addf %0, %5 : vector<64x32xf32>
    %c0_7 = arith.constant 0 : index
    %c1 = arith.constant 1 : index
    %c0_8 = arith.constant 0 : index
    %7 = vector.load %arg0[%c0_7, %c1, %c0_8] : memref<10x10x8xf32, #tpu.memory_space<vmem>>, vector<8x8x8xf32>
    %8 = vector.shape_cast %7 : vector<8x8x8xf32> to vector<64x8xf32>
    %c0_9 = arith.constant 0 : index
    %c1_10 = arith.constant 1 : index
    %c0_11 = arith.constant 0 : index
    %c0_12 = arith.constant 0 : index
    %9 = vector.load %arg1[%c0_9, %c1_10, %c0_11, %c0_12] : memref<3x3x8x32xf32, #tpu.memory_space<vmem>>, vector<1x1x8x32xf32>
    %10 = vector.shape_cast %9 : vector<1x1x8x32xf32> to vector<8x32xf32>
    %cst_13 = arith.constant dense<0.000000e+00> : vector<64x32xf32>
    %11 = tpu.matmul %8, %10, %cst_13 {dimension_numbers = #tpu.dot_dimension_numbers<[1], [0], [0], [1], [0, 0, 1, 1], [], []>} : vector<64x8xf32>, vector<8x32xf32>, vector<64x32xf32> -> vector<64x32xf32>
    %12 = arith.addf %6, %11 : vector<64x32xf32>
    %c0_14 = arith.constant 0 : index
    %c2 = arith.constant 2 : index
    %c0_15 = arith.constant 0 : index
    %13 = vector.load %arg0[%c0_14, %c2, %c0_15] : memref<10x10x8xf32, #tpu.memory_space<vmem>>, vector<8x8x8xf32>
    %14 = vector.shape_cast %13 : vector<8x8x8xf32> to vector<64x8xf32>
    %c0_16 = arith.constant 0 : index
    %c2_17 = arith.constant 2 : index
    %c0_18 = arith.constant 0 : index
    %c0_19 = arith.constant 0 : index
    %15 = vector.load %arg1[%c0_16, %c2_17, %c0_18, %c0_19] : memref<3x3x8x32xf32, #tpu.memory_space<vmem>>, vector<1x1x8x32xf32>
    %16 = vector.shape_cast %15 : vector<1x1x8x32xf32> to vector<8x32xf32>
    %cst_20 = arith.constant dense<0.000000e+00> : vector<64x32xf32>
    %17 = tpu.matmul %14, %16, %cst_20 {dimension_numbers = #tpu.dot_dimension_numbers<[1], [0], [0], [1], [0, 0, 1, 1], [], []>} : vector<64x8xf32>, vector<8x32xf32>, vector<64x32xf32> -> vector<64x32xf32>
    %18 = arith.addf %12, %17 : vector<64x32xf32>
    %c1_21 = arith.constant 1 : index
    %c0_22 = arith.constant 0 : index
    %c0_23 = arith.constant 0 : index
    %19 = vector.load %arg0[%c1_21, %c0_22, %c0_23] : memref<10x10x8xf32, #tpu.memory_space<vmem>>, vector<8x8x8xf32>
    %20 = vector.shape_cast %19 : vector<8x8x8xf32> to vector<64x8xf32>
    %c1_24 = arith.constant 1 : index
    %c0_25 = arith.constant 0 : index
    %c0_26 = arith.constant 0 : index
    %c0_27 = arith.constant 0 : index
    %21 = vector.load %arg1[%c1_24, %c0_25, %c0_26, %c0_27] : memref<3x3x8x32xf32, #tpu.memory_space<vmem>>, vector<1x1x8x32xf32>
    %22 = vector.shape_cast %21 : vector<1x1x8x32xf32> to vector<8x32xf32>
    %cst_28 = arith.constant dense<0.000000e+00> : vector<64x32xf32>
    %23 = tpu.matmul %20, %22, %cst_28 {dimension_numbers = #tpu.dot_dimension_numbers<[1], [0], [0], [1], [0, 0, 1, 1], [], []>} : vector<64x8xf32>, vector<8x32xf32>, vector<64x32xf32> -> vector<64x32xf32>
    %24 = arith.addf %18, %23 : vector<64x32xf32>
    %c1_29 = arith.constant 1 : index
    %c1_30 = arith.constant 1 : index
    %c0_31 = arith.constant 0 : index
    %25 = vector.load %arg0[%c1_29, %c1_30, %c0_31] : memref<10x10x8xf32, #tpu.memory_space<vmem>>, vector<8x8x8xf32>
    %26 = vector.shape_cast %25 : vector<8x8x8xf32> to vector<64x8xf32>
    %c1_32 = arith.constant 1 : index
    %c1_33 = arith.constant 1 : index
    %c0_34 = arith.constant 0 : index
    %c0_35 = arith.constant 0 : index
    %27 = vector.load %arg1[%c1_32, %c1_33, %c0_34, %c0_35] : memref<3x3x8x32xf32, #tpu.memory_space<vmem>>, vector<1x1x8x32xf32>
    %28 = vector.shape_cast %27 : vector<1x1x8x32xf32> to vector<8x32xf32>
    %cst_36 = arith.constant dense<0.000000e+00> : vector<64x32xf32>
    %29 = tpu.matmul %26, %28, %cst_36 {dimension_numbers = #tpu.dot_dimension_numbers<[1], [0], [0], [1], [0, 0, 1, 1], [], []>} : vector<64x8xf32>, vector<8x32xf32>, vector<64x32xf32> -> vector<64x32xf32>
    %30 = arith.addf %24, %29 : vector<64x32xf32>
    %c1_37 = arith.constant 1 : index
    %c2_38 = arith.constant 2 : index
    %c0_39 = arith.constant 0 : index
    %31 = vector.load %arg0[%c1_37, %c2_38, %c0_39] : memref<10x10x8xf32, #tpu.memory_space<vmem>>, vector<8x8x8xf32>
    %32 = vector.shape_cast %31 : vector<8x8x8xf32> to vector<64x8xf32>
    %c1_40 = arith.constant 1 : index
    %c2_41 = arith.constant 2 : index
    %c0_42 = arith.constant 0 : index
    %c0_43 = arith.constant 0 : index
    %33 = vector.load %arg1[%c1_40, %c2_41, %c0_42, %c0_43] : memref<3x3x8x32xf32, #tpu.memory_space<vmem>>, vector<1x1x8x32xf32>
    %34 = vector.shape_cast %33 : vector<1x1x8x32xf32> to vector<8x32xf32>
    %cst_44 = arith.constant dense<0.000000e+00> : vector<64x32xf32>
    %35 = tpu.matmul %32, %34, %cst_44 {dimension_numbers = #tpu.dot_dimension_numbers<[1], [0], [0], [1], [0, 0, 1, 1], [], []>} : vector<64x8xf32>, vector<8x32xf32>, vector<64x32xf32> -> vector<64x32xf32>
    %36 = arith.addf %30, %35 : vector<64x32xf32>
    %c2_45 = arith.constant 2 : index
    %c0_46 = arith.constant 0 : index
    %c0_47 = arith.constant 0 : index
    %37 = vector.load %arg0[%c2_45, %c0_46, %c0_47] : memref<10x10x8xf32, #tpu.memory_space<vmem>>, vector<8x8x8xf32>
    %38 = vector.shape_cast %37 : vector<8x8x8xf32> to vector<64x8xf32>
    %c2_48 = arith.constant 2 : index
    %c0_49 = arith.constant 0 : index
    %c0_50 = arith.constant 0 : index
    %c0_51 = arith.constant 0 : index
    %39 = vector.load %arg1[%c2_48, %c0_49, %c0_50, %c0_51] : memref<3x3x8x32xf32, #tpu.memory_space<vmem>>, vector<1x1x8x32xf32>
    %40 = vector.shape_cast %39 : vector<1x1x8x32xf32> to vector<8x32xf32>
    %cst_52 = arith.constant dense<0.000000e+00> : vector<64x32xf32>
    %41 = tpu.matmul %38, %40, %cst_52 {dimension_numbers = #tpu.dot_dimension_numbers<[1], [0], [0], [1], [0, 0, 1, 1], [], []>} : vector<64x8xf32>, vector<8x32xf32>, vector<64x32xf32> -> vector<64x32xf32>
    %42 = arith.addf %36, %41 : vector<64x32xf32>
    %c2_53 = arith.constant 2 : index
    %c1_54 = arith.constant 1 : index
    %c0_55 = arith.constant 0 : index
    %43 = vector.load %arg0[%c2_53, %c1_54, %c0_55] : memref<10x10x8xf32, #tpu.memory_space<vmem>>, vector<8x8x8xf32>
    %44 = vector.shape_cast %43 : vector<8x8x8xf32> to vector<64x8xf32>
    %c2_56 = arith.constant 2 : index
    %c1_57 = arith.constant 1 : index
    %c0_58 = arith.constant 0 : index
    %c0_59 = arith.constant 0 : index
    %45 = vector.load %arg1[%c2_56, %c1_57, %c0_58, %c0_59] : memref<3x3x8x32xf32, #tpu.memory_space<vmem>>, vector<1x1x8x32xf32>
    %46 = vector.shape_cast %45 : vector<1x1x8x32xf32> to vector<8x32xf32>
    %cst_60 = arith.constant dense<0.000000e+00> : vector<64x32xf32>
    %47 = tpu.matmul %44, %46, %cst_60 {dimension_numbers = #tpu.dot_dimension_numbers<[1], [0], [0], [1], [0, 0, 1, 1], [], []>} : vector<64x8xf32>, vector<8x32xf32>, vector<64x32xf32> -> vector<64x32xf32>
    %48 = arith.addf %42, %47 : vector<64x32xf32>
    %c2_61 = arith.constant 2 : index
    %c2_62 = arith.constant 2 : index
    %c0_63 = arith.constant 0 : index
    %49 = vector.load %arg0[%c2_61, %c2_62, %c0_63] : memref<10x10x8xf32, #tpu.memory_space<vmem>>, vector<8x8x8xf32>
    %50 = vector.shape_cast %49 : vector<8x8x8xf32> to vector<64x8xf32>
    %c2_64 = arith.constant 2 : index
    %c2_65 = arith.constant 2 : index
    %c0_66 = arith.constant 0 : index
    %c0_67 = arith.constant 0 : index
    %51 = vector.load %arg1[%c2_64, %c2_65, %c0_66, %c0_67] : memref<3x3x8x32xf32, #tpu.memory_space<vmem>>, vector<1x1x8x32xf32>
    %52 = vector.shape_cast %51 : vector<1x1x8x32xf32> to vector<8x32xf32>
    %cst_68 = arith.constant dense<0.000000e+00> : vector<64x32xf32>
    %53 = tpu.matmul %50, %52, %cst_68 {dimension_numbers = #tpu.dot_dimension_numbers<[1], [0], [0], [1], [0, 0, 1, 1], [], []>} : vector<64x8xf32>, vector<8x32xf32>, vector<64x32xf32> -> vector<64x32xf32>
    %54 = arith.addf %48, %53 : vector<64x32xf32>
    %cst_69 = arith.constant dense<0.000000e+00> : vector<32xf32>
    %55 = vector.multi_reduction <add>, %54, %cst_69 [0] : vector<64x32xf32> to vector<32xf32>
    %56 = vector.shape_cast %55 : vector<32xf32> to vector<1x32xf32>
    %c0_70 = arith.constant 0 : index
    %c0_71 = arith.constant 0 : index
    %57 = vector.load %arg12[%c0_70, %c0_71] : memref<32x32xf32, #tpu.memory_space<vmem>>, vector<32x32xf32>
    %cst_72 = arith.constant dense<0.000000e+00> : vector<1x32xf32>
    %58 = tpu.matmul %56, %57, %cst_72 {dimension_numbers = #tpu.dot_dimension_numbers<[1], [0], [0], [1], [0, 0, 1, 1], [], []>} : vector<1x32xf32>, vector<32x32xf32>, vector<1x32xf32> -> vector<1x32xf32>
    %cst_73 = arith.constant 1.280000e+02 : f32
    %59 = vector.broadcast %cst_73 : f32 to vector<1x32xf32>
    %60 = arith.divf %58, %59 : vector<1x32xf32>
    %61 = vector.broadcast %60 : vector<1x32xf32> to vector<64x32xf32>
    %62 = arith.subf %54, %61 : vector<64x32xf32>
    %63 = arith.mulf %62, %62 : vector<64x32xf32>
    %cst_74 = arith.constant dense<0.000000e+00> : vector<32xf32>
    %64 = vector.multi_reduction <add>, %63, %cst_74 [0] : vector<64x32xf32> to vector<32xf32>
    %65 = vector.shape_cast %64 : vector<32xf32> to vector<1x32xf32>
    %c0_75 = arith.constant 0 : index
    %c0_76 = arith.constant 0 : index
    %66 = vector.load %arg12[%c0_75, %c0_76] : memref<32x32xf32, #tpu.memory_space<vmem>>, vector<32x32xf32>
    %cst_77 = arith.constant dense<0.000000e+00> : vector<1x32xf32>
    %67 = tpu.matmul %65, %66, %cst_77 {dimension_numbers = #tpu.dot_dimension_numbers<[1], [0], [0], [1], [0, 0, 1, 1], [], []>} : vector<1x32xf32>, vector<32x32xf32>, vector<1x32xf32> -> vector<1x32xf32>
    %cst_78 = arith.constant 1.280000e+02 : f32
    %68 = vector.broadcast %cst_78 : f32 to vector<1x32xf32>
    %69 = arith.divf %67, %68 : vector<1x32xf32>
    %cst_79 = arith.constant 1.000000e-03 : f32
    %70 = vector.broadcast %cst_79 : f32 to vector<1x32xf32>
    %71 = arith.addf %69, %70 : vector<1x32xf32>
    %72 = math.rsqrt %71 : vector<1x32xf32>
    %73 = vector.broadcast %72 : vector<1x32xf32> to vector<64x32xf32>
    %74 = arith.mulf %62, %73 : vector<64x32xf32>
    %c0_80 = arith.constant 0 : index
    %c0_81 = arith.constant 0 : index
    %75 = vector.load %arg2[%c0_80, %c0_81] : memref<1x32xf32, #tpu.memory_space<vmem>>, vector<1x32xf32>
    %76 = vector.broadcast %75 : vector<1x32xf32> to vector<64x32xf32>
    %77 = arith.mulf %74, %76 : vector<64x32xf32>
    %c0_82 = arith.constant 0 : index
    %c0_83 = arith.constant 0 : index
    %78 = vector.load %arg3[%c0_82, %c0_83] : memref<1x32xf32, #tpu.memory_space<vmem>>, vector<1x32xf32>
    %79 = vector.broadcast %78 : vector<1x32xf32> to vector<64x32xf32>
    %80 = arith.addf %77, %79 : vector<64x32xf32>
    %cst_84 = arith.constant 0.000000e+00 : f32
    %81 = vector.broadcast %cst_84 : f32 to vector<64x32xf32>
    %82 = arith.maximumf %80, %81 : vector<64x32xf32>
    %c0_85 = arith.constant 0 : index
    %c0_86 = arith.constant 0 : index
    %83 = vector.load %arg10[%c0_85, %c0_86] : memref<256x64xf32, #tpu.memory_space<vmem>>, vector<256x64xf32>
    %cst_87 = arith.constant dense<0.000000e+00> : vector<256x32xf32>
    %84 = tpu.matmul %83, %82, %cst_87 {dimension_numbers = #tpu.dot_dimension_numbers<[1], [0], [0], [1], [0, 0, 1, 1], [], []>} : vector<256x64xf32>, vector<64x32xf32>, vector<256x32xf32> -> vector<256x32xf32>
    %85 = vector.shape_cast %84 : vector<256x32xf32> to vector<16x16x32xf32>
    %c1_88 = arith.constant 1 : index
    %c1_89 = arith.constant 1 : index
    %c0_90 = arith.constant 0 : index
    %86 = vector.load %arg15[%c1_88, %c1_89, %c0_90] : memref<18x18x32xf32, #tpu.memory_space<vmem>>, vector<16x16x32xf32>
    tpu.vector_store %arg15[%c1_88, %c1_89, %c0_90], %85 {strides = array<i32>} : memref<18x18x32xf32, #tpu.memory_space<vmem>>, vector<16x16x32xf32>,
    %87 = vector.extract_strided_slice %85 {offsets = [1, 0, 0], sizes = [1, 16, 32], strides = [1, 1, 1]} : vector<16x16x32xf32> to vector<1x16x32xf32>
    %c0_91 = arith.constant 0 : index
    %c1_92 = arith.constant 1 : index
    %c0_93 = arith.constant 0 : index
    %88 = vector.load %arg15[%c0_91, %c1_92, %c0_93] : memref<18x18x32xf32, #tpu.memory_space<vmem>>, vector<1x16x32xf32>
    tpu.vector_store %arg15[%c0_91, %c1_92, %c0_93], %87 {strides = array<i32>} : memref<18x18x32xf32, #tpu.memory_space<vmem>>, vector<1x16x32xf32>,
    %89 = vector.extract_strided_slice %85 {offsets = [14, 0, 0], sizes = [1, 16, 32], strides = [1, 1, 1]} : vector<16x16x32xf32> to vector<1x16x32xf32>
    %c17 = arith.constant 17 : index
    %c1_94 = arith.constant 1 : index
    %c0_95 = arith.constant 0 : index
    %90 = vector.load %arg15[%c17, %c1_94, %c0_95] : memref<18x18x32xf32, #tpu.memory_space<vmem>>, vector<1x16x32xf32>
    tpu.vector_store %arg15[%c17, %c1_94, %c0_95], %89 {strides = array<i32>} : memref<18x18x32xf32, #tpu.memory_space<vmem>>, vector<1x16x32xf32>,
    %c0_96 = arith.constant 0 : index
    %c2_97 = arith.constant 2 : index
    %c0_98 = arith.constant 0 : index
    %91 = vector.load %arg15[%c0_96, %c2_97, %c0_98] : memref<18x18x32xf32, #tpu.memory_space<vmem>>, vector<18x1x32xf32>
    %c0_99 = arith.constant 0 : index
    %c0_100 = arith.constant 0 : index
    %c0_101 = arith.constant 0 : index
    %92 = vector.load %arg15[%c0_99, %c0_100, %c0_101] : memref<18x18x32xf32, #tpu.memory_space<vmem>>, vector<18x1x32xf32>
    tpu.vector_store %arg15[%c0_99, %c0_100, %c0_101], %91 {strides = array<i32>} : memref<18x18x32xf32, #tpu.memory_space<vmem>>, vector<18x1x32xf32>,
    %c0_102 = arith.constant 0 : index
    %c15 = arith.constant 15 : index
    %c0_103 = arith.constant 0 : index
    %93 = vector.load %arg15[%c0_102, %c15, %c0_103] : memref<18x18x32xf32, #tpu.memory_space<vmem>>, vector<18x1x32xf32>
    %c0_104 = arith.constant 0 : index
    %c17_105 = arith.constant 17 : index
    %c0_106 = arith.constant 0 : index
    %94 = vector.load %arg15[%c0_104, %c17_105, %c0_106] : memref<18x18x32xf32, #tpu.memory_space<vmem>>, vector<18x1x32xf32>
    tpu.vector_store %arg15[%c0_104, %c17_105, %c0_106], %93 {strides = array<i32>} : memref<18x18x32xf32, #tpu.memory_space<vmem>>, vector<18x1x32xf32>,
    %cst_107 = arith.constant 0.000000e+00 : f32
    %95 = vector.broadcast %cst_107 : f32 to vector<256x32xf32>
    %c0_108 = arith.constant 0 : index
    %c0_109 = arith.constant 0 : index
    %c0_110 = arith.constant 0 : index
    %96 = vector.load %arg15[%c0_108, %c0_109, %c0_110] : memref<18x18x32xf32, #tpu.memory_space<vmem>>, vector<16x16x32xf32>
    %97 = vector.shape_cast %96 : vector<16x16x32xf32> to vector<256x32xf32>
    %c0_111 = arith.constant 0 : index
    %c0_112 = arith.constant 0 : index
    %c0_113 = arith.constant 0 : index
    %c0_114 = arith.constant 0 : index
    %98 = vector.load %arg4[%c0_111, %c0_112, %c0_113, %c0_114] : memref<3x3x32x32xf32, #tpu.memory_space<vmem>>, vector<1x1x32x32xf32>
    %99 = vector.shape_cast %98 : vector<1x1x32x32xf32> to vector<32x32xf32>
    %cst_115 = arith.constant dense<0.000000e+00> : vector<256x32xf32>
    %100 = tpu.matmul %97, %99, %cst_115 {dimension_numbers = #tpu.dot_dimension_numbers<[1], [0], [0], [1], [0, 0, 1, 1], [], []>} : vector<256x32xf32>, vector<32x32xf32>, vector<256x32xf32> -> vector<256x32xf32>
    %101 = arith.addf %95, %100 : vector<256x32xf32>
    %c0_116 = arith.constant 0 : index
    %c1_117 = arith.constant 1 : index
    %c0_118 = arith.constant 0 : index
    %102 = vector.load %arg15[%c0_116, %c1_117, %c0_118] : memref<18x18x32xf32, #tpu.memory_space<vmem>>, vector<16x16x32xf32>
    %103 = vector.shape_cast %102 : vector<16x16x32xf32> to vector<256x32xf32>
    %c0_119 = arith.constant 0 : index
    %c1_120 = arith.constant 1 : index
    %c0_121 = arith.constant 0 : index
    %c0_122 = arith.constant 0 : index
    %104 = vector.load %arg4[%c0_119, %c1_120, %c0_121, %c0_122] : memref<3x3x32x32xf32, #tpu.memory_space<vmem>>, vector<1x1x32x32xf32>
    %105 = vector.shape_cast %104 : vector<1x1x32x32xf32> to vector<32x32xf32>
    %cst_123 = arith.constant dense<0.000000e+00> : vector<256x32xf32>
    %106 = tpu.matmul %103, %105, %cst_123 {dimension_numbers = #tpu.dot_dimension_numbers<[1], [0], [0], [1], [0, 0, 1, 1], [], []>} : vector<256x32xf32>, vector<32x32xf32>, vector<256x32xf32> -> vector<256x32xf32>
    %107 = arith.addf %101, %106 : vector<256x32xf32>
    %c0_124 = arith.constant 0 : index
    %c2_125 = arith.constant 2 : index
    %c0_126 = arith.constant 0 : index
    %108 = vector.load %arg15[%c0_124, %c2_125, %c0_126] : memref<18x18x32xf32, #tpu.memory_space<vmem>>, vector<16x16x32xf32>
    %109 = vector.shape_cast %108 : vector<16x16x32xf32> to vector<256x32xf32>
    %c0_127 = arith.constant 0 : index
    %c2_128 = arith.constant 2 : index
    %c0_129 = arith.constant 0 : index
    %c0_130 = arith.constant 0 : index
    %110 = vector.load %arg4[%c0_127, %c2_128, %c0_129, %c0_130] : memref<3x3x32x32xf32, #tpu.memory_space<vmem>>, vector<1x1x32x32xf32>
    %111 = vector.shape_cast %110 : vector<1x1x32x32xf32> to vector<32x32xf32>
    %cst_131 = arith.constant dense<0.000000e+00> : vector<256x32xf32>
    %112 = tpu.matmul %109, %111, %cst_131 {dimension_numbers = #tpu.dot_dimension_numbers<[1], [0], [0], [1], [0, 0, 1, 1], [], []>} : vector<256x32xf32>, vector<32x32xf32>, vector<256x32xf32> -> vector<256x32xf32>
    %113 = arith.addf %107, %112 : vector<256x32xf32>
    %c1_132 = arith.constant 1 : index
    %c0_133 = arith.constant 0 : index
    %c0_134 = arith.constant 0 : index
    %114 = vector.load %arg15[%c1_132, %c0_133, %c0_134] : memref<18x18x32xf32, #tpu.memory_space<vmem>>, vector<16x16x32xf32>
    %115 = vector.shape_cast %114 : vector<16x16x32xf32> to vector<256x32xf32>
    %c1_135 = arith.constant 1 : index
    %c0_136 = arith.constant 0 : index
    %c0_137 = arith.constant 0 : index
    %c0_138 = arith.constant 0 : index
    %116 = vector.load %arg4[%c1_135, %c0_136, %c0_137, %c0_138] : memref<3x3x32x32xf32, #tpu.memory_space<vmem>>, vector<1x1x32x32xf32>
    %117 = vector.shape_cast %116 : vector<1x1x32x32xf32> to vector<32x32xf32>
    %cst_139 = arith.constant dense<0.000000e+00> : vector<256x32xf32>
    %118 = tpu.matmul %115, %117, %cst_139 {dimension_numbers = #tpu.dot_dimension_numbers<[1], [0], [0], [1], [0, 0, 1, 1], [], []>} : vector<256x32xf32>, vector<32x32xf32>, vector<256x32xf32> -> vector<256x32xf32>
    %119 = arith.addf %113, %118 : vector<256x32xf32>
    %c1_140 = arith.constant 1 : index
    %c1_141 = arith.constant 1 : index
    %c0_142 = arith.constant 0 : index
    %120 = vector.load %arg15[%c1_140, %c1_141, %c0_142] : memref<18x18x32xf32, #tpu.memory_space<vmem>>, vector<16x16x32xf32>
    %121 = vector.shape_cast %120 : vector<16x16x32xf32> to vector<256x32xf32>
    %c1_143 = arith.constant 1 : index
    %c1_144 = arith.constant 1 : index
    %c0_145 = arith.constant 0 : index
    %c0_146 = arith.constant 0 : index
    %122 = vector.load %arg4[%c1_143, %c1_144, %c0_145, %c0_146] : memref<3x3x32x32xf32, #tpu.memory_space<vmem>>, vector<1x1x32x32xf32>
    %123 = vector.shape_cast %122 : vector<1x1x32x32xf32> to vector<32x32xf32>
    %cst_147 = arith.constant dense<0.000000e+00> : vector<256x32xf32>
    %124 = tpu.matmul %121, %123, %cst_147 {dimension_numbers = #tpu.dot_dimension_numbers<[1], [0], [0], [1], [0, 0, 1, 1], [], []>} : vector<256x32xf32>, vector<32x32xf32>, vector<256x32xf32> -> vector<256x32xf32>
    %125 = arith.addf %119, %124 : vector<256x32xf32>
    %c1_148 = arith.constant 1 : index
    %c2_149 = arith.constant 2 : index
    %c0_150 = arith.constant 0 : index
    %126 = vector.load %arg15[%c1_148, %c2_149, %c0_150] : memref<18x18x32xf32, #tpu.memory_space<vmem>>, vector<16x16x32xf32>
    %127 = vector.shape_cast %126 : vector<16x16x32xf32> to vector<256x32xf32>
    %c1_151 = arith.constant 1 : index
    %c2_152 = arith.constant 2 : index
    %c0_153 = arith.constant 0 : index
    %c0_154 = arith.constant 0 : index
    %128 = vector.load %arg4[%c1_151, %c2_152, %c0_153, %c0_154] : memref<3x3x32x32xf32, #tpu.memory_space<vmem>>, vector<1x1x32x32xf32>
    %129 = vector.shape_cast %128 : vector<1x1x32x32xf32> to vector<32x32xf32>
    %cst_155 = arith.constant dense<0.000000e+00> : vector<256x32xf32>
    %130 = tpu.matmul %127, %129, %cst_155 {dimension_numbers = #tpu.dot_dimension_numbers<[1], [0], [0], [1], [0, 0, 1, 1], [], []>} : vector<256x32xf32>, vector<32x32xf32>, vector<256x32xf32> -> vector<256x32xf32>
    %131 = arith.addf %125, %130 : vector<256x32xf32>
    %c2_156 = arith.constant 2 : index
    %c0_157 = arith.constant 0 : index
    %c0_158 = arith.constant 0 : index
    %132 = vector.load %arg15[%c2_156, %c0_157, %c0_158] : memref<18x18x32xf32, #tpu.memory_space<vmem>>, vector<16x16x32xf32>
    %133 = vector.shape_cast %132 : vector<16x16x32xf32> to vector<256x32xf32>
    %c2_159 = arith.constant 2 : index
    %c0_160 = arith.constant 0 : index
    %c0_161 = arith.constant 0 : index
    %c0_162 = arith.constant 0 : index
    %134 = vector.load %arg4[%c2_159, %c0_160, %c0_161, %c0_162] : memref<3x3x32x32xf32, #tpu.memory_space<vmem>>, vector<1x1x32x32xf32>
    %135 = vector.shape_cast %134 : vector<1x1x32x32xf32> to vector<32x32xf32>
    %cst_163 = arith.constant dense<0.000000e+00> : vector<256x32xf32>
    %136 = tpu.matmul %133, %135, %cst_163 {dimension_numbers = #tpu.dot_dimension_numbers<[1], [0], [0], [1], [0, 0, 1, 1], [], []>} : vector<256x32xf32>, vector<32x32xf32>, vector<256x32xf32> -> vector<256x32xf32>
    %137 = arith.addf %131, %136 : vector<256x32xf32>
    %c2_164 = arith.constant 2 : index
    %c1_165 = arith.constant 1 : index
    %c0_166 = arith.constant 0 : index
    %138 = vector.load %arg15[%c2_164, %c1_165, %c0_166] : memref<18x18x32xf32, #tpu.memory_space<vmem>>, vector<16x16x32xf32>
    %139 = vector.shape_cast %138 : vector<16x16x32xf32> to vector<256x32xf32>
    %c2_167 = arith.constant 2 : index
    %c1_168 = arith.constant 1 : index
    %c0_169 = arith.constant 0 : index
    %c0_170 = arith.constant 0 : index
    %140 = vector.load %arg4[%c2_167, %c1_168, %c0_169, %c0_170] : memref<3x3x32x32xf32, #tpu.memory_space<vmem>>, vector<1x1x32x32xf32>
    %141 = vector.shape_cast %140 : vector<1x1x32x32xf32> to vector<32x32xf32>
    %cst_171 = arith.constant dense<0.000000e+00> : vector<256x32xf32>
    %142 = tpu.matmul %139, %141, %cst_171 {dimension_numbers = #tpu.dot_dimension_numbers<[1], [0], [0], [1], [0, 0, 1, 1], [], []>} : vector<256x32xf32>, vector<32x32xf32>, vector<256x32xf32> -> vector<256x32xf32>
    %143 = arith.addf %137, %142 : vector<256x32xf32>
    %c2_172 = arith.constant 2 : index
    %c2_173 = arith.constant 2 : index
    %c0_174 = arith.constant 0 : index
    %144 = vector.load %arg15[%c2_172, %c2_173, %c0_174] : memref<18x18x32xf32, #tpu.memory_space<vmem>>, vector<16x16x32xf32>
    %145 = vector.shape_cast %144 : vector<16x16x32xf32> to vector<256x32xf32>
    %c2_175 = arith.constant 2 : index
    %c2_176 = arith.constant 2 : index
    %c0_177 = arith.constant 0 : index
    %c0_178 = arith.constant 0 : index
    %146 = vector.load %arg4[%c2_175, %c2_176, %c0_177, %c0_178] : memref<3x3x32x32xf32, #tpu.memory_space<vmem>>, vector<1x1x32x32xf32>
    %147 = vector.shape_cast %146 : vector<1x1x32x32xf32> to vector<32x32xf32>
    %cst_179 = arith.constant dense<0.000000e+00> : vector<256x32xf32>
    %148 = tpu.matmul %145, %147, %cst_179 {dimension_numbers = #tpu.dot_dimension_numbers<[1], [0], [0], [1], [0, 0, 1, 1], [], []>} : vector<256x32xf32>, vector<32x32xf32>, vector<256x32xf32> -> vector<256x32xf32>
    %149 = arith.addf %143, %148 : vector<256x32xf32>
    %cst_180 = arith.constant dense<0.000000e+00> : vector<32xf32>
    %150 = vector.multi_reduction <add>, %149, %cst_180 [0] : vector<256x32xf32> to vector<32xf32>
    %151 = vector.shape_cast %150 : vector<32xf32> to vector<1x32xf32>
    %c0_181 = arith.constant 0 : index
    %c0_182 = arith.constant 0 : index
    %152 = vector.load %arg12[%c0_181, %c0_182] : memref<32x32xf32, #tpu.memory_space<vmem>>, vector<32x32xf32>
    %cst_183 = arith.constant dense<0.000000e+00> : vector<1x32xf32>
    %153 = tpu.matmul %151, %152, %cst_183 {dimension_numbers = #tpu.dot_dimension_numbers<[1], [0], [0], [1], [0, 0, 1, 1], [], []>} : vector<1x32xf32>, vector<32x32xf32>, vector<1x32xf32> -> vector<1x32xf32>
    %cst_184 = arith.constant 5.120000e+02 : f32
    %154 = vector.broadcast %cst_184 : f32 to vector<1x32xf32>
    %155 = arith.divf %153, %154 : vector<1x32xf32>
    %156 = vector.broadcast %155 : vector<1x32xf32> to vector<256x32xf32>
    %157 = arith.subf %149, %156 : vector<256x32xf32>
    %158 = arith.mulf %157, %157 : vector<256x32xf32>
    %cst_185 = arith.constant dense<0.000000e+00> : vector<32xf32>
    %159 = vector.multi_reduction <add>, %158, %cst_185 [0] : vector<256x32xf32> to vector<32xf32>
    %160 = vector.shape_cast %159 : vector<32xf32> to vector<1x32xf32>
    %c0_186 = arith.constant 0 : index
    %c0_187 = arith.constant 0 : index
    %161 = vector.load %arg12[%c0_186, %c0_187] : memref<32x32xf32, #tpu.memory_space<vmem>>, vector<32x32xf32>
    %cst_188 = arith.constant dense<0.000000e+00> : vector<1x32xf32>
    %162 = tpu.matmul %160, %161, %cst_188 {dimension_numbers = #tpu.dot_dimension_numbers<[1], [0], [0], [1], [0, 0, 1, 1], [], []>} : vector<1x32xf32>, vector<32x32xf32>, vector<1x32xf32> -> vector<1x32xf32>
    %cst_189 = arith.constant 5.120000e+02 : f32
    %163 = vector.broadcast %cst_189 : f32 to vector<1x32xf32>
    %164 = arith.divf %162, %163 : vector<1x32xf32>
    %cst_190 = arith.constant 1.000000e-03 : f32
    %165 = vector.broadcast %cst_190 : f32 to vector<1x32xf32>
    %166 = arith.addf %164, %165 : vector<1x32xf32>
    %167 = math.rsqrt %166 : vector<1x32xf32>
    %168 = vector.broadcast %167 : vector<1x32xf32> to vector<256x32xf32>
    %169 = arith.mulf %157, %168 : vector<256x32xf32>
    %c0_191 = arith.constant 0 : index
    %c0_192 = arith.constant 0 : index
    %170 = vector.load %arg5[%c0_191, %c0_192] : memref<1x32xf32, #tpu.memory_space<vmem>>, vector<1x32xf32>
    %171 = vector.broadcast %170 : vector<1x32xf32> to vector<256x32xf32>
    %172 = arith.mulf %169, %171 : vector<256x32xf32>
    %c0_193 = arith.constant 0 : index
    %c0_194 = arith.constant 0 : index
    %173 = vector.load %arg6[%c0_193, %c0_194] : memref<1x32xf32, #tpu.memory_space<vmem>>, vector<1x32xf32>
    %174 = vector.broadcast %173 : vector<1x32xf32> to vector<256x32xf32>
    %175 = arith.addf %172, %174 : vector<256x32xf32>
    %cst_195 = arith.constant 0.000000e+00 : f32
    %176 = vector.broadcast %cst_195 : f32 to vector<256x32xf32>
    %177 = arith.maximumf %175, %176 : vector<256x32xf32>
    %c0_196 = arith.constant 0 : index
    %c0_197 = arith.constant 0 : index
    %178 = vector.load %arg11[%c0_196, %c0_197] : memref<1024x256xf32, #tpu.memory_space<vmem>>, vector<1024x256xf32>
    %cst_198 = arith.constant dense<0.000000e+00> : vector<1024x32xf32>
    %179 = tpu.matmul %178, %177, %cst_198 {dimension_numbers = #tpu.dot_dimension_numbers<[1], [0], [0], [1], [0, 0, 1, 1], [], []>} : vector<1024x256xf32>, vector<256x32xf32>, vector<1024x32xf32> -> vector<1024x32xf32>
    %180 = vector.shape_cast %179 : vector<1024x32xf32> to vector<32x32x32xf32>
    %c1_199 = arith.constant 1 : index
    %c1_200 = arith.constant 1 : index
    %c0_201 = arith.constant 0 : index
    %181 = vector.load %arg16[%c1_199, %c1_200, %c0_201] : memref<34x34x32xf32, #tpu.memory_space<vmem>>, vector<32x32x32xf32>
    tpu.vector_store %arg16[%c1_199, %c1_200, %c0_201], %180 {strides = array<i32>} : memref<34x34x32xf32, #tpu.memory_space<vmem>>, vector<32x32x32xf32>,
    %182 = vector.extract_strided_slice %180 {offsets = [1, 0, 0], sizes = [1, 32, 32], strides = [1, 1, 1]} : vector<32x32x32xf32> to vector<1x32x32xf32>
    %c0_202 = arith.constant 0 : index
    %c1_203 = arith.constant 1 : index
    %c0_204 = arith.constant 0 : index
    %183 = vector.load %arg16[%c0_202, %c1_203, %c0_204] : memref<34x34x32xf32, #tpu.memory_space<vmem>>, vector<1x32x32xf32>
    tpu.vector_store %arg16[%c0_202, %c1_203, %c0_204], %182 {strides = array<i32>} : memref<34x34x32xf32, #tpu.memory_space<vmem>>, vector<1x32x32xf32>,
    %184 = vector.extract_strided_slice %180 {offsets = [30, 0, 0], sizes = [1, 32, 32], strides = [1, 1, 1]} : vector<32x32x32xf32> to vector<1x32x32xf32>
    %c33 = arith.constant 33 : index
    %c1_205 = arith.constant 1 : index
    %c0_206 = arith.constant 0 : index
    %185 = vector.load %arg16[%c33, %c1_205, %c0_206] : memref<34x34x32xf32, #tpu.memory_space<vmem>>, vector<1x32x32xf32>
    tpu.vector_store %arg16[%c33, %c1_205, %c0_206], %184 {strides = array<i32>} : memref<34x34x32xf32, #tpu.memory_space<vmem>>, vector<1x32x32xf32>,
    %c0_207 = arith.constant 0 : index
    %c2_208 = arith.constant 2 : index
    %c0_209 = arith.constant 0 : index
    %186 = vector.load %arg16[%c0_207, %c2_208, %c0_209] : memref<34x34x32xf32, #tpu.memory_space<vmem>>, vector<34x1x32xf32>
    %c0_210 = arith.constant 0 : index
    %c0_211 = arith.constant 0 : index
    %c0_212 = arith.constant 0 : index
    %187 = vector.load %arg16[%c0_210, %c0_211, %c0_212] : memref<34x34x32xf32, #tpu.memory_space<vmem>>, vector<34x1x32xf32>
    tpu.vector_store %arg16[%c0_210, %c0_211, %c0_212], %186 {strides = array<i32>} : memref<34x34x32xf32, #tpu.memory_space<vmem>>, vector<34x1x32xf32>,
    %c0_213 = arith.constant 0 : index
    %c31 = arith.constant 31 : index
    %c0_214 = arith.constant 0 : index
    %188 = vector.load %arg16[%c0_213, %c31, %c0_214] : memref<34x34x32xf32, #tpu.memory_space<vmem>>, vector<34x1x32xf32>
    %c0_215 = arith.constant 0 : index
    %c33_216 = arith.constant 33 : index
    %c0_217 = arith.constant 0 : index
    %189 = vector.load %arg16[%c0_215, %c33_216, %c0_217] : memref<34x34x32xf32, #tpu.memory_space<vmem>>, vector<34x1x32xf32>
    tpu.vector_store %arg16[%c0_215, %c33_216, %c0_217], %188 {strides = array<i32>} : memref<34x34x32xf32, #tpu.memory_space<vmem>>, vector<34x1x32xf32>,
    %cst_218 = arith.constant 0.000000e+00 : f32
    %190 = vector.broadcast %cst_218 : f32 to vector<2x1024xf32>
    %c0_219 = arith.constant 0 : index
    %c0_220 = arith.constant 0 : index
    %c0_221 = arith.constant 0 : index
    %191 = vector.load %arg16[%c0_219, %c0_220, %c0_221] : memref<34x34x32xf32, #tpu.memory_space<vmem>>, vector<32x32x32xf32>
    %192 = vector.shape_cast %191 : vector<32x32x32xf32> to vector<1024x32xf32>
    %c0_222 = arith.constant 0 : index
    %c0_223 = arith.constant 0 : index
    %c0_224 = arith.constant 0 : index
    %c0_225 = arith.constant 0 : index
    %193 = vector.load %arg7[%c0_222, %c0_223, %c0_224, %c0_225] : memref<3x3x2x32xf32, #tpu.memory_space<vmem>>, vector<1x1x2x32xf32>
    %194 = vector.shape_cast %193 : vector<1x1x2x32xf32> to vector<2x32xf32>
    %cst_226 = arith.constant dense<0.000000e+00> : vector<2x1024xf32>
    %195 = tpu.matmul %194, %192, %cst_226 {dimension_numbers = #tpu.dot_dimension_numbers<[1], [1], [0], [0], [0, 0, 1, 0], [], []>} : vector<2x32xf32>, vector<1024x32xf32>, vector<2x1024xf32> -> vector<2x1024xf32>
    %196 = arith.addf %190, %195 : vector<2x1024xf32>
    %c0_227 = arith.constant 0 : index
    %c1_228 = arith.constant 1 : index
    %c0_229 = arith.constant 0 : index
    %197 = vector.load %arg16[%c0_227, %c1_228, %c0_229] : memref<34x34x32xf32, #tpu.memory_space<vmem>>, vector<32x32x32xf32>
    %198 = vector.shape_cast %197 : vector<32x32x32xf32> to vector<1024x32xf32>
    %c0_230 = arith.constant 0 : index
    %c1_231 = arith.constant 1 : index
    %c0_232 = arith.constant 0 : index
    %c0_233 = arith.constant 0 : index
    %199 = vector.load %arg7[%c0_230, %c1_231, %c0_232, %c0_233] : memref<3x3x2x32xf32, #tpu.memory_space<vmem>>, vector<1x1x2x32xf32>
    %200 = vector.shape_cast %199 : vector<1x1x2x32xf32> to vector<2x32xf32>
    %cst_234 = arith.constant dense<0.000000e+00> : vector<2x1024xf32>
    %201 = tpu.matmul %200, %198, %cst_234 {dimension_numbers = #tpu.dot_dimension_numbers<[1], [1], [0], [0], [0, 0, 1, 0], [], []>} : vector<2x32xf32>, vector<1024x32xf32>, vector<2x1024xf32> -> vector<2x1024xf32>
    %202 = arith.addf %196, %201 : vector<2x1024xf32>
    %c0_235 = arith.constant 0 : index
    %c2_236 = arith.constant 2 : index
    %c0_237 = arith.constant 0 : index
    %203 = vector.load %arg16[%c0_235, %c2_236, %c0_237] : memref<34x34x32xf32, #tpu.memory_space<vmem>>, vector<32x32x32xf32>
    %204 = vector.shape_cast %203 : vector<32x32x32xf32> to vector<1024x32xf32>
    %c0_238 = arith.constant 0 : index
    %c2_239 = arith.constant 2 : index
    %c0_240 = arith.constant 0 : index
    %c0_241 = arith.constant 0 : index
    %205 = vector.load %arg7[%c0_238, %c2_239, %c0_240, %c0_241] : memref<3x3x2x32xf32, #tpu.memory_space<vmem>>, vector<1x1x2x32xf32>
    %206 = vector.shape_cast %205 : vector<1x1x2x32xf32> to vector<2x32xf32>
    %cst_242 = arith.constant dense<0.000000e+00> : vector<2x1024xf32>
    %207 = tpu.matmul %206, %204, %cst_242 {dimension_numbers = #tpu.dot_dimension_numbers<[1], [1], [0], [0], [0, 0, 1, 0], [], []>} : vector<2x32xf32>, vector<1024x32xf32>, vector<2x1024xf32> -> vector<2x1024xf32>
    %208 = arith.addf %202, %207 : vector<2x1024xf32>
    %c1_243 = arith.constant 1 : index
    %c0_244 = arith.constant 0 : index
    %c0_245 = arith.constant 0 : index
    %209 = vector.load %arg16[%c1_243, %c0_244, %c0_245] : memref<34x34x32xf32, #tpu.memory_space<vmem>>, vector<32x32x32xf32>
    %210 = vector.shape_cast %209 : vector<32x32x32xf32> to vector<1024x32xf32>
    %c1_246 = arith.constant 1 : index
    %c0_247 = arith.constant 0 : index
    %c0_248 = arith.constant 0 : index
    %c0_249 = arith.constant 0 : index
    %211 = vector.load %arg7[%c1_246, %c0_247, %c0_248, %c0_249] : memref<3x3x2x32xf32, #tpu.memory_space<vmem>>, vector<1x1x2x32xf32>
    %212 = vector.shape_cast %211 : vector<1x1x2x32xf32> to vector<2x32xf32>
    %cst_250 = arith.constant dense<0.000000e+00> : vector<2x1024xf32>
    %213 = tpu.matmul %212, %210, %cst_250 {dimension_numbers = #tpu.dot_dimension_numbers<[1], [1], [0], [0], [0, 0, 1, 0], [], []>} : vector<2x32xf32>, vector<1024x32xf32>, vector<2x1024xf32> -> vector<2x1024xf32>
    %214 = arith.addf %208, %213 : vector<2x1024xf32>
    %c1_251 = arith.constant 1 : index
    %c1_252 = arith.constant 1 : index
    %c0_253 = arith.constant 0 : index
    %215 = vector.load %arg16[%c1_251, %c1_252, %c0_253] : memref<34x34x32xf32, #tpu.memory_space<vmem>>, vector<32x32x32xf32>
    %216 = vector.shape_cast %215 : vector<32x32x32xf32> to vector<1024x32xf32>
    %c1_254 = arith.constant 1 : index
    %c1_255 = arith.constant 1 : index
    %c0_256 = arith.constant 0 : index
    %c0_257 = arith.constant 0 : index
    %217 = vector.load %arg7[%c1_254, %c1_255, %c0_256, %c0_257] : memref<3x3x2x32xf32, #tpu.memory_space<vmem>>, vector<1x1x2x32xf32>
    %218 = vector.shape_cast %217 : vector<1x1x2x32xf32> to vector<2x32xf32>
    %cst_258 = arith.constant dense<0.000000e+00> : vector<2x1024xf32>
    %219 = tpu.matmul %218, %216, %cst_258 {dimension_numbers = #tpu.dot_dimension_numbers<[1], [1], [0], [0], [0, 0, 1, 0], [], []>} : vector<2x32xf32>, vector<1024x32xf32>, vector<2x1024xf32> -> vector<2x1024xf32>
    %220 = arith.addf %214, %219 : vector<2x1024xf32>
    %c1_259 = arith.constant 1 : index
    %c2_260 = arith.constant 2 : index
    %c0_261 = arith.constant 0 : index
    %221 = vector.load %arg16[%c1_259, %c2_260, %c0_261] : memref<34x34x32xf32, #tpu.memory_space<vmem>>, vector<32x32x32xf32>
    %222 = vector.shape_cast %221 : vector<32x32x32xf32> to vector<1024x32xf32>
    %c1_262 = arith.constant 1 : index
    %c2_263 = arith.constant 2 : index
    %c0_264 = arith.constant 0 : index
    %c0_265 = arith.constant 0 : index
    %223 = vector.load %arg7[%c1_262, %c2_263, %c0_264, %c0_265] : memref<3x3x2x32xf32, #tpu.memory_space<vmem>>, vector<1x1x2x32xf32>
    %224 = vector.shape_cast %223 : vector<1x1x2x32xf32> to vector<2x32xf32>
    %cst_266 = arith.constant dense<0.000000e+00> : vector<2x1024xf32>
    %225 = tpu.matmul %224, %222, %cst_266 {dimension_numbers = #tpu.dot_dimension_numbers<[1], [1], [0], [0], [0, 0, 1, 0], [], []>} : vector<2x32xf32>, vector<1024x32xf32>, vector<2x1024xf32> -> vector<2x1024xf32>
    %226 = arith.addf %220, %225 : vector<2x1024xf32>
    %c2_267 = arith.constant 2 : index
    %c0_268 = arith.constant 0 : index
    %c0_269 = arith.constant 0 : index
    %227 = vector.load %arg16[%c2_267, %c0_268, %c0_269] : memref<34x34x32xf32, #tpu.memory_space<vmem>>, vector<32x32x32xf32>
    %228 = vector.shape_cast %227 : vector<32x32x32xf32> to vector<1024x32xf32>
    %c2_270 = arith.constant 2 : index
    %c0_271 = arith.constant 0 : index
    %c0_272 = arith.constant 0 : index
    %c0_273 = arith.constant 0 : index
    %229 = vector.load %arg7[%c2_270, %c0_271, %c0_272, %c0_273] : memref<3x3x2x32xf32, #tpu.memory_space<vmem>>, vector<1x1x2x32xf32>
    %230 = vector.shape_cast %229 : vector<1x1x2x32xf32> to vector<2x32xf32>
    %cst_274 = arith.constant dense<0.000000e+00> : vector<2x1024xf32>
    %231 = tpu.matmul %230, %228, %cst_274 {dimension_numbers = #tpu.dot_dimension_numbers<[1], [1], [0], [0], [0, 0, 1, 0], [], []>} : vector<2x32xf32>, vector<1024x32xf32>, vector<2x1024xf32> -> vector<2x1024xf32>
    %232 = arith.addf %226, %231 : vector<2x1024xf32>
    %c2_275 = arith.constant 2 : index
    %c1_276 = arith.constant 1 : index
    %c0_277 = arith.constant 0 : index
    %233 = vector.load %arg16[%c2_275, %c1_276, %c0_277] : memref<34x34x32xf32, #tpu.memory_space<vmem>>, vector<32x32x32xf32>
    %234 = vector.shape_cast %233 : vector<32x32x32xf32> to vector<1024x32xf32>
    %c2_278 = arith.constant 2 : index
    %c1_279 = arith.constant 1 : index
    %c0_280 = arith.constant 0 : index
    %c0_281 = arith.constant 0 : index
    %235 = vector.load %arg7[%c2_278, %c1_279, %c0_280, %c0_281] : memref<3x3x2x32xf32, #tpu.memory_space<vmem>>, vector<1x1x2x32xf32>
    %236 = vector.shape_cast %235 : vector<1x1x2x32xf32> to vector<2x32xf32>
    %cst_282 = arith.constant dense<0.000000e+00> : vector<2x1024xf32>
    %237 = tpu.matmul %236, %234, %cst_282 {dimension_numbers = #tpu.dot_dimension_numbers<[1], [1], [0], [0], [0, 0, 1, 0], [], []>} : vector<2x32xf32>, vector<1024x32xf32>, vector<2x1024xf32> -> vector<2x1024xf32>
    %238 = arith.addf %232, %237 : vector<2x1024xf32>
    %c2_283 = arith.constant 2 : index
    %c2_284 = arith.constant 2 : index
    %c0_285 = arith.constant 0 : index
    %239 = vector.load %arg16[%c2_283, %c2_284, %c0_285] : memref<34x34x32xf32, #tpu.memory_space<vmem>>, vector<32x32x32xf32>
    %240 = vector.shape_cast %239 : vector<32x32x32xf32> to vector<1024x32xf32>
    %c2_286 = arith.constant 2 : index
    %c2_287 = arith.constant 2 : index
    %c0_288 = arith.constant 0 : index
    %c0_289 = arith.constant 0 : index
    %241 = vector.load %arg7[%c2_286, %c2_287, %c0_288, %c0_289] : memref<3x3x2x32xf32, #tpu.memory_space<vmem>>, vector<1x1x2x32xf32>
    %242 = vector.shape_cast %241 : vector<1x1x2x32xf32> to vector<2x32xf32>
    %cst_290 = arith.constant dense<0.000000e+00> : vector<2x1024xf32>
    %243 = tpu.matmul %242, %240, %cst_290 {dimension_numbers = #tpu.dot_dimension_numbers<[1], [1], [0], [0], [0, 0, 1, 0], [], []>} : vector<2x32xf32>, vector<1024x32xf32>, vector<2x1024xf32> -> vector<2x1024xf32>
    %244 = arith.addf %238, %243 : vector<2x1024xf32>
    %cst_291 = arith.constant dense<0.000000e+00> : vector<2xf32>
    %245 = vector.multi_reduction <add>, %244, %cst_291 [1] : vector<2x1024xf32> to vector<2xf32>
    %246 = vector.shape_cast %245 : vector<2xf32> to vector<2x1xf32>
    %c0_292 = arith.constant 0 : index
    %c0_293 = arith.constant 0 : index
    %247 = vector.load %arg13[%c0_292, %c0_293] : memref<2x2xf32, #tpu.memory_space<vmem>>, vector<2x2xf32>
    %cst_294 = arith.constant dense<0.000000e+00> : vector<2x1xf32>
    %248 = tpu.matmul %247, %246, %cst_294 {dimension_numbers = #tpu.dot_dimension_numbers<[1], [0], [0], [1], [0, 0, 1, 1], [], []>} : vector<2x2xf32>, vector<2x1xf32>, vector<2x1xf32> -> vector<2x1xf32>
    %cst_295 = arith.constant 2.048000e+03 : f32
    %249 = vector.broadcast %cst_295 : f32 to vector<2x1xf32>
    %250 = arith.divf %248, %249 : vector<2x1xf32>
    %251 = vector.broadcast %250 : vector<2x1xf32> to vector<2x1024xf32>
    %252 = arith.subf %244, %251 : vector<2x1024xf32>
    %253 = arith.mulf %252, %252 : vector<2x1024xf32>
    %cst_296 = arith.constant dense<0.000000e+00> : vector<2xf32>
    %254 = vector.multi_reduction <add>, %253, %cst_296 [1] : vector<2x1024xf32> to vector<2xf32>
    %255 = vector.shape_cast %254 : vector<2xf32> to vector<2x1xf32>
    %c0_297 = arith.constant 0 : index
    %c0_298 = arith.constant 0 : index
    %256 = vector.load %arg13[%c0_297, %c0_298] : memref<2x2xf32, #tpu.memory_space<vmem>>, vector<2x2xf32>
    %cst_299 = arith.constant dense<0.000000e+00> : vector<2x1xf32>
    %257 = tpu.matmul %256, %255, %cst_299 {dimension_numbers = #tpu.dot_dimension_numbers<[1], [0], [0], [1], [0, 0, 1, 1], [], []>} : vector<2x2xf32>, vector<2x1xf32>, vector<2x1xf32> -> vector<2x1xf32>
    %cst_300 = arith.constant 2.048000e+03 : f32
    %258 = vector.broadcast %cst_300 : f32 to vector<2x1xf32>
    %259 = arith.divf %257, %258 : vector<2x1xf32>
    %cst_301 = arith.constant 1.000000e-03 : f32
    %260 = vector.broadcast %cst_301 : f32 to vector<2x1xf32>
    %261 = arith.addf %259, %260 : vector<2x1xf32>
    %262 = math.rsqrt %261 : vector<2x1xf32>
    %263 = vector.broadcast %262 : vector<2x1xf32> to vector<2x1024xf32>
    %264 = arith.mulf %252, %263 : vector<2x1024xf32>
    %c0_302 = arith.constant 0 : index
    %c0_303 = arith.constant 0 : index
    %265 = vector.load %arg8[%c0_302, %c0_303] : memref<2x1xf32, #tpu.memory_space<vmem>>, vector<2x1xf32>
    %266 = vector.broadcast %265 : vector<2x1xf32> to vector<2x1024xf32>
    %267 = arith.mulf %264, %266 : vector<2x1024xf32>
    %c0_304 = arith.constant 0 : index
    %c0_305 = arith.constant 0 : index
    %268 = vector.load %arg9[%c0_304, %c0_305] : memref<2x1xf32, #tpu.memory_space<vmem>>, vector<2x1xf32>
    %269 = vector.broadcast %268 : vector<2x1xf32> to vector<2x1024xf32>
    %270 = arith.addf %267, %269 : vector<2x1024xf32>
    %271 = math.tanh %270 : vector<2x1024xf32>
    %c0_306 = arith.constant 0 : index
    %c0_307 = arith.constant 0 : index
    %272 = vector.load %arg14[%c0_306, %c0_307] : memref<2x1024xf32, #tpu.memory_space<vmem>>, vector<2x1024xf32>
    tpu.vector_store %arg14[%c0_306, %c0_307], %271 {strides = array<i32>} : memref<2x1024xf32, #tpu.memory_space<vmem>>, vector<2x1024xf32>,
    return
  }
}

</mosaic_0001>

<bundles_post_ra>
// kernel: tile.31
= control target key start
LH: loop header
LB: loop body
LE: loop exit
PB: predicated region body
PF: predicated region fallthrough
CT: control target
= control target key end

     0   :  { %2 = vsyncpa [#allocation1], 0  ;;  %s44_s6 = smov [#allocation0]   ;;  %s70_s0 = inlined_call_operand.hbm [shape: f32[16], index: 0, kind: input, shape index: {}]   ;;  %s71_s1 = inlined_call_operand.vmem [shape: f32[2,16], index: 1, kind: output, shape index: {}]  }
   0x1   :  { %s9_s7 = sshll.u32 %s44_s6, 4  ;;  %s20_s10 = scalar_lea.hbm %s70_s0, 16  ;;  %s10_s7 = int_to_ptr.vmem [resolvable:$true] %s9_s7 }
   0x2   :  { %p21_p0 = scmp.ne.s32.totalorder %s70_s0, %s20_s10  ;;  %p24_p1 = scmp.lt.u32.totalorder %s20_s10, %s70_s0 }
   0x4   :  { %p26_p2 = pnand %p24_p1, %p21_p0 }
   0x6   :  { %29 = shalt.err (!%p26_p2)
}
   0x7   :  { %s30_s15 = scalar_lea.vmem %s10_s7, 16  ;;  %s34_s16 = scalar_lea.vmem %s10_s7, 32 }
   0x8   :  { %p31_p3 = scmp.ne.s32.totalorder %s10_s7, %s30_s15  ;;  %p35_p4 = scmp.lt.s32.totalorder %s10_s7, %s10_s7 }
   0x9   :  { %p36_p5 = scmp.lt.s32.totalorder %s34_s16, %s30_s15 }
   0xb   :  { %p37_p6 = por %p36_p5, %p35_p4 }
   0xd   :  { %p38_p7 = pnand %p37_p6, %p31_p3 }
   0xf   :  { %41 = shalt.err (!%p38_p7)
}
  0x10   :  { %12 = dma.hbm_to_vmem [thread:$0]  %s70_s0, 16, %s10_s7, [#allocation1]  }
  0x11   :  { %42 = dma.done.wait [#allocation1], 16  }
  0x12   :  { %43 = vsyncadd [#allocation1], 4294967280  ;;  %v16_v0 = vld [vmem:[#allocation0] ss:$0 sm:$0xff] }
  0x13   :  { %17 = vst [vmem:[%s71_s1] sm:$0x3] %v16_v0 }
  0x14   :  { %18 = vsyncpa [#allocation1], 1 }

// kernel: tile.32
= control target key start
LH: loop header
LB: loop body
LE: loop exit
PB: predicated region body
PF: predicated region fallthrough
CT: control target
= control target key end

     0   :  { %vm7_vm0 = vcmask 130048   ;;  %vm13_vm1 = vcmask 261248   ;;  %s39_s0 = inlined_call_operand.vmem [shape: f32[2,16], index: 0, kind: input, shape index: {}]   ;;  %s40_s1 = inlined_call_operand.vmem [shape: f32[1,32], index: 1, kind: output, shape index: {}]  }
   0x1   :  { %v4_v0 = vld [vmem:[%s39_s0] sm:$0x3]  ;;  %s22_s0 = smov 16  }
   0x2   :  { %5 = vst [vmem:[#allocation1] sm:$0x3] %v4_v0 }
   0x9   :  { %v10_v1 = vld [vmem:[#allocation1 + $0x1] sm:$0x1]   ;;  %v6_v2 = vld [vmem:[#allocation1] sm:$0x1]  }
   0xa   :  { %11 = vrot.lane.b32.xlu0 %v10_v1, %s22_s0  ;;  %8 = vst.msk [vmem:[#allocation0] sm:$0x1] %vm7_vm0, %v6_v2  }
  0x7c   :  { %v12_v3 = vpop.permute.xlu0 %11  }
  0x7d   :  { %14 = vst.msk [vmem:[#allocation0] sm:$0x1] %vm13_vm1, %v12_v3  }
  0x84   :  { %v18_v4 = vld [vmem:[#allocation0] sm:$0x1] }
  0x85   :  { %20 = vst [vmem:[%s40_s1] sm:$0x1] %v18_v4 }

// kernel: tile.51
= control target key start
LH: loop header
LB: loop body
LE: loop exit
PB: predicated region body
PF: predicated region fallthrough
CT: control target
= control target key end

     0   :  { %s20_s0 = inlined_call_operand.<no memory space> [shape: f32[], index: 0, kind: input, shape index: {}]   ;;  %s21_s1 = inlined_call_operand.vmem [shape: f32[2,1], index: 1, kind: output, shape index: {}]  }
   0x1   :  { %v2_v0 = vstv %s20_s0 }
   0x2   :  { %3 = vst [vmem:[%s21_s1] sm:$0x3] %v2_v0 }

// kernel: generator_forward.1
= control target key start
LH: loop header
LB: loop body
LE: loop exit
PB: predicated region body
PF: predicated region fallthrough
CT: control target
= control target key end

     0   :  { %vm66_vm0 = vcmask 64512   ;;  %v25730_v42 = vmov 0.0|0.0   ;;  %vm21291_vm1 = vmmov 0   ;;  %v25728_v46 = vmov 0.0   ;;  %s25713_s1 = inlined_call_operand.vmem [shape: f32[3,3,8,32], index: 1, kind: input, shape index: {}]   ;;  %s25714_s0 = inlined_call_operand.vmem [shape: f32[10,10,8], index: 0, kind: input, shape index: {}]   ;;  %s25715_s12 = inlined_call_operand.vmem [shape: f32[32,32], index: 12, kind: input, shape index: {}]   ;;  %s25716_s10 = inlined_call_operand.vmem [shape: f32[256,64], index: 10, kind: input, shape index: {}]   ;;  %s25717_s2 = inlined_call_operand.vmem [shape: f32[1,32], index: 2, kind: input, shape index: {}]   ;;  %s25718_s3 = inlined_call_operand.vmem [shape: f32[1,32], index: 3, kind: input, shape index: {}]   ;;  %s25719_s4 = inlined_call_operand.vmem [shape: f32[3,3,32,32], index: 4, kind: input, shape index: {}]   ;;  %s25720_s11 = inlined_call_operand.vmem [shape: f32[1024,256], index: 11, kind: input, shape index: {}]   ;;  %s25721_s5 = inlined_call_operand.vmem [shape: f32[1,32], index: 5, kind: input, shape index: {}]   ;;  %s25722_s6 = inlined_call_operand.vmem [shape: f32[1,32], index: 6, kind: input, shape index: {}]   ;;  %s25723_s7 = inlined_call_operand.vmem [shape: f32[3,3,2,32], index: 7, kind: input, shape index: {}]   ;;  %s25724_s13 = inlined_call_operand.vmem [shape: f32[2,2], index: 13, kind: input, shape index: {}]   ;;  %s25725_s8 = inlined_call_operand.vmem [shape: f32[2,1], index: 8, kind: input, shape index: {}]   ;;  %s25726_s9 = inlined_call_operand.vmem [shape: f32[2,1], index: 9, kind: input, shape index: {}]   ;;  %s25727_s14 = inlined_call_operand.vmem [shape: f32[2,1024], index: 14, kind: output, shape index: {}]  }
   0x1   :  { %v55_v0 = vld [vmem:[%s25713_s1] sm:$0xff]  ;;  %v48_v2 = vld [vmem:[%s25714_s0 + $0x10] sm:$0xff]  ;;  %v14887_v5 = vld [vmem:[%s25713_s1 + $0x18] sm:$0xff]  ;;  %vm1356_vm2 = vcmask 261120   ;;  %vm1656_vm3 = vcmask 523264   ;;  %vm2034_vm4 = vcmask 253952  }
   0x2   :  { %v47_v1 = vld [vmem:[%s25714_s0] sm:$0xff]  ;;  %18248 = vmatprep.subr.mxu0 %v55_v0  ;;  %v14870_v3 = vld [vmem:[%s25713_s1 + $0x10] sm:$0xff]  ;;  %v14853_v9 = vld [vmem:[%s25713_s1 + $0x8] sm:$0xff]  ;;  %vm14542_vm6 = vcmask 1041408   ;;  %vm14561_vm7 = vcmask 15360  }
   0x3   :  { %18250 = vmatprep.mubr.msk.f32.mxu0 %vm66_vm0, %v47_v1  ;;  %v325_v4 = vld [vmem:[%s25714_s0 + $0x2] sm:$0xff]  ;;  %18249 = vmatpush3.msra.mxu0 %v55_v0  ;;  %v21394_v6 = vld [vmem:[%s25714_s0 + $0x12] sm:$0xff]  ;;  %vm23653_vm5 = vmpackc.low %vm1356_vm2, %vm1356_vm2 }
   0x4   :  { %18251 = vmatmul.mubr.msk.f32.vlgmr.msra.gmra.mrb[0].mxu0 %vm66_vm0, %v48_v2  ;;  %18262 = vmatprep.subr.mxu0 %v14870_v3  ;;  %v21399_v7 = vld [vmem:[%s25714_s0 + $0x22] sm:$0xff]  ;;  %v21417_v11 = vld [vmem:[%s25714_s0 + $0x32] sm:$0xff] }
   0x5   :  { %18263 = vmatpush3.msra.mxu0 %v14870_v3  ;;  %18264 = vmatprep.mubr.msk.f32.mxu0 %vm66_vm0, %v325_v4  ;;  %v14904_v8 = vld [vmem:[%s25713_s1 + $0x20] sm:$0xff]  ;;  %v14896_v13 = vld [vmem:[%s25714_s0 + $0x11] sm:$0xff]  ;;  %v14921_v25 = vld [vmem:[%s25713_s1 + $0x28] sm:$0xff] }
   0x6   :  { %18276 = vmatprep.subr.mxu0 %v14887_v5  ;;  %18234 = vmatprep.subr.mxu1 %v14853_v9  ;;  %v56_v10 = vld [vmem:[%s25714_s0 + $0x1] sm:$0xff]  ;;  %v21441_v15 = vld [vmem:[%s25714_s0 + $0x52] sm:$0xff] }
   0x7   :  { %v21422_v12 = vld [vmem:[%s25714_s0 + $0x42] sm:$0xff]  ;;  %18235 = vmatpush3.msra.mxu1 %v14853_v9  ;;  %18236 = vmatprep.mubr.msk.f32.mxu1 %vm66_vm0, %v56_v10  ;;  %v21453_v17 = vld [vmem:[%s25714_s0 + $0x31] sm:$0xff] }
   0x8   :  { %20870 = vmatprep.subr.mxu1 %v55_v0  ;;  %v21433_v14 = vld [vmem:[%s25714_s0 + $0x21] sm:$0xff]  ;;  %18237 = vmatmul.mubr.msk.f32.vlgmr.msra.gmra.mrb[0].mxu1 %vm66_vm0, %v14896_v13  ;;  %v21469_v19 = vld [vmem:[%s25714_s0 + $0x72] sm:$0xff] }
   0x9   :  { %18239 = vmatprep.mubr.msk.f32.mxu1 %vm66_vm0, %v21433_v14  ;;  %v21448_v16 = vld [vmem:[%s25714_s0 + $0x62] sm:$0xff]  ;;  %20871 = vmatpush3.msra.mxu1 %v55_v0  ;;  %v21476_v20 = vld [vmem:[%s25714_s0 + $0x51] sm:$0xff] }
   0xa   :  { %v21460_v18 = vld [vmem:[%s25714_s0 + $0x41] sm:$0xff]  ;;  %v14881_v23 = vld [vmem:[%s25714_s0 + $0x30] sm:$0xff]  ;;  %v14955_v33 = vld [vmem:[%s25713_s1 + $0x38] sm:$0xff]  ;;  %18982 = vmatprep.subr.bf16.mxu1 %v25730_v42 }
   0xb   :  { %v21483_v21 = vld [vmem:[%s25714_s0 + $0x61] sm:$0xff]  ;;  %v21499_v24 = vld [vmem:[%s25714_s0 + $0x71] sm:$0xff] }
   0xc   :  { %18265 = vmatmul.mubr.msk.f32.vlgmr.msra.gmra.mrb[0].mxu0 %vm66_vm0, %v21394_v6  ;;  %18240 = vmatmul.mubr.msk.f32.gmra.mrb[2].mxu1 %vm66_vm0, %v21453_v17  ;;  %v14880_v22 = vld [vmem:[%s25714_s0 + $0x20] sm:$0xff]  ;;  %v14883_v27 = vld [vmem:[%s25714_s0 + $0x50] sm:$0xff]  ;;  %v1379_v40 = vld [vmem:[%s25715_s12 + $0x8] sm:$0xff] }
   0xd   :  { %18267 = vmatprep.mubr.msk.f32.mxu0 %vm66_vm0, %v21399_v7  ;;  %18277 = vmatpush3.msra.mxu0 %v14887_v5  ;;  %v14882_v26 = vld [vmem:[%s25714_s0 + $0x40] sm:$0xff]  ;;  %v14885_v29 = vld [vmem:[%s25714_s0 + $0x70] sm:$0xff]  ;;  %v1381_v44 = vld [vmem:[%s25715_s12 + $0x18] sm:$0xff] }
   0xe   :  { %18290 = vmatprep.subr.mxu0 %v14904_v8  ;;  %18242 = vmatprep.mubr.msk.f32.mxu1 %vm66_vm0, %v21460_v18  ;;  %v14884_v28 = vld [vmem:[%s25714_s0 + $0x60] sm:$0xff]  ;;  %v14938_v31 = vld [vmem:[%s25713_s1 + $0x30] sm:$0xff] }
   0xf   :  { %v14886_v30 = vld [vmem:[%s25714_s0 + $0x80] sm:$0xff]  ;;  %v14937_v36 = vld [vmem:[%s25714_s0 + $0x90] sm:$0xff] }
  0x10   :  { %18268 = vmatmul.mubr.msk.f32.gmra.mrb[2].mxu0 %vm66_vm0, %v21417_v11  ;;  %18243 = vmatmul.mubr.msk.f32.gmra.mrb[4].mxu1 %vm66_vm0, %v21476_v20  ;;  %v14903_v32 = vld [vmem:[%s25714_s0 + $0x81] sm:$0xff]  ;;  %v14954_v37 = vld [vmem:[%s25714_s0 + $0x91] sm:$0xff] }
  0x11   :  { %18270 = vmatprep.mubr.msk.f32.mxu0 %vm66_vm0, %v21422_v12  ;;  %18245 = vmatprep.mubr.msk.f32.mxu1 %vm66_vm0, %v21483_v21  ;;  %v14920_v34 = vld [vmem:[%s25714_s0 + $0x82] sm:$0xff]  ;;  %v14971_v38 = vld [vmem:[%s25714_s0 + $0x92] sm:$0xff] }
  0x12   :  { %v14972_v35 = vld [vmem:[%s25713_s1 + $0x40] sm:$0xff]  ;;  %v1380_v43 = vld [vmem:[%s25715_s12 + $0x10] sm:$0xff] }
  0x13   :  { %v1378_v39 = vld [vmem:[%s25715_s12] sm:$0xff]  ;;  %v18986_v45 = vpack.c.bf16 %v1381_v44, %v1380_v43 }
  0x14   :  { %18271 = vmatmul.mubr.msk.f32.gmra.mrb[4].mxu0 %vm66_vm0, %v21441_v15  ;;  %18246 = vmatmul.mubr.msk.f32.gmra.mrb[6].mxu1 %vm66_vm0, %v21499_v24  ;;  %v18983_v41 = vpack.c.bf16 %v1379_v40, %v1378_v39 }
  0x15   :  { %18273 = vmatprep.mubr.msk.f32.mxu0 %vm66_vm0, %v21448_v16  ;;  %18253 = vmatprep.mubr.msk.f32.mxu1 %vm66_vm0, %v14880_v22 }
  0x18   :  { %18274 = vmatmul.mubr.msk.f32.gmra.mrb[6].mxu0 %vm66_vm0, %v21469_v19  ;;  %18254 = vmatmul.mubr.msk.f32.vlgmr.msra.gmra.mrb[2].mxu1 %vm66_vm0, %v14881_v23 }
  0x19   :  { %18278 = vmatprep.mubr.msk.f32.mxu0 %vm66_vm0, %v48_v2  ;;  %18256 = vmatprep.mubr.msk.f32.mxu1 %vm66_vm0, %v14882_v26 }
  0x1a   :  { %18984 = vmatpush3.bf16.msra.mxu1 %v18983_v41 }
  0x1b   :  { %18985 = vmatprep.subr.bf16.mxu1 %v25730_v42 }
  0x1c   :  { %18279 = vmatmul.mubr.msk.f32.vlgmr.msra.gmra.mrb[0].mxu0 %vm66_vm0, %v14880_v22  ;;  %18257 = vmatmul.mubr.msk.f32.gmra.mrb[4].mxu1 %vm66_vm0, %v14883_v27 }
  0x1d   :  { %18281 = vmatprep.mubr.msk.f32.mxu0 %vm66_vm0, %v14881_v23  ;;  %18291 = vmatpush3.msra.mxu0 %v14904_v8 }
  0x1e   :  { %18304 = vmatprep.subr.mxu0 %v14921_v25  ;;  %18259 = vmatprep.mubr.msk.f32.mxu1 %vm66_vm0, %v14884_v28 }
  0x1f   :  { %18987 = vmatpush3.bf16.msra.mxu1 %v18986_v45 }
  0x20   :  { %18282 = vmatmul.mubr.msk.f32.gmra.mrb[2].mxu0 %vm66_vm0, %v14882_v26  ;;  %18260 = vmatmul.mubr.msk.f32.gmra.mrb[6].mxu1 %vm66_vm0, %v14885_v29 }
  0x21   :  { %18284 = vmatprep.mubr.msk.f32.mxu0 %vm66_vm0, %v14883_v27  ;;  %18988 = vmatprep.subr.bf16.mxu1 %v25730_v42 }
  0x22   :  { %18368 = vmatprep.mubr.msk.f32.mxu1 %vm21291_vm1, %v25728_v46 }
  0x24   :  { %18285 = vmatmul.mubr.msk.f32.gmra.mrb[4].mxu0 %vm66_vm0, %v14884_v28 }
  0x25   :  { %18287 = vmatprep.mubr.msk.f32.mxu0 %vm66_vm0, %v14885_v29 }
  0x28   :  { %18288 = vmatmul.mubr.msk.f32.gmra.mrb[6].mxu0 %vm66_vm0, %v14886_v30 }
  0x29   :  { %18292 = vmatprep.mubr.msk.f32.mxu0 %vm66_vm0, %v14896_v13 }
  0x2c   :  { %18293 = vmatmul.mubr.msk.f32.vlgmr.msra.gmra.mrb[0].mxu0 %vm66_vm0, %v21433_v14 }
  0x2d   :  { %18295 = vmatprep.mubr.msk.f32.mxu0 %vm66_vm0, %v21453_v17  ;;  %18305 = vmatpush3.msra.mxu0 %v14921_v25 }
  0x2e   :  { %18318 = vmatprep.subr.mxu0 %v14938_v31 }
  0x30   :  { %18296 = vmatmul.mubr.msk.f32.gmra.mrb[2].mxu0 %vm66_vm0, %v21460_v18 }
  0x31   :  { %18298 = vmatprep.mubr.msk.f32.mxu0 %vm66_vm0, %v21476_v20 }
  0x34   :  { %18299 = vmatmul.mubr.msk.f32.gmra.mrb[4].mxu0 %vm66_vm0, %v21483_v21 }
  0x35   :  { %18301 = vmatprep.mubr.msk.f32.mxu0 %vm66_vm0, %v21499_v24 }
  0x38   :  { %18302 = vmatmul.mubr.msk.f32.gmra.mrb[6].mxu0 %vm66_vm0, %v14903_v32 }
  0x39   :  { %18306 = vmatprep.mubr.msk.f32.mxu0 %vm66_vm0, %v21394_v6 }
  0x3c   :  { %18307 = vmatmul.mubr.msk.f32.vlgmr.msra.gmra.mrb[0].mxu0 %vm66_vm0, %v21399_v7 }
  0x3d   :  { %18309 = vmatprep.mubr.msk.f32.mxu0 %vm66_vm0, %v21417_v11  ;;  %18319 = vmatpush3.msra.mxu0 %v14938_v31 }
  0x3e   :  { %18332 = vmatprep.subr.mxu0 %v14955_v33 }
  0x40   :  { %18310 = vmatmul.mubr.msk.f32.gmra.mrb[2].mxu0 %vm66_vm0, %v21422_v12 }
  0x41   :  { %18312 = vmatprep.mubr.msk.f32.mxu0 %vm66_vm0, %v21441_v15 }
  0x44   :  { %18313 = vmatmul.mubr.msk.f32.gmra.mrb[4].mxu0 %vm66_vm0, %v21448_v16 }
  0x45   :  { %18315 = vmatprep.mubr.msk.f32.mxu0 %vm66_vm0, %v21469_v19 }
  0x48   :  { %18316 = vmatmul.mubr.msk.f32.gmra.mrb[6].mxu0 %vm66_vm0, %v14920_v34 }
  0x49   :  { %18320 = vmatprep.mubr.msk.f32.mxu0 %vm66_vm0, %v14880_v22 }
  0x4c   :  { %18321 = vmatmul.mubr.msk.f32.vlgmr.msra.gmra.mrb[0].mxu0 %vm66_vm0, %v14881_v23 }
  0x4d   :  { %18323 = vmatprep.mubr.msk.f32.mxu0 %vm66_vm0, %v14882_v26  ;;  %18333 = vmatpush3.msra.mxu0 %v14955_v33 }
  0x4e   :  { %18346 = vmatprep.subr.mxu0 %v14972_v35 }
  0x50   :  { %18324 = vmatmul.mubr.msk.f32.gmra.mrb[2].mxu0 %vm66_vm0, %v14883_v27 }
  0x51   :  { %18326 = vmatprep.mubr.msk.f32.mxu0 %vm66_vm0, %v14884_v28  ;;  %v1457_v28 = vlaneseq }
  0x54   :  { %18327 = vmatmul.mubr.msk.f32.gmra.mrb[4].mxu0 %vm66_vm0, %v14885_v29  ;;  %v21655_v29 = vshrl.u32 %v1457_v28, 7 }
  0x55   :  { %18329 = vmatprep.mubr.msk.f32.mxu0 %vm66_vm0, %v14886_v30 }
  0x56   :  { %25798 = vst [vmem:[#allocation4_spill] sm:$0xff] %v21655_v29  ;;  %v21658_v30 = vsub.s32 0, %v21655_v29  ;;  %v15124_v29 = vld [vmem:[%s25719_s4 + $0x78] sm:$0xff] }
  0x58   :  { %18330 = vmatmul.mubr.msk.f32.gmra.mrb[6].mxu0 %vm66_vm0, %v14937_v36  ;;  %25799 = vst [vmem:[#allocation5_spill] sm:$0xff] %v21658_v30 }
  0x59   :  { %18334 = vmatprep.mubr.msk.f32.mxu0 %vm66_vm0, %v21433_v14 }
  0x5c   :  { %18335 = vmatmul.mubr.msk.f32.vlgmr.msra.gmra.mrb[0].mxu0 %vm66_vm0, %v21453_v17 }
  0x5d   :  { %18337 = vmatprep.mubr.msk.f32.mxu0 %vm66_vm0, %v21460_v18  ;;  %18347 = vmatpush3.msra.mxu0 %v14972_v35 }
  0x5e   :  { %19082 = vmatprep.subr.bf16.mxu0 %v25730_v42 }
  0x60   :  { %18338 = vmatmul.mubr.msk.f32.gmra.mrb[2].mxu0 %vm66_vm0, %v21476_v20 }
  0x61   :  { %18340 = vmatprep.mubr.msk.f32.mxu0 %vm66_vm0, %v21483_v21 }
  0x64   :  { %18341 = vmatmul.mubr.msk.f32.gmra.mrb[4].mxu0 %vm66_vm0, %v21499_v24 }
  0x65   :  { %18343 = vmatprep.mubr.msk.f32.mxu0 %vm66_vm0, %v14903_v32 }
  0x68   :  { %18344 = vmatmul.mubr.msk.f32.gmra.mrb[6].mxu0 %vm66_vm0, %v14954_v37 }
  0x69   :  { %18348 = vmatprep.mubr.msk.f32.mxu0 %vm66_vm0, %v21399_v7 }
  0x6c   :  { %18349 = vmatmul.mubr.msk.f32.vlgmr.msra.gmra.mrb[0].mxu0 %vm66_vm0, %v21417_v11 }
  0x6d   :  { %18351 = vmatprep.mubr.msk.f32.mxu0 %vm66_vm0, %v21422_v12 }
  0x70   :  { %18352 = vmatmul.mubr.msk.f32.gmra.mrb[2].mxu0 %vm66_vm0, %v21441_v15 }
  0x71   :  { %18354 = vmatprep.mubr.msk.f32.mxu0 %vm66_vm0, %v21448_v16 }
  0x74   :  { %18355 = vmatmul.mubr.msk.f32.gmra.mrb[4].mxu0 %vm66_vm0, %v21469_v19 }
  0x75   :  { %18357 = vmatprep.mubr.msk.f32.mxu0 %vm66_vm0, %v14920_v34 }
  0x78   :  { %18358 = vmatmul.mubr.msk.f32.gmra.mrb[6].mxu0 %vm66_vm0, %v14971_v38 }
  0x79   :  { %18958 = vmatprep.mubr.msk.f32.mxu0 %vm21291_vm1, %v25728_v46 }
  0xdb   :  { %v18238_v47 = vpop.f32.mrb[0].mxu1 }
  0xdc   :  { %v157_v48 = vpop.f32.mrb[1].mxu1 }
  0xeb   :  { %v18255_v49 = vpop.f32.mrb[2].mxu1 }
  0xec   :  { %v296_v50 = vpop.f32.mrb[3].mxu1 }
  0xef   :  { %v18258_v51 = vpop.f32.mrb[4].mxu1 }
  0xf0   :  { %v306_v52 = vpop.f32.mrb[5].mxu1 }
  0xf3   :  { %v18261_v53 = vpop.f32.mrb[6].mxu1 }
  0xf4   :  { %v316_v54 = vpop.f32.mrb[7].mxu1 }
 0x13f   :  { %v18350_v55 = vpop.f32.mrb[0].mxu0 }
 0x140   :  { %v20872_v56 = vadd.f32 %v18350_v55, %v18238_v47  ;;  %v1309_v57 = vpop.f32.mrb[1].mxu0 }
 0x141   :  { %v20873_v58 = vadd.f32 %v1309_v57, %v157_v48 }
 0x142   :  { %v1358_v59 = vsel %vm1356_vm2, %v20872_v56, 0.0 }
 0x143   :  { %v1357_v60 = vsel %vm1356_vm2, %v20873_v58, 0.0  ;;  %v18353_v61 = vpop.f32.mrb[2].mxu0 }
 0x144   :  { %v20874_v62 = vadd.f32 %v18353_v61, %v18255_v49  ;;  %v1319_v63 = vpop.f32.mrb[3].mxu0  ;;  %v1359_v1 = vadd.f32 %v1358_v59, %v1357_v60 }
 0x145   :  { %v20875_v0 = vadd.f32 %v1319_v63, %v296_v50 }
 0x146   :  { %v1362_v7 = vsel %vm1356_vm2, %v20874_v62, 0.0 }
 0x147   :  { %v1360_v2 = vsel %vm1356_vm2, %v20875_v0, 0.0  ;;  %v18356_v3 = vpop.f32.mrb[4].mxu0 }
 0x148   :  { %v1361_v4 = vadd.f32 %v1360_v2, %v1359_v1  ;;  %v20876_v5 = vadd.f32 %v18356_v3, %v18258_v51  ;;  %v1329_v6 = vpop.f32.mrb[5].mxu0 }
 0x149   :  { %v20877_v8 = vadd.f32 %v1329_v6, %v306_v52 }
 0x14a   :  { %v1363_v9 = vadd.f32 %v1362_v7, %v1361_v4  ;;  %v1366_v15 = vsel %vm1356_vm2, %v20876_v5, 0.0 }
 0x14b   :  { %v1364_v10 = vsel %vm1356_vm2, %v20877_v8, 0.0  ;;  %v18359_v11 = vpop.f32.mrb[6].mxu0 }
 0x14c   :  { %v1365_v12 = vadd.f32 %v1364_v10, %v1363_v9  ;;  %v20878_v13 = vadd.f32 %v18359_v11, %v18261_v53  ;;  %v1339_v14 = vpop.f32.mrb[7].mxu0  ;;  %v1624_v10 = vld [vmem:[%s25716_s10] sm:$0xff] }
 0x14d   :  { %v20879_v16 = vadd.f32 %v1339_v14, %v316_v54 }
 0x14e   :  { %v1367_v17 = vadd.f32 %v1366_v15, %v1365_v12  ;;  %v1370_v20 = vsel %vm1356_vm2, %v20878_v13, 0.0 }
 0x14f   :  { %v1368_v18 = vsel %vm1356_vm2, %v20879_v16, 0.0 }
 0x150   :  { %v1369_v19 = vadd.f32 %v1368_v18, %v1367_v17  ;;  %v14983_v17 = vld [vmem:[%s25717_s2] ss:$0 sm:$0xff] }
 0x152   :  { %v1371_v21 = vadd.f32 %v1370_v20, %v1369_v19 }
 0x154   :  { %v1372_v22 = vrot.slane %v1371_v21, 4 }
 0x156   :  { %v1373_v23 = vadd.f32 %v1372_v22, %v1371_v21  ;;  %v14984_v22 = vld [vmem:[%s25718_s3] ss:$0 sm:$0xff] }
 0x158   :  { %v1374_v24 = vrot.slane %v1373_v23, 2 }
 0x15a   :  { %v1375_v25 = vadd.f32 %v1374_v24, %v1373_v23 }
 0x15c   :  { %v1376_v26 = vrot.slane %v1375_v25, 1 }
 0x15e   :  { %v1377_v27 = vadd.f32 %v1376_v26, %v1375_v25 }
 0x160   :  { %18369 = vmatmul.mubr.msk.f32.vlgmr.msra.gmra.mrb[8].mxu1 %vm1356_vm2, %v1377_v27 }
 0x161   :  { %18990 = vmatpush3.bf16.msra.mxu1 %v18983_v41  ;;  %18379 = vmatprep.mubr.msk.f32.mxu1 %vm21291_vm1, %v25728_v46 }
 0x162   :  { %18991 = vmatprep.subr.bf16.mxu1 %v25730_v42  ;;  %v15123_v42 = vld [vmem:[%s25719_s4 + $0x70] sm:$0xff] }
 0x165   :  { %18993 = vmatpush3.bf16.msra.mxu1 %v18986_v45 }
 0x233   :  { %v1451_v31 = vpop.f32.mrb[8].mxu1 }
 0x234   :  { %v1456_v32 = vmul.f32 0.0078125, %v1451_v31  ;;  %v18370_v33 = vpop.f32.mrb[9].mxu1 }
 0x236   :  { %v1460_v34 = vrot.slane %v1456_v32, %v21658_v30 }
 0x238   :  { %v1461_v35 = vsub.f32 %v20873_v58, %v1460_v34  ;;  %v1462_v36 = vsub.f32 %v20872_v56, %v1460_v34  ;;  %v1463_v37 = vsub.f32 %v20875_v0, %v1460_v34  ;;  %v1464_v38 = vsub.f32 %v20874_v62, %v1460_v34 }
 0x239   :  { %v1465_v39 = vsub.f32 %v20877_v8, %v1460_v34  ;;  %v1466_v44 = vsub.f32 %v20876_v5, %v1460_v34  ;;  %v1467_v50 = vsub.f32 %v20879_v16, %v1460_v34  ;;  %v1468_v54 = vsub.f32 %v20878_v13, %v1460_v34 }
 0x23a   :  { %v1469_v40 = vmul.f32 %v1461_v35, %v1461_v35  ;;  %v1470_v41 = vmul.f32 %v1462_v36, %v1462_v36  ;;  %v1471_v43 = vmul.f32 %v1463_v37, %v1463_v37  ;;  %v1472_v45 = vmul.f32 %v1464_v38, %v1464_v38 }
 0x23b   :  { %v1473_v51 = vmul.f32 %v1465_v39, %v1465_v39  ;;  %v1474_v55 = vmul.f32 %v1466_v44, %v1466_v44  ;;  %v1475_v58 = vmul.f32 %v1467_v50, %v1467_v50  ;;  %v1476_v61 = vmul.f32 %v1468_v54, %v1468_v54 }
 0x23c   :  { %v1477_v47 = vsel %vm1356_vm2, %v1469_v40, 0.0  ;;  %v1478_v48 = vsel %vm1356_vm2, %v1470_v41, 0.0  ;;  %v1480_v52 = vsel %vm1356_vm2, %v1471_v43, 0.0  ;;  %v1482_v56 = vsel %vm1356_vm2, %v1472_v45, 0.0 }
 0x23d   :  { %v1479_v49 = vadd.f32 %v1478_v48, %v1477_v47  ;;  %v1484_v59 = vsel %vm1356_vm2, %v1473_v51, 0.0  ;;  %v1486_v62 = vsel %vm1356_vm2, %v1474_v55, 0.0  ;;  %v1488_v0 = vsel %vm1356_vm2, %v1475_v58, 0.0 }
 0x23e   :  { %v1490_v2 = vsel %vm1356_vm2, %v1476_v61, 0.0  ;;  %v1627_v61 = vld [vmem:[%s25716_s10 + $0x18] sm:$0xff] }
 0x23f   :  { %v1481_v53 = vadd.f32 %v1480_v52, %v1479_v49 }
 0x241   :  { %v1483_v57 = vadd.f32 %v1482_v56, %v1481_v53 }
 0x243   :  { %v1485_v60 = vadd.f32 %v1484_v59, %v1483_v57  ;;  %v1625_v59 = vld [vmem:[%s25716_s10 + $0x8] sm:$0xff] }
 0x245   :  { %v1487_v63 = vadd.f32 %v1486_v62, %v1485_v60  ;;  %v1626_v60 = vld [vmem:[%s25716_s10 + $0x10] sm:$0xff]  ;;  %v1628_v62 = vld [vmem:[%s25716_s10 + $0x20] sm:$0xff] }
 0x247   :  { %v1489_v1 = vadd.f32 %v1488_v0, %v1487_v63  ;;  %v1629_v63 = vld [vmem:[%s25716_s10 + $0x28] sm:$0xff]  ;;  %v1630_v0 = vld [vmem:[%s25716_s10 + $0x30] sm:$0xff] }
 0x249   :  { %v1491_v3 = vadd.f32 %v1490_v2, %v1489_v1  ;;  %v1631_v1 = vld [vmem:[%s25716_s10 + $0x38] sm:$0xff]  ;;  %v1632_v2 = vld [vmem:[%s25716_s10 + $0x40] sm:$0xff] }
 0x24b   :  { %v1492_v4 = vrot.slane %v1491_v3, 4 }
 0x24d   :  { %v1493_v5 = vadd.f32 %v1492_v4, %v1491_v3  ;;  %v1633_v3 = vld [vmem:[%s25716_s10 + $0x48] sm:$0xff]  ;;  %v1634_v4 = vld [vmem:[%s25716_s10 + $0x50] sm:$0xff] }
 0x24f   :  { %v1494_v6 = vrot.slane %v1493_v5, 2 }
 0x251   :  { %v1495_v7 = vadd.f32 %v1494_v6, %v1493_v5  ;;  %v1635_v5 = vld [vmem:[%s25716_s10 + $0x58] sm:$0xff]  ;;  %v1636_v6 = vld [vmem:[%s25716_s10 + $0x60] sm:$0xff] }
 0x253   :  { %v1496_v8 = vrot.slane %v1495_v7, 1 }
 0x255   :  { %v1497_v9 = vadd.f32 %v1496_v8, %v1495_v7  ;;  %v1637_v7 = vld [vmem:[%s25716_s10 + $0x68] sm:$0xff]  ;;  %v1638_v8 = vld [vmem:[%s25716_s10 + $0x70] sm:$0xff] }
 0x257   :  { %18380 = vmatmul.mubr.msk.f32.vlgmr.msra.gmra.mrb[10].mxu1 %vm1356_vm2, %v1497_v9  ;;  %v1639_v9 = vld [vmem:[%s25716_s10 + $0x78] sm:$0xff] }
 0x258   :  { %18398 = vmatprep.mubr.msk.f32.mxu1 %vm1656_vm3, %v1624_v10  ;;  %v1640_v10 = vld [vmem:[%s25716_s10 + $0x80] sm:$0xff] }
 0x32a   :  { %v1567_v11 = vpop.f32.mrb[10].mxu1 }
 0x32b   :  { %v1571_v12 = vmul.f32 0.0078125, %v1567_v11  ;;  %v18381_v13 = vpop.f32.mrb[11].mxu1  ;;  %v1641_v11 = vld [vmem:[%s25716_s10 + $0x88] sm:$0xff] }
 0x32c   :  { %v1643_v13 = vld [vmem:[%s25716_s10 + $0x98] sm:$0xff] }
 0x32d   :  { %v1572_v14 = vadd.f32 0.001, %v1571_v12  ;;  %v1642_v12 = vld [vmem:[%s25716_s10 + $0x90] sm:$0xff] }
 0x32f   :  { %21263 = vrsqrt.f32 %v1572_v14  ;;  %v1644_v14 = vld [vmem:[%s25716_s10 + $0xa0] sm:$0xff] }
 0x339   :  { %v21264_v15 = vpop.eup %21263 }
 0x33a   :  { %v1577_v16 = vrot.slane %v21264_v15, %v21658_v30  ;;  %v1645_v15 = vld [vmem:[%s25716_s10 + $0xa8] sm:$0xff] }
 0x33c   :  { %v1578_v18 = vmul.f32 %v1577_v16, %v1461_v35  ;;  %v1579_v19 = vmul.f32 %v1577_v16, %v1462_v36  ;;  %v1580_v20 = vmul.f32 %v1577_v16, %v1463_v37  ;;  %v1581_v21 = vmul.f32 %v1577_v16, %v1464_v38 }
 0x33d   :  { %v1582_v23 = vmul.f32 %v1577_v16, %v1465_v39  ;;  %v1583_v24 = vmul.f32 %v1577_v16, %v1466_v44  ;;  %v1584_v25 = vmul.f32 %v1577_v16, %v1467_v50  ;;  %v1585_v26 = vmul.f32 %v1577_v16, %v1468_v54  ;;  %v1646_v16 = vld [vmem:[%s25716_s10 + $0xb0] sm:$0xff] }
 0x33e   :  { %v1593_v27 = vmul.f32 %v14983_v17, %v1578_v18  ;;  %v1594_v28 = vmul.f32 %v14983_v17, %v1579_v19  ;;  %v1595_v31 = vmul.f32 %v14983_v17, %v1580_v20  ;;  %v1596_v32 = vmul.f32 %v14983_v17, %v1581_v21  ;;  %v1648_v18 = vld [vmem:[%s25716_s10 + $0xc0] sm:$0xff]  ;;  %v1649_v19 = vld [vmem:[%s25716_s10 + $0xc8] sm:$0xff]  ;;  %v1650_v20 = vld [vmem:[%s25716_s10 + $0xd0] sm:$0xff] }
 0x33f   :  { %v1597_v33 = vmul.f32 %v14983_v17, %v1582_v23  ;;  %v1598_v34 = vmul.f32 %v14983_v17, %v1583_v24  ;;  %v1599_v43 = vmul.f32 %v14983_v17, %v1584_v25  ;;  %v1600_v45 = vmul.f32 %v14983_v17, %v1585_v26  ;;  %v1647_v17 = vld [vmem:[%s25716_s10 + $0xb8] sm:$0xff]  ;;  %v1653_v23 = vld [vmem:[%s25716_s10 + $0xe8] sm:$0xff]  ;;  %v1654_v24 = vld [vmem:[%s25716_s10 + $0xf0] sm:$0xff] }
 0x340   :  { %v1608_v40 = vadd.f32 %v14984_v22, %v1593_v27  ;;  %v1609_v41 = vadd.f32 %v14984_v22, %v1594_v28  ;;  %v1610_v35 = vadd.f32 %v14984_v22, %v1595_v31  ;;  %v1611_v36 = vadd.f32 %v14984_v22, %v1596_v32  ;;  %v1651_v21 = vld [vmem:[%s25716_s10 + $0xd8] sm:$0xff]  ;;  %v15017_v26 = vld [vmem:[%s25719_s4 + $0x20] sm:$0xff]  ;;  %v15018_v27 = vld [vmem:[%s25719_s4 + $0x28] sm:$0xff] }
 0x341   :  { %v1612_v37 = vadd.f32 %v14984_v22, %v1597_v33  ;;  %v1613_v38 = vadd.f32 %v14984_v22, %v1598_v34  ;;  %v1614_v50 = vadd.f32 %v14984_v22, %v1599_v43  ;;  %v1615_v54 = vadd.f32 %v14984_v22, %v1600_v45  ;;  %v1652_v22 = vld [vmem:[%s25716_s10 + $0xe0] sm:$0xff]  ;;  %v1655_v25 = vld [vmem:[%s25716_s10 + $0xf8] sm:$0xff]  ;;  %v15019_v31 = vld [vmem:[%s25719_s4 + $0x30] sm:$0xff] }
 0x342   :  { %v1616_v47 = vmax.f32 %v1608_v40, 0.0  ;;  %v1617_v48 = vmax.f32 %v1609_v41, 0.0  ;;  %v1618_v39 = vmax.f32 %v1610_v35, 0.0  ;;  %v1619_v44 = vmax.f32 %v1611_v36, 0.0  ;;  %v15020_v32 = vld [vmem:[%s25719_s4 + $0x38] sm:$0xff]  ;;  %v2121_v34 = vld [vmem:[%s25719_s4] sm:$0xff] }
 0x343   :  { %v1620_v52 = vmax.f32 %v1612_v37, 0.0  ;;  %v1621_v53 = vmax.f32 %v1613_v38, 0.0  ;;  %v1622_v56 = vmax.f32 %v1614_v50, 0.0  ;;  %v1623_v57 = vmax.f32 %v1615_v54, 0.0  ;;  %v2122_v40 = vld [vmem:[%s25719_s4 + $0x8] sm:$0xff] }
 0x344   :  { %v18994_v49 = vpack.c.bf16 %v1617_v48, %v1616_v47  ;;  %v18998_v51 = vpack.c.bf16 %v1619_v44, %v1618_v39  ;;  %v19010_v28 = vpack.c.bf16 %v15018_v27, %v15017_v26  ;;  %v19014_v33 = vpack.c.bf16 %v15020_v32, %v15019_v31  ;;  %v2123_v39 = vld [vmem:[%s25719_s4 + $0x10] sm:$0xff]  ;;  %v2124_v44 = vld [vmem:[%s25719_s4 + $0x18] sm:$0xff] }
 0x345   :  { %v19002_v55 = vpack.c.bf16 %v1621_v53, %v1620_v52  ;;  %v19006_v58 = vpack.c.bf16 %v1623_v57, %v1622_v56  ;;  %v19018_v41 = vpack.c.bf16 %v2122_v40, %v2121_v34  ;;  %v19022_v56 = vpack.c.bf16 %v2124_v44, %v2123_v39 }
 0x346   :  { %18995 = vmatprep.subr.bf16.mxu1 %v18994_v49 }
 0x347   :  { %18997 = vmatpush3.bf16.msra.mxu1 %v18994_v49 }
 0x348   :  { %18999 = vmatprep.subr.bf16.mxu1 %v18998_v51 }
 0x34b   :  { %19001 = vmatpush3.bf16.msra.mxu1 %v18998_v51 }
 0x34c   :  { %19003 = vmatprep.subr.bf16.mxu1 %v19002_v55 }
 0x34f   :  { %19005 = vmatpush3.bf16.msra.mxu1 %v19002_v55 }
 0x350   :  { %19007 = vmatprep.subr.bf16.mxu1 %v19006_v58 }
 0x353   :  { %19009 = vmatpush3.bf16.msra.mxu1 %v19006_v58  ;;  %v15085_v58 = vld [vmem:[%s25719_s4 + $0x40] sm:$0xff] }
 0x354   :  { %19011 = vmatprep.subr.bf16.mxu1 %v19010_v28 }
 0x356   :  { %18399 = vmatmul.mubr.msk.f32.vlgmr.msra.gmra.mrb[12].mxu1 %vm1656_vm3, %v1625_v59  ;;  %v15086_v59 = vld [vmem:[%s25719_s4 + $0x48] sm:$0xff] }
 0x357   :  { %18401 = vmatprep.mubr.msk.f32.mxu1 %vm1656_vm3, %v1626_v60  ;;  %19013 = vmatpush3.bf16.msra.mxu1 %v19010_v28 }
 0x358   :  { %19015 = vmatprep.subr.bf16.mxu1 %v19014_v33 }
 0x35a   :  { %18402 = vmatmul.mubr.msk.f32.gmra.mrb[14].mxu1 %vm1656_vm3, %v1627_v61 }
 0x35b   :  { %18404 = vmatprep.mubr.msk.f32.mxu1 %vm1656_vm3, %v1628_v62  ;;  %19017 = vmatpush3.bf16.msra.mxu1 %v19014_v33 }
 0x35c   :  { %19019 = vmatprep.subr.bf16.mxu1 %v19018_v41 }
 0x35e   :  { %18405 = vmatmul.mubr.msk.f32.gmra.mrb[16].mxu1 %vm1656_vm3, %v1629_v63 }
 0x35f   :  { %18407 = vmatprep.mubr.msk.f32.mxu1 %vm1656_vm3, %v1630_v0 }
 0x362   :  { %18408 = vmatmul.mubr.msk.f32.gmra.mrb[18].mxu1 %vm1656_vm3, %v1631_v1  ;;  %v21859_v1 = vpack.c.bf16 %v15086_v59, %v15085_v58 }
 0x363   :  { %18410 = vmatprep.mubr.msk.f32.mxu1 %vm1656_vm3, %v1632_v2 }
 0x366   :  { %18411 = vmatmul.mubr.msk.f32.gmra.mrb[20].mxu1 %vm1656_vm3, %v1633_v3 }
 0x367   :  { %18413 = vmatprep.mubr.msk.f32.mxu1 %vm1656_vm3, %v1634_v4 }
 0x36a   :  { %18414 = vmatmul.mubr.msk.f32.gmra.mrb[22].mxu1 %vm1656_vm3, %v1635_v5 }
 0x36b   :  { %18416 = vmatprep.mubr.msk.f32.mxu1 %vm1656_vm3, %v1636_v6 }
 0x36e   :  { %18417 = vmatmul.mubr.msk.f32.gmra.mrb[24].mxu1 %vm1656_vm3, %v1637_v7 }
 0x36f   :  { %18419 = vmatprep.mubr.msk.f32.mxu1 %vm1656_vm3, %v1638_v8 }
 0x372   :  { %18420 = vmatmul.mubr.msk.f32.gmra.mrb[26].mxu1 %vm1656_vm3, %v1639_v9 }
 0x373   :  { %18422 = vmatprep.mubr.msk.f32.mxu1 %vm1656_vm3, %v1640_v10 }
 0x376   :  { %18423 = vmatmul.mubr.msk.f32.gmra.mrb[28].mxu1 %vm1656_vm3, %v1641_v11 }
 0x377   :  { %18425 = vmatprep.mubr.msk.f32.mxu1 %vm1656_vm3, %v1642_v12 }
 0x37a   :  { %18426 = vmatmul.mubr.msk.f32.gmra.mrb[30].mxu1 %vm1656_vm3, %v1643_v13 }
 0x37b   :  { %18428 = vmatprep.mubr.msk.f32.mxu1 %vm1656_vm3, %v1644_v14 }
 0x37e   :  { %18429 = vmatmul.mubr.msk.f32.gmra.mrb[32].mxu1 %vm1656_vm3, %v1645_v15 }
 0x37f   :  { %18431 = vmatprep.mubr.msk.f32.mxu1 %vm1656_vm3, %v1646_v16 }
 0x382   :  { %18432 = vmatmul.mubr.msk.f32.gmra.mrb[34].mxu1 %vm1656_vm3, %v1647_v17 }
 0x383   :  { %18434 = vmatprep.mubr.msk.f32.mxu1 %vm1656_vm3, %v1648_v18 }
 0x386   :  { %18435 = vmatmul.mubr.msk.f32.gmra.mrb[36].mxu1 %vm1656_vm3, %v1649_v19 }
 0x387   :  { %18437 = vmatprep.mubr.msk.f32.mxu1 %vm1656_vm3, %v1650_v20 }
 0x38a   :  { %18438 = vmatmul.mubr.msk.f32.gmra.mrb[38].mxu1 %vm1656_vm3, %v1651_v21 }
 0x38b   :  { %18440 = vmatprep.mubr.msk.f32.mxu1 %vm1656_vm3, %v1652_v22 }
 0x38e   :  { %18441 = vmatmul.mubr.msk.f32.gmra.mrb[40].mxu1 %vm1656_vm3, %v1653_v23 }
 0x38f   :  { %18443 = vmatprep.mubr.msk.f32.mxu1 %vm1656_vm3, %v1654_v24 }
 0x392   :  { %18444 = vmatmul.mubr.msk.f32.gmra.mrb[42].mxu1 %vm1656_vm3, %v1655_v25 }
 0x429   :  { %v18400_v35 = vpop.f32.mrb[12].mxu1 }
 0x42a   :  { %1980 = vst.msk [vmem:[#allocation2 + $0x21] sm:$0xff] %vm1356_vm2, %v18400_v35  ;;  %v1819_v36 = vpop.f32.mrb[13].mxu1 }
 0x42b   :  { %1979 = vst.msk [vmem:[#allocation2 + $0x19] sm:$0xff] %vm1356_vm2, %v1819_v36 }
 0x42d   :  { %v18403_v37 = vpop.f32.mrb[14].mxu1 }
 0x42e   :  { %1982 = vst.msk [vmem:[#allocation2 + $0x39] sm:$0xff] %vm1356_vm2, %v18403_v37  ;;  %2012 = vst.msk [vmem:[#allocation2 + $0x9] sm:$0xff] %vm1356_vm2, %v18403_v37  ;;  %v1829_v38 = vpop.f32.mrb[15].mxu1 }
 0x42f   :  { %1981 = vst.msk [vmem:[#allocation2 + $0x31] sm:$0xff] %vm1356_vm2, %v1829_v38  ;;  %2011 = vst.msk [vmem:[#allocation2 + $0x1] sm:$0xff] %vm1356_vm2, %v1829_v38 }
 0x431   :  { %v2054_v43 = vld [vmem:[#allocation2 + $0x27] sm:$0x1]  ;;  %v18406_v45 = vpop.f32.mrb[16].mxu1 }
 0x432   :  { %2072 = vst.msk [vmem:[#allocation2 + $0x29] sm:$0x1] %vm2034_vm4, %v2054_v43  ;;  %v2017_v47 = vld [vmem:[#allocation2 + $0x1a] sm:$0x1]  ;;  %v1839_v48 = vpop.f32.mrb[17].mxu1  ;;  %v21863_v2 = vld [vmem:[#allocation2 + $0x21] sm:$0xff] }
 0x433   :  { %1984 = vst.msk [vmem:[#allocation2 + $0x51] sm:$0xff] %vm1356_vm2, %v18406_v45  ;;  %1983 = vst.msk [vmem:[#allocation2 + $0x49] sm:$0xff] %vm1356_vm2, %v1839_v48  ;;  %v21853_v60 = vld [vmem:[#allocation2 + $0x19] sm:$0xff] }
 0x434   :  { %2036 = vst.msk [vmem:[#allocation2 + $0x18] sm:$0x1] %vm2034_vm4, %v2017_v47 }
 0x435   :  { %v2053_v49 = vld [vmem:[#allocation2 + $0xf] sm:$0x1]  ;;  %v2055_v50 = vld [vmem:[#allocation2 + $0x3f] sm:$0x1]  ;;  %v18409_v51 = vpop.f32.mrb[18].mxu1 }
 0x436   :  { %2071 = vst.msk [vmem:[#allocation2 + $0x11] sm:$0x1] %vm2034_vm4, %v2053_v49  ;;  %2073 = vst.msk [vmem:[#allocation2 + $0x41] sm:$0x1] %vm2034_vm4, %v2055_v50  ;;  %v2016_v52 = vld [vmem:[#allocation2 + $0x2] sm:$0x1] }
 0x437   :  { %v2018_v53 = vld [vmem:[#allocation2 + $0x32] sm:$0x1]  ;;  %1986 = vst.msk [vmem:[#allocation2 + $0x69] sm:$0xff] %vm1356_vm2, %v18409_v51  ;;  %v1849_v54 = vpop.f32.mrb[19].mxu1  ;;  %v2125_v55 = vld [vmem:[#allocation2 + $0x1] sm:$0xff]  ;;  %v2126_v57 = vld [vmem:[#allocation2 + $0x9] sm:$0xff] }
 0x438   :  { %2035 = vst.msk [vmem:[#allocation2] sm:$0x1] %vm2034_vm4, %v2016_v52  ;;  %2037 = vst.msk [vmem:[#allocation2 + $0x30] sm:$0x1] %vm2034_vm4, %v2018_v53  ;;  %18454 = vmatprep.mubr.msk.f32.mxu1 %vm1356_vm2, %v2125_v55  ;;  %v21867_v3 = vld [vmem:[#allocation2 + $0x31] sm:$0xff]  ;;  %v21878_v9 = vld [vmem:[#allocation2 + $0x39] sm:$0xff] }
 0x439   :  { %1985 = vst.msk [vmem:[#allocation2 + $0x61] sm:$0xff] %vm1356_vm2, %v1849_v54  ;;  %18455 = vmatmul.mubr.msk.f32.vlgmr.msra.gmra.mrb[44].mxu1 %vm1356_vm2, %v2126_v57  ;;  %v18412_v62 = vpop.f32.mrb[20].mxu1  ;;  %v2804_v30 = vld [vmem:[#allocation2 + $0x2] sm:$0xff] }
 0x43a   :  { %v2056_v61 = vld [vmem:[#allocation2 + $0x57] sm:$0x1]  ;;  %18457 = vmatprep.mubr.msk.f32.mxu1 %vm1356_vm2, %v21853_v60  ;;  %19021 = vmatpush3.bf16.msra.mxu1 %v19018_v41  ;;  %v2019_v63 = vld [vmem:[#allocation2 + $0x4a] sm:$0x1]  ;;  %1988 = vst.msk [vmem:[#allocation2 + $0x81] sm:$0xff] %vm1356_vm2, %v18412_v62  ;;  %v1859_v0 = vpop.f32.mrb[21].mxu1 }
 0x43b   :  { %2074 = vst.msk [vmem:[#allocation2 + $0x59] sm:$0x1] %vm2034_vm4, %v2056_v61  ;;  %19023 = vmatprep.subr.bf16.mxu1 %v19022_v56  ;;  %2038 = vst.msk [vmem:[#allocation2 + $0x48] sm:$0x1] %vm2034_vm4, %v2019_v63  ;;  %v21873_v8 = vld [vmem:[#allocation2 + $0x49] sm:$0xff]  ;;  %v21890_v15 = vld [vmem:[#allocation2 + $0x51] sm:$0xff] }
 0x43c   :  { %1987 = vst.msk [vmem:[#allocation2 + $0x79] sm:$0xff] %vm1356_vm2, %v1859_v0 }
 0x43d   :  { %18458 = vmatmul.mubr.msk.f32.gmra.mrb[46].mxu1 %vm1356_vm2, %v21863_v2  ;;  %v18415_v5 = vpop.f32.mrb[22].mxu1 }
 0x43e   :  { %v2057_v4 = vld [vmem:[#allocation2 + $0x6f] sm:$0x1]  ;;  %18460 = vmatprep.mubr.msk.f32.mxu1 %vm1356_vm2, %v21867_v3  ;;  %19025 = vmatpush3.bf16.msra.mxu1 %v19022_v56  ;;  %1990 = vst.msk [vmem:[#allocation2 + $0x99] sm:$0xff] %vm1356_vm2, %v18415_v5  ;;  %v1869_v7 = vpop.f32.mrb[23].mxu1 }
 0x43f   :  { %2075 = vst.msk [vmem:[#allocation2 + $0x71] sm:$0x1] %vm2034_vm4, %v2057_v4  ;;  %19027 = vmatprep.subr.bf16.mxu1 %v21859_v1  ;;  %v21902_v21 = vld [vmem:[#allocation2 + $0x69] sm:$0xff] }
 0x440   :  { %v2020_v6 = vld [vmem:[#allocation2 + $0x62] sm:$0x1]  ;;  %1989 = vst.msk [vmem:[#allocation2 + $0x91] sm:$0xff] %vm1356_vm2, %v1869_v7 }
 0x441   :  { %2039 = vst.msk [vmem:[#allocation2 + $0x60] sm:$0x1] %vm2034_vm4, %v2020_v6  ;;  %18461 = vmatmul.mubr.msk.f32.gmra.mrb[48].mxu1 %vm1356_vm2, %v21878_v9  ;;  %v2058_v10 = vld [vmem:[#allocation2 + $0x87] sm:$0x1]  ;;  %v18418_v11 = vpop.f32.mrb[24].mxu1 }
 0x442   :  { %18463 = vmatprep.mubr.msk.f32.mxu1 %vm1356_vm2, %v21873_v8  ;;  %2076 = vst.msk [vmem:[#allocation2 + $0x89] sm:$0x1] %vm2034_vm4, %v2058_v10  ;;  %v1879_v13 = vpop.f32.mrb[25].mxu1  ;;  %v21886_v14 = vld [vmem:[#allocation2 + $0x61] sm:$0xff] }
 0x443   :  { %v2021_v12 = vld [vmem:[#allocation2 + $0x7a] sm:$0x1]  ;;  %1992 = vst.msk [vmem:[#allocation2 + $0xb1] sm:$0xff] %vm1356_vm2, %v18418_v11  ;;  %1991 = vst.msk [vmem:[#allocation2 + $0xa9] sm:$0xff] %vm1356_vm2, %v1879_v13  ;;  %v21914_v27 = vld [vmem:[#allocation2 + $0x81] sm:$0xff] }
 0x444   :  { %2040 = vst.msk [vmem:[#allocation2 + $0x78] sm:$0x1] %vm2034_vm4, %v2021_v12  ;;  %v21898_v20 = vld [vmem:[#allocation2 + $0x79] sm:$0xff] }
 0x445   :  { %18464 = vmatmul.mubr.msk.f32.gmra.mrb[50].mxu1 %vm1356_vm2, %v21890_v15  ;;  %v2059_v16 = vld [vmem:[#allocation2 + $0x9f] sm:$0x1]  ;;  %v18421_v17 = vpop.f32.mrb[26].mxu1 }
 0x446   :  { %18466 = vmatprep.mubr.msk.f32.mxu1 %vm1356_vm2, %v21886_v14  ;;  %2077 = vst.msk [vmem:[#allocation2 + $0xa1] sm:$0x1] %vm2034_vm4, %v2059_v16  ;;  %v1889_v19 = vpop.f32.mrb[27].mxu1  ;;  %v21926_v40 = vld [vmem:[#allocation2 + $0x99] sm:$0xff] }
 0x447   :  { %v2022_v18 = vld [vmem:[#allocation2 + $0x92] sm:$0x1]  ;;  %1994 = vst.msk [vmem:[#allocation2 + $0xc9] sm:$0xff] %vm1356_vm2, %v18421_v17  ;;  %1993 = vst.msk [vmem:[#allocation2 + $0xc1] sm:$0xff] %vm1356_vm2, %v1889_v19 }
 0x448   :  { %2041 = vst.msk [vmem:[#allocation2 + $0x90] sm:$0x1] %vm2034_vm4, %v2022_v18  ;;  %v21910_v26 = vld [vmem:[#allocation2 + $0x91] sm:$0xff] }
 0x449   :  { %18467 = vmatmul.mubr.msk.f32.gmra.mrb[52].mxu1 %vm1356_vm2, %v21902_v21  ;;  %v18424_v23 = vpop.f32.mrb[28].mxu1 }
 0x44a   :  { %v2060_v22 = vld [vmem:[#allocation2 + $0xb7] sm:$0x1]  ;;  %18469 = vmatprep.mubr.msk.f32.mxu1 %vm1356_vm2, %v21898_v20  ;;  %v2023_v24 = vld [vmem:[#allocation2 + $0xaa] sm:$0x1]  ;;  %1996 = vst.msk [vmem:[#allocation2 + $0xe1] sm:$0xff] %vm1356_vm2, %v18424_v23  ;;  %v1899_v25 = vpop.f32.mrb[29].mxu1 }
 0x44b   :  { %2078 = vst.msk [vmem:[#allocation2 + $0xb9] sm:$0x1] %vm2034_vm4, %v2060_v22  ;;  %2042 = vst.msk [vmem:[#allocation2 + $0xa8] sm:$0x1] %vm2034_vm4, %v2023_v24  ;;  %v21922_v34 = vld [vmem:[#allocation2 + $0xa9] sm:$0xff]  ;;  %v21938_v43 = vld [vmem:[#allocation2 + $0xb1] sm:$0xff] }
 0x44c   :  { %1995 = vst.msk [vmem:[#allocation2 + $0xd9] sm:$0xff] %vm1356_vm2, %v1899_v25 }
 0x44d   :  { %18470 = vmatmul.mubr.msk.f32.gmra.mrb[54].mxu1 %vm1356_vm2, %v21914_v27  ;;  %v18427_v31 = vpop.f32.mrb[30].mxu1 }
 0x44e   :  { %v2061_v28 = vld [vmem:[#allocation2 + $0xcf] sm:$0x1]  ;;  %18472 = vmatprep.mubr.msk.f32.mxu1 %vm1356_vm2, %v21910_v26  ;;  %v2024_v32 = vld [vmem:[#allocation2 + $0xc2] sm:$0x1]  ;;  %1998 = vst.msk [vmem:[#allocation2 + $0xf9] sm:$0xff] %vm1356_vm2, %v18427_v31  ;;  %v1909_v33 = vpop.f32.mrb[31].mxu1 }
 0x44f   :  { %2079 = vst.msk [vmem:[#allocation2 + $0xd1] sm:$0x1] %vm2034_vm4, %v2061_v28  ;;  %2043 = vst.msk [vmem:[#allocation2 + $0xc0] sm:$0x1] %vm2034_vm4, %v2024_v32  ;;  %v21934_v38 = vld [vmem:[#allocation2 + $0xc1] sm:$0xff]  ;;  %v21950_v49 = vld [vmem:[#allocation2 + $0xc9] sm:$0xff] }
 0x450   :  { %1997 = vst.msk [vmem:[#allocation2 + $0xf1] sm:$0xff] %vm1356_vm2, %v1909_v33  ;;  %v15087_v31 = vld [vmem:[%s25719_s4 + $0x50] sm:$0xff]  ;;  %v15088_v32 = vld [vmem:[%s25719_s4 + $0x58] sm:$0xff]  ;;  %v2089_v33 = vld [vmem:[#allocation2] sm:$0xff] }
 0x451   :  { %18473 = vmatmul.mubr.msk.f32.gmra.mrb[56].mxu1 %vm1356_vm2, %v21926_v40  ;;  %v2062_v41 = vld [vmem:[#allocation2 + $0xe7] sm:$0x1]  ;;  %v18430_v35 = vpop.f32.mrb[32].mxu1 }
 0x452   :  { %18475 = vmatprep.mubr.msk.f32.mxu1 %vm1356_vm2, %v21922_v34  ;;  %2080 = vst.msk [vmem:[#allocation2 + $0xe9] sm:$0x1] %vm2034_vm4, %v2062_v41  ;;  %v1919_v37 = vpop.f32.mrb[33].mxu1  ;;  %v21962_v55 = vld [vmem:[#allocation2 + $0xe1] sm:$0xff]  ;;  %v19030_v41 = vpack.c.bf16 %v15088_v32, %v15087_v31 }
 0x453   :  { %v2025_v36 = vld [vmem:[#allocation2 + $0xda] sm:$0x1]  ;;  %2000 = vst.msk [vmem:[#allocation2 + $0x111] sm:$0xff] %vm1356_vm2, %v18430_v35  ;;  %1999 = vst.msk [vmem:[#allocation2 + $0x109] sm:$0xff] %vm1356_vm2, %v1919_v37  ;;  %v2090_v35 = vld [vmem:[#allocation2 + $0x8] sm:$0xff] }
 0x454   :  { %2044 = vst.msk [vmem:[#allocation2 + $0xd8] sm:$0x1] %vm2034_vm4, %v2025_v36  ;;  %v21946_v44 = vld [vmem:[#allocation2 + $0xd9] sm:$0xff]  ;;  %v15122_v37 = vld [vmem:[%s25719_s4 + $0x68] sm:$0xff] }
 0x455   :  { %18476 = vmatmul.mubr.msk.f32.gmra.mrb[58].mxu1 %vm1356_vm2, %v21938_v43  ;;  %v2063_v45 = vld [vmem:[#allocation2 + $0xff] sm:$0x1]  ;;  %v18433_v47 = vpop.f32.mrb[34].mxu1  ;;  %v15121_v36 = vld [vmem:[%s25719_s4 + $0x60] sm:$0xff] }
 0x456   :  { %18478 = vmatprep.mubr.msk.f32.mxu1 %vm1356_vm2, %v21934_v38  ;;  %2081 = vst.msk [vmem:[#allocation2 + $0x101] sm:$0x1] %vm2034_vm4, %v2063_v45  ;;  %v1929_v39 = vpop.f32.mrb[35].mxu1  ;;  %v21974_v62 = vld [vmem:[#allocation2 + $0xf9] sm:$0xff] }
 0x457   :  { %v2026_v48 = vld [vmem:[#allocation2 + $0xf2] sm:$0x1]  ;;  %2002 = vst.msk [vmem:[#allocation2 + $0x129] sm:$0xff] %vm1356_vm2, %v18433_v47  ;;  %2001 = vst.msk [vmem:[#allocation2 + $0x121] sm:$0xff] %vm1356_vm2, %v1929_v39  ;;  %v22042_v45 = vld [vmem:[#allocation2 + $0x18] sm:$0xff]  ;;  %v22047_v47 = vpack.c.bf16 %v15122_v37, %v15121_v36 }
 0x458   :  { %2045 = vst.msk [vmem:[#allocation2 + $0xf0] sm:$0x1] %vm2034_vm4, %v2026_v48  ;;  %v21958_v54 = vld [vmem:[#allocation2 + $0xf1] sm:$0xff]  ;;  %v22049_v48 = vld [vmem:[#allocation2 + $0x20] sm:$0xff] }
 0x459   :  { %18479 = vmatmul.mubr.msk.f32.gmra.mrb[60].mxu1 %vm1356_vm2, %v21950_v49  ;;  %v18436_v51 = vpop.f32.mrb[36].mxu1  ;;  %v22053_v39 = vld [vmem:[#allocation2 + $0x30] sm:$0xff]  ;;  %v22126_v32 = vld [vmem:[#allocation2 + $0xf8] sm:$0xff] }
 0x45a   :  { %v2064_v50 = vld [vmem:[#allocation2 + $0x117] sm:$0x1]  ;;  %18481 = vmatprep.mubr.msk.f32.mxu1 %vm1356_vm2, %v21946_v44  ;;  %v2027_v52 = vld [vmem:[#allocation2 + $0x10a] sm:$0x1]  ;;  %2004 = vst.msk [vmem:[#allocation2 + $0x141] sm:$0xff] %vm1356_vm2, %v18436_v51  ;;  %v1939_v53 = vpop.f32.mrb[37].mxu1 }
 0x45b   :  { %2082 = vst.msk [vmem:[#allocation2 + $0x119] sm:$0x1] %vm2034_vm4, %v2064_v50  ;;  %2046 = vst.msk [vmem:[#allocation2 + $0x108] sm:$0x1] %vm2034_vm4, %v2027_v52  ;;  %v21970_v61 = vld [vmem:[#allocation2 + $0x109] sm:$0xff]  ;;  %v21988_v7 = vld [vmem:[#allocation2 + $0x111] sm:$0xff] }
 0x45c   :  { %2003 = vst.msk [vmem:[#allocation2 + $0x139] sm:$0xff] %vm1356_vm2, %v1939_v53  ;;  %v22058_v50 = vld [vmem:[#allocation2 + $0x38] sm:$0xff]  ;;  %v22068_v53 = vld [vmem:[#allocation2 + $0x50] sm:$0xff] }
 0x45d   :  { %18482 = vmatmul.mubr.msk.f32.gmra.mrb[62].mxu1 %vm1356_vm2, %v21962_v55  ;;  %v18439_v57 = vpop.f32.mrb[38].mxu1 }
 0x45e   :  { %v2065_v56 = vld [vmem:[#allocation2 + $0x12f] sm:$0x1]  ;;  %18484 = vmatprep.mubr.msk.f32.mxu1 %vm1356_vm2, %v21958_v54  ;;  %v2028_v58 = vld [vmem:[#allocation2 + $0x122] sm:$0x1]  ;;  %2006 = vst.msk [vmem:[#allocation2 + $0x159] sm:$0xff] %vm1356_vm2, %v18439_v57  ;;  %v1949_v59 = vpop.f32.mrb[39].mxu1 }
 0x45f   :  { %2083 = vst.msk [vmem:[#allocation2 + $0x131] sm:$0x1] %vm2034_vm4, %v2065_v56  ;;  %2047 = vst.msk [vmem:[#allocation2 + $0x120] sm:$0x1] %vm2034_vm4, %v2028_v58  ;;  %v21983_v6 = vld [vmem:[#allocation2 + $0x121] sm:$0xff]  ;;  %v21998_v13 = vld [vmem:[#allocation2 + $0x129] sm:$0xff] }
 0x460   :  { %2005 = vst.msk [vmem:[#allocation2 + $0x151] sm:$0xff] %vm1356_vm2, %v1949_v59  ;;  %v22072_v56 = vld [vmem:[#allocation2 + $0x60] sm:$0xff]  ;;  %v22076_v57 = vld [vmem:[#allocation2 + $0x68] sm:$0xff]  ;;  %v22080_v58 = vld [vmem:[#allocation2 + $0x78] sm:$0xff] }
 0x461   :  { %18485 = vmatmul.mubr.msk.f32.gmra.mrb[64].mxu1 %vm1356_vm2, %v21974_v62  ;;  %v2066_v63 = vld [vmem:[#allocation2 + $0x147] sm:$0x1]  ;;  %v18442_v0 = vpop.f32.mrb[40].mxu1  ;;  %v22122_v31 = vld [vmem:[#allocation2 + $0xf0] sm:$0xff]  ;;  %v22142_v36 = vld [vmem:[#allocation2 + $0x128] sm:$0xff] }
 0x462   :  { %18487 = vmatprep.mubr.msk.f32.mxu1 %vm1356_vm2, %v21970_v61  ;;  %2084 = vst.msk [vmem:[#allocation2 + $0x149] sm:$0x1] %vm2034_vm4, %v2066_v63  ;;  %v1959_v5 = vpop.f32.mrb[41].mxu1  ;;  %v22010_v23 = vld [vmem:[#allocation2 + $0x141] sm:$0xff] }
 0x463   :  { %v2029_v4 = vld [vmem:[#allocation2 + $0x13a] sm:$0x1]  ;;  %2008 = vst.msk [vmem:[#allocation2 + $0x171] sm:$0xff] %vm1356_vm2, %v18442_v0  ;;  %2015 = vst.msk [vmem:[#allocation2 + $0x1a1] sm:$0xff] %vm1356_vm2, %v18442_v0  ;;  %v22086_v0 = vld [vmem:[#allocation2 + $0x80] sm:$0xff] }
 0x464   :  { %2048 = vst.msk [vmem:[#allocation2 + $0x138] sm:$0x1] %vm2034_vm4, %v2029_v4  ;;  %v21995_v12 = vld [vmem:[#allocation2 + $0x139] sm:$0xff]  ;;  %25801 = vst [vmem:[#allocation7_spill] sm:$0xff] %v22010_v23  ;;  %v22090_v4 = vld [vmem:[#allocation2 + $0x90] sm:$0xff] }
 0x465   :  { %2007 = vst.msk [vmem:[#allocation2 + $0x169] sm:$0xff] %vm1356_vm2, %v1959_v5  ;;  %2014 = vst.msk [vmem:[#allocation2 + $0x199] sm:$0xff] %vm1356_vm2, %v1959_v5  ;;  %18488 = vmatmul.mubr.msk.f32.gmra.mrb[66].mxu1 %vm1356_vm2, %v21988_v7  ;;  %v2067_v10 = vld [vmem:[#allocation2 + $0x15f] sm:$0x1]  ;;  %v18445_v51 = vpop.f32.mrb[42].mxu1 }
 0x466   :  { %18490 = vmatprep.mubr.msk.f32.mxu1 %vm1356_vm2, %v21983_v6  ;;  %2085 = vst.msk [vmem:[#allocation2 + $0x161] sm:$0x1] %vm2034_vm4, %v2067_v10  ;;  %v22018_v25 = vld [vmem:[#allocation2 + $0x159] sm:$0xff]  ;;  %v1969_v52 = vpop.f32.mrb[43].mxu1  ;;  %v22098_v10 = vld [vmem:[#allocation2 + $0xa8] sm:$0xff] }
 0x467   :  { %v2030_v11 = vld [vmem:[#allocation2 + $0x152] sm:$0x1]  ;;  %25803 = vst [vmem:[#allocation9_spill] sm:$0xff] %v22018_v25  ;;  %2010 = vst.msk [vmem:[#allocation2 + $0x189] sm:$0xff] %vm1356_vm2, %v18445_v51  ;;  %v22094_v5 = vld [vmem:[#allocation2 + $0x98] sm:$0xff] }
 0x468   :  { %2049 = vst.msk [vmem:[#allocation2 + $0x150] sm:$0x1] %vm2034_vm4, %v2030_v11  ;;  %v22006_v22 = vld [vmem:[#allocation2 + $0x151] sm:$0xff]  ;;  %v22150_v51 = vld [vmem:[#allocation2 + $0x140] sm:$0xff] }
 0x469   :  { %18491 = vmatmul.mubr.msk.f32.gmra.mrb[68].mxu1 %vm1356_vm2, %v21998_v13  ;;  %25800 = vst [vmem:[#allocation6_spill] sm:$0xff] %v22006_v22  ;;  %2009 = vst.msk [vmem:[#allocation2 + $0x181] sm:$0xff] %vm1356_vm2, %v1969_v52  ;;  %v22102_v11 = vld [vmem:[#allocation2 + $0xb0] sm:$0xff] }
 0x46a   :  { %v2068_v16 = vld [vmem:[#allocation2 + $0x177] sm:$0x1]  ;;  %v2070_v17 = vld [vmem:[#allocation2 + $0x1a7] sm:$0x1]  ;;  %18493 = vmatprep.mubr.msk.f32.mxu1 %vm1356_vm2, %v21995_v12 }
 0x46b   :  { %2086 = vst.msk [vmem:[#allocation2 + $0x179] sm:$0x1] %vm2034_vm4, %v2068_v16  ;;  %2088 = vst.msk [vmem:[#allocation2 + $0x1a9] sm:$0x1] %vm2034_vm4, %v2070_v17  ;;  %v22024_v28 = vld [vmem:[#allocation2 + $0x171] sm:$0xff]  ;;  %v22106_v16 = vld [vmem:[#allocation2 + $0xc0] sm:$0xff] }
 0x46c   :  { %v2031_v18 = vld [vmem:[#allocation2 + $0x16a] sm:$0x1]  ;;  %v2033_v19 = vld [vmem:[#allocation2 + $0x19a] sm:$0x1]  ;;  %25804 = vst [vmem:[#allocation10_spill] sm:$0xff] %v22024_v28  ;;  %v22166_v46 = vld [vmem:[#allocation2 + $0x170] sm:$0xff] }
 0x46d   :  { %2050 = vst.msk [vmem:[#allocation2 + $0x168] sm:$0x1] %vm2034_vm4, %v2031_v18  ;;  %2052 = vst.msk [vmem:[#allocation2 + $0x198] sm:$0x1] %vm2034_vm4, %v2033_v19  ;;  %18494 = vmatmul.mubr.msk.f32.gmra.mrb[70].mxu1 %vm1356_vm2, %v22010_v23  ;;  %v22016_v24 = vld [vmem:[#allocation2 + $0x169] sm:$0xff]  ;;  %v22114_v18 = vld [vmem:[#allocation2 + $0xd8] sm:$0xff] }
 0x46e   :  { %18496 = vmatprep.mubr.msk.f32.mxu1 %vm1356_vm2, %v22006_v22  ;;  %25802 = vst [vmem:[#allocation8_spill] sm:$0xff] %v22016_v24  ;;  %v2069_v59 = vld [vmem:[#allocation2 + $0x18f] sm:$0x1]  ;;  %v22118_v19 = vld [vmem:[#allocation2 + $0xe0] sm:$0xff]  ;;  %v22146_v37 = vld [vmem:[#allocation2 + $0x138] sm:$0xff] }
 0x46f   :  { %2087 = vst.msk [vmem:[#allocation2 + $0x191] sm:$0x1] %vm2034_vm4, %v2069_v59  ;;  %v22110_v17 = vld [vmem:[#allocation2 + $0xc8] sm:$0xff]  ;;  %v22154_v52 = vld [vmem:[#allocation2 + $0x150] sm:$0xff]  ;;  %v22158_v59 = vld [vmem:[#allocation2 + $0x158] sm:$0xff] }
 0x470   :  { %v2032_v63 = vld [vmem:[#allocation2 + $0x182] sm:$0x1]  ;;  %v15158_v22 = vld [vmem:[%s25719_s4 + $0x88] sm:$0xff]  ;;  %v22184_v23 = vld [vmem:[#allocation2 + $0x1a] sm:$0xff] }
 0x471   :  { %18497 = vmatmul.mubr.msk.f32.gmra.mrb[72].mxu1 %vm1356_vm2, %v22018_v25  ;;  %2051 = vst.msk [vmem:[#allocation2 + $0x180] sm:$0x1] %vm2034_vm4, %v2032_v63  ;;  %v15157_v25 = vld [vmem:[%s25719_s4 + $0x80] sm:$0xff] }
 0x472   :  { %18499 = vmatprep.mubr.msk.f32.mxu1 %vm1356_vm2, %v22016_v24  ;;  %v2805_v24 = vld [vmem:[#allocation2 + $0xa] sm:$0xff] }
 0x474   :  { %v22162_v63 = vld [vmem:[#allocation2 + $0x168] sm:$0xff] }
 0x475   :  { %18500 = vmatmul.mubr.msk.f32.gmra.mrb[74].mxu1 %vm1356_vm2, %v22024_v28  ;;  %v19038_v28 = vpack.c.bf16 %v15124_v29, %v15123_v42  ;;  %v22189_v42 = vpack.c.bf16 %v15158_v22, %v15157_v25  ;;  %v22191_v29 = vld [vmem:[#allocation2 + $0x22] sm:$0xff]  ;;  %v22204_v22 = vld [vmem:[#allocation2 + $0x4a] sm:$0xff]  ;;  %v22208_v25 = vld [vmem:[#allocation2 + $0x52] sm:$0xff] }
 0x476   :  { %18510 = vmatprep.mubr.msk.f32.mxu1 %vm1356_vm2, %v2089_v33  ;;  %v22130_v33 = vld [vmem:[#allocation2 + $0x108] sm:$0xff]  ;;  %25807 = vst [vmem:[#allocation13_spill] sm:$0xff] %v22204_v22  ;;  %25808 = vst [vmem:[#allocation14_spill] sm:$0xff] %v22208_v25 }
 0x479   :  { %18511 = vmatmul.mubr.msk.f32.vlgmr.msra.gmra.mrb[44].mxu1 %vm1356_vm2, %v2090_v35  ;;  %v22138_v35 = vld [vmem:[#allocation2 + $0x120] sm:$0xff] }
 0x47a   :  { %18513 = vmatprep.mubr.msk.f32.mxu1 %vm1356_vm2, %v22042_v45  ;;  %19029 = vmatpush3.bf16.msra.mxu1 %v21859_v1  ;;  %v22062_v1 = vld [vmem:[#allocation2 + $0x48] sm:$0xff] }
 0x47b   :  { %19031 = vmatprep.subr.bf16.mxu1 %v19030_v41 }
 0x47d   :  { %18514 = vmatmul.mubr.msk.f32.gmra.mrb[46].mxu1 %vm1356_vm2, %v22049_v48 }
 0x47e   :  { %18516 = vmatprep.mubr.msk.f32.mxu1 %vm1356_vm2, %v22053_v39  ;;  %19033 = vmatpush3.bf16.msra.mxu1 %v19030_v41  ;;  %v22134_v41 = vld [vmem:[#allocation2 + $0x110] sm:$0xff] }
 0x47f   :  { %19035 = vmatprep.subr.bf16.mxu1 %v22047_v47 }
 0x481   :  { %18517 = vmatmul.mubr.msk.f32.gmra.mrb[48].mxu1 %vm1356_vm2, %v22058_v50 }
 0x482   :  { %18519 = vmatprep.mubr.msk.f32.mxu1 %vm1356_vm2, %v22062_v1 }
 0x485   :  { %18520 = vmatmul.mubr.msk.f32.gmra.mrb[50].mxu1 %vm1356_vm2, %v22068_v53 }
 0x486   :  { %18522 = vmatprep.mubr.msk.f32.mxu1 %vm1356_vm2, %v22072_v56 }
 0x489   :  { %18523 = vmatmul.mubr.msk.f32.gmra.mrb[52].mxu1 %vm1356_vm2, %v22076_v57 }
 0x48a   :  { %18525 = vmatprep.mubr.msk.f32.mxu1 %vm1356_vm2, %v22080_v58 }
 0x48d   :  { %18526 = vmatmul.mubr.msk.f32.gmra.mrb[54].mxu1 %vm1356_vm2, %v22086_v0 }
 0x48e   :  { %18528 = vmatprep.mubr.msk.f32.mxu1 %vm1356_vm2, %v22090_v4 }
 0x491   :  { %18529 = vmatmul.mubr.msk.f32.gmra.mrb[56].mxu1 %vm1356_vm2, %v22094_v5 }
 0x492   :  { %18531 = vmatprep.mubr.msk.f32.mxu1 %vm1356_vm2, %v22098_v10 }
 0x495   :  { %18532 = vmatmul.mubr.msk.f32.gmra.mrb[58].mxu1 %vm1356_vm2, %v22102_v11 }
 0x496   :  { %18534 = vmatprep.mubr.msk.f32.mxu1 %vm1356_vm2, %v22106_v16 }
 0x499   :  { %18535 = vmatmul.mubr.msk.f32.gmra.mrb[60].mxu1 %vm1356_vm2, %v22110_v17 }
 0x49a   :  { %18537 = vmatprep.mubr.msk.f32.mxu1 %vm1356_vm2, %v22114_v18 }
 0x49d   :  { %18538 = vmatmul.mubr.msk.f32.gmra.mrb[62].mxu1 %vm1356_vm2, %v22118_v19 }
 0x49e   :  { %18540 = vmatprep.mubr.msk.f32.mxu1 %vm1356_vm2, %v22122_v31 }
 0x4a1   :  { %18541 = vmatmul.mubr.msk.f32.gmra.mrb[64].mxu1 %vm1356_vm2, %v22126_v32 }
 0x4a2   :  { %18543 = vmatprep.mubr.msk.f32.mxu1 %vm1356_vm2, %v22130_v33 }
 0x4a5   :  { %18544 = vmatmul.mubr.msk.f32.gmra.mrb[66].mxu1 %vm1356_vm2, %v22134_v41 }
 0x4a6   :  { %18546 = vmatprep.mubr.msk.f32.mxu1 %vm1356_vm2, %v22138_v35 }
 0x4a9   :  { %18547 = vmatmul.mubr.msk.f32.gmra.mrb[68].mxu1 %vm1356_vm2, %v22142_v36 }
 0x4aa   :  { %18549 = vmatprep.mubr.msk.f32.mxu1 %vm1356_vm2, %v22146_v37 }
 0x4ad   :  { %18550 = vmatmul.mubr.msk.f32.gmra.mrb[70].mxu1 %vm1356_vm2, %v22150_v51 }
 0x4ae   :  { %18552 = vmatprep.mubr.msk.f32.mxu1 %vm1356_vm2, %v22154_v52 }
 0x4b1   :  { %18553 = vmatmul.mubr.msk.f32.gmra.mrb[72].mxu1 %vm1356_vm2, %v22158_v59 }
 0x4b2   :  { %18555 = vmatprep.mubr.msk.f32.mxu1 %vm1356_vm2, %v22162_v63 }
 0x4b5   :  { %18556 = vmatmul.mubr.msk.f32.gmra.mrb[74].mxu1 %vm1356_vm2, %v22166_v46 }
 0x4b6   :  { %18566 = vmatprep.mubr.msk.f32.mxu1 %vm1356_vm2, %v2804_v30  ;;  %v22195_v30 = vld [vmem:[#allocation2 + $0x32] sm:$0xff] }
 0x4b7   :  { %25805 = vst [vmem:[#allocation11_spill] sm:$0xff] %v22195_v30 }
 0x4b9   :  { %18567 = vmatmul.mubr.msk.f32.vlgmr.msra.gmra.mrb[44].mxu1 %vm1356_vm2, %v2805_v24  ;;  %v22200_v24 = vld [vmem:[#allocation2 + $0x3a] sm:$0xff] }
 0x4ba   :  { %18569 = vmatprep.mubr.msk.f32.mxu1 %vm1356_vm2, %v22184_v23  ;;  %19037 = vmatpush3.bf16.msra.mxu1 %v22047_v47  ;;  %25806 = vst [vmem:[#allocation12_spill] sm:$0xff] %v22200_v24  ;;  %v22212_v47 = vld [vmem:[#allocation2 + $0x62] sm:$0xff] }
 0x4bb   :  { %19039 = vmatprep.subr.bf16.mxu1 %v19038_v28  ;;  %25809 = vst [vmem:[#allocation15_spill] sm:$0xff] %v22212_v47 }
 0x4bd   :  { %18570 = vmatmul.mubr.msk.f32.gmra.mrb[46].mxu1 %vm1356_vm2, %v22191_v29 }
 0x4be   :  { %18572 = vmatprep.mubr.msk.f32.mxu1 %vm1356_vm2, %v22195_v30  ;;  %19041 = vmatpush3.bf16.msra.mxu1 %v19038_v28  ;;  %v22216_v28 = vld [vmem:[#allocation2 + $0x6a] sm:$0xff] }
 0x4bf   :  { %19043 = vmatprep.subr.bf16.mxu1 %v22189_v42  ;;  %25810 = vst [vmem:[#allocation16_spill] sm:$0xff] %v22216_v28  ;;  %v15194_v30 = vld [vmem:[%s25719_s4 + $0xa8] sm:$0xff] }
 0x4c1   :  { %18573 = vmatmul.mubr.msk.f32.gmra.mrb[48].mxu1 %vm1356_vm2, %v22200_v24  ;;  %v22220_v24 = vld [vmem:[#allocation2 + $0x7a] sm:$0xff] }
 0x4c2   :  { %18575 = vmatprep.mubr.msk.f32.mxu1 %vm1356_vm2, %v22204_v22  ;;  %25811 = vst [vmem:[#allocation17_spill] sm:$0xff] %v22220_v24  ;;  %v22224_v22 = vld [vmem:[#allocation2 + $0x82] sm:$0xff] }
 0x4c3   :  { %25812 = vst [vmem:[#allocation18_spill] sm:$0xff] %v22224_v22 }
 0x4c5   :  { %18576 = vmatmul.mubr.msk.f32.gmra.mrb[50].mxu1 %vm1356_vm2, %v22208_v25  ;;  %v22228_v25 = vld [vmem:[#allocation2 + $0x92] sm:$0xff] }
 0x4c6   :  { %18578 = vmatprep.mubr.msk.f32.mxu1 %vm1356_vm2, %v22212_v47  ;;  %25813 = vst [vmem:[#allocation19_spill] sm:$0xff] %v22228_v25  ;;  %v22232_v47 = vld [vmem:[#allocation2 + $0x9a] sm:$0xff] }
 0x4c7   :  { %25814 = vst [vmem:[#allocation20_spill] sm:$0xff] %v22232_v47 }
 0x4c9   :  { %18579 = vmatmul.mubr.msk.f32.gmra.mrb[52].mxu1 %vm1356_vm2, %v22216_v28  ;;  %v22236_v28 = vld [vmem:[#allocation2 + $0xaa] sm:$0xff] }
 0x4ca   :  { %18581 = vmatprep.mubr.msk.f32.mxu1 %vm1356_vm2, %v22220_v24  ;;  %25815 = vst [vmem:[#allocation21_spill] sm:$0xff] %v22236_v28  ;;  %v22240_v24 = vld [vmem:[#allocation2 + $0xb2] sm:$0xff] }
 0x4cb   :  { %25816 = vst [vmem:[#allocation22_spill] sm:$0xff] %v22240_v24 }
 0x4cd   :  { %18582 = vmatmul.mubr.msk.f32.gmra.mrb[54].mxu1 %vm1356_vm2, %v22224_v22  ;;  %v22244_v22 = vld [vmem:[#allocation2 + $0xc2] sm:$0xff] }
 0x4ce   :  { %18584 = vmatprep.mubr.msk.f32.mxu1 %vm1356_vm2, %v22228_v25  ;;  %25817 = vst [vmem:[#allocation23_spill] sm:$0xff] %v22244_v22  ;;  %v22248_v25 = vld [vmem:[#allocation2 + $0xca] sm:$0xff] }
 0x4cf   :  { %25818 = vst [vmem:[#allocation24_spill] sm:$0xff] %v22248_v25 }
 0x4d1   :  { %18585 = vmatmul.mubr.msk.f32.gmra.mrb[56].mxu1 %vm1356_vm2, %v22232_v47  ;;  %v22252_v47 = vld [vmem:[#allocation2 + $0xda] sm:$0xff] }
 0x4d2   :  { %18587 = vmatprep.mubr.msk.f32.mxu1 %vm1356_vm2, %v22236_v28  ;;  %25819 = vst [vmem:[#allocation25_spill] sm:$0xff] %v22252_v47  ;;  %v22256_v28 = vld [vmem:[#allocation2 + $0xe2] sm:$0xff] }
 0x4d3   :  { %25820 = vst [vmem:[#allocation26_spill] sm:$0xff] %v22256_v28 }
 0x4d5   :  { %18588 = vmatmul.mubr.msk.f32.gmra.mrb[58].mxu1 %vm1356_vm2, %v22240_v24  ;;  %v22260_v24 = vld [vmem:[#allocation2 + $0xf2] sm:$0xff] }
 0x4d6   :  { %18590 = vmatprep.mubr.msk.f32.mxu1 %vm1356_vm2, %v22244_v22  ;;  %25821 = vst [vmem:[#allocation27_spill] sm:$0xff] %v22260_v24  ;;  %v22264_v22 = vld [vmem:[#allocation2 + $0xfa] sm:$0xff] }
 0x4d7   :  { %25822 = vst [vmem:[#allocation28_spill] sm:$0xff] %v22264_v22 }
 0x4d9   :  { %18591 = vmatmul.mubr.msk.f32.gmra.mrb[60].mxu1 %vm1356_vm2, %v22248_v25  ;;  %v22268_v25 = vld [vmem:[#allocation2 + $0x10a] sm:$0xff] }
 0x4da   :  { %18593 = vmatprep.mubr.msk.f32.mxu1 %vm1356_vm2, %v22252_v47  ;;  %25823 = vst [vmem:[#allocation29_spill] sm:$0xff] %v22268_v25  ;;  %v22272_v47 = vld [vmem:[#allocation2 + $0x112] sm:$0xff] }
 0x4db   :  { %25824 = vst [vmem:[#allocation30_spill] sm:$0xff] %v22272_v47 }
 0x4dd   :  { %18594 = vmatmul.mubr.msk.f32.gmra.mrb[62].mxu1 %vm1356_vm2, %v22256_v28  ;;  %v22276_v28 = vld [vmem:[#allocation2 + $0x122] sm:$0xff] }
 0x4de   :  { %18596 = vmatprep.mubr.msk.f32.mxu1 %vm1356_vm2, %v22260_v24  ;;  %25825 = vst [vmem:[#allocation31_spill] sm:$0xff] %v22276_v28  ;;  %v22280_v24 = vld [vmem:[#allocation2 + $0x12a] sm:$0xff] }
 0x4df   :  { %25826 = vst [vmem:[#allocation32_spill] sm:$0xff] %v22280_v24 }
 0x4e1   :  { %18597 = vmatmul.mubr.msk.f32.gmra.mrb[64].mxu1 %vm1356_vm2, %v22264_v22  ;;  %v22284_v22 = vld [vmem:[#allocation2 + $0x13a] sm:$0xff] }
 0x4e2   :  { %18599 = vmatprep.mubr.msk.f32.mxu1 %vm1356_vm2, %v22268_v25  ;;  %25827 = vst [vmem:[#allocation33_spill] sm:$0xff] %v22284_v22  ;;  %v22288_v25 = vld [vmem:[#allocation2 + $0x142] sm:$0xff] }
 0x4e3   :  { %25828 = vst [vmem:[#allocation34_spill] sm:$0xff] %v22288_v25 }
 0x4e5   :  { %18600 = vmatmul.mubr.msk.f32.gmra.mrb[66].mxu1 %vm1356_vm2, %v22272_v47  ;;  %v22292_v47 = vld [vmem:[#allocation2 + $0x152] sm:$0xff] }
 0x4e6   :  { %18602 = vmatprep.mubr.msk.f32.mxu1 %vm1356_vm2, %v22276_v28  ;;  %25829 = vst [vmem:[#allocation35_spill] sm:$0xff] %v22292_v47  ;;  %v22296_v28 = vld [vmem:[#allocation2 + $0x15a] sm:$0xff] }
 0x4e7   :  { %25830 = vst [vmem:[#allocation36_spill] sm:$0xff] %v22296_v28 }
 0x4e9   :  { %18603 = vmatmul.mubr.msk.f32.gmra.mrb[68].mxu1 %vm1356_vm2, %v22280_v24  ;;  %v22300_v24 = vld [vmem:[#allocation2 + $0x16a] sm:$0xff] }
 0x4ea   :  { %18605 = vmatprep.mubr.msk.f32.mxu1 %vm1356_vm2, %v22284_v22  ;;  %25831 = vst [vmem:[#allocation37_spill] sm:$0xff] %v22300_v24  ;;  %v22304_v22 = vld [vmem:[#allocation2 + $0x172] sm:$0xff] }
 0x4eb   :  { %25832 = vst [vmem:[#allocation38_spill] sm:$0xff] %v22304_v22 }
 0x4ed   :  { %18606 = vmatmul.mubr.msk.f32.gmra.mrb[70].mxu1 %vm1356_vm2, %v22288_v25  ;;  %v15159_v25 = vld [vmem:[%s25719_s4 + $0x90] sm:$0xff] }
 0x4ee   :  { %18608 = vmatprep.mubr.msk.f32.mxu1 %vm1356_vm2, %v22292_v47  ;;  %v15160_v47 = vld [vmem:[%s25719_s4 + $0x98] sm:$0xff] }
 0x4f1   :  { %18609 = vmatmul.mubr.msk.f32.gmra.mrb[72].mxu1 %vm1356_vm2, %v22296_v28  ;;  %v19046_v28 = vpack.c.bf16 %v15160_v47, %v15159_v25  ;;  %v15229_v25 = vld [vmem:[%s25719_s4 + $0xc0] sm:$0xff]  ;;  %v15230_v47 = vld [vmem:[%s25719_s4 + $0xc8] sm:$0xff] }
 0x4f2   :  { %18611 = vmatprep.mubr.msk.f32.mxu1 %vm1356_vm2, %v22300_v24  ;;  %v15193_v24 = vld [vmem:[%s25719_s4 + $0xa0] sm:$0xff] }
 0x4f5   :  { %18612 = vmatmul.mubr.msk.f32.gmra.mrb[74].mxu1 %vm1356_vm2, %v22304_v22  ;;  %v19050_v22 = vpack.c.bf16 %v15194_v30, %v15193_v24  ;;  %v15196_v30 = vld [vmem:[%s25719_s4 + $0xb8] sm:$0xff] }
 0x4f6   :  { %18622 = vmatprep.mubr.msk.f32.mxu1 %vm1356_vm2, %v22042_v45  ;;  %v22381_v45 = vld [vmem:[#allocation2 + $0x180] sm:$0xff] }
 0x4f9   :  { %18623 = vmatmul.mubr.msk.f32.vlgmr.msra.gmra.mrb[44].mxu1 %vm1356_vm2, %v22049_v48  ;;  %v22385_v48 = vld [vmem:[#allocation2 + $0x188] sm:$0xff] }
 0x4fa   :  { %18625 = vmatprep.mubr.msk.f32.mxu1 %vm1356_vm2, %v22053_v39  ;;  %19045 = vmatpush3.bf16.msra.mxu1 %v22189_v42  ;;  %v15195_v42 = vld [vmem:[%s25719_s4 + $0xb0] sm:$0xff] }
 0x4fb   :  { %19047 = vmatprep.subr.bf16.mxu1 %v19046_v28  ;;  %v19054_v24 = vpack.c.bf16 %v15196_v30, %v15195_v42  ;;  %v25853_v42 = vld [vmem:[#allocation26_spill] sm:$0xff]  ;;  %v25854_v30 = vld [vmem:[#allocation27_spill] sm:$0xff] }
 0x4fd   :  { %18626 = vmatmul.mubr.msk.f32.gmra.mrb[46].mxu1 %vm1356_vm2, %v22058_v50 }
 0x4fe   :  { %18628 = vmatprep.mubr.msk.f32.mxu1 %vm1356_vm2, %v22062_v1  ;;  %19049 = vmatpush3.bf16.msra.mxu1 %v19046_v28  ;;  %v19058_v28 = vpack.c.bf16 %v15230_v47, %v15229_v25  ;;  %v25856_v25 = vld [vmem:[#allocation29_spill] sm:$0xff]  ;;  %v25857_v47 = vld [vmem:[#allocation30_spill] sm:$0xff] }
 0x4ff   :  { %19051 = vmatprep.subr.bf16.mxu1 %v19050_v22 }
 0x501   :  { %18629 = vmatmul.mubr.msk.f32.gmra.mrb[48].mxu1 %vm1356_vm2, %v22068_v53 }
 0x502   :  { %18631 = vmatprep.mubr.msk.f32.mxu1 %vm1356_vm2, %v22072_v56 }
 0x505   :  { %18632 = vmatmul.mubr.msk.f32.gmra.mrb[50].mxu1 %vm1356_vm2, %v22076_v57 }
 0x506   :  { %18634 = vmatprep.mubr.msk.f32.mxu1 %vm1356_vm2, %v22080_v58 }
 0x509   :  { %18635 = vmatmul.mubr.msk.f32.gmra.mrb[52].mxu1 %vm1356_vm2, %v22086_v0 }
 0x50a   :  { %18637 = vmatprep.mubr.msk.f32.mxu1 %vm1356_vm2, %v22090_v4 }
 0x50d   :  { %18638 = vmatmul.mubr.msk.f32.gmra.mrb[54].mxu1 %vm1356_vm2, %v22094_v5 }
 0x50e   :  { %18640 = vmatprep.mubr.msk.f32.mxu1 %vm1356_vm2, %v22098_v10 }
 0x511   :  { %18641 = vmatmul.mubr.msk.f32.gmra.mrb[56].mxu1 %vm1356_vm2, %v22102_v11 }
 0x512   :  { %18643 = vmatprep.mubr.msk.f32.mxu1 %vm1356_vm2, %v22106_v16 }
 0x515   :  { %18644 = vmatmul.mubr.msk.f32.gmra.mrb[58].mxu1 %vm1356_vm2, %v22110_v17 }
 0x516   :  { %18646 = vmatprep.mubr.msk.f32.mxu1 %vm1356_vm2, %v22114_v18 }
 0x519   :  { %18647 = vmatmul.mubr.msk.f32.gmra.mrb[60].mxu1 %vm1356_vm2, %v22118_v19 }
 0x51a   :  { %18649 = vmatprep.mubr.msk.f32.mxu1 %vm1356_vm2, %v22122_v31 }
 0x51d   :  { %18650 = vmatmul.mubr.msk.f32.gmra.mrb[62].mxu1 %vm1356_vm2, %v22126_v32 }
 0x51e   :  { %18652 = vmatprep.mubr.msk.f32.mxu1 %vm1356_vm2, %v22130_v33 }
 0x521   :  { %18653 = vmatmul.mubr.msk.f32.gmra.mrb[64].mxu1 %vm1356_vm2, %v22134_v41 }
 0x522   :  { %18655 = vmatprep.mubr.msk.f32.mxu1 %vm1356_vm2, %v22138_v35 }
 0x525   :  { %18656 = vmatmul.mubr.msk.f32.gmra.mrb[66].mxu1 %vm1356_vm2, %v22142_v36 }
 0x526   :  { %18658 = vmatprep.mubr.msk.f32.mxu1 %vm1356_vm2, %v22146_v37 }
 0x529   :  { %18659 = vmatmul.mubr.msk.f32.gmra.mrb[68].mxu1 %vm1356_vm2, %v22150_v51 }
 0x52a   :  { %18661 = vmatprep.mubr.msk.f32.mxu1 %vm1356_vm2, %v22154_v52 }
 0x52d   :  { %18662 = vmatmul.mubr.msk.f32.gmra.mrb[70].mxu1 %vm1356_vm2, %v22158_v59 }
 0x52e   :  { %18664 = vmatprep.mubr.msk.f32.mxu1 %vm1356_vm2, %v22162_v63 }
 0x531   :  { %18665 = vmatmul.mubr.msk.f32.gmra.mrb[72].mxu1 %vm1356_vm2, %v22166_v46 }
 0x532   :  { %18667 = vmatprep.mubr.msk.f32.mxu1 %vm1356_vm2, %v22381_v45 }
 0x535   :  { %18668 = vmatmul.mubr.msk.f32.gmra.mrb[74].mxu1 %vm1356_vm2, %v22385_v48 }
 0x536   :  { %18678 = vmatprep.mubr.msk.f32.mxu1 %vm1356_vm2, %v21853_v60  ;;  %v25833_v60 = vld [vmem:[#allocation7_spill] sm:$0xff] }
 0x539   :  { %18679 = vmatmul.mubr.msk.f32.vlgmr.msra.gmra.mrb[44].mxu1 %vm1356_vm2, %v21863_v2  ;;  %v25834_v2 = vld [vmem:[#allocation6_spill] sm:$0xff] }
 0x53a   :  { %18681 = vmatprep.mubr.msk.f32.mxu1 %vm1356_vm2, %v21867_v3  ;;  %19053 = vmatpush3.bf16.msra.mxu1 %v19050_v22  ;;  %v25835_v3 = vld [vmem:[#allocation9_spill] sm:$0xff] }
 0x53b   :  { %19055 = vmatprep.subr.bf16.mxu1 %v19054_v24  ;;  %v25852_v22 = vld [vmem:[#allocation25_spill] sm:$0xff] }
 0x53d   :  { %18682 = vmatmul.mubr.msk.f32.gmra.mrb[46].mxu1 %vm1356_vm2, %v21878_v9  ;;  %v25837_v9 = vld [vmem:[#allocation10_spill] sm:$0xff] }
 0x53e   :  { %18684 = vmatprep.mubr.msk.f32.mxu1 %vm1356_vm2, %v21873_v8  ;;  %19057 = vmatpush3.bf16.msra.mxu1 %v19054_v24  ;;  %v25836_v8 = vld [vmem:[#allocation8_spill] sm:$0xff] }
 0x53f   :  { %19059 = vmatprep.subr.bf16.mxu1 %v19058_v28  ;;  %v25855_v24 = vld [vmem:[#allocation28_spill] sm:$0xff] }
 0x541   :  { %18685 = vmatmul.mubr.msk.f32.gmra.mrb[48].mxu1 %vm1356_vm2, %v21890_v15  ;;  %v22465_v15 = vld [vmem:[#allocation2 + $0x189] sm:$0xff] }
 0x542   :  { %18687 = vmatprep.mubr.msk.f32.mxu1 %vm1356_vm2, %v21886_v14  ;;  %v22461_v14 = vld [vmem:[#allocation2 + $0x181] sm:$0xff] }
 0x545   :  { %18688 = vmatmul.mubr.msk.f32.gmra.mrb[50].mxu1 %vm1356_vm2, %v21902_v21  ;;  %v15232_v21 = vld [vmem:[%s25719_s4 + $0xd8] sm:$0xff] }
 0x546   :  { %18690 = vmatprep.mubr.msk.f32.mxu1 %vm1356_vm2, %v21898_v20  ;;  %v15231_v20 = vld [vmem:[%s25719_s4 + $0xd0] sm:$0xff] }
 0x549   :  { %18691 = vmatmul.mubr.msk.f32.gmra.mrb[52].mxu1 %vm1356_vm2, %v21914_v27  ;;  %v15265_v27 = vld [vmem:[%s25719_s4 + $0xe0] sm:$0xff] }
 0x54a   :  { %18693 = vmatprep.mubr.msk.f32.mxu1 %vm1356_vm2, %v21910_v26  ;;  %v19062_v26 = vpack.c.bf16 %v15232_v21, %v15231_v20  ;;  %v25864_v20 = vld [vmem:[#allocation37_spill] sm:$0xff]  ;;  %v25865_v21 = vld [vmem:[#allocation38_spill] sm:$0xff] }
 0x54d   :  { %18694 = vmatmul.mubr.msk.f32.gmra.mrb[54].mxu1 %vm1356_vm2, %v21926_v40  ;;  %v25838_v40 = vld [vmem:[#allocation11_spill] sm:$0xff] }
 0x54e   :  { %18696 = vmatprep.mubr.msk.f32.mxu1 %vm1356_vm2, %v21922_v34  ;;  %v15266_v34 = vld [vmem:[%s25719_s4 + $0xe8] sm:$0xff] }
 0x551   :  { %18697 = vmatmul.mubr.msk.f32.gmra.mrb[56].mxu1 %vm1356_vm2, %v21938_v43  ;;  %v25839_v43 = vld [vmem:[#allocation12_spill] sm:$0xff] }
 0x552   :  { %18699 = vmatprep.mubr.msk.f32.mxu1 %vm1356_vm2, %v21934_v38  ;;  %v19066_v38 = vpack.c.bf16 %v15266_v34, %v15265_v27  ;;  %v22545_v27 = vld [vmem:[#allocation2 + $0x18a] sm:$0xff] }
 0x553   :  { %25867 = vst [vmem:[#allocation6_spill] sm:$0xff] %v22545_v27  ;;  %v15267_v34 = vld [vmem:[%s25719_s4 + $0xf0] sm:$0xff] }
 0x555   :  { %18700 = vmatmul.mubr.msk.f32.gmra.mrb[58].mxu1 %vm1356_vm2, %v21950_v49  ;;  %v25841_v49 = vld [vmem:[#allocation14_spill] sm:$0xff] }
 0x556   :  { %18702 = vmatprep.mubr.msk.f32.mxu1 %vm1356_vm2, %v21946_v44  ;;  %v25840_v44 = vld [vmem:[#allocation13_spill] sm:$0xff] }
 0x559   :  { %18703 = vmatmul.mubr.msk.f32.gmra.mrb[60].mxu1 %vm1356_vm2, %v21962_v55  ;;  %v25843_v55 = vld [vmem:[#allocation16_spill] sm:$0xff] }
 0x55a   :  { %18705 = vmatprep.mubr.msk.f32.mxu1 %vm1356_vm2, %v21958_v54  ;;  %v25842_v54 = vld [vmem:[#allocation15_spill] sm:$0xff] }
 0x55d   :  { %18706 = vmatmul.mubr.msk.f32.gmra.mrb[62].mxu1 %vm1356_vm2, %v21974_v62  ;;  %v25845_v62 = vld [vmem:[#allocation18_spill] sm:$0xff] }
 0x55e   :  { %18708 = vmatprep.mubr.msk.f32.mxu1 %vm1356_vm2, %v21970_v61  ;;  %v25844_v61 = vld [vmem:[#allocation17_spill] sm:$0xff] }
 0x561   :  { %18709 = vmatmul.mubr.msk.f32.gmra.mrb[64].mxu1 %vm1356_vm2, %v21988_v7  ;;  %v25847_v7 = vld [vmem:[#allocation20_spill] sm:$0xff] }
 0x562   :  { %18711 = vmatprep.mubr.msk.f32.mxu1 %vm1356_vm2, %v21983_v6  ;;  %v25846_v6 = vld [vmem:[#allocation19_spill] sm:$0xff] }
 0x565   :  { %18712 = vmatmul.mubr.msk.f32.gmra.mrb[66].mxu1 %vm1356_vm2, %v21998_v13  ;;  %v25849_v13 = vld [vmem:[#allocation22_spill] sm:$0xff] }
 0x566   :  { %18714 = vmatprep.mubr.msk.f32.mxu1 %vm1356_vm2, %v21995_v12  ;;  %v25848_v12 = vld [vmem:[#allocation21_spill] sm:$0xff] }
 0x569   :  { %18715 = vmatmul.mubr.msk.f32.gmra.mrb[68].mxu1 %vm1356_vm2, %v25833_v60  ;;  %v25859_v60 = vld [vmem:[#allocation32_spill] sm:$0xff] }
 0x56a   :  { %18717 = vmatprep.mubr.msk.f32.mxu1 %vm1356_vm2, %v25834_v2  ;;  %v25860_v2 = vld [vmem:[#allocation33_spill] sm:$0xff] }
 0x56d   :  { %18718 = vmatmul.mubr.msk.f32.gmra.mrb[70].mxu1 %vm1356_vm2, %v25835_v3  ;;  %v25861_v3 = vld [vmem:[#allocation34_spill] sm:$0xff] }
 0x56e   :  { %18720 = vmatprep.mubr.msk.f32.mxu1 %vm1356_vm2, %v25836_v8  ;;  %v25862_v8 = vld [vmem:[#allocation35_spill] sm:$0xff] }
 0x571   :  { %18721 = vmatmul.mubr.msk.f32.gmra.mrb[72].mxu1 %vm1356_vm2, %v25837_v9  ;;  %v25863_v9 = vld [vmem:[#allocation36_spill] sm:$0xff] }
 0x572   :  { %18723 = vmatprep.mubr.msk.f32.mxu1 %vm1356_vm2, %v22461_v14 }
 0x575   :  { %18724 = vmatmul.mubr.msk.f32.gmra.mrb[74].mxu1 %vm1356_vm2, %v22465_v15 }
 0x576   :  { %18734 = vmatprep.mubr.msk.f32.mxu1 %vm1356_vm2, %v22184_v23  ;;  %v25850_v23 = vld [vmem:[#allocation23_spill] sm:$0xff] }
 0x579   :  { %18735 = vmatmul.mubr.msk.f32.vlgmr.msra.gmra.mrb[44].mxu1 %vm1356_vm2, %v22191_v29  ;;  %v25851_v29 = vld [vmem:[#allocation24_spill] sm:$0xff] }
 0x57a   :  { %18737 = vmatprep.mubr.msk.f32.mxu1 %vm1356_vm2, %v25838_v40  ;;  %19061 = vmatpush3.bf16.msra.mxu1 %v19058_v28  ;;  %v25858_v28 = vld [vmem:[#allocation31_spill] sm:$0xff] }
 0x57b   :  { %19063 = vmatprep.subr.bf16.mxu1 %v19062_v26 }
 0x57d   :  { %18738 = vmatmul.mubr.msk.f32.gmra.mrb[46].mxu1 %vm1356_vm2, %v25839_v43 }
 0x57e   :  { %18740 = vmatprep.mubr.msk.f32.mxu1 %vm1356_vm2, %v25840_v44  ;;  %19065 = vmatpush3.bf16.msra.mxu1 %v19062_v26  ;;  %v22541_v26 = vld [vmem:[#allocation2 + $0x182] sm:$0xff] }
 0x57f   :  { %19067 = vmatprep.subr.bf16.mxu1 %v19066_v38  ;;  %25866 = vst [vmem:[#allocation7_spill] sm:$0xff] %v22541_v26 }
 0x581   :  { %18741 = vmatmul.mubr.msk.f32.gmra.mrb[48].mxu1 %vm1356_vm2, %v25841_v49 }
 0x582   :  { %18743 = vmatprep.mubr.msk.f32.mxu1 %vm1356_vm2, %v25842_v54 }
 0x585   :  { %18744 = vmatmul.mubr.msk.f32.gmra.mrb[50].mxu1 %vm1356_vm2, %v25843_v55 }
 0x586   :  { %18746 = vmatprep.mubr.msk.f32.mxu1 %vm1356_vm2, %v25844_v61 }
 0x589   :  { %18747 = vmatmul.mubr.msk.f32.gmra.mrb[52].mxu1 %vm1356_vm2, %v25845_v62 }
 0x58a   :  { %18749 = vmatprep.mubr.msk.f32.mxu1 %vm1356_vm2, %v25846_v6 }
 0x58d   :  { %18750 = vmatmul.mubr.msk.f32.gmra.mrb[54].mxu1 %vm1356_vm2, %v25847_v7 }
 0x58e   :  { %18752 = vmatprep.mubr.msk.f32.mxu1 %vm1356_vm2, %v25848_v12 }
 0x591   :  { %18753 = vmatmul.mubr.msk.f32.gmra.mrb[56].mxu1 %vm1356_vm2, %v25849_v13 }
 0x592   :  { %18755 = vmatprep.mubr.msk.f32.mxu1 %vm1356_vm2, %v25850_v23 }
 0x595   :  { %18756 = vmatmul.mubr.msk.f32.gmra.mrb[58].mxu1 %vm1356_vm2, %v25851_v29 }
 0x596   :  { %18758 = vmatprep.mubr.msk.f32.mxu1 %vm1356_vm2, %v25852_v22 }
 0x599   :  { %18759 = vmatmul.mubr.msk.f32.gmra.mrb[60].mxu1 %vm1356_vm2, %v25853_v42 }
 0x59a   :  { %18761 = vmatprep.mubr.msk.f32.mxu1 %vm1356_vm2, %v25854_v30 }
 0x59d   :  { %18762 = vmatmul.mubr.msk.f32.gmra.mrb[62].mxu1 %vm1356_vm2, %v25855_v24 }
 0x59e   :  { %18764 = vmatprep.mubr.msk.f32.mxu1 %vm1356_vm2, %v25856_v25 }
 0x5a1   :  { %18765 = vmatmul.mubr.msk.f32.gmra.mrb[64].mxu1 %vm1356_vm2, %v25857_v47 }
 0x5a2   :  { %18767 = vmatprep.mubr.msk.f32.mxu1 %vm1356_vm2, %v25858_v28 }
 0x5a5   :  { %18768 = vmatmul.mubr.msk.f32.gmra.mrb[66].mxu1 %vm1356_vm2, %v25859_v60 }
 0x5a6   :  { %18770 = vmatprep.mubr.msk.f32.mxu1 %vm1356_vm2, %v25860_v2 }
 0x5a9   :  { %18771 = vmatmul.mubr.msk.f32.gmra.mrb[68].mxu1 %vm1356_vm2, %v25861_v3 }
 0x5aa   :  { %18773 = vmatprep.mubr.msk.f32.mxu1 %vm1356_vm2, %v25862_v8 }
 0x5ad   :  { %18774 = vmatmul.mubr.msk.f32.gmra.mrb[70].mxu1 %vm1356_vm2, %v25863_v9  ;;  %v15268_v9 = vld [vmem:[%s25719_s4 + $0xf8] sm:$0xff] }
 0x5ae   :  { %18776 = vmatprep.mubr.msk.f32.mxu1 %vm1356_vm2, %v25864_v20  ;;  %v15302_v20 = vld [vmem:[%s25719_s4 + $0x108] sm:$0xff] }
 0x5b1   :  { %18777 = vmatmul.mubr.msk.f32.gmra.mrb[72].mxu1 %vm1356_vm2, %v25865_v21  ;;  %v19070_v21 = vpack.c.bf16 %v15268_v9, %v15267_v34  ;;  %v4781_v9 = vld [vmem:[#allocation2 + $0x169] sm:$0xff] }
 0x5b2   :  { %18779 = vmatprep.mubr.msk.f32.mxu1 %vm1356_vm2, %v22541_v26  ;;  %v15301_v26 = vld [vmem:[%s25719_s4 + $0x100] sm:$0xff] }
 0x5b5   :  { %18780 = vmatmul.mubr.msk.f32.gmra.mrb[74].mxu1 %vm1356_vm2, %v22545_v27  ;;  %v19074_v27 = vpack.c.bf16 %v15302_v20, %v15301_v26  ;;  %v4782_v20 = vld [vmem:[#allocation2 + $0x171] sm:$0xff]  ;;  %v4786_v26 = vld [vmem:[#allocation2 + $0x1a1] sm:$0xff] }
 0x5b6   :  { %18790 = vmatprep.mubr.msk.f32.mxu1 %vm1356_vm2, %v22053_v39  ;;  %v4395_v39 = vld [vmem:[#allocation2 + $0x198] sm:$0xff] }
 0x5b9   :  { %18791 = vmatmul.mubr.msk.f32.vlgmr.msra.gmra.mrb[44].mxu1 %vm1356_vm2, %v22058_v50  ;;  %v4396_v50 = vld [vmem:[#allocation2 + $0x1a0] sm:$0xff] }
 0x5ba   :  { %18793 = vmatprep.mubr.msk.f32.mxu1 %vm1356_vm2, %v22062_v1  ;;  %19069 = vmatpush3.bf16.msra.mxu1 %v19066_v38  ;;  %v15303_v1 = vld [vmem:[%s25719_s4 + $0x110] sm:$0xff]  ;;  %v4780_v38 = vld [vmem:[#allocation2 + $0x159] sm:$0xff] }
 0x5bb   :  { %19071 = vmatprep.subr.bf16.mxu1 %v19070_v21 }
 0x5bd   :  { %18794 = vmatmul.mubr.msk.f32.gmra.mrb[46].mxu1 %vm1356_vm2, %v22068_v53  ;;  %v15304_v53 = vld [vmem:[%s25719_s4 + $0x118] sm:$0xff] }
 0x5be   :  { %18796 = vmatprep.mubr.msk.f32.mxu1 %vm1356_vm2, %v22072_v56  ;;  %19073 = vmatpush3.bf16.msra.mxu1 %v19070_v21  ;;  %v19078_v56 = vpack.c.bf16 %v15304_v53, %v15303_v1  ;;  %v4785_v21 = vld [vmem:[#allocation2 + $0x199] sm:$0xff] }
 0x5bf   :  { %19075 = vmatprep.subr.bf16.mxu1 %v19074_v27 }
 0x5c1   :  { %18797 = vmatmul.mubr.msk.f32.gmra.mrb[48].mxu1 %vm1356_vm2, %v22076_v57  ;;  %v4756_v57 = vld [vmem:[#allocation2 + $0x39] sm:$0xff] }
 0x5c2   :  { %18799 = vmatprep.mubr.msk.f32.mxu1 %vm1356_vm2, %v22080_v58  ;;  %v4757_v58 = vld [vmem:[#allocation2 + $0x49] sm:$0xff] }
 0x5c5   :  { %18800 = vmatmul.mubr.msk.f32.gmra.mrb[50].mxu1 %vm1356_vm2, %v22086_v0  ;;  %v4758_v0 = vld [vmem:[#allocation2 + $0x51] sm:$0xff] }
 0x5c6   :  { %18802 = vmatprep.mubr.msk.f32.mxu1 %vm1356_vm2, %v22090_v4  ;;  %v4759_v4 = vld [vmem:[#allocation2 + $0x61] sm:$0xff] }
 0x5c9   :  { %18803 = vmatmul.mubr.msk.f32.gmra.mrb[52].mxu1 %vm1356_vm2, %v22094_v5  ;;  %v4760_v5 = vld [vmem:[#allocation2 + $0x69] sm:$0xff] }
 0x5ca   :  { %18805 = vmatprep.mubr.msk.f32.mxu1 %vm1356_vm2, %v22098_v10  ;;  %v4761_v10 = vld [vmem:[#allocation2 + $0x79] sm:$0xff] }
 0x5cd   :  { %18806 = vmatmul.mubr.msk.f32.gmra.mrb[54].mxu1 %vm1356_vm2, %v22102_v11  ;;  %v4762_v11 = vld [vmem:[#allocation2 + $0x81] sm:$0xff] }
 0x5ce   :  { %18808 = vmatprep.mubr.msk.f32.mxu1 %vm1356_vm2, %v22106_v16  ;;  %v4763_v16 = vld [vmem:[#allocation2 + $0x91] sm:$0xff] }
 0x5d1   :  { %18809 = vmatmul.mubr.msk.f32.gmra.mrb[56].mxu1 %vm1356_vm2, %v22110_v17  ;;  %v4764_v17 = vld [vmem:[#allocation2 + $0x99] sm:$0xff] }
 0x5d2   :  { %18811 = vmatprep.mubr.msk.f32.mxu1 %vm1356_vm2, %v22114_v18  ;;  %v4765_v18 = vld [vmem:[#allocation2 + $0xa9] sm:$0xff] }
 0x5d5   :  { %18812 = vmatmul.mubr.msk.f32.gmra.mrb[58].mxu1 %vm1356_vm2, %v22118_v19  ;;  %v4766_v19 = vld [vmem:[#allocation2 + $0xb1] sm:$0xff] }
 0x5d6   :  { %18814 = vmatprep.mubr.msk.f32.mxu1 %vm1356_vm2, %v22122_v31  ;;  %v4767_v31 = vld [vmem:[#allocation2 + $0xc1] sm:$0xff] }
 0x5d9   :  { %18815 = vmatmul.mubr.msk.f32.gmra.mrb[60].mxu1 %vm1356_vm2, %v22126_v32  ;;  %v4768_v32 = vld [vmem:[#allocation2 + $0xc9] sm:$0xff] }
 0x5da   :  { %18817 = vmatprep.mubr.msk.f32.mxu1 %vm1356_vm2, %v22130_v33  ;;  %v4769_v33 = vld [vmem:[#allocation2 + $0xd9] sm:$0xff] }
 0x5dd   :  { %18818 = vmatmul.mubr.msk.f32.gmra.mrb[62].mxu1 %vm1356_vm2, %v22134_v41  ;;  %v4770_v41 = vld [vmem:[#allocation2 + $0xe1] sm:$0xff] }
 0x5de   :  { %18820 = vmatprep.mubr.msk.f32.mxu1 %vm1356_vm2, %v22138_v35  ;;  %v4771_v35 = vld [vmem:[#allocation2 + $0xf1] sm:$0xff] }
 0x5e1   :  { %18821 = vmatmul.mubr.msk.f32.gmra.mrb[64].mxu1 %vm1356_vm2, %v22142_v36  ;;  %v4772_v36 = vld [vmem:[#allocation2 + $0xf9] sm:$0xff] }
 0x5e2   :  { %18823 = vmatprep.mubr.msk.f32.mxu1 %vm1356_vm2, %v22146_v37  ;;  %v4773_v37 = vld [vmem:[#allocation2 + $0x109] sm:$0xff] }
 0x5e5   :  { %18824 = vmatmul.mubr.msk.f32.gmra.mrb[66].mxu1 %vm1356_vm2, %v22150_v51  ;;  %v4774_v51 = vld [vmem:[#allocation2 + $0x111] sm:$0xff] }
 0x5e6   :  { %18826 = vmatprep.mubr.msk.f32.mxu1 %vm1356_vm2, %v22154_v52  ;;  %v4775_v52 = vld [vmem:[#allocation2 + $0x121] sm:$0xff] }
 0x5e9   :  { %18827 = vmatmul.mubr.msk.f32.gmra.mrb[68].mxu1 %vm1356_vm2, %v22158_v59  ;;  %v4776_v59 = vld [vmem:[#allocation2 + $0x129] sm:$0xff] }
 0x5ea   :  { %18829 = vmatprep.mubr.msk.f32.mxu1 %vm1356_vm2, %v22162_v63  ;;  %v4777_v63 = vld [vmem:[#allocation2 + $0x139] sm:$0xff] }
 0x5ed   :  { %18830 = vmatmul.mubr.msk.f32.gmra.mrb[70].mxu1 %vm1356_vm2, %v22166_v46  ;;  %v4755_v46 = vld [vmem:[#allocation2 + $0x31] sm:$0xff] }
 0x5ee   :  { %18832 = vmatprep.mubr.msk.f32.mxu1 %vm1356_vm2, %v22381_v45  ;;  %v4778_v45 = vld [vmem:[#allocation2 + $0x141] sm:$0xff] }
 0x5f1   :  { %18833 = vmatmul.mubr.msk.f32.gmra.mrb[72].mxu1 %vm1356_vm2, %v22385_v48  ;;  %v4779_v48 = vld [vmem:[#allocation2 + $0x151] sm:$0xff] }
 0x5f2   :  { %18835 = vmatprep.mubr.msk.f32.mxu1 %vm1356_vm2, %v4395_v39 }
 0x5f5   :  { %18836 = vmatmul.mubr.msk.f32.gmra.mrb[74].mxu1 %vm1356_vm2, %v4396_v50 }
 0x5f6   :  { %18846 = vmatprep.mubr.msk.f32.mxu1 %vm1356_vm2, %v4755_v46 }
 0x5f9   :  { %18847 = vmatmul.mubr.msk.f32.vlgmr.msra.gmra.mrb[44].mxu1 %vm1356_vm2, %v4756_v57 }
 0x5fa   :  { %18849 = vmatprep.mubr.msk.f32.mxu1 %vm1356_vm2, %v4757_v58  ;;  %19077 = vmatpush3.bf16.msra.mxu1 %v19074_v27 }
 0x5fb   :  { %19079 = vmatprep.subr.bf16.mxu1 %v19078_v56 }
 0x5fd   :  { %18850 = vmatmul.mubr.msk.f32.gmra.mrb[46].mxu1 %vm1356_vm2, %v4758_v0 }
 0x5fe   :  { %18852 = vmatprep.mubr.msk.f32.mxu1 %vm1356_vm2, %v4759_v4  ;;  %19081 = vmatpush3.bf16.msra.mxu1 %v19078_v56 }
 0x601   :  { %18853 = vmatmul.mubr.msk.f32.gmra.mrb[48].mxu1 %vm1356_vm2, %v4760_v5 }
 0x602   :  { %18855 = vmatprep.mubr.msk.f32.mxu1 %vm1356_vm2, %v4761_v10 }
 0x605   :  { %18856 = vmatmul.mubr.msk.f32.gmra.mrb[50].mxu1 %vm1356_vm2, %v4762_v11 }
 0x606   :  { %18858 = vmatprep.mubr.msk.f32.mxu1 %vm1356_vm2, %v4763_v16 }
 0x609   :  { %18859 = vmatmul.mubr.msk.f32.gmra.mrb[52].mxu1 %vm1356_vm2, %v4764_v17 }
 0x60a   :  { %18861 = vmatprep.mubr.msk.f32.mxu1 %vm1356_vm2, %v4765_v18 }
 0x60d   :  { %18862 = vmatmul.mubr.msk.f32.gmra.mrb[54].mxu1 %vm1356_vm2, %v4766_v19 }
 0x60e   :  { %18864 = vmatprep.mubr.msk.f32.mxu1 %vm1356_vm2, %v4767_v31 }
 0x611   :  { %18865 = vmatmul.mubr.msk.f32.gmra.mrb[56].mxu1 %vm1356_vm2, %v4768_v32 }
 0x612   :  { %18867 = vmatprep.mubr.msk.f32.mxu1 %vm1356_vm2, %v4769_v33 }
 0x615   :  { %18868 = vmatmul.mubr.msk.f32.gmra.mrb[58].mxu1 %vm1356_vm2, %v4770_v41 }
 0x616   :  { %18870 = vmatprep.mubr.msk.f32.mxu1 %vm1356_vm2, %v4771_v35 }
 0x619   :  { %18871 = vmatmul.mubr.msk.f32.gmra.mrb[60].mxu1 %vm1356_vm2, %v4772_v36 }
 0x61a   :  { %18873 = vmatprep.mubr.msk.f32.mxu1 %vm1356_vm2, %v4773_v37 }
 0x61d   :  { %18874 = vmatmul.mubr.msk.f32.gmra.mrb[62].mxu1 %vm1356_vm2, %v4774_v51 }
 0x61e   :  { %18876 = vmatprep.mubr.msk.f32.mxu1 %vm1356_vm2, %v4775_v52 }
 0x621   :  { %18877 = vmatmul.mubr.msk.f32.gmra.mrb[64].mxu1 %vm1356_vm2, %v4776_v59 }
 0x622   :  { %18879 = vmatprep.mubr.msk.f32.mxu1 %vm1356_vm2, %v4777_v63 }
 0x625   :  { %18880 = vmatmul.mubr.msk.f32.gmra.mrb[66].mxu1 %vm1356_vm2, %v4778_v45 }
 0x626   :  { %18882 = vmatprep.mubr.msk.f32.mxu1 %vm1356_vm2, %v4779_v48 }
 0x629   :  { %18883 = vmatmul.mubr.msk.f32.gmra.mrb[68].mxu1 %vm1356_vm2, %v4780_v38 }
 0x62a   :  { %18885 = vmatprep.mubr.msk.f32.mxu1 %vm1356_vm2, %v4781_v9 }
 0x62d   :  { %18886 = vmatmul.mubr.msk.f32.gmra.mrb[70].mxu1 %vm1356_vm2, %v4782_v20 }
 0x62e   :  { %18888 = vmatprep.mubr.msk.f32.mxu1 %vm1356_vm2, %v22461_v14  ;;  %v25868_v14 = vld [vmem:[#allocation36_spill] sm:$0xff] }
 0x631   :  { %18889 = vmatmul.mubr.msk.f32.gmra.mrb[72].mxu1 %vm1356_vm2, %v22465_v15  ;;  %v25869_v15 = vld [vmem:[#allocation37_spill] sm:$0xff] }
 0x632   :  { %18891 = vmatprep.mubr.msk.f32.mxu1 %vm1356_vm2, %v4785_v21 }
 0x635   :  { %18892 = vmatmul.mubr.msk.f32.gmra.mrb[74].mxu1 %vm1356_vm2, %v4786_v26 }
 0x636   :  { %18902 = vmatprep.mubr.msk.f32.mxu1 %vm1356_vm2, %v25838_v40  ;;  %v25870_v40 = vld [vmem:[#allocation38_spill] sm:$0xff] }
 0x639   :  { %18903 = vmatmul.mubr.msk.f32.vlgmr.msra.gmra.mrb[44].mxu1 %vm1356_vm2, %v25839_v43  ;;  %v25871_v43 = vld [vmem:[#allocation7_spill] sm:$0xff] }
 0x63a   :  { %18905 = vmatprep.mubr.msk.f32.mxu1 %vm1356_vm2, %v25840_v44  ;;  %v25872_v44 = vld [vmem:[#allocation6_spill] sm:$0xff] }
 0x63d   :  { %18906 = vmatmul.mubr.msk.f32.gmra.mrb[46].mxu1 %vm1356_vm2, %v25841_v49  ;;  %v5175_v49 = vld [vmem:[#allocation2 + $0x19a] sm:$0xff] }
 0x63e   :  { %18908 = vmatprep.mubr.msk.f32.mxu1 %vm1356_vm2, %v25842_v54  ;;  %v5176_v54 = vld [vmem:[#allocation2 + $0x1a2] sm:$0xff] }
 0x641   :  { %18909 = vmatmul.mubr.msk.f32.gmra.mrb[48].mxu1 %vm1356_vm2, %v25843_v55  ;;  %v5604_v55 = vld [vmem:[%s25715_s12] sm:$0xff] }
 0x642   :  { %18911 = vmatprep.mubr.msk.f32.mxu1 %vm1356_vm2, %v25844_v61  ;;  %v5605_v61 = vld [vmem:[%s25715_s12 + $0x8] sm:$0xff] }
 0x645   :  { %18912 = vmatmul.mubr.msk.f32.gmra.mrb[50].mxu1 %vm1356_vm2, %v25845_v62  ;;  %v22731_v62 = vpack.c.bf16 %v5605_v61, %v5604_v55 }
 0x646   :  { %18914 = vmatprep.mubr.msk.f32.mxu1 %vm1356_vm2, %v25846_v6  ;;  %v5606_v6 = vld [vmem:[%s25715_s12 + $0x10] sm:$0xff] }
 0x647   :  { %19084 = vmatpush3.bf16.msra.mxu0 %v22731_v62 }
 0x649   :  { %18915 = vmatmul.mubr.msk.f32.gmra.mrb[52].mxu1 %vm1356_vm2, %v25847_v7  ;;  %v5607_v7 = vld [vmem:[%s25715_s12 + $0x18] sm:$0xff] }
 0x64a   :  { %18917 = vmatprep.mubr.msk.f32.mxu1 %vm1356_vm2, %v25848_v12  ;;  %v22740_v12 = vpack.c.bf16 %v5607_v7, %v5606_v6 }
 0x64d   :  { %18918 = vmatmul.mubr.msk.f32.gmra.mrb[54].mxu1 %vm1356_vm2, %v25849_v13  ;;  %v25873_v13 = vmov 0.0|0.0  }
 0x64e   :  { %18920 = vmatprep.mubr.msk.f32.mxu1 %vm1356_vm2, %v25850_v23  ;;  %19085 = vmatprep.subr.bf16.mxu0 %v25873_v13 }
 0x64f   :  { %19087 = vmatpush3.bf16.msra.mxu0 %v22740_v12 }
 0x650   :  { %19088 = vmatprep.subr.bf16.mxu0 %v25873_v13 }
 0x651   :  { %18921 = vmatmul.mubr.msk.f32.gmra.mrb[56].mxu1 %vm1356_vm2, %v25851_v29 }
 0x652   :  { %18923 = vmatprep.mubr.msk.f32.mxu1 %vm1356_vm2, %v25852_v22 }
 0x655   :  { %18924 = vmatmul.mubr.msk.f32.gmra.mrb[58].mxu1 %vm1356_vm2, %v25853_v42 }
 0x656   :  { %18926 = vmatprep.mubr.msk.f32.mxu1 %vm1356_vm2, %v25854_v30 }
 0x659   :  { %18927 = vmatmul.mubr.msk.f32.gmra.mrb[60].mxu1 %vm1356_vm2, %v25855_v24 }
 0x65a   :  { %18929 = vmatprep.mubr.msk.f32.mxu1 %vm1356_vm2, %v25856_v25 }
 0x65d   :  { %18930 = vmatmul.mubr.msk.f32.gmra.mrb[62].mxu1 %vm1356_vm2, %v25857_v47 }
 0x65e   :  { %18932 = vmatprep.mubr.msk.f32.mxu1 %vm1356_vm2, %v25858_v28 }
 0x661   :  { %18933 = vmatmul.mubr.msk.f32.gmra.mrb[64].mxu1 %vm1356_vm2, %v25859_v60 }
 0x662   :  { %18935 = vmatprep.mubr.msk.f32.mxu1 %vm1356_vm2, %v25860_v2 }
 0x665   :  { %18936 = vmatmul.mubr.msk.f32.gmra.mrb[66].mxu1 %vm1356_vm2, %v25861_v3 }
 0x666   :  { %18938 = vmatprep.mubr.msk.f32.mxu1 %vm1356_vm2, %v25862_v8 }
 0x669   :  { %18939 = vmatmul.mubr.msk.f32.gmra.mrb[68].mxu1 %vm1356_vm2, %v25868_v14 }
 0x66a   :  { %18941 = vmatprep.mubr.msk.f32.mxu1 %vm1356_vm2, %v25869_v15 }
 0x66d   :  { %18942 = vmatmul.mubr.msk.f32.gmra.mrb[70].mxu1 %vm1356_vm2, %v25870_v40 }
 0x66e   :  { %18944 = vmatprep.mubr.msk.f32.mxu1 %vm1356_vm2, %v25871_v43 }
 0x671   :  { %18945 = vmatmul.mubr.msk.f32.gmra.mrb[72].mxu1 %vm1356_vm2, %v25872_v44 }
 0x672   :  { %18947 = vmatprep.mubr.msk.f32.mxu1 %vm1356_vm2, %v5175_v49 }
 0x675   :  { %18948 = vmatmul.mubr.msk.f32.gmra.mrb[74].mxu1 %vm1356_vm2, %v5176_v54 }
 0x70c   :  { %v22745_v23 = vpop.f32.mrb[44].mxu1 }
 0x70d   :  { %v5536_v29 = vsel %vm1356_vm2, %v22745_v23, 0.0  ;;  %v22749_v22 = vpop.f32.mrb[45].mxu1 }
 0x70e   :  { %v5535_v42 = vsel %vm1356_vm2, %v22749_v22, 0.0 }
 0x70f   :  { %v5537_v30 = vadd.f32 %v5536_v29, %v5535_v42 }
 0x710   :  { %v22753_v24 = vpop.f32.mrb[46].mxu1 }
 0x711   :  { %v22755_v25 = vpop.f32.mrb[47].mxu1  ;;  %v5540_v60 = vsel %vm1356_vm2, %v22753_v24, 0.0 }
 0x712   :  { %v5538_v47 = vsel %vm1356_vm2, %v22755_v25, 0.0 }
 0x713   :  { %v5539_v28 = vadd.f32 %v5538_v47, %v5537_v30 }
 0x714   :  { %v22761_v2 = vpop.f32.mrb[48].mxu1 }
 0x715   :  { %v22763_v3 = vpop.f32.mrb[49].mxu1  ;;  %v5541_v8 = vadd.f32 %v5540_v60, %v5539_v28  ;;  %v5544_v39 = vsel %vm1356_vm2, %v22761_v2, 0.0 }
 0x716   :  { %v5542_v27 = vsel %vm1356_vm2, %v22763_v3, 0.0 }
 0x717   :  { %v5543_v34 = vadd.f32 %v5542_v27, %v5541_v8 }
 0x718   :  { %v22769_v50 = vpop.f32.mrb[50].mxu1 }
 0x719   :  { %v22771_v1 = vpop.f32.mrb[51].mxu1  ;;  %v5545_v53 = vadd.f32 %v5544_v39, %v5543_v34  ;;  %v5548_v57 = vsel %vm1356_vm2, %v22769_v50, 0.0 }
 0x71a   :  { %v5546_v46 = vsel %vm1356_vm2, %v22771_v1, 0.0 }
 0x71b   :  { %v5547_v56 = vadd.f32 %v5546_v46, %v5545_v53 }
 0x71c   :  { %v22777_v58 = vpop.f32.mrb[52].mxu1 }
 0x71d   :  { %v22779_v0 = vpop.f32.mrb[53].mxu1  ;;  %v5549_v4 = vadd.f32 %v5548_v57, %v5547_v56  ;;  %v5552_v11 = vsel %vm1356_vm2, %v22777_v58, 0.0 }
 0x71e   :  { %v5550_v5 = vsel %vm1356_vm2, %v22779_v0, 0.0 }
 0x71f   :  { %v5551_v10 = vadd.f32 %v5550_v5, %v5549_v4 }
 0x720   :  { %v22785_v16 = vpop.f32.mrb[54].mxu1 }
 0x721   :  { %v22787_v17 = vpop.f32.mrb[55].mxu1  ;;  %v5553_v18 = vadd.f32 %v5552_v11, %v5551_v10  ;;  %v5556_v32 = vsel %vm1356_vm2, %v22785_v16, 0.0 }
 0x722   :  { %v5554_v19 = vsel %vm1356_vm2, %v22787_v17, 0.0 }
 0x723   :  { %v5555_v31 = vadd.f32 %v5554_v19, %v5553_v18 }
 0x724   :  { %v22793_v33 = vpop.f32.mrb[56].mxu1 }
 0x725   :  { %v22795_v41 = vpop.f32.mrb[57].mxu1  ;;  %v5557_v35 = vadd.f32 %v5556_v32, %v5555_v31  ;;  %v5560_v51 = vsel %vm1356_vm2, %v22793_v33, 0.0 }
 0x726   :  { %v5558_v36 = vsel %vm1356_vm2, %v22795_v41, 0.0 }
 0x727   :  { %v5559_v37 = vadd.f32 %v5558_v36, %v5557_v35 }
 0x728   :  { %v22801_v52 = vpop.f32.mrb[58].mxu1 }
 0x729   :  { %v22803_v59 = vpop.f32.mrb[59].mxu1  ;;  %v5561_v63 = vadd.f32 %v5560_v51, %v5559_v37  ;;  %v5564_v38 = vsel %vm1356_vm2, %v22801_v52, 0.0 }
 0x72a   :  { %v5562_v45 = vsel %vm1356_vm2, %v22803_v59, 0.0 }
 0x72b   :  { %v5563_v48 = vadd.f32 %v5562_v45, %v5561_v63 }
 0x72c   :  { %v22809_v9 = vpop.f32.mrb[60].mxu1 }
 0x72d   :  { %v22811_v20 = vpop.f32.mrb[61].mxu1  ;;  %v5565_v21 = vadd.f32 %v5564_v38, %v5563_v48  ;;  %v5568_v15 = vsel %vm1356_vm2, %v22809_v9, 0.0 }
 0x72e   :  { %v5566_v26 = vsel %vm1356_vm2, %v22811_v20, 0.0 }
 0x72f   :  { %v5567_v14 = vadd.f32 %v5566_v26, %v5565_v21 }
 0x730   :  { %v22817_v40 = vpop.f32.mrb[62].mxu1 }
 0x731   :  { %v22819_v43 = vpop.f32.mrb[63].mxu1  ;;  %v5569_v44 = vadd.f32 %v5568_v15, %v5567_v14  ;;  %v5572_v55 = vsel %vm1356_vm2, %v22817_v40, 0.0 }
 0x732   :  { %v5570_v49 = vsel %vm1356_vm2, %v22819_v43, 0.0 }
 0x733   :  { %v5571_v54 = vadd.f32 %v5570_v49, %v5569_v44 }
 0x734   :  { %v22825_v61 = vpop.f32.mrb[64].mxu1 }
 0x735   :  { %v22827_v6 = vpop.f32.mrb[65].mxu1  ;;  %v5573_v7 = vadd.f32 %v5572_v55, %v5571_v54  ;;  %v5576_v30 = vsel %vm1356_vm2, %v22825_v61, 0.0 }
 0x736   :  { %v5574_v29 = vsel %vm1356_vm2, %v22827_v6, 0.0 }
 0x737   :  { %v5575_v42 = vadd.f32 %v5574_v29, %v5573_v7 }
 0x738   :  { %v22833_v47 = vpop.f32.mrb[66].mxu1 }
 0x739   :  { %v22835_v28 = vpop.f32.mrb[67].mxu1  ;;  %v5577_v60 = vadd.f32 %v5576_v30, %v5575_v42  ;;  %v5580_v34 = vsel %vm1356_vm2, %v22833_v47, 0.0  ;;  %v25874_v42 = vmov 0.0  }
 0x73a   :  { %v5578_v8 = vsel %vm1356_vm2, %v22835_v28, 0.0 }
 0x73b   :  { %v5579_v27 = vadd.f32 %v5578_v8, %v5577_v60 }
 0x73c   :  { %v22841_v39 = vpop.f32.mrb[68].mxu1 }
 0x73d   :  { %v22843_v53 = vpop.f32.mrb[69].mxu1  ;;  %v5581_v46 = vadd.f32 %v5580_v34, %v5579_v27  ;;  %v5584_v4 = vsel %vm1356_vm2, %v22841_v39, 0.0  ;;  %v25875_v27 = vld [vmem:[#allocation5_spill] sm:$0xff] }
 0x73e   :  { %v5582_v56 = vsel %vm1356_vm2, %v22843_v53, 0.0 }
 0x73f   :  { %v5583_v57 = vadd.f32 %v5582_v56, %v5581_v46 }
 0x740   :  { %v18943_v5 = vpop.f32.mrb[70].mxu1 }
 0x741   :  { %v5474_v10 = vpop.f32.mrb[71].mxu1  ;;  %v5585_v11 = vadd.f32 %v5584_v4, %v5583_v57  ;;  %v5588_v31 = vsel %vm1356_vm2, %v18943_v5, 0.0 }
 0x742   :  { %v5586_v18 = vsel %vm1356_vm2, %v5474_v10, 0.0 }
 0x743   :  { %v5587_v19 = vadd.f32 %v5586_v18, %v5585_v11 }
 0x744   :  { %v18946_v32 = vpop.f32.mrb[72].mxu1 }
 0x745   :  { %v5484_v35 = vpop.f32.mrb[73].mxu1  ;;  %v5589_v36 = vadd.f32 %v5588_v31, %v5587_v19  ;;  %v5592_v63 = vsel %vm1356_vm2, %v18946_v32, 0.0 }
 0x746   :  { %v5590_v37 = vsel %vm1356_vm2, %v5484_v35, 0.0 }
 0x747   :  { %v5591_v51 = vadd.f32 %v5590_v37, %v5589_v36 }
 0x748   :  { %v18949_v45 = vpop.f32.mrb[74].mxu1 }
 0x749   :  { %v5494_v48 = vpop.f32.mrb[75].mxu1  ;;  %v5593_v38 = vadd.f32 %v5592_v63, %v5591_v51  ;;  %v5596_v14 = vsel %vm1356_vm2, %v18949_v45, 0.0 }
 0x74a   :  { %v5594_v21 = vsel %vm1356_vm2, %v5494_v48, 0.0 }
 0x74b   :  { %v5595_v26 = vadd.f32 %v5594_v21, %v5593_v38 }
 0x74d   :  { %v5597_v15 = vadd.f32 %v5596_v14, %v5595_v26 }
 0x74f   :  { %v5598_v44 = vrot.slane %v5597_v15, 4 }
 0x751   :  { %v5599_v49 = vadd.f32 %v5598_v44, %v5597_v15 }
 0x753   :  { %v5600_v54 = vrot.slane %v5599_v49, 2 }
 0x755   :  { %v5601_v55 = vadd.f32 %v5600_v54, %v5599_v49 }
 0x757   :  { %v5602_v7 = vrot.slane %v5601_v55, 1 }
 0x759   :  { %v5603_v29 = vadd.f32 %v5602_v7, %v5601_v55 }
 0x75b   :  { %18959 = vmatmul.mubr.msk.f32.vlgmr.msra.gmra.mrb[8].mxu0 %vm1356_vm2, %v5603_v29 }
 0x75c   :  { %19090 = vmatpush3.bf16.msra.mxu0 %v22731_v62  ;;  %18969 = vmatprep.mubr.msk.f32.mxu0 %vm21291_vm1, %v25874_v42 }
 0x75d   :  { %19091 = vmatprep.subr.bf16.mxu0 %v25873_v13 }
 0x760   :  { %19093 = vmatpush3.bf16.msra.mxu0 %v22740_v12 }
 0x761   :  { %19094 = vmatprep.subr.bf16.mxu0 %v25873_v13 }
 0x82e   :  { %v5677_v30 = vpop.f32.mrb[8].mxu0 }
 0x82f   :  { %v5682_v60 = vmul.f32 0.001953125, %v5677_v30  ;;  %v18960_v8 = vpop.f32.mrb[9].mxu0 }
 0x831   :  { %v5686_v34 = vrot.slane %v5682_v60, %v25875_v27 }
 0x833   :  { %v22864_v46 = vsub.f32 %v22749_v22, %v5686_v34  ;;  %v22867_v56 = vsub.f32 %v22745_v23, %v5686_v34  ;;  %v22870_v62 = vsub.f32 %v22755_v25, %v5686_v34  ;;  %v22873_v57 = vsub.f32 %v22753_v24, %v5686_v34 }
 0x834   :  { %v22876_v12 = vsub.f32 %v22763_v3, %v5686_v34  ;;  %v22879_v4 = vsub.f32 %v22761_v2, %v5686_v34  ;;  %v22882_v11 = vsub.f32 %v22771_v1, %v5686_v34  ;;  %v22885_v22 = vsub.f32 %v22769_v50, %v5686_v34 }
 0x835   :  { %v22888_v23 = vsub.f32 %v22779_v0, %v5686_v34  ;;  %v22891_v25 = vsub.f32 %v22777_v58, %v5686_v34  ;;  %v22894_v24 = vsub.f32 %v22787_v17, %v5686_v34  ;;  %v22897_v3 = vsub.f32 %v22785_v16, %v5686_v34 }
 0x836   :  { %v22900_v2 = vsub.f32 %v22795_v41, %v5686_v34  ;;  %v22903_v1 = vsub.f32 %v22793_v33, %v5686_v34  ;;  %v22906_v50 = vsub.f32 %v22803_v59, %v5686_v34  ;;  %v22909_v0 = vsub.f32 %v22801_v52, %v5686_v34 }
 0x837   :  { %v22912_v58 = vsub.f32 %v22811_v20, %v5686_v34  ;;  %v22915_v17 = vsub.f32 %v22809_v9, %v5686_v34  ;;  %v22918_v16 = vsub.f32 %v22819_v43, %v5686_v34  ;;  %v22921_v41 = vsub.f32 %v22817_v40, %v5686_v34 }
 0x838   :  { %v22924_v33 = vsub.f32 %v22827_v6, %v5686_v34  ;;  %v22927_v59 = vsub.f32 %v22825_v61, %v5686_v34  ;;  %v22930_v52 = vsub.f32 %v22835_v28, %v5686_v34  ;;  %v22933_v20 = vsub.f32 %v22833_v47, %v5686_v34 }
 0x839   :  { %v22936_v9 = vsub.f32 %v22843_v53, %v5686_v34  ;;  %v22939_v43 = vsub.f32 %v22841_v39, %v5686_v34  ;;  %v22941_v40 = vsub.f32 %v5474_v10, %v5686_v34  ;;  %v22943_v18 = vsub.f32 %v18943_v5, %v5686_v34 }
 0x83a   :  { %v22945_v6 = vsub.f32 %v5484_v35, %v5686_v34  ;;  %v22947_v61 = vsub.f32 %v18946_v32, %v5686_v34  ;;  %v22949_v19 = vsub.f32 %v5494_v48, %v5686_v34  ;;  %v22951_v28 = vsub.f32 %v18949_v45, %v5686_v34 }
 0x83b   :  { %v5719_v47 = vmul.f32 %v22864_v46, %v22864_v46  ;;  %v5720_v53 = vmul.f32 %v22867_v56, %v22867_v56  ;;  %v5721_v39 = vmul.f32 %v22870_v62, %v22870_v62  ;;  %v5722_v5 = vmul.f32 %v22873_v57, %v22873_v57 }
 0x83c   :  { %v5723_v35 = vmul.f32 %v22876_v12, %v22876_v12  ;;  %v5724_v51 = vmul.f32 %v22879_v4, %v22879_v4  ;;  %v5725_v48 = vmul.f32 %v22882_v11, %v22882_v11  ;;  %v5726_v26 = vmul.f32 %v22885_v22, %v22885_v22 }
 0x83d   :  { %v5751_v10 = vsel %vm1356_vm2, %v5719_v47, 0.0  ;;  %v5752_v31 = vsel %vm1356_vm2, %v5720_v53, 0.0  ;;  %v5754_v36 = vsel %vm1356_vm2, %v5721_v39, 0.0  ;;  %v5756_v63 = vsel %vm1356_vm2, %v5722_v5, 0.0 }
 0x83e   :  { %v5753_v32 = vadd.f32 %v5752_v31, %v5751_v10  ;;  %v5758_v38 = vsel %vm1356_vm2, %v5723_v35, 0.0  ;;  %v5760_v14 = vsel %vm1356_vm2, %v5724_v51, 0.0  ;;  %v5727_v44 = vmul.f32 %v22888_v23, %v22888_v23 }
 0x83f   :  { %v5762_v49 = vsel %vm1356_vm2, %v5725_v48, 0.0  ;;  %v5728_v55 = vmul.f32 %v22891_v25, %v22891_v25  ;;  %v5764_v7 = vsel %vm1356_vm2, %v5726_v26, 0.0  ;;  %v5729_v30 = vmul.f32 %v22894_v24, %v22894_v24 }
 0x840   :  { %v5755_v37 = vadd.f32 %v5754_v36, %v5753_v32  ;;  %v5766_v60 = vsel %vm1356_vm2, %v5727_v44, 0.0  ;;  %v5730_v34 = vmul.f32 %v22897_v3, %v22897_v3  ;;  %v5731_v39 = vmul.f32 %v22900_v2, %v22900_v2 }
 0x841   :  { %v5768_v47 = vsel %vm1356_vm2, %v5728_v55, 0.0  ;;  %v5770_v5 = vsel %vm1356_vm2, %v5729_v30, 0.0  ;;  %v5732_v31 = vmul.f32 %v22903_v1, %v22903_v1  ;;  %v5733_v36 = vmul.f32 %v22906_v50, %v22906_v50 }
 0x842   :  { %v5757_v45 = vadd.f32 %v5756_v63, %v5755_v37  ;;  %v5772_v32 = vsel %vm1356_vm2, %v5730_v34, 0.0  ;;  %v5774_v37 = vsel %vm1356_vm2, %v5731_v39, 0.0  ;;  %v5734_v63 = vmul.f32 %v22909_v0, %v22909_v0 }
 0x844   :  { %v5759_v21 = vadd.f32 %v5758_v38, %v5757_v45  ;;  %v5776_v45 = vsel %vm1356_vm2, %v5732_v31, 0.0  ;;  %v5735_v38 = vmul.f32 %v22912_v58, %v22912_v58 }
 0x846   :  { %v5761_v15 = vadd.f32 %v5760_v14, %v5759_v21  ;;  %v5778_v21 = vsel %vm1356_vm2, %v5733_v36, 0.0  ;;  %v5736_v14 = vmul.f32 %v22915_v17, %v22915_v17 }
 0x848   :  { %v5763_v54 = vadd.f32 %v5762_v49, %v5761_v15  ;;  %v5780_v15 = vsel %vm1356_vm2, %v5734_v63, 0.0  ;;  %v5737_v49 = vmul.f32 %v22918_v16, %v22918_v16 }
 0x84a   :  { %v5765_v29 = vadd.f32 %v5764_v7, %v5763_v54  ;;  %v5782_v54 = vsel %vm1356_vm2, %v5735_v38, 0.0  ;;  %v5738_v7 = vmul.f32 %v22921_v41, %v22921_v41 }
 0x84c   :  { %v5767_v8 = vadd.f32 %v5766_v60, %v5765_v29  ;;  %v5784_v29 = vsel %vm1356_vm2, %v5736_v14, 0.0  ;;  %v5739_v60 = vmul.f32 %v22924_v33, %v22924_v33 }
 0x84e   :  { %v5769_v53 = vadd.f32 %v5768_v47, %v5767_v8  ;;  %v5786_v8 = vsel %vm1356_vm2, %v5737_v49, 0.0  ;;  %v5740_v47 = vmul.f32 %v22927_v59, %v22927_v59 }
 0x850   :  { %v5771_v10 = vadd.f32 %v5770_v5, %v5769_v53  ;;  %v5788_v53 = vsel %vm1356_vm2, %v5738_v7, 0.0  ;;  %v5741_v5 = vmul.f32 %v22930_v52, %v22930_v52 }
 0x852   :  { %v5773_v35 = vadd.f32 %v5772_v32, %v5771_v10  ;;  %v5790_v10 = vsel %vm1356_vm2, %v5739_v60, 0.0  ;;  %v5742_v32 = vmul.f32 %v22933_v20, %v22933_v20 }
 0x854   :  { %v5775_v51 = vadd.f32 %v5774_v37, %v5773_v35  ;;  %v5792_v35 = vsel %vm1356_vm2, %v5740_v47, 0.0  ;;  %v5743_v37 = vmul.f32 %v22936_v9, %v22936_v9 }
 0x856   :  { %v5777_v48 = vadd.f32 %v5776_v45, %v5775_v51  ;;  %v5794_v51 = vsel %vm1356_vm2, %v5741_v5, 0.0  ;;  %v5744_v45 = vmul.f32 %v22939_v43, %v22939_v43 }
 0x858   :  { %v5779_v26 = vadd.f32 %v5778_v21, %v5777_v48  ;;  %v5796_v48 = vsel %vm1356_vm2, %v5742_v32, 0.0  ;;  %v5745_v21 = vmul.f32 %v22941_v40, %v22941_v40 }
 0x85a   :  { %v5781_v44 = vadd.f32 %v5780_v15, %v5779_v26  ;;  %v5798_v26 = vsel %vm1356_vm2, %v5743_v37, 0.0  ;;  %v5746_v15 = vmul.f32 %v22943_v18, %v22943_v18 }
 0x85c   :  { %v5783_v55 = vadd.f32 %v5782_v54, %v5781_v44  ;;  %v5800_v44 = vsel %vm1356_vm2, %v5744_v45, 0.0  ;;  %v5747_v54 = vmul.f32 %v22945_v6, %v22945_v6 }
 0x85e   :  { %v5785_v30 = vadd.f32 %v5784_v29, %v5783_v55  ;;  %v5802_v55 = vsel %vm1356_vm2, %v5745_v21, 0.0  ;;  %v5748_v29 = vmul.f32 %v22947_v61, %v22947_v61 }
 0x860   :  { %v5787_v34 = vadd.f32 %v5786_v8, %v5785_v30  ;;  %v5804_v30 = vsel %vm1356_vm2, %v5746_v15, 0.0  ;;  %v5749_v8 = vmul.f32 %v22949_v19, %v22949_v19 }
 0x862   :  { %v5789_v39 = vadd.f32 %v5788_v53, %v5787_v34  ;;  %v5806_v34 = vsel %vm1356_vm2, %v5747_v54, 0.0  ;;  %v5750_v53 = vmul.f32 %v22951_v28, %v22951_v28 }
 0x864   :  { %v5791_v31 = vadd.f32 %v5790_v10, %v5789_v39  ;;  %v5808_v39 = vsel %vm1356_vm2, %v5748_v29, 0.0  ;;  %v5810_v10 = vsel %vm1356_vm2, %v5749_v8, 0.0  ;;  %v5812_v32 = vsel %vm1356_vm2, %v5750_v53, 0.0 }
 0x866   :  { %v5793_v36 = vadd.f32 %v5792_v35, %v5791_v31 }
 0x868   :  { %v5795_v63 = vadd.f32 %v5794_v51, %v5793_v36 }
 0x86a   :  { %v5797_v38 = vadd.f32 %v5796_v48, %v5795_v63 }
 0x86c   :  { %v5799_v14 = vadd.f32 %v5798_v26, %v5797_v38  ;;  %v6043_v38 = vld [vmem:[%s25720_s11 + $0x8] sm:$0xff] }
 0x86e   :  { %v5801_v49 = vadd.f32 %v5800_v44, %v5799_v14 }
 0x870   :  { %v5803_v7 = vadd.f32 %v5802_v55, %v5801_v49 }
 0x872   :  { %v5805_v60 = vadd.f32 %v5804_v30, %v5803_v7  ;;  %v23063_v7 = vld [vmem:[%s25721_s5] ss:$0 sm:$0xff] }
 0x874   :  { %v5807_v47 = vadd.f32 %v5806_v34, %v5805_v60 }
 0x876   :  { %v5809_v5 = vadd.f32 %v5808_v39, %v5807_v47 }
 0x878   :  { %v5811_v31 = vadd.f32 %v5810_v10, %v5809_v5 }
 0x87a   :  { %v5813_v35 = vadd.f32 %v5812_v32, %v5811_v31 }
 0x87c   :  { %v5814_v36 = vrot.slane %v5813_v35, 4 }
 0x87e   :  { %v5815_v37 = vadd.f32 %v5814_v36, %v5813_v35 }
 0x880   :  { %v5816_v51 = vrot.slane %v5815_v37, 2 }
 0x882   :  { %v5817_v63 = vadd.f32 %v5816_v51, %v5815_v37 }
 0x884   :  { %v5818_v45 = vrot.slane %v5817_v63, 1 }
 0x886   :  { %v5819_v48 = vadd.f32 %v5818_v45, %v5817_v63 }
 0x888   :  { %18970 = vmatmul.mubr.msk.f32.vlgmr.msra.gmra.mrb[10].mxu0 %vm1356_vm2, %v5819_v48 }
 0x889   :  { %6362 = vmatprep.mubr.f32.mxu0 %v6043_v38 }
 0x95b   :  { %v5889_v21 = vpop.f32.mrb[10].mxu0 }
 0x95c   :  { %v18971_v26 = vpop.f32.mrb[11].mxu0  ;;  %v5893_v14 = vmul.f32 0.001953125, %v5889_v21 }
 0x95e   :  { %v5894_v15 = vadd.f32 0.001, %v5893_v14 }
 0x960   :  { %21265 = vrsqrt.f32 %v5894_v15 }
 0x96a   :  { %v21266_v44 = vpop.eup %21265 }
 0x96b   :  { %v23054_v49 = vrot.slane %v21266_v44, %v25875_v27 }
 0x96d   :  { %v5900_v54 = vmul.f32 %v23054_v49, %v22864_v46  ;;  %v5901_v55 = vmul.f32 %v23054_v49, %v22867_v56  ;;  %v5902_v29 = vmul.f32 %v23054_v49, %v22870_v62  ;;  %v5903_v30 = vmul.f32 %v23054_v49, %v22873_v57  ;;  %v23074_v46 = vld [vmem:[%s25722_s6] ss:$0 sm:$0xff] }
 0x96e   :  { %v5904_v56 = vmul.f32 %v23054_v49, %v22876_v12  ;;  %v5905_v8 = vmul.f32 %v23054_v49, %v22879_v4  ;;  %v5906_v53 = vmul.f32 %v23054_v49, %v22882_v11  ;;  %v5907_v39 = vmul.f32 %v23054_v49, %v22885_v22 }
 0x96f   :  { %v5939_v27 = vmul.f32 %v23063_v7, %v5900_v54  ;;  %v5940_v60 = vmul.f32 %v23063_v7, %v5901_v55  ;;  %v5941_v62 = vmul.f32 %v23063_v7, %v5902_v29  ;;  %v5942_v34 = vmul.f32 %v23063_v7, %v5903_v30 }
 0x970   :  { %v5943_v5 = vmul.f32 %v23063_v7, %v5904_v56  ;;  %v5944_v12 = vmul.f32 %v23063_v7, %v5905_v8  ;;  %v5908_v35 = vmul.f32 %v23054_v49, %v22888_v23  ;;  %v5909_v36 = vmul.f32 %v23054_v49, %v22891_v25 }
 0x971   :  { %v5978_v57 = vadd.f32 %v23074_v46, %v5939_v27  ;;  %v5979_v47 = vadd.f32 %v23074_v46, %v5940_v60  ;;  %v5980_v4 = vadd.f32 %v23074_v46, %v5941_v62  ;;  %v5981_v10 = vadd.f32 %v23074_v46, %v5942_v34 }
 0x972   :  { %v5945_v11 = vmul.f32 %v23063_v7, %v5906_v53  ;;  %v5946_v22 = vmul.f32 %v23063_v7, %v5907_v39  ;;  %v5982_v37 = vadd.f32 %v23074_v46, %v5943_v5  ;;  %v5983_v51 = vadd.f32 %v23074_v46, %v5944_v12 }
 0x973   :  { %v6010_v31 = vmax.f32 %v5978_v57, 0.0  ;;  %v6011_v32 = vmax.f32 %v5979_v47, 0.0  ;;  %v6012_v63 = vmax.f32 %v5980_v4, 0.0  ;;  %v6013_v45 = vmax.f32 %v5981_v10, 0.0 }
 0x974   :  { %v5910_v38 = vmul.f32 %v23054_v49, %v22894_v24  ;;  %v5911_v23 = vmul.f32 %v23054_v49, %v22897_v3  ;;  %v5947_v25 = vmul.f32 %v23063_v7, %v5908_v35  ;;  %v5948_v21 = vmul.f32 %v23063_v7, %v5909_v36 }
 0x975   :  { %v19095_v48 = vpack.c.bf16 %v6011_v32, %v6010_v31  ;;  %v5984_v26 = vadd.f32 %v23074_v46, %v5945_v11  ;;  %v5985_v14 = vadd.f32 %v23074_v46, %v5946_v22  ;;  %v6014_v15 = vmax.f32 %v5982_v37, 0.0 }
 0x976   :  { %v6015_v44 = vmax.f32 %v5983_v51, 0.0  ;;  %v19098_v54 = vpack.c.bf16 %v6013_v45, %v6012_v63  ;;  %v5912_v24 = vmul.f32 %v23054_v49, %v22900_v2  ;;  %v5913_v3 = vmul.f32 %v23054_v49, %v22903_v1 }
 0x977   :  { %19096 = vmatpush1.bf16.msra.mxu0 %v19095_v48  ;;  %v5949_v55 = vmul.f32 %v23063_v7, %v5910_v38  ;;  %v5950_v29 = vmul.f32 %v23063_v7, %v5911_v23  ;;  %v5986_v30 = vadd.f32 %v23074_v46, %v5947_v25  ;;  %v5987_v27 = vadd.f32 %v23074_v46, %v5948_v21 }
 0x978   :  { %19097 = vmatprep.subr.bf16.mxu0 %v25873_v13  ;;  %v6016_v60 = vmax.f32 %v5984_v26, 0.0  ;;  %v6017_v56 = vmax.f32 %v5985_v14, 0.0  ;;  %v19101_v8 = vpack.c.bf16 %v6015_v44, %v6014_v15  ;;  %v5914_v2 = vmul.f32 %v23054_v49, %v22906_v50 }
 0x979   :  { %v5915_v1 = vmul.f32 %v23054_v49, %v22909_v0  ;;  %v5951_v62 = vmul.f32 %v23063_v7, %v5912_v24  ;;  %v5952_v34 = vmul.f32 %v23063_v7, %v5913_v3  ;;  %v5988_v57 = vadd.f32 %v23074_v46, %v5949_v55 }
 0x97a   :  { %v5989_v47 = vadd.f32 %v23074_v46, %v5950_v29  ;;  %v6018_v53 = vmax.f32 %v5986_v30, 0.0  ;;  %v6019_v39 = vmax.f32 %v5987_v27, 0.0  ;;  %v19104_v5 = vpack.c.bf16 %v6017_v56, %v6016_v60 }
 0x97b   :  { %19099 = vmatpush1.bf16.msra.mxu0 %v19098_v54  ;;  %v5916_v50 = vmul.f32 %v23054_v49, %v22912_v58  ;;  %v5917_v0 = vmul.f32 %v23054_v49, %v22915_v17  ;;  %v5953_v12 = vmul.f32 %v23063_v7, %v5914_v2  ;;  %v5954_v4 = vmul.f32 %v23063_v7, %v5915_v1 }
 0x97c   :  { %19100 = vmatprep.subr.bf16.mxu0 %v25873_v13  ;;  %v5990_v10 = vadd.f32 %v23074_v46, %v5951_v62  ;;  %v5991_v31 = vadd.f32 %v23074_v46, %v5952_v34  ;;  %v6020_v32 = vmax.f32 %v5988_v57, 0.0  ;;  %v6021_v35 = vmax.f32 %v5989_v47, 0.0 }
 0x97d   :  { %v19107_v36 = vpack.c.bf16 %v6019_v39, %v6018_v53  ;;  %v5918_v58 = vmul.f32 %v23054_v49, %v22918_v16  ;;  %v5919_v17 = vmul.f32 %v23054_v49, %v22921_v41  ;;  %v5955_v11 = vmul.f32 %v23063_v7, %v5916_v50 }
 0x97e   :  { %v5956_v22 = vmul.f32 %v23063_v7, %v5917_v0  ;;  %v5992_v37 = vadd.f32 %v23074_v46, %v5953_v12  ;;  %v5993_v51 = vadd.f32 %v23074_v46, %v5954_v4  ;;  %v6022_v63 = vmax.f32 %v5990_v10, 0.0 }
 0x97f   :  { %19102 = vmatpush1.bf16.msra.mxu0 %v19101_v8  ;;  %v6023_v45 = vmax.f32 %v5991_v31, 0.0  ;;  %v19110_v48 = vpack.c.bf16 %v6021_v35, %v6020_v32  ;;  %v5920_v16 = vmul.f32 %v23054_v49, %v22924_v33  ;;  %v5921_v41 = vmul.f32 %v23054_v49, %v22927_v59 }
 0x980   :  { %19103 = vmatprep.subr.bf16.mxu0 %v25873_v13  ;;  %v5957_v38 = vmul.f32 %v23063_v7, %v5918_v58  ;;  %v5958_v23 = vmul.f32 %v23063_v7, %v5919_v17  ;;  %v5994_v25 = vadd.f32 %v23074_v46, %v5955_v11  ;;  %v5995_v21 = vadd.f32 %v23074_v46, %v5956_v22 }
 0x981   :  { %v6024_v26 = vmax.f32 %v5992_v37, 0.0  ;;  %v6025_v14 = vmax.f32 %v5993_v51, 0.0  ;;  %v19113_v15 = vpack.c.bf16 %v6023_v45, %v6022_v63  ;;  %v5922_v33 = vmul.f32 %v23054_v49, %v22930_v52 }
 0x982   :  { %v5923_v59 = vmul.f32 %v23054_v49, %v22933_v20  ;;  %v5959_v44 = vmul.f32 %v23063_v7, %v5920_v16  ;;  %v5960_v54 = vmul.f32 %v23063_v7, %v5921_v41  ;;  %v5996_v24 = vadd.f32 %v23074_v46, %v5957_v38 }
 0x983   :  { %19105 = vmatpush1.bf16.msra.mxu0 %v19104_v5  ;;  %v5997_v3 = vadd.f32 %v23074_v46, %v5958_v23  ;;  %v6026_v55 = vmax.f32 %v5994_v25, 0.0  ;;  %v6027_v29 = vmax.f32 %v5995_v21, 0.0  ;;  %v19116_v30 = vpack.c.bf16 %v6025_v14, %v6024_v26 }
 0x984   :  { %19106 = vmatprep.subr.bf16.mxu0 %v25873_v13  ;;  %v5924_v52 = vmul.f32 %v23054_v49, %v22936_v9  ;;  %v5925_v20 = vmul.f32 %v23054_v49, %v22939_v43  ;;  %v5961_v27 = vmul.f32 %v23063_v7, %v5922_v33  ;;  %v5962_v60 = vmul.f32 %v23063_v7, %v5923_v59  ;;  %v6042_v33 = vld [vmem:[%s25720_s11] sm:$0xff]  ;;  %v6044_v59 = vld [vmem:[%s25720_s11 + $0x10] sm:$0xff] }
 0x985   :  { %v5998_v56 = vadd.f32 %v23074_v46, %v5959_v44  ;;  %v5999_v8 = vadd.f32 %v23074_v46, %v5960_v54  ;;  %v6028_v2 = vmax.f32 %v5996_v24, 0.0  ;;  %v6029_v1 = vmax.f32 %v5997_v3, 0.0  ;;  %v6046_v44 = vld [vmem:[%s25720_s11 + $0x20] sm:$0xff]  ;;  %v6049_v54 = vld [vmem:[%s25720_s11 + $0x38] sm:$0xff]  ;;  %v6048_v24 = vld [vmem:[%s25720_s11 + $0x30] sm:$0xff] }
 0x986   :  { %v19119_v62 = vpack.c.bf16 %v6027_v29, %v6026_v55  ;;  %v5926_v9 = vmul.f32 %v23054_v49, %v22941_v40  ;;  %v5927_v43 = vmul.f32 %v23054_v49, %v22943_v18  ;;  %v5963_v34 = vmul.f32 %v23063_v7, %v5924_v52  ;;  %v6051_v3 = vld [vmem:[%s25720_s11 + $0x48] sm:$0xff]  ;;  %v6050_v55 = vld [vmem:[%s25720_s11 + $0x40] sm:$0xff]  ;;  %v6053_v29 = vld [vmem:[%s25720_s11 + $0x58] sm:$0xff] }
 0x987   :  { %19108 = vmatpush1.bf16.msra.mxu0 %v19107_v36  ;;  %v5964_v57 = vmul.f32 %v23063_v7, %v5925_v20  ;;  %v6000_v47 = vadd.f32 %v23074_v46, %v5961_v27  ;;  %v6001_v53 = vadd.f32 %v23074_v46, %v5962_v60  ;;  %v6030_v39 = vmax.f32 %v5998_v56, 0.0  ;;  %v6055_v52 = vld [vmem:[%s25720_s11 + $0x68] sm:$0xff]  ;;  %v6054_v20 = vld [vmem:[%s25720_s11 + $0x60] sm:$0xff]  ;;  %v6057_v27 = vld [vmem:[%s25720_s11 + $0x78] sm:$0xff] }
 0x988   :  { %19109 = vmatprep.subr.bf16.mxu0 %v25873_v13  ;;  %v6031_v5 = vmax.f32 %v5999_v8, 0.0  ;;  %v19122_v50 = vpack.c.bf16 %v6029_v1, %v6028_v2  ;;  %v5928_v40 = vmul.f32 %v23054_v49, %v22945_v6  ;;  %v5929_v18 = vmul.f32 %v23054_v49, %v22947_v61  ;;  %v6056_v60 = vld [vmem:[%s25720_s11 + $0x70] sm:$0xff]  ;;  %v6059_v56 = vld [vmem:[%s25720_s11 + $0x88] sm:$0xff]  ;;  %v6058_v8 = vld [vmem:[%s25720_s11 + $0x80] sm:$0xff] }
 0x989   :  { %v5965_v0 = vmul.f32 %v23063_v7, %v5926_v9  ;;  %v5966_v12 = vmul.f32 %v23063_v7, %v5927_v43  ;;  %v6002_v4 = vadd.f32 %v23074_v46, %v5963_v34  ;;  %v6003_v10 = vadd.f32 %v23074_v46, %v5964_v57  ;;  %v6061_v2 = vld [vmem:[%s25720_s11 + $0x98] sm:$0xff]  ;;  %v6060_v1 = vld [vmem:[%s25720_s11 + $0x90] sm:$0xff]  ;;  %v6062_v9 = vld [vmem:[%s25720_s11 + $0xa0] sm:$0xff] }
 0x98a   :  { %v6032_v31 = vmax.f32 %v6000_v47, 0.0  ;;  %v6033_v32 = vmax.f32 %v6001_v53, 0.0  ;;  %v19125_v35 = vpack.c.bf16 %v6031_v5, %v6030_v39  ;;  %v5930_v6 = vmul.f32 %v23054_v49, %v22949_v19  ;;  %v6065_v43 = vld [vmem:[%s25720_s11 + $0xb8] sm:$0xff]  ;;  %v6064_v34 = vld [vmem:[%s25720_s11 + $0xb0] sm:$0xff]  ;;  %v6067_v57 = vld [vmem:[%s25720_s11 + $0xc8] sm:$0xff] }
 0x98b   :  { %19111 = vmatpush1.bf16.msra.mxu0 %v19110_v48  ;;  %v5931_v61 = vmul.f32 %v23054_v49, %v22951_v28  ;;  %v5967_v36 = vmul.f32 %v23063_v7, %v5928_v40  ;;  %v5968_v58 = vmul.f32 %v23063_v7, %v5929_v18  ;;  %v6004_v17 = vadd.f32 %v23074_v46, %v5965_v0  ;;  %v6066_v47 = vld [vmem:[%s25720_s11 + $0xc0] sm:$0xff]  ;;  %v6069_v53 = vld [vmem:[%s25720_s11 + $0xd8] sm:$0xff]  ;;  %v6068_v39 = vld [vmem:[%s25720_s11 + $0xd0] sm:$0xff] }
 0x98c   :  { %19112 = vmatprep.subr.bf16.mxu0 %v25873_v13  ;;  %v6005_v11 = vadd.f32 %v23074_v46, %v5966_v12  ;;  %v6034_v22 = vmax.f32 %v6002_v4, 0.0  ;;  %v6035_v37 = vmax.f32 %v6003_v10, 0.0  ;;  %v19128_v51 = vpack.c.bf16 %v6033_v32, %v6032_v31  ;;  %v6071_v5 = vld [vmem:[%s25720_s11 + $0xe8] sm:$0xff]  ;;  %v6073_v40 = vld [vmem:[%s25720_s11 + $0xf8] sm:$0xff]  ;;  %v6072_v18 = vld [vmem:[%s25720_s11 + $0xf0] sm:$0xff] }
 0x98d   :  { %v5969_v19 = vmul.f32 %v23063_v7, %v5930_v6  ;;  %v5970_v63 = vmul.f32 %v23063_v7, %v5931_v61  ;;  %v6006_v28 = vadd.f32 %v23074_v46, %v5967_v36  ;;  %v6007_v49 = vadd.f32 %v23074_v46, %v5968_v58  ;;  %v6075_v0 = vld [vmem:[%s25720_s11 + $0x108] sm:$0xff]  ;;  %v6074_v12 = vld [vmem:[%s25720_s11 + $0x100] sm:$0xff]  ;;  %v6077_v4 = vld [vmem:[%s25720_s11 + $0x118] sm:$0xff] }
 0x98e   :  { %v6036_v45 = vmax.f32 %v6004_v17, 0.0  ;;  %v6037_v48 = vmax.f32 %v6005_v11, 0.0  ;;  %v19131_v16 = vpack.c.bf16 %v6035_v37, %v6034_v22  ;;  %v6076_v10 = vld [vmem:[%s25720_s11 + $0x110] sm:$0xff]  ;;  %v6079_v31 = vld [vmem:[%s25720_s11 + $0x128] sm:$0xff]  ;;  %v6078_v32 = vld [vmem:[%s25720_s11 + $0x120] sm:$0xff] }
 0x98f   :  { %19114 = vmatpush1.bf16.msra.mxu0 %v19113_v15  ;;  %v6008_v41 = vadd.f32 %v23074_v46, %v5969_v19  ;;  %v6009_v38 = vadd.f32 %v23074_v46, %v5970_v63  ;;  %v6038_v23 = vmax.f32 %v6006_v28, 0.0  ;;  %v6039_v25 = vmax.f32 %v6007_v49, 0.0  ;;  %v6045_v46 = vld [vmem:[%s25720_s11 + $0x18] sm:$0xff]  ;;  %v6080_v6 = vld [vmem:[%s25720_s11 + $0x130] sm:$0xff]  ;;  %v6083_v61 = vld [vmem:[%s25720_s11 + $0x148] sm:$0xff] }
 0x990   :  { %19115 = vmatprep.subr.bf16.mxu0 %v25873_v13  ;;  %v19134_v21 = vpack.c.bf16 %v6037_v48, %v6036_v45  ;;  %v6082_v36 = vld [vmem:[%s25720_s11 + $0x140] sm:$0xff]  ;;  %v6085_v58 = vld [vmem:[%s25720_s11 + $0x158] sm:$0xff]  ;;  %v6084_v17 = vld [vmem:[%s25720_s11 + $0x150] sm:$0xff] }
 0x991   :  { %v6040_v7 = vmax.f32 %v6008_v41, 0.0  ;;  %v6041_v26 = vmax.f32 %v6009_v38, 0.0  ;;  %v19137_v14 = vpack.c.bf16 %v6039_v25, %v6038_v23  ;;  %v6087_v11 = vld [vmem:[%s25720_s11 + $0x168] sm:$0xff]  ;;  %v6086_v22 = vld [vmem:[%s25720_s11 + $0x160] sm:$0xff]  ;;  %v6089_v37 = vld [vmem:[%s25720_s11 + $0x178] sm:$0xff] }
 0x992   :  { %v6091_v19 = vld [vmem:[%s25720_s11 + $0x188] sm:$0xff]  ;;  %v6090_v63 = vld [vmem:[%s25720_s11 + $0x180] sm:$0xff]  ;;  %v6093_v28 = vld [vmem:[%s25720_s11 + $0x198] sm:$0xff] }
 0x993   :  { %19117 = vmatpush1.bf16.msra.mxu0 %v19116_v30  ;;  %v19140_v15 = vpack.c.bf16 %v6041_v26, %v6040_v7  ;;  %v6052_v30 = vld [vmem:[%s25720_s11 + $0x50] sm:$0xff]  ;;  %v6095_v45 = vld [vmem:[%s25720_s11 + $0x1a8] sm:$0xff]  ;;  %v6094_v48 = vld [vmem:[%s25720_s11 + $0x1a0] sm:$0xff] }
 0x994   :  { %19118 = vmatprep.subr.bf16.mxu0 %v25873_v13  ;;  %v6092_v49 = vld [vmem:[%s25720_s11 + $0x190] sm:$0xff]  ;;  %v6099_v38 = vld [vmem:[%s25720_s11 + $0x1c8] sm:$0xff]  ;;  %v6098_v23 = vld [vmem:[%s25720_s11 + $0x1c0] sm:$0xff] }
 0x995   :  { %v6096_v41 = vld [vmem:[%s25720_s11 + $0x1b0] sm:$0xff]  ;;  %v6101_v25 = vld [vmem:[%s25720_s11 + $0x1d8] sm:$0xff]  ;;  %v6103_v7 = vld [vmem:[%s25720_s11 + $0x1e8] sm:$0xff] }
 0x996   :  { %v6102_v26 = vld [vmem:[%s25720_s11 + $0x1e0] sm:$0xff] }
 0x997   :  { %19120 = vmatpush1.bf16.msra.mxu0 %v19119_v62  ;;  %v6063_v62 = vld [vmem:[%s25720_s11 + $0xa8] sm:$0xff] }
 0x998   :  { %19121 = vmatprep.subr.bf16.mxu0 %v25873_v13 }
 0x99b   :  { %19123 = vmatpush1.bf16.msra.mxu0 %v19122_v50  ;;  %v6070_v50 = vld [vmem:[%s25720_s11 + $0xe0] sm:$0xff] }
 0x99c   :  { %19124 = vmatprep.subr.bf16.mxu0 %v25873_v13 }
 0x99f   :  { %19126 = vmatpush1.bf16.msra.mxu0 %v19125_v35  ;;  %v6081_v35 = vld [vmem:[%s25720_s11 + $0x138] sm:$0xff] }
 0x9a0   :  { %19127 = vmatprep.subr.bf16.mxu0 %v25873_v13 }
 0x9a3   :  { %19129 = vmatpush1.bf16.msra.mxu0 %v19128_v51  ;;  %v6088_v51 = vld [vmem:[%s25720_s11 + $0x170] sm:$0xff] }
 0x9a4   :  { %19130 = vmatprep.subr.bf16.mxu0 %v25873_v13 }
 0x9a7   :  { %19132 = vmatpush1.bf16.msra.mxu0 %v19131_v16  ;;  %v6097_v16 = vld [vmem:[%s25720_s11 + $0x1b8] sm:$0xff] }
 0x9a8   :  { %19133 = vmatprep.subr.bf16.mxu0 %v25873_v13 }
 0x9ab   :  { %19135 = vmatpush1.bf16.msra.mxu0 %v19134_v21  ;;  %v6100_v21 = vld [vmem:[%s25720_s11 + $0x1d0] sm:$0xff] }
 0x9ac   :  { %19136 = vmatprep.subr.bf16.mxu0 %v25873_v13 }
 0x9af   :  { %19138 = vmatpush1.bf16.msra.mxu0 %v19137_v14  ;;  %v6105_v14 = vld [vmem:[%s25720_s11 + $0x1f8] sm:$0xff] }
 0x9b0   :  { %19139 = vmatprep.subr.bf16.mxu0 %v25873_v13  ;;  %v6047_v13 = vld [vmem:[%s25720_s11 + $0x28] sm:$0xff] }
 0x9b3   :  { %19141 = vmatpush1.bf16.msra.mxu0 %v19140_v15  ;;  %v6104_v15 = vld [vmem:[%s25720_s11 + $0x1f0] sm:$0xff] }
 0x9b6   :  { %6363 = vmatmul.mubr.f32.vlgmr.msra.gmra.mrb[12].mxu0 %v6042_v33  ;;  %v6107_v33 = vld [vmem:[%s25720_s11 + $0x208] sm:$0xff] }
 0x9b7   :  { %6367 = vmatprep.mubr.f32.mxu0 %v6045_v46  ;;  %v6106_v46 = vld [vmem:[%s25720_s11 + $0x200] sm:$0xff] }
 0x9ba   :  { %6368 = vmatmul.mubr.f32.gmra.mrb[14].mxu0 %v6044_v59  ;;  %v6109_v59 = vld [vmem:[%s25720_s11 + $0x218] sm:$0xff] }
 0x9bb   :  { %6372 = vmatprep.mubr.f32.mxu0 %v6047_v13  ;;  %v6108_v13 = vld [vmem:[%s25720_s11 + $0x210] sm:$0xff] }
 0x9be   :  { %6373 = vmatmul.mubr.f32.gmra.mrb[16].mxu0 %v6046_v44  ;;  %v6111_v44 = vld [vmem:[%s25720_s11 + $0x228] sm:$0xff] }
 0x9bf   :  { %6377 = vmatprep.mubr.f32.mxu0 %v6049_v54  ;;  %v6110_v54 = vld [vmem:[%s25720_s11 + $0x220] sm:$0xff] }
 0x9c2   :  { %6378 = vmatmul.mubr.f32.gmra.mrb[18].mxu0 %v6048_v24  ;;  %v6113_v24 = vld [vmem:[%s25720_s11 + $0x238] sm:$0xff] }
 0x9c3   :  { %6382 = vmatprep.mubr.f32.mxu0 %v6051_v3  ;;  %v6112_v3 = vld [vmem:[%s25720_s11 + $0x230] sm:$0xff] }
 0x9c6   :  { %6383 = vmatmul.mubr.f32.gmra.mrb[20].mxu0 %v6050_v55  ;;  %v6115_v55 = vld [vmem:[%s25720_s11 + $0x248] sm:$0xff] }
 0x9c7   :  { %6387 = vmatprep.mubr.f32.mxu0 %v6053_v29  ;;  %v6114_v29 = vld [vmem:[%s25720_s11 + $0x240] sm:$0xff] }
 0x9ca   :  { %6388 = vmatmul.mubr.f32.gmra.mrb[22].mxu0 %v6052_v30  ;;  %v6117_v30 = vld [vmem:[%s25720_s11 + $0x258] sm:$0xff] }
 0x9cb   :  { %6392 = vmatprep.mubr.f32.mxu0 %v6055_v52  ;;  %v6116_v52 = vld [vmem:[%s25720_s11 + $0x250] sm:$0xff] }
 0x9ce   :  { %6393 = vmatmul.mubr.f32.gmra.mrb[24].mxu0 %v6054_v20  ;;  %v6119_v20 = vld [vmem:[%s25720_s11 + $0x268] sm:$0xff] }
 0x9cf   :  { %6397 = vmatprep.mubr.f32.mxu0 %v6057_v27  ;;  %v6118_v27 = vld [vmem:[%s25720_s11 + $0x260] sm:$0xff] }
 0x9d2   :  { %6398 = vmatmul.mubr.f32.gmra.mrb[26].mxu0 %v6056_v60  ;;  %v6121_v60 = vld [vmem:[%s25720_s11 + $0x278] sm:$0xff] }
 0x9d3   :  { %6402 = vmatprep.mubr.f32.mxu0 %v6059_v56  ;;  %v6120_v56 = vld [vmem:[%s25720_s11 + $0x270] sm:$0xff] }
 0x9d6   :  { %6403 = vmatmul.mubr.f32.gmra.mrb[28].mxu0 %v6058_v8  ;;  %v6123_v8 = vld [vmem:[%s25720_s11 + $0x288] sm:$0xff] }
 0x9d7   :  { %6407 = vmatprep.mubr.f32.mxu0 %v6061_v2  ;;  %v6122_v2 = vld [vmem:[%s25720_s11 + $0x280] sm:$0xff] }
 0x9da   :  { %6408 = vmatmul.mubr.f32.gmra.mrb[30].mxu0 %v6060_v1  ;;  %v6125_v1 = vld [vmem:[%s25720_s11 + $0x298] sm:$0xff] }
 0x9db   :  { %6412 = vmatprep.mubr.f32.mxu0 %v6063_v62  ;;  %v6124_v62 = vld [vmem:[%s25720_s11 + $0x290] sm:$0xff] }
 0x9de   :  { %6413 = vmatmul.mubr.f32.gmra.mrb[32].mxu0 %v6062_v9  ;;  %v6127_v9 = vld [vmem:[%s25720_s11 + $0x2a8] sm:$0xff] }
 0x9df   :  { %6417 = vmatprep.mubr.f32.mxu0 %v6065_v43  ;;  %v6126_v43 = vld [vmem:[%s25720_s11 + $0x2a0] sm:$0xff] }
 0x9e2   :  { %6418 = vmatmul.mubr.f32.gmra.mrb[34].mxu0 %v6064_v34  ;;  %v6129_v34 = vld [vmem:[%s25720_s11 + $0x2b8] sm:$0xff] }
 0x9e3   :  { %6422 = vmatprep.mubr.f32.mxu0 %v6067_v57  ;;  %v6128_v57 = vld [vmem:[%s25720_s11 + $0x2b0] sm:$0xff] }
 0x9e6   :  { %6423 = vmatmul.mubr.f32.gmra.mrb[36].mxu0 %v6066_v47  ;;  %v6131_v47 = vld [vmem:[%s25720_s11 + $0x2c8] sm:$0xff] }
 0x9e7   :  { %6427 = vmatprep.mubr.f32.mxu0 %v6069_v53  ;;  %v6130_v53 = vld [vmem:[%s25720_s11 + $0x2c0] sm:$0xff] }
 0x9ea   :  { %6428 = vmatmul.mubr.f32.gmra.mrb[38].mxu0 %v6068_v39  ;;  %v6133_v39 = vld [vmem:[%s25720_s11 + $0x2d8] sm:$0xff] }
 0x9eb   :  { %6432 = vmatprep.mubr.f32.mxu0 %v6071_v5  ;;  %v6132_v5 = vld [vmem:[%s25720_s11 + $0x2d0] sm:$0xff] }
 0x9ee   :  { %6433 = vmatmul.mubr.f32.gmra.mrb[40].mxu0 %v6070_v50  ;;  %v6135_v50 = vld [vmem:[%s25720_s11 + $0x2e8] sm:$0xff] }
 0x9ef   :  { %6437 = vmatprep.mubr.f32.mxu0 %v6073_v40  ;;  %v6134_v40 = vld [vmem:[%s25720_s11 + $0x2e0] sm:$0xff] }
 0x9f2   :  { %6438 = vmatmul.mubr.f32.gmra.mrb[42].mxu0 %v6072_v18  ;;  %v6137_v18 = vld [vmem:[%s25720_s11 + $0x2f8] sm:$0xff] }
 0x9f3   :  { %6442 = vmatprep.mubr.f32.mxu0 %v6075_v0  ;;  %v6136_v0 = vld [vmem:[%s25720_s11 + $0x2f0] sm:$0xff] }
 0x9f6   :  { %6443 = vmatmul.mubr.f32.gmra.mrb[44].mxu0 %v6074_v12  ;;  %v6139_v12 = vld [vmem:[%s25720_s11 + $0x308] sm:$0xff] }
 0x9f7   :  { %6447 = vmatprep.mubr.f32.mxu0 %v6077_v4  ;;  %v6138_v4 = vld [vmem:[%s25720_s11 + $0x300] sm:$0xff] }
 0x9fa   :  { %6448 = vmatmul.mubr.f32.gmra.mrb[46].mxu0 %v6076_v10  ;;  %v6141_v10 = vld [vmem:[%s25720_s11 + $0x318] sm:$0xff] }
 0x9fb   :  { %6452 = vmatprep.mubr.f32.mxu0 %v6079_v31  ;;  %v6140_v31 = vld [vmem:[%s25720_s11 + $0x310] sm:$0xff] }
 0x9fe   :  { %6453 = vmatmul.mubr.f32.gmra.mrb[48].mxu0 %v6078_v32  ;;  %v6143_v32 = vld [vmem:[%s25720_s11 + $0x328] sm:$0xff] }
 0x9ff   :  { %6457 = vmatprep.mubr.f32.mxu0 %v6081_v35  ;;  %v6142_v35 = vld [vmem:[%s25720_s11 + $0x320] sm:$0xff] }
 0xa02   :  { %6458 = vmatmul.mubr.f32.gmra.mrb[50].mxu0 %v6080_v6  ;;  %v6145_v6 = vld [vmem:[%s25720_s11 + $0x338] sm:$0xff] }
 0xa03   :  { %6462 = vmatprep.mubr.f32.mxu0 %v6083_v61  ;;  %v6144_v61 = vld [vmem:[%s25720_s11 + $0x330] sm:$0xff] }
 0xa06   :  { %6463 = vmatmul.mubr.f32.gmra.mrb[52].mxu0 %v6082_v36  ;;  %v6147_v36 = vld [vmem:[%s25720_s11 + $0x348] sm:$0xff] }
 0xa07   :  { %6467 = vmatprep.mubr.f32.mxu0 %v6085_v58  ;;  %v6146_v58 = vld [vmem:[%s25720_s11 + $0x340] sm:$0xff] }
 0xa0a   :  { %6468 = vmatmul.mubr.f32.gmra.mrb[54].mxu0 %v6084_v17  ;;  %v6149_v17 = vld [vmem:[%s25720_s11 + $0x358] sm:$0xff] }
 0xa0b   :  { %6472 = vmatprep.mubr.f32.mxu0 %v6087_v11  ;;  %v6148_v11 = vld [vmem:[%s25720_s11 + $0x350] sm:$0xff] }
 0xa0e   :  { %6473 = vmatmul.mubr.f32.gmra.mrb[56].mxu0 %v6086_v22  ;;  %v6151_v22 = vld [vmem:[%s25720_s11 + $0x368] sm:$0xff] }
 0xa0f   :  { %6477 = vmatprep.mubr.f32.mxu0 %v6089_v37 }
 0xa12   :  { %6478 = vmatmul.mubr.f32.gmra.mrb[58].mxu0 %v6088_v51 }
 0xa13   :  { %6482 = vmatprep.mubr.f32.mxu0 %v6091_v19  ;;  %v6150_v19 = vld [vmem:[%s25720_s11 + $0x360] sm:$0xff] }
 0xa16   :  { %6483 = vmatmul.mubr.f32.gmra.mrb[60].mxu0 %v6090_v63  ;;  %v6153_v63 = vld [vmem:[%s25720_s11 + $0x378] sm:$0xff] }
 0xa17   :  { %6487 = vmatprep.mubr.f32.mxu0 %v6093_v28 }
 0xa1a   :  { %6488 = vmatmul.mubr.f32.gmra.mrb[62].mxu0 %v6092_v49 }
 0xa1b   :  { %6492 = vmatprep.mubr.f32.mxu0 %v6095_v45  ;;  %v6152_v45 = vld [vmem:[%s25720_s11 + $0x370] sm:$0xff] }
 0xa1e   :  { %6493 = vmatmul.mubr.f32.gmra.mrb[64].mxu0 %v6094_v48  ;;  %v6155_v48 = vld [vmem:[%s25720_s11 + $0x388] sm:$0xff] }
 0xa1f   :  { %6497 = vmatprep.mubr.f32.mxu0 %v6097_v16 }
 0xa22   :  { %6498 = vmatmul.mubr.f32.gmra.mrb[66].mxu0 %v6096_v41 }
 0xa23   :  { %6502 = vmatprep.mubr.f32.mxu0 %v6099_v38 }
 0xa26   :  { %6503 = vmatmul.mubr.f32.gmra.mrb[68].mxu0 %v6098_v23  ;;  %v6154_v23 = vld [vmem:[%s25720_s11 + $0x380] sm:$0xff] }
 0xa27   :  { %6507 = vmatprep.mubr.f32.mxu0 %v6101_v25  ;;  %v6157_v25 = vld [vmem:[%s25720_s11 + $0x398] sm:$0xff] }
 0xa2a   :  { %6508 = vmatmul.mubr.f32.gmra.mrb[70].mxu0 %v6100_v21 }
 0xa2b   :  { %6512 = vmatprep.mubr.f32.mxu0 %v6103_v7 }
 0xa2e   :  { %6513 = vmatmul.mubr.f32.gmra.mrb[72].mxu0 %v6102_v26  ;;  %v6156_v26 = vld [vmem:[%s25720_s11 + $0x390] sm:$0xff] }
 0xa2f   :  { %6517 = vmatprep.mubr.f32.mxu0 %v6105_v14  ;;  %v6159_v14 = vld [vmem:[%s25720_s11 + $0x3a8] sm:$0xff] }
 0xa32   :  { %6518 = vmatmul.mubr.f32.gmra.mrb[74].mxu0 %v6104_v15 }
 0xa33   :  { %6522 = vmatprep.mubr.f32.mxu0 %v6107_v33 }
 0xa36   :  { %6523 = vmatmul.mubr.f32.gmra.mrb[76].mxu0 %v6106_v46  ;;  %v6158_v46 = vld [vmem:[%s25720_s11 + $0x3a0] sm:$0xff] }
 0xa37   :  { %6527 = vmatprep.mubr.f32.mxu0 %v6109_v59  ;;  %v6161_v59 = vld [vmem:[%s25720_s11 + $0x3b8] sm:$0xff] }
 0xa3a   :  { %6528 = vmatmul.mubr.f32.gmra.mrb[78].mxu0 %v6108_v13 }
 0xa3b   :  { %6532 = vmatprep.mubr.f32.mxu0 %v6111_v44 }
 0xa3e   :  { %6533 = vmatmul.mubr.f32.gmra.mrb[80].mxu0 %v6110_v54 }
 0xa3f   :  { %6537 = vmatprep.mubr.f32.mxu0 %v6113_v24  ;;  %v6160_v24 = vld [vmem:[%s25720_s11 + $0x3b0] sm:$0xff] }
 0xa42   :  { %6538 = vmatmul.mubr.f32.gmra.mrb[82].mxu0 %v6112_v3  ;;  %v6163_v3 = vld [vmem:[%s25720_s11 + $0x3c8] sm:$0xff] }
 0xa43   :  { %6542 = vmatprep.mubr.f32.mxu0 %v6115_v55 }
 0xa46   :  { %6543 = vmatmul.mubr.f32.gmra.mrb[84].mxu0 %v6114_v29 }
 0xa47   :  { %6547 = vmatprep.mubr.f32.mxu0 %v6117_v30 }
 0xa4a   :  { %6548 = vmatmul.mubr.f32.gmra.mrb[86].mxu0 %v6116_v52 }
 0xa4b   :  { %6552 = vmatprep.mubr.f32.mxu0 %v6119_v20  ;;  %v6162_v20 = vld [vmem:[%s25720_s11 + $0x3c0] sm:$0xff] }
 0xa4e   :  { %6553 = vmatmul.mubr.f32.gmra.mrb[88].mxu0 %v6118_v27  ;;  %v6165_v27 = vld [vmem:[%s25720_s11 + $0x3d8] sm:$0xff] }
 0xa4f   :  { %6557 = vmatprep.mubr.f32.mxu0 %v6121_v60 }
 0xa52   :  { %6558 = vmatmul.mubr.f32.gmra.mrb[90].mxu0 %v6120_v56 }
 0xa53   :  { %6562 = vmatprep.mubr.f32.mxu0 %v6123_v8  ;;  %v6164_v8 = vld [vmem:[%s25720_s11 + $0x3d0] sm:$0xff] }
 0xa56   :  { %6563 = vmatmul.mubr.f32.gmra.mrb[92].mxu0 %v6122_v2  ;;  %v6167_v2 = vld [vmem:[%s25720_s11 + $0x3e8] sm:$0xff] }
 0xa57   :  { %6567 = vmatprep.mubr.f32.mxu0 %v6125_v1 }
 0xa5a   :  { %6568 = vmatmul.mubr.f32.gmra.mrb[94].mxu0 %v6124_v62 }
 0xa5b   :  { %6572 = vmatprep.mubr.f32.mxu0 %v6127_v9  ;;  %v6166_v9 = vld [vmem:[%s25720_s11 + $0x3e0] sm:$0xff] }
 0xa5e   :  { %6573 = vmatmul.mubr.f32.gmra.mrb[96].mxu0 %v6126_v43  ;;  %v6169_v43 = vld [vmem:[%s25720_s11 + $0x3f8] sm:$0xff] }
 0xa5f   :  { %6577 = vmatprep.mubr.f32.mxu0 %v6129_v34 }
 0xa62   :  { %6578 = vmatmul.mubr.f32.gmra.mrb[98].mxu0 %v6128_v57 }
 0xa63   :  { %6582 = vmatprep.mubr.f32.mxu0 %v6131_v47 }
 0xa66   :  { %6583 = vmatmul.mubr.f32.gmra.mrb[100].mxu0 %v6130_v53 }
 0xa67   :  { %6587 = vmatprep.mubr.f32.mxu0 %v6133_v39  ;;  %v6168_v39 = vld [vmem:[%s25720_s11 + $0x3f0] sm:$0xff] }
 0xa6a   :  { %6588 = vmatmul.mubr.f32.gmra.mrb[102].mxu0 %v6132_v5  ;;  %v6171_v5 = vld [vmem:[%s25720_s11 + $0x408] sm:$0xff] }
 0xa6b   :  { %6592 = vmatprep.mubr.f32.mxu0 %v6135_v50 }
 0xa6e   :  { %6593 = vmatmul.mubr.f32.gmra.mrb[104].mxu0 %v6134_v40 }
 0xa6f   :  { %6597 = vmatprep.mubr.f32.mxu0 %v6137_v18 }
 0xa72   :  { %6598 = vmatmul.mubr.f32.gmra.mrb[106].mxu0 %v6136_v0  ;;  %v6170_v0 = vld [vmem:[%s25720_s11 + $0x400] sm:$0xff] }
 0xa73   :  { %6602 = vmatprep.mubr.f32.mxu0 %v6139_v12  ;;  %v6173_v12 = vld [vmem:[%s25720_s11 + $0x418] sm:$0xff] }
 0xa76   :  { %6603 = vmatmul.mubr.f32.gmra.mrb[108].mxu0 %v6138_v4 }
 0xa77   :  { %6607 = vmatprep.mubr.f32.mxu0 %v6141_v10 }
 0xa7a   :  { %6608 = vmatmul.mubr.f32.gmra.mrb[110].mxu0 %v6140_v31  ;;  %v6172_v31 = vld [vmem:[%s25720_s11 + $0x410] sm:$0xff] }
 0xa7b   :  { %6612 = vmatprep.mubr.f32.mxu0 %v6143_v32  ;;  %v6175_v32 = vld [vmem:[%s25720_s11 + $0x428] sm:$0xff] }
 0xa7e   :  { %6613 = vmatmul.mubr.f32.gmra.mrb[112].mxu0 %v6142_v35 }
 0xa7f   :  { %6617 = vmatprep.mubr.f32.mxu0 %v6145_v6 }
 0xa82   :  { %6618 = vmatmul.mubr.f32.gmra.mrb[114].mxu0 %v6144_v61  ;;  %v6174_v61 = vld [vmem:[%s25720_s11 + $0x420] sm:$0xff] }
 0xa83   :  { %6622 = vmatprep.mubr.f32.mxu0 %v6147_v36  ;;  %v6177_v36 = vld [vmem:[%s25720_s11 + $0x438] sm:$0xff] }
 0xa86   :  { %6623 = vmatmul.mubr.f32.gmra.mrb[116].mxu0 %v6146_v58 }
 0xa87   :  { %6627 = vmatprep.mubr.f32.mxu0 %v6149_v17 }
 0xa89   :  { %v6364_v37 = vpop.f32.mrb[12].mxu0 }
 0xa8a   :  { %7004 = vst.msk [vmem:[#allocation3 + $0x29] sm:$0xff] %vm1356_vm2, %v6364_v37  ;;  %v6366_v51 = vpop.f32.mrb[13].mxu0  ;;  %6628 = vmatmul.mubr.f32.gmra.mrb[118].mxu0 %v6148_v11  ;;  %v6179_v37 = vld [vmem:[%s25720_s11 + $0x448] sm:$0xff] }
 0xa8b   :  { %6632 = vmatprep.mubr.f32.mxu0 %v6151_v22  ;;  %v6176_v22 = vld [vmem:[%s25720_s11 + $0x430] sm:$0xff] }
 0xa8d   :  { %v6369_v28 = vpop.f32.mrb[14].mxu0 }
 0xa8e   :  { %7005 = vst.msk [vmem:[#allocation3 + $0x31] sm:$0xff] %vm1356_vm2, %v6369_v28  ;;  %v6371_v49 = vpop.f32.mrb[15].mxu0  ;;  %6633 = vmatmul.mubr.f32.gmra.mrb[120].mxu0 %v6150_v19  ;;  %v6178_v28 = vld [vmem:[%s25720_s11 + $0x440] sm:$0xff] }
 0xa8f   :  { %6637 = vmatprep.mubr.f32.mxu0 %v6153_v63  ;;  %v6181_v49 = vld [vmem:[%s25720_s11 + $0x458] sm:$0xff] }
 0xa91   :  { %v6374_v16 = vpop.f32.mrb[16].mxu0  ;;  %v7142_v41 = vld [vmem:[#allocation3 + $0x2a] sm:$0x1] }
 0xa92   :  { %7006 = vst.msk [vmem:[#allocation3 + $0x39] sm:$0xff] %vm1356_vm2, %v6374_v16  ;;  %v6376_v38 = vpop.f32.mrb[17].mxu0  ;;  %6638 = vmatmul.mubr.f32.gmra.mrb[122].mxu0 %v6152_v45 }
 0xa93   :  { %7176 = vst.msk [vmem:[#allocation3 + $0x28] sm:$0x1] %vm2034_vm4, %v7142_v41  ;;  %6642 = vmatprep.mubr.f32.mxu0 %v6155_v48 }
 0xa95   :  { %v6379_v21 = vpop.f32.mrb[18].mxu0 }
 0xa96   :  { %7007 = vst.msk [vmem:[#allocation3 + $0x41] sm:$0xff] %vm1356_vm2, %v6379_v21  ;;  %v6381_v7 = vpop.f32.mrb[19].mxu0  ;;  %6643 = vmatmul.mubr.f32.gmra.mrb[124].mxu0 %v6154_v23 }
 0xa97   :  { %6647 = vmatprep.mubr.f32.mxu0 %v6157_v25 }
 0xa99   :  { %v6384_v15 = vpop.f32.mrb[20].mxu0 }
 0xa9a   :  { %7008 = vst.msk [vmem:[#allocation3 + $0x51] sm:$0xff] %vm1356_vm2, %v6384_v15  ;;  %7132 = vst.msk [vmem:[#allocation3 + $0x1] sm:$0xff] %vm1356_vm2, %v6384_v15  ;;  %v6386_v33 = vpop.f32.mrb[21].mxu0  ;;  %6648 = vmatmul.mubr.f32.gmra.mrb[126].mxu0 %v6156_v26  ;;  %v6180_v26 = vld [vmem:[%s25720_s11 + $0x450] sm:$0xff] }
 0xa9b   :  { %6652 = vmatprep.mubr.f32.mxu0 %v6159_v14  ;;  %v6183_v14 = vld [vmem:[%s25720_s11 + $0x468] sm:$0xff] }
 0xa9d   :  { %v7210_v13 = vld [vmem:[#allocation3 + $0x47] sm:$0x1]  ;;  %v6389_v44 = vpop.f32.mrb[22].mxu0 }
 0xa9e   :  { %7244 = vst.msk [vmem:[#allocation3 + $0x49] sm:$0x1] %vm2034_vm4, %v7210_v13  ;;  %v6391_v54 = vpop.f32.mrb[23].mxu0  ;;  %6653 = vmatmul.mubr.f32.gmra.mrb[128].mxu0 %v6158_v46  ;;  %v6182_v46 = vld [vmem:[%s25720_s11 + $0x460] sm:$0xff] }
 0xa9f   :  { %7009 = vst.msk [vmem:[#allocation3 + $0x59] sm:$0xff] %vm1356_vm2, %v6389_v44  ;;  %7133 = vst.msk [vmem:[#allocation3 + $0x9] sm:$0xff] %vm1356_vm2, %v6389_v44  ;;  %6657 = vmatprep.mubr.f32.mxu0 %v6161_v59  ;;  %v6185_v59 = vld [vmem:[%s25720_s11 + $0x478] sm:$0xff] }
 0xaa1   :  { %v7141_v55 = vld [vmem:[#allocation3 + $0x2] sm:$0x1]  ;;  %v7143_v29 = vld [vmem:[#allocation3 + $0x52] sm:$0x1]  ;;  %v6394_v30 = vpop.f32.mrb[24].mxu0 }
 0xaa2   :  { %7175 = vst.msk [vmem:[#allocation3] sm:$0x1] %vm2034_vm4, %v7141_v55  ;;  %7177 = vst.msk [vmem:[#allocation3 + $0x50] sm:$0x1] %vm2034_vm4, %v7143_v29  ;;  %v6396_v52 = vpop.f32.mrb[25].mxu0  ;;  %6658 = vmatmul.mubr.f32.gmra.mrb[130].mxu0 %v6160_v24  ;;  %v7406_v21 = vld [vmem:[#allocation3 + $0x1] sm:$0xff] }
 0xaa3   :  { %7010 = vst.msk [vmem:[#allocation3 + $0x61] sm:$0xff] %vm1356_vm2, %v6394_v30  ;;  %7134 = vst.msk [vmem:[#allocation3 + $0x11] sm:$0xff] %vm1356_vm2, %v6394_v30  ;;  %6662 = vmatprep.mubr.f32.mxu0 %v6163_v3 }
 0xaa5   :  { %v6399_v60 = vpop.f32.mrb[26].mxu0 }
 0xaa6   :  { %7011 = vst.msk [vmem:[#allocation3 + $0x69] sm:$0xff] %vm1356_vm2, %v6399_v60  ;;  %7135 = vst.msk [vmem:[#allocation3 + $0x19] sm:$0xff] %vm1356_vm2, %v6399_v60  ;;  %v6401_v56 = vpop.f32.mrb[27].mxu0  ;;  %6663 = vmatmul.mubr.f32.gmra.mrb[132].mxu0 %v6162_v20  ;;  %v7407_v45 = vld [vmem:[#allocation3 + $0x9] sm:$0xff]  ;;  %v6184_v20 = vld [vmem:[%s25720_s11 + $0x470] sm:$0xff] }
 0xaa7   :  { %6667 = vmatprep.mubr.f32.mxu0 %v6165_v27  ;;  %v19145_v7 = vpack.c.bf16 %v7407_v45, %v7406_v21  ;;  %v6187_v27 = vld [vmem:[%s25720_s11 + $0x488] sm:$0xff]  ;;  %v6196_v21 = vld [vmem:[%s25720_s11 + $0x4d0] sm:$0xff] }
 0xaa9   :  { %v6404_v1 = vpop.f32.mrb[28].mxu0 }
 0xaaa   :  { %7012 = vst.msk [vmem:[#allocation3 + $0x79] sm:$0xff] %vm1356_vm2, %v6404_v1  ;;  %v6406_v62 = vpop.f32.mrb[29].mxu0  ;;  %6668 = vmatmul.mubr.f32.gmra.mrb[134].mxu0 %v6164_v8  ;;  %v7408_v30 = vld [vmem:[#allocation3 + $0x11] sm:$0xff]  ;;  %v6189_v1 = vld [vmem:[%s25720_s11 + $0x498] sm:$0xff] }
 0xaab   :  { %6672 = vmatprep.mubr.f32.mxu0 %v6167_v2  ;;  %v6186_v2 = vld [vmem:[%s25720_s11 + $0x480] sm:$0xff] }
 0xaac   :  { %v7411_v62 = vld [vmem:[#allocation3 + $0x31] sm:$0xff] }
 0xaad   :  { %v7209_v34 = vld [vmem:[#allocation3 + $0x1f] sm:$0x1]  ;;  %v7211_v57 = vld [vmem:[#allocation3 + $0x6f] sm:$0x1]  ;;  %v6409_v47 = vpop.f32.mrb[30].mxu0 }
 0xaae   :  { %7243 = vst.msk [vmem:[#allocation3 + $0x21] sm:$0x1] %vm2034_vm4, %v7209_v34  ;;  %7245 = vst.msk [vmem:[#allocation3 + $0x71] sm:$0x1] %vm2034_vm4, %v7211_v57  ;;  %v6411_v53 = vpop.f32.mrb[31].mxu0  ;;  %6673 = vmatmul.mubr.f32.gmra.mrb[136].mxu0 %v6166_v9  ;;  %v7409_v13 = vld [vmem:[#allocation3 + $0x19] sm:$0xff] }
 0xaaf   :  { %7013 = vst.msk [vmem:[#allocation3 + $0x81] sm:$0xff] %vm1356_vm2, %v6409_v47  ;;  %6677 = vmatprep.mubr.f32.mxu0 %v6169_v43  ;;  %v19151_v52 = vpack.c.bf16 %v7409_v13, %v7408_v30  ;;  %v7410_v53 = vld [vmem:[#allocation3 + $0x29] sm:$0xff]  ;;  %v6200_v30 = vld [vmem:[%s25720_s11 + $0x4f0] sm:$0xff] }
 0xab1   :  { %v7144_v50 = vld [vmem:[#allocation3 + $0x7a] sm:$0x1]  ;;  %v6414_v40 = vpop.f32.mrb[32].mxu0 }
 0xab2   :  { %7178 = vst.msk [vmem:[#allocation3 + $0x78] sm:$0x1] %vm2034_vm4, %v7144_v50  ;;  %v6416_v18 = vpop.f32.mrb[33].mxu0  ;;  %6678 = vmatmul.mubr.f32.gmra.mrb[138].mxu0 %v6168_v39  ;;  %v19157_v39 = vpack.c.bf16 %v7411_v62, %v7410_v53  ;;  %v6191_v50 = vld [vmem:[%s25720_s11 + $0x4a8] sm:$0xff]  ;;  %v6204_v53 = vld [vmem:[%s25720_s11 + $0x510] sm:$0xff] }
 0xab3   :  { %7014 = vst.msk [vmem:[#allocation3 + $0x89] sm:$0xff] %vm1356_vm2, %v6414_v40  ;;  %6682 = vmatprep.mubr.f32.mxu0 %v6171_v5  ;;  %v6188_v5 = vld [vmem:[%s25720_s11 + $0x490] sm:$0xff] }
 0xab5   :  { %v6419_v4 = vpop.f32.mrb[34].mxu0 }
 0xab6   :  { %7015 = vst.msk [vmem:[#allocation3 + $0x91] sm:$0xff] %vm1356_vm2, %v6419_v4  ;;  %v6421_v10 = vpop.f32.mrb[35].mxu0  ;;  %6683 = vmatmul.mubr.f32.gmra.mrb[140].mxu0 %v6170_v0  ;;  %v6190_v0 = vld [vmem:[%s25720_s11 + $0x4a0] sm:$0xff]  ;;  %v7413_v4 = vld [vmem:[#allocation3 + $0x41] sm:$0xff] }
 0xab7   :  { %6687 = vmatprep.mubr.f32.mxu0 %v6173_v12  ;;  %v6193_v12 = vld [vmem:[%s25720_s11 + $0x4b8] sm:$0xff] }
 0xab9   :  { %v6424_v35 = vpop.f32.mrb[36].mxu0 }
 0xaba   :  { %7016 = vst.msk [vmem:[#allocation3 + $0xa1] sm:$0xff] %vm1356_vm2, %v6424_v35  ;;  %v6426_v6 = vpop.f32.mrb[37].mxu0  ;;  %6688 = vmatmul.mubr.f32.gmra.mrb[142].mxu0 %v6172_v31 }
 0xabb   :  { %6692 = vmatprep.mubr.f32.mxu0 %v6175_v32 }
 0xabd   :  { %v7212_v58 = vld [vmem:[#allocation3 + $0x97] sm:$0x1]  ;;  %v6429_v17 = vpop.f32.mrb[38].mxu0 }
 0xabe   :  { %7246 = vst.msk [vmem:[#allocation3 + $0x99] sm:$0x1] %vm2034_vm4, %v7212_v58  ;;  %v6431_v11 = vpop.f32.mrb[39].mxu0  ;;  %6693 = vmatmul.mubr.f32.gmra.mrb[144].mxu0 %v6174_v61 }
 0xabf   :  { %7017 = vst.msk [vmem:[#allocation3 + $0xa9] sm:$0xff] %vm1356_vm2, %v6429_v17  ;;  %6697 = vmatprep.mubr.f32.mxu0 %v6177_v36  ;;  %v7412_v36 = vld [vmem:[#allocation3 + $0x39] sm:$0xff] }
 0xac0   :  { %v19163_v58 = vpack.c.bf16 %v7413_v4, %v7412_v36  ;;  %v6192_v17 = vld [vmem:[%s25720_s11 + $0x4b0] sm:$0xff]  ;;  %v6195_v11 = vld [vmem:[%s25720_s11 + $0x4c8] sm:$0xff] }
 0xac1   :  { %v7145_v51 = vld [vmem:[#allocation3 + $0xa2] sm:$0x1]  ;;  %v6434_v19 = vpop.f32.mrb[40].mxu0 }
 0xac2   :  { %7179 = vst.msk [vmem:[#allocation3 + $0xa0] sm:$0x1] %vm2034_vm4, %v7145_v51  ;;  %v6436_v63 = vpop.f32.mrb[41].mxu0  ;;  %6698 = vmatmul.mubr.f32.gmra.mrb[146].mxu0 %v6176_v22  ;;  %v7422_v16 = vld [vmem:[#allocation3 + $0xa1] sm:$0xff] }
 0xac3   :  { %7018 = vst.msk [vmem:[#allocation3 + $0xb1] sm:$0xff] %vm1356_vm2, %v6434_v19  ;;  %6702 = vmatprep.mubr.f32.mxu0 %v6179_v37  ;;  %v6194_v19 = vld [vmem:[%s25720_s11 + $0x4c0] sm:$0xff]  ;;  %v6197_v63 = vld [vmem:[%s25720_s11 + $0x4d8] sm:$0xff]  ;;  %v6208_v36 = vld [vmem:[%s25720_s11 + $0x530] sm:$0xff] }
 0xac5   :  { %v6439_v48 = vpop.f32.mrb[42].mxu0 }
 0xac6   :  { %v7423_v41 = vld [vmem:[#allocation3 + $0xa9] sm:$0xff]  ;;  %7019 = vst.msk [vmem:[#allocation3 + $0xb9] sm:$0xff] %vm1356_vm2, %v6439_v48  ;;  %v6441_v23 = vpop.f32.mrb[43].mxu0  ;;  %6703 = vmatmul.mubr.f32.gmra.mrb[148].mxu0 %v6178_v28  ;;  %v7415_v28 = vld [vmem:[#allocation3 + $0x59] sm:$0xff] }
 0xac7   :  { %v19142_v25 = vpack.c.bf16 %v7423_v41, %v7422_v16  ;;  %6707 = vmatprep.mubr.f32.mxu0 %v6181_v49  ;;  %v7414_v23 = vld [vmem:[#allocation3 + $0x51] sm:$0xff] }
 0xac9   :  { %19144 = vmatprep.subr.msk.bf16.mxu1 %vm23653_vm5, %v19142_v25  ;;  %v6444_v15 = vpop.f32.mrb[44].mxu0  ;;  %v19169_v25 = vpack.c.bf16 %v7415_v28, %v7414_v23  ;;  %v6212_v28 = vld [vmem:[%s25720_s11 + $0x550] sm:$0xff] }
 0xaca   :  { %19147 = vmatpush3.bf16.xpose.msk.msra.mxu1 %vm23653_vm5, %v19145_v7  ;;  %7020 = vst.msk [vmem:[#allocation3 + $0xc9] sm:$0xff] %vm1356_vm2, %v6444_v15  ;;  %v6446_v33 = vpop.f32.mrb[45].mxu0  ;;  %6708 = vmatmul.mubr.f32.gmra.mrb[150].mxu0 %v6180_v26  ;;  %v7424_v24 = vld [vmem:[#allocation3 + $0xb1] sm:$0xff] }
 0xacb   :  { %6712 = vmatprep.mubr.f32.mxu0 %v6183_v14  ;;  %v6199_v7 = vld [vmem:[%s25720_s11 + $0x4e8] sm:$0xff]  ;;  %v6198_v15 = vld [vmem:[%s25720_s11 + $0x4e0] sm:$0xff]  ;;  %v6201_v33 = vld [vmem:[%s25720_s11 + $0x4f8] sm:$0xff] }
 0xacd   :  { %v7213_v44 = vld [vmem:[#allocation3 + $0xbf] sm:$0x1]  ;;  %v6449_v54 = vpop.f32.mrb[46].mxu0 }
 0xace   :  { %v7425_v3 = vld [vmem:[#allocation3 + $0xb9] sm:$0xff]  ;;  %7247 = vst.msk [vmem:[#allocation3 + $0xc1] sm:$0x1] %vm2034_vm4, %v7213_v44  ;;  %v6451_v55 = vpop.f32.mrb[47].mxu0  ;;  %6713 = vmatmul.mubr.f32.gmra.mrb[152].mxu0 %v6182_v46  ;;  %v7417_v46 = vld [vmem:[#allocation3 + $0x69] sm:$0xff] }
 0xacf   :  { %7021 = vst.msk [vmem:[#allocation3 + $0xd1] sm:$0xff] %vm1356_vm2, %v6449_v54  ;;  %v19148_v29 = vpack.c.bf16 %v7425_v3, %v7424_v24  ;;  %6717 = vmatprep.mubr.f32.mxu0 %v6185_v59  ;;  %v7416_v55 = vld [vmem:[#allocation3 + $0x61] sm:$0xff] }
 0xad1   :  { %19150 = vmatprep.subr.msk.bf16.mxu1 %vm23653_vm5, %v19148_v29  ;;  %v7146_v60 = vld [vmem:[#allocation3 + $0xca] sm:$0x1]  ;;  %v6454_v56 = vpop.f32.mrb[48].mxu0  ;;  %v19175_v29 = vpack.c.bf16 %v7417_v46, %v7416_v55  ;;  %v6218_v46 = vld [vmem:[%s25720_s11 + $0x580] sm:$0xff] }
 0xad2   :  { %19153 = vmatpush3.bf16.xpose.msk.msra.mxu1 %vm23653_vm5, %v19151_v52  ;;  %7180 = vst.msk [vmem:[#allocation3 + $0xc8] sm:$0x1] %vm2034_vm4, %v7146_v60  ;;  %v6456_v8 = vpop.f32.mrb[49].mxu0  ;;  %6718 = vmatmul.mubr.f32.gmra.mrb[154].mxu0 %v6184_v20  ;;  %v7426_v43 = vld [vmem:[#allocation3 + $0xc9] sm:$0xff]  ;;  %v6203_v52 = vld [vmem:[%s25720_s11 + $0x508] sm:$0xff] }
 0xad3   :  { %7022 = vst.msk [vmem:[#allocation3 + $0xd9] sm:$0xff] %vm1356_vm2, %v6454_v56  ;;  %6722 = vmatprep.mubr.f32.mxu0 %v6187_v27  ;;  %v6202_v56 = vld [vmem:[%s25720_s11 + $0x500] sm:$0xff]  ;;  %v6205_v8 = vld [vmem:[%s25720_s11 + $0x518] sm:$0xff] }
 0xad5   :  { %v6459_v9 = vpop.f32.mrb[50].mxu0 }
 0xad6   :  { %v7427_v34 = vld [vmem:[#allocation3 + $0xd1] sm:$0xff]  ;;  %7023 = vst.msk [vmem:[#allocation3 + $0xe1] sm:$0xff] %vm1356_vm2, %v6459_v9  ;;  %v6461_v57 = vpop.f32.mrb[51].mxu0  ;;  %6723 = vmatmul.mubr.f32.gmra.mrb[156].mxu0 %v6186_v2  ;;  %v7419_v2 = vld [vmem:[#allocation3 + $0x81] sm:$0xff] }
 0xad7   :  { %v19154_v47 = vpack.c.bf16 %v7427_v34, %v7426_v43  ;;  %6727 = vmatprep.mubr.f32.mxu0 %v6189_v1  ;;  %v7418_v57 = vld [vmem:[#allocation3 + $0x79] sm:$0xff] }
 0xad9   :  { %19156 = vmatprep.subr.msk.bf16.mxu1 %vm23653_vm5, %v19154_v47  ;;  %v6464_v40 = vpop.f32.mrb[52].mxu0  ;;  %v19181_v47 = vpack.c.bf16 %v7419_v2, %v7418_v57  ;;  %v6228_v57 = vld [vmem:[%s25720_s11 + $0x5d0] sm:$0xff] }
 0xada   :  { %19159 = vmatpush3.bf16.xpose.msk.msra.mxu1 %vm23653_vm5, %v19157_v39  ;;  %7024 = vst.msk [vmem:[#allocation3 + $0xf1] sm:$0xff] %vm1356_vm2, %v6464_v40  ;;  %v6466_v18 = vpop.f32.mrb[53].mxu0  ;;  %6728 = vmatmul.mubr.f32.gmra.mrb[158].mxu0 %v6188_v5  ;;  %v7428_v32 = vld [vmem:[#allocation3 + $0xd9] sm:$0xff]  ;;  %v6206_v40 = vld [vmem:[%s25720_s11 + $0x520] sm:$0xff] }
 0xadb   :  { %6732 = vmatprep.mubr.f32.mxu0 %v6191_v50  ;;  %v6207_v39 = vld [vmem:[%s25720_s11 + $0x528] sm:$0xff]  ;;  %v6209_v18 = vld [vmem:[%s25720_s11 + $0x538] sm:$0xff] }
 0xadd   :  { %v7214_v10 = vld [vmem:[#allocation3 + $0xe7] sm:$0x1]  ;;  %v6469_v31 = vpop.f32.mrb[54].mxu0 }
 0xade   :  { %v7429_v35 = vld [vmem:[#allocation3 + $0xe1] sm:$0xff]  ;;  %7248 = vst.msk [vmem:[#allocation3 + $0xe9] sm:$0x1] %vm2034_vm4, %v7214_v10  ;;  %v6471_v6 = vpop.f32.mrb[55].mxu0  ;;  %6733 = vmatmul.mubr.f32.gmra.mrb[160].mxu0 %v6190_v0  ;;  %v7421_v0 = vld [vmem:[#allocation3 + $0x91] sm:$0xff] }
 0xadf   :  { %7025 = vst.msk [vmem:[#allocation3 + $0xf9] sm:$0xff] %vm1356_vm2, %v6469_v31  ;;  %v19160_v61 = vpack.c.bf16 %v7429_v35, %v7428_v32  ;;  %6737 = vmatprep.mubr.f32.mxu0 %v6193_v12  ;;  %v7420_v6 = vld [vmem:[#allocation3 + $0x89] sm:$0xff] }
 0xae1   :  { %19162 = vmatprep.subr.msk.bf16.mxu1 %vm23653_vm5, %v19160_v61  ;;  %v7147_v22 = vld [vmem:[#allocation3 + $0xf2] sm:$0x1]  ;;  %v6474_v37 = vpop.f32.mrb[56].mxu0  ;;  %v19187_v61 = vpack.c.bf16 %v7421_v0, %v7420_v6  ;;  %v6237_v6 = vld [vmem:[%s25720_s11 + $0x618] sm:$0xff] }
 0xae2   :  { %19165 = vmatpush3.bf16.xpose.msk.msra.mxu1 %vm23653_vm5, %v19163_v58  ;;  %7181 = vst.msk [vmem:[#allocation3 + $0xf0] sm:$0x1] %vm2034_vm4, %v7147_v22  ;;  %v6476_v51 = vpop.f32.mrb[57].mxu0  ;;  %6738 = vmatmul.mubr.f32.gmra.mrb[162].mxu0 %v6192_v17  ;;  %v7430_v45 = vld [vmem:[#allocation3 + $0xf1] sm:$0xff] }
 0xae3   :  { %7026 = vst.msk [vmem:[#allocation3 + $0x101] sm:$0xff] %vm1356_vm2, %v6474_v37  ;;  %6742 = vmatprep.mubr.f32.mxu0 %v6195_v11  ;;  %v6211_v58 = vld [vmem:[%s25720_s11 + $0x548] sm:$0xff]  ;;  %v6210_v37 = vld [vmem:[%s25720_s11 + $0x540] sm:$0xff]  ;;  %v6213_v51 = vld [vmem:[%s25720_s11 + $0x558] sm:$0xff] }
 0xae5   :  { %v6479_v49 = vpop.f32.mrb[58].mxu0 }
 0xae6   :  { %v7431_v48 = vld [vmem:[#allocation3 + $0xf9] sm:$0xff]  ;;  %7027 = vst.msk [vmem:[#allocation3 + $0x109] sm:$0xff] %vm1356_vm2, %v6479_v49  ;;  %v6481_v16 = vpop.f32.mrb[59].mxu0  ;;  %6743 = vmatmul.mubr.f32.gmra.mrb[164].mxu0 %v6194_v19 }
 0xae7   :  { %v19166_v41 = vpack.c.bf16 %v7431_v48, %v7430_v45  ;;  %6747 = vmatprep.mubr.f32.mxu0 %v6197_v63  ;;  %v6215_v49 = vld [vmem:[%s25720_s11 + $0x568] sm:$0xff]  ;;  %v6214_v16 = vld [vmem:[%s25720_s11 + $0x560] sm:$0xff] }
 0xae9   :  { %19168 = vmatprep.subr.msk.bf16.mxu1 %vm23653_vm5, %v19166_v41  ;;  %v6484_v26 = vpop.f32.mrb[60].mxu0  ;;  %v6217_v41 = vld [vmem:[%s25720_s11 + $0x578] sm:$0xff] }
 0xaea   :  { %19171 = vmatpush3.bf16.xpose.msk.msra.mxu1 %vm23653_vm5, %v19169_v25  ;;  %7028 = vst.msk [vmem:[#allocation3 + $0x119] sm:$0xff] %vm1356_vm2, %v6484_v26  ;;  %v6486_v14 = vpop.f32.mrb[61].mxu0  ;;  %6748 = vmatmul.mubr.f32.gmra.mrb[166].mxu0 %v6196_v21  ;;  %v7432_v44 = vld [vmem:[#allocation3 + $0x101] sm:$0xff]  ;;  %v6219_v26 = vld [vmem:[%s25720_s11 + $0x588] sm:$0xff] }
 0xaeb   :  { %6752 = vmatprep.mubr.f32.mxu0 %v6199_v7  ;;  %v6216_v7 = vld [vmem:[%s25720_s11 + $0x570] sm:$0xff] }
 0xaed   :  { %v7215_v59 = vld [vmem:[#allocation3 + $0x10f] sm:$0x1]  ;;  %v6489_v13 = vpop.f32.mrb[62].mxu0 }
 0xaee   :  { %v7433_v54 = vld [vmem:[#allocation3 + $0x109] sm:$0xff]  ;;  %7249 = vst.msk [vmem:[#allocation3 + $0x111] sm:$0x1] %vm2034_vm4, %v7215_v59  ;;  %v6491_v24 = vpop.f32.mrb[63].mxu0  ;;  %6753 = vmatmul.mubr.f32.gmra.mrb[168].mxu0 %v6198_v15 }
 0xaef   :  { %7029 = vst.msk [vmem:[#allocation3 + $0x121] sm:$0xff] %vm1356_vm2, %v6489_v13  ;;  %v19172_v3 = vpack.c.bf16 %v7433_v54, %v7432_v44  ;;  %6757 = vmatprep.mubr.f32.mxu0 %v6201_v33  ;;  %v6221_v59 = vld [vmem:[%s25720_s11 + $0x598] sm:$0xff]  ;;  %v6220_v54 = vld [vmem:[%s25720_s11 + $0x590] sm:$0xff]  ;;  %v6223_v24 = vld [vmem:[%s25720_s11 + $0x5a8] sm:$0xff] }
 0xaf1   :  { %19174 = vmatprep.subr.msk.bf16.mxu1 %vm23653_vm5, %v19172_v3  ;;  %v7148_v20 = vld [vmem:[#allocation3 + $0x11a] sm:$0x1]  ;;  %v6494_v27 = vpop.f32.mrb[64].mxu0 }
 0xaf2   :  { %19177 = vmatpush3.bf16.xpose.msk.msra.mxu1 %vm23653_vm5, %v19175_v29  ;;  %7182 = vst.msk [vmem:[#allocation3 + $0x118] sm:$0x1] %vm2034_vm4, %v7148_v20  ;;  %v6496_v60 = vpop.f32.mrb[65].mxu0  ;;  %6758 = vmatmul.mubr.f32.gmra.mrb[170].mxu0 %v6200_v30  ;;  %v7434_v62 = vld [vmem:[#allocation3 + $0x119] sm:$0xff]  ;;  %v6222_v29 = vld [vmem:[%s25720_s11 + $0x5a0] sm:$0xff]  ;;  %v6225_v30 = vld [vmem:[%s25720_s11 + $0x5b8] sm:$0xff] }
 0xaf3   :  { %7030 = vst.msk [vmem:[#allocation3 + $0x129] sm:$0xff] %vm1356_vm2, %v6494_v27  ;;  %6762 = vmatprep.mubr.f32.mxu0 %v6203_v52  ;;  %v6224_v60 = vld [vmem:[%s25720_s11 + $0x5b0] sm:$0xff] }
 0xaf5   :  { %v6499_v1 = vpop.f32.mrb[66].mxu0 }
 0xaf6   :  { %v7435_v9 = vld [vmem:[#allocation3 + $0x121] sm:$0xff]  ;;  %7031 = vst.msk [vmem:[#allocation3 + $0x131] sm:$0xff] %vm1356_vm2, %v6499_v1  ;;  %v6501_v43 = vpop.f32.mrb[67].mxu0  ;;  %6763 = vmatmul.mubr.f32.gmra.mrb[172].mxu0 %v6202_v56  ;;  %v6227_v56 = vld [vmem:[%s25720_s11 + $0x5c8] sm:$0xff] }
 0xaf7   :  { %v19178_v34 = vpack.c.bf16 %v7435_v9, %v7434_v62  ;;  %6767 = vmatprep.mubr.f32.mxu0 %v6205_v8  ;;  %v6226_v62 = vld [vmem:[%s25720_s11 + $0x5c0] sm:$0xff]  ;;  %v6229_v9 = vld [vmem:[%s25720_s11 + $0x5d8] sm:$0xff] }
 0xaf9   :  { %19180 = vmatprep.subr.msk.bf16.mxu1 %vm23653_vm5, %v19178_v34  ;;  %v6504_v5 = vpop.f32.mrb[68].mxu0 }
 0xafa   :  { %19183 = vmatpush3.bf16.xpose.msk.msra.mxu1 %vm23653_vm5, %v19181_v47  ;;  %7032 = vst.msk [vmem:[#allocation3 + $0x141] sm:$0xff] %vm1356_vm2, %v6504_v5  ;;  %v6506_v50 = vpop.f32.mrb[69].mxu0  ;;  %6768 = vmatmul.mubr.f32.gmra.mrb[174].mxu0 %v6204_v53  ;;  %v7436_v10 = vld [vmem:[#allocation3 + $0x129] sm:$0xff]  ;;  %v6231_v47 = vld [vmem:[%s25720_s11 + $0x5e8] sm:$0xff] }
 0xafb   :  { %6772 = vmatprep.mubr.f32.mxu0 %v6207_v39  ;;  %v6230_v5 = vld [vmem:[%s25720_s11 + $0x5e0] sm:$0xff]  ;;  %v6233_v50 = vld [vmem:[%s25720_s11 + $0x5f8] sm:$0xff] }
 0xafd   :  { %v7216_v12 = vld [vmem:[#allocation3 + $0x137] sm:$0x1]  ;;  %v6509_v4 = vpop.f32.mrb[70].mxu0 }
 0xafe   :  { %v7437_v31 = vld [vmem:[#allocation3 + $0x131] sm:$0xff]  ;;  %7250 = vst.msk [vmem:[#allocation3 + $0x139] sm:$0x1] %vm2034_vm4, %v7216_v12  ;;  %v6511_v32 = vpop.f32.mrb[71].mxu0  ;;  %6773 = vmatmul.mubr.f32.gmra.mrb[176].mxu0 %v6206_v40  ;;  %v6232_v12 = vld [vmem:[%s25720_s11 + $0x5f0] sm:$0xff] }
 0xaff   :  { %7033 = vst.msk [vmem:[#allocation3 + $0x149] sm:$0xff] %vm1356_vm2, %v6509_v4  ;;  %v19184_v35 = vpack.c.bf16 %v7437_v31, %v7436_v10  ;;  %6777 = vmatprep.mubr.f32.mxu0 %v6209_v18  ;;  %v6235_v4 = vld [vmem:[%s25720_s11 + $0x608] sm:$0xff] }
 0xb01   :  { %19186 = vmatprep.subr.msk.bf16.mxu1 %vm23653_vm5, %v19184_v35  ;;  %v7149_v17 = vld [vmem:[#allocation3 + $0x142] sm:$0x1]  ;;  %v6514_v11 = vpop.f32.mrb[72].mxu0  ;;  %v6234_v35 = vld [vmem:[%s25720_s11 + $0x600] sm:$0xff] }
 0xb02   :  { %19189 = vmatpush3.bf16.xpose.msk.msra.mxu1 %vm23653_vm5, %v19187_v61  ;;  %7183 = vst.msk [vmem:[#allocation3 + $0x140] sm:$0x1] %vm2034_vm4, %v7149_v17  ;;  %v6516_v22 = vpop.f32.mrb[73].mxu0  ;;  %6778 = vmatmul.mubr.f32.gmra.mrb[178].mxu0 %v6208_v36  ;;  %v6239_v17 = vld [vmem:[%s25720_s11 + $0x628] sm:$0xff] }
 0xb03   :  { %7034 = vst.msk [vmem:[#allocation3 + $0x151] sm:$0xff] %vm1356_vm2, %v6514_v11  ;;  %6782 = vmatprep.mubr.f32.mxu0 %v6211_v58  ;;  %v6236_v58 = vld [vmem:[%s25720_s11 + $0x610] sm:$0xff] }
 0xb05   :  { %v6519_v19 = vpop.f32.mrb[74].mxu0 }
 0xb06   :  { %7035 = vst.msk [vmem:[#allocation3 + $0x159] sm:$0xff] %vm1356_vm2, %v6519_v19  ;;  %v6521_v63 = vpop.f32.mrb[75].mxu0  ;;  %6783 = vmatmul.mubr.f32.gmra.mrb[180].mxu0 %v6210_v37  ;;  %v6238_v37 = vld [vmem:[%s25720_s11 + $0x620] sm:$0xff] }
 0xb07   :  { %6787 = vmatprep.mubr.f32.mxu0 %v6213_v51  ;;  %v6241_v51 = vld [vmem:[%s25720_s11 + $0x638] sm:$0xff] }
 0xb09   :  { %v6524_v45 = vpop.f32.mrb[76].mxu0 }
 0xb0a   :  { %7036 = vst.msk [vmem:[#allocation3 + $0x169] sm:$0xff] %vm1356_vm2, %v6524_v45  ;;  %v6526_v48 = vpop.f32.mrb[77].mxu0  ;;  %6788 = vmatmul.mubr.f32.gmra.mrb[182].mxu0 %v6212_v28  ;;  %v6243_v45 = vld [vmem:[%s25720_s11 + $0x648] sm:$0xff] }
 0xb0b   :  { %6792 = vmatprep.mubr.f32.mxu0 %v6215_v49  ;;  %v6240_v49 = vld [vmem:[%s25720_s11 + $0x630] sm:$0xff] }
 0xb0d   :  { %v7217_v23 = vld [vmem:[#allocation3 + $0x15f] sm:$0x1]  ;;  %v6529_v25 = vpop.f32.mrb[78].mxu0 }
 0xb0e   :  { %7251 = vst.msk [vmem:[#allocation3 + $0x161] sm:$0x1] %vm2034_vm4, %v7217_v23  ;;  %v6531_v21 = vpop.f32.mrb[79].mxu0  ;;  %6793 = vmatmul.mubr.f32.gmra.mrb[184].mxu0 %v6214_v16  ;;  %v6242_v23 = vld [vmem:[%s25720_s11 + $0x640] sm:$0xff] }
 0xb0f   :  { %7037 = vst.msk [vmem:[#allocation3 + $0x171] sm:$0xff] %vm1356_vm2, %v6529_v25  ;;  %6797 = vmatprep.mubr.f32.mxu0 %v6217_v41  ;;  %v6245_v25 = vld [vmem:[%s25720_s11 + $0x658] sm:$0xff] }
 0xb10   :  { %v7439_v21 = vld [vmem:[#allocation3 + $0x149] sm:$0xff] }
 0xb11   :  { %v7150_v14 = vld [vmem:[#allocation3 + $0x16a] sm:$0x1]  ;;  %v6534_v15 = vpop.f32.mrb[80].mxu0 }
 0xb12   :  { %7184 = vst.msk [vmem:[#allocation3 + $0x168] sm:$0x1] %vm2034_vm4, %v7150_v14  ;;  %v6536_v33 = vpop.f32.mrb[81].mxu0  ;;  %6798 = vmatmul.mubr.f32.gmra.mrb[186].mxu0 %v6216_v7 }
 0xb13   :  { %7038 = vst.msk [vmem:[#allocation3 + $0x179] sm:$0xff] %vm1356_vm2, %v6534_v15  ;;  %6802 = vmatprep.mubr.f32.mxu0 %v6219_v26  ;;  %v7438_v33 = vld [vmem:[#allocation3 + $0x141] sm:$0xff] }
 0xb15   :  { %v6539_v13 = vpop.f32.mrb[82].mxu0 }
 0xb16   :  { %7039 = vst.msk [vmem:[#allocation3 + $0x181] sm:$0xff] %vm1356_vm2, %v6539_v13  ;;  %v6541_v44 = vpop.f32.mrb[83].mxu0  ;;  %6803 = vmatmul.mubr.f32.gmra.mrb[188].mxu0 %v6218_v46  ;;  %v6244_v13 = vld [vmem:[%s25720_s11 + $0x650] sm:$0xff] }
 0xb17   :  { %6807 = vmatprep.mubr.f32.mxu0 %v6221_v59  ;;  %v19193_v59 = vpack.c.bf16 %v7439_v21, %v7438_v33  ;;  %v6247_v44 = vld [vmem:[%s25720_s11 + $0x668] sm:$0xff] }
 0xb19   :  { %v6544_v3 = vpop.f32.mrb[84].mxu0 }
 0xb1a   :  { %7040 = vst.msk [vmem:[#allocation3 + $0x191] sm:$0xff] %vm1356_vm2, %v6544_v3  ;;  %v6546_v55 = vpop.f32.mrb[85].mxu0  ;;  %6808 = vmatmul.mubr.f32.gmra.mrb[190].mxu0 %v6220_v54  ;;  %v23944_v3 = vld [vmem:[%s25723_s7 + $0x2] sm:$0x3] }
 0xb1b   :  { %6812 = vmatprep.mubr.f32.mxu0 %v6223_v24  ;;  %v6246_v55 = vld [vmem:[%s25720_s11 + $0x660] sm:$0xff]  ;;  %17038 = vmatprep.mubr.msk.f32.mxu1 %vm1356_vm2, %v23944_v3 }
 0xb1c   :  { %17039 = vmatmul.mubr.msk.f32.vlgmr.msra.gmra.mrb[76].mxu1 %vm1356_vm2, %v23944_v3 }
 0xb1d   :  { %v7218_v52 = vld [vmem:[#allocation3 + $0x187] sm:$0x1]  ;;  %v6549_v20 = vpop.f32.mrb[86].mxu0  ;;  %17106 = vmatprep.mubr.msk.f32.mxu1 %vm1356_vm2, %v23944_v3 }
 0xb1e   :  { %7252 = vst.msk [vmem:[#allocation3 + $0x189] sm:$0x1] %vm2034_vm4, %v7218_v52  ;;  %v6551_v27 = vpop.f32.mrb[87].mxu0  ;;  %6813 = vmatmul.mubr.f32.gmra.mrb[192].mxu0 %v6222_v29  ;;  %v6249_v29 = vld [vmem:[%s25720_s11 + $0x678] sm:$0xff] }
 0xb1f   :  { %7041 = vst.msk [vmem:[#allocation3 + $0x199] sm:$0xff] %vm1356_vm2, %v6549_v20  ;;  %6817 = vmatprep.mubr.f32.mxu0 %v6225_v30  ;;  %v7441_v30 = vld [vmem:[#allocation3 + $0x159] sm:$0xff] }
 0xb21   :  { %v7151_v8 = vld [vmem:[#allocation3 + $0x192] sm:$0x1]  ;;  %v6554_v2 = vpop.f32.mrb[88].mxu0 }
 0xb22   :  { %7185 = vst.msk [vmem:[#allocation3 + $0x190] sm:$0x1] %vm2034_vm4, %v7151_v8  ;;  %v6556_v1 = vpop.f32.mrb[89].mxu0  ;;  %6818 = vmatmul.mubr.f32.gmra.mrb[194].mxu0 %v6224_v60  ;;  %v7440_v8 = vld [vmem:[#allocation3 + $0x151] sm:$0xff] }
 0xb23   :  { %7042 = vst.msk [vmem:[#allocation3 + $0x1a1] sm:$0xff] %vm1356_vm2, %v6554_v2  ;;  %6822 = vmatprep.mubr.f32.mxu0 %v6227_v56  ;;  %v19199_v1 = vpack.c.bf16 %v7441_v30, %v7440_v8 }
 0xb25   :  { %v6559_v43 = vpop.f32.mrb[90].mxu0 }
 0xb26   :  { %7043 = vst.msk [vmem:[#allocation3 + $0x1a9] sm:$0xff] %vm1356_vm2, %v6559_v43  ;;  %v6561_v34 = vpop.f32.mrb[91].mxu0  ;;  %6823 = vmatmul.mubr.f32.gmra.mrb[196].mxu0 %v6226_v62  ;;  %v6248_v62 = vld [vmem:[%s25720_s11 + $0x670] sm:$0xff] }
 0xb27   :  { %6827 = vmatprep.mubr.f32.mxu0 %v6229_v9  ;;  %v6251_v9 = vld [vmem:[%s25720_s11 + $0x688] sm:$0xff] }
 0xb29   :  { %v6564_v53 = vpop.f32.mrb[92].mxu0 }
 0xb2a   :  { %7044 = vst.msk [vmem:[#allocation3 + $0x1b9] sm:$0xff] %vm1356_vm2, %v6564_v53  ;;  %v6566_v39 = vpop.f32.mrb[93].mxu0  ;;  %6828 = vmatmul.mubr.f32.gmra.mrb[198].mxu0 %v6228_v57  ;;  %v6253_v53 = vld [vmem:[%s25720_s11 + $0x698] sm:$0xff] }
 0xb2b   :  { %6832 = vmatprep.mubr.f32.mxu0 %v6231_v47  ;;  %v6250_v47 = vld [vmem:[%s25720_s11 + $0x680] sm:$0xff] }
 0xb2c   :  { %v7443_v39 = vld [vmem:[#allocation3 + $0x171] sm:$0xff] }
 0xb2d   :  { %v7219_v40 = vld [vmem:[#allocation3 + $0x1af] sm:$0x1]  ;;  %v6569_v18 = vpop.f32.mrb[94].mxu0 }
 0xb2e   :  { %7253 = vst.msk [vmem:[#allocation3 + $0x1b1] sm:$0x1] %vm2034_vm4, %v7219_v40  ;;  %v6571_v0 = vpop.f32.mrb[95].mxu0  ;;  %6833 = vmatmul.mubr.f32.gmra.mrb[200].mxu0 %v6230_v5 }
 0xb2f   :  { %7045 = vst.msk [vmem:[#allocation3 + $0x1c1] sm:$0xff] %vm1356_vm2, %v6569_v18  ;;  %6837 = vmatprep.mubr.f32.mxu0 %v6233_v50  ;;  %v7442_v0 = vld [vmem:[#allocation3 + $0x169] sm:$0xff] }
 0xb31   :  { %v7152_v10 = vld [vmem:[#allocation3 + $0x1ba] sm:$0x1]  ;;  %v6574_v31 = vpop.f32.mrb[96].mxu0 }
 0xb32   :  { %7186 = vst.msk [vmem:[#allocation3 + $0x1b8] sm:$0x1] %vm2034_vm4, %v7152_v10  ;;  %v6576_v32 = vpop.f32.mrb[97].mxu0  ;;  %6838 = vmatmul.mubr.f32.gmra.mrb[202].mxu0 %v6232_v12  ;;  %v6252_v10 = vld [vmem:[%s25720_s11 + $0x690] sm:$0xff] }
 0xb33   :  { %7046 = vst.msk [vmem:[#allocation3 + $0x1c9] sm:$0xff] %vm1356_vm2, %v6574_v31  ;;  %6842 = vmatprep.mubr.f32.mxu0 %v6235_v4  ;;  %v19205_v4 = vpack.c.bf16 %v7443_v39, %v7442_v0  ;;  %v6255_v31 = vld [vmem:[%s25720_s11 + $0x6a8] sm:$0xff] }
 0xb35   :  { %v6579_v61 = vpop.f32.mrb[98].mxu0 }
 0xb36   :  { %7047 = vst.msk [vmem:[#allocation3 + $0x1d1] sm:$0xff] %vm1356_vm2, %v6579_v61  ;;  %v6581_v36 = vpop.f32.mrb[99].mxu0  ;;  %6843 = vmatmul.mubr.f32.gmra.mrb[204].mxu0 %v6234_v35  ;;  %v6257_v61 = vld [vmem:[%s25720_s11 + $0x6b8] sm:$0xff] }
 0xb37   :  { %6847 = vmatprep.mubr.f32.mxu0 %v6237_v6  ;;  %v6254_v6 = vld [vmem:[%s25720_s11 + $0x6a0] sm:$0xff]  ;;  %v7445_v36 = vld [vmem:[#allocation3 + $0x181] sm:$0xff] }
 0xb39   :  { %v6584_v11 = vpop.f32.mrb[100].mxu0 }
 0xb3a   :  { %7048 = vst.msk [vmem:[#allocation3 + $0x1e1] sm:$0xff] %vm1356_vm2, %v6584_v11  ;;  %v6586_v22 = vpop.f32.mrb[101].mxu0  ;;  %6848 = vmatmul.mubr.f32.gmra.mrb[206].mxu0 %v6236_v58 }
 0xb3b   :  { %6852 = vmatprep.mubr.f32.mxu0 %v6239_v17 }
 0xb3d   :  { %v7220_v19 = vld [vmem:[#allocation3 + $0x1d7] sm:$0x1]  ;;  %v6589_v63 = vpop.f32.mrb[102].mxu0 }
 0xb3e   :  { %7254 = vst.msk [vmem:[#allocation3 + $0x1d9] sm:$0x1] %vm2034_vm4, %v7220_v19  ;;  %v6591_v28 = vpop.f32.mrb[103].mxu0  ;;  %6853 = vmatmul.mubr.f32.gmra.mrb[208].mxu0 %v6238_v37 }
 0xb3f   :  { %7049 = vst.msk [vmem:[#allocation3 + $0x1e9] sm:$0xff] %vm1356_vm2, %v6589_v63  ;;  %6857 = vmatprep.mubr.f32.mxu0 %v6241_v51  ;;  %v7444_v51 = vld [vmem:[#allocation3 + $0x179] sm:$0xff] }
 0xb40   :  { %v19211_v63 = vpack.c.bf16 %v7445_v36, %v7444_v51  ;;  %v6256_v28 = vld [vmem:[%s25720_s11 + $0x6b0] sm:$0xff] }
 0xb41   :  { %v7153_v48 = vld [vmem:[#allocation3 + $0x1e2] sm:$0x1]  ;;  %v6594_v16 = vpop.f32.mrb[104].mxu0 }
 0xb42   :  { %7187 = vst.msk [vmem:[#allocation3 + $0x1e0] sm:$0x1] %vm2034_vm4, %v7153_v48  ;;  %6858 = vmatmul.mubr.f32.gmra.mrb[210].mxu0 %v6240_v49  ;;  %v6596_v41 = vpop.f32.mrb[105].mxu0  ;;  %v7454_v26 = vld [vmem:[#allocation3 + $0x1e1] sm:$0xff]  ;;  %v6259_v49 = vld [vmem:[%s25720_s11 + $0x6c8] sm:$0xff] }
 0xb43   :  { %7050 = vst.msk [vmem:[#allocation3 + $0x1f1] sm:$0xff] %vm1356_vm2, %v6594_v16  ;;  %6862 = vmatprep.mubr.f32.mxu0 %v6243_v45  ;;  %v6258_v41 = vld [vmem:[%s25720_s11 + $0x6c0] sm:$0xff] }
 0xb45   :  { %v6599_v7 = vpop.f32.mrb[106].mxu0 }
 0xb46   :  { %v7455_v14 = vld [vmem:[#allocation3 + $0x1e9] sm:$0xff]  ;;  %7051 = vst.msk [vmem:[#allocation3 + $0x1f9] sm:$0xff] %vm1356_vm2, %v6599_v7  ;;  %6863 = vmatmul.mubr.f32.gmra.mrb[212].mxu0 %v6242_v23  ;;  %v6601_v46 = vpop.f32.mrb[107].mxu0 }
 0xb47   :  { %v19190_v15 = vpack.c.bf16 %v7455_v14, %v7454_v26  ;;  %6867 = vmatprep.mubr.f32.mxu0 %v6245_v25  ;;  %v6261_v23 = vld [vmem:[%s25720_s11 + $0x6d8] sm:$0xff]  ;;  %v7447_v25 = vld [vmem:[#allocation3 + $0x199] sm:$0xff] }
 0xb49   :  { %19192 = vmatprep.subr.msk.bf16.mxu0 %vm23653_vm5, %v19190_v15  ;;  %v6604_v54 = vpop.f32.mrb[108].mxu0  ;;  %v7446_v15 = vld [vmem:[#allocation3 + $0x191] sm:$0xff] }
 0xb4a   :  { %19195 = vmatpush3.bf16.xpose.msk.msra.mxu0 %vm23653_vm5, %v19193_v59  ;;  %7052 = vst.msk [vmem:[#allocation3 + $0x209] sm:$0xff] %vm1356_vm2, %v6604_v54  ;;  %v6606_v24 = vpop.f32.mrb[109].mxu0  ;;  %v7456_v27 = vld [vmem:[#allocation3 + $0x1f1] sm:$0xff]  ;;  %v19217_v46 = vpack.c.bf16 %v7447_v25, %v7446_v15  ;;  %v6260_v59 = vld [vmem:[%s25720_s11 + $0x6d0] sm:$0xff] }
 0xb4b   :  { %6868 = vmatmul.mubr.f32.gmra.mrb[214].mxu0 %v6244_v13  ;;  %v6263_v13 = vld [vmem:[%s25720_s11 + $0x6e8] sm:$0xff]  ;;  %v6262_v24 = vld [vmem:[%s25720_s11 + $0x6e0] sm:$0xff] }
 0xb4c   :  { %6872 = vmatprep.mubr.f32.mxu0 %v6247_v44  ;;  %v6278_v15 = vld [vmem:[%s25720_s11 + $0x760] sm:$0xff] }
 0xb4d   :  { %v7221_v52 = vld [vmem:[#allocation3 + $0x1ff] sm:$0x1]  ;;  %v6609_v20 = vpop.f32.mrb[110].mxu0 }
 0xb4e   :  { %v7457_v60 = vld [vmem:[#allocation3 + $0x1f9] sm:$0xff]  ;;  %7255 = vst.msk [vmem:[#allocation3 + $0x201] sm:$0x1] %vm2034_vm4, %v7221_v52  ;;  %v6611_v2 = vpop.f32.mrb[111].mxu0 }
 0xb4f   :  { %7053 = vst.msk [vmem:[#allocation3 + $0x211] sm:$0xff] %vm1356_vm2, %v6609_v20  ;;  %6873 = vmatmul.mubr.f32.gmra.mrb[216].mxu0 %v6246_v55  ;;  %v19196_v56 = vpack.c.bf16 %v7457_v60, %v7456_v27  ;;  %v6265_v55 = vld [vmem:[%s25720_s11 + $0x6f8] sm:$0xff] }
 0xb50   :  { %6877 = vmatprep.mubr.f32.mxu0 %v6249_v29  ;;  %v7449_v29 = vld [vmem:[#allocation3 + $0x1a9] sm:$0xff] }
 0xb51   :  { %19198 = vmatprep.subr.msk.bf16.mxu0 %vm23653_vm5, %v19196_v56  ;;  %v7154_v43 = vld [vmem:[#allocation3 + $0x20a] sm:$0x1]  ;;  %v6614_v34 = vpop.f32.mrb[112].mxu0  ;;  %v7448_v56 = vld [vmem:[#allocation3 + $0x1a1] sm:$0xff] }
 0xb52   :  { %19201 = vmatpush3.bf16.xpose.msk.msra.mxu0 %vm23653_vm5, %v19199_v1  ;;  %7188 = vst.msk [vmem:[#allocation3 + $0x208] sm:$0x1] %vm2034_vm4, %v7154_v43  ;;  %v6616_v57 = vpop.f32.mrb[113].mxu0  ;;  %v7458_v50 = vld [vmem:[#allocation3 + $0x209] sm:$0xff]  ;;  %v19223_v2 = vpack.c.bf16 %v7449_v29, %v7448_v56  ;;  %v6264_v1 = vld [vmem:[%s25720_s11 + $0x6f0] sm:$0xff]  ;;  %v6287_v56 = vld [vmem:[%s25720_s11 + $0x7a8] sm:$0xff] }
 0xb53   :  { %6878 = vmatmul.mubr.f32.gmra.mrb[218].mxu0 %v6248_v62  ;;  %7054 = vst.msk [vmem:[#allocation3 + $0x219] sm:$0xff] %vm1356_vm2, %v6614_v34  ;;  %v6267_v62 = vld [vmem:[%s25720_s11 + $0x708] sm:$0xff]  ;;  %v6266_v57 = vld [vmem:[%s25720_s11 + $0x700] sm:$0xff] }
 0xb54   :  { %6882 = vmatprep.mubr.f32.mxu0 %v6251_v9 }
 0xb55   :  { %v6619_v5 = vpop.f32.mrb[114].mxu0 }
 0xb56   :  { %v7459_v40 = vld [vmem:[#allocation3 + $0x211] sm:$0xff]  ;;  %7055 = vst.msk [vmem:[#allocation3 + $0x221] sm:$0xff] %vm1356_vm2, %v6619_v5  ;;  %v6621_v12 = vpop.f32.mrb[115].mxu0 }
 0xb57   :  { %6883 = vmatmul.mubr.f32.gmra.mrb[220].mxu0 %v6250_v47  ;;  %v19202_v18 = vpack.c.bf16 %v7459_v40, %v7458_v50  ;;  %v6269_v47 = vld [vmem:[%s25720_s11 + $0x718] sm:$0xff] }
 0xb58   :  { %6887 = vmatprep.mubr.f32.mxu0 %v6253_v53  ;;  %v7451_v53 = vld [vmem:[#allocation3 + $0x1c1] sm:$0xff] }
 0xb59   :  { %19204 = vmatprep.subr.msk.bf16.mxu0 %vm23653_vm5, %v19202_v18  ;;  %v6624_v32 = vpop.f32.mrb[116].mxu0  ;;  %v7450_v18 = vld [vmem:[#allocation3 + $0x1b9] sm:$0xff] }
 0xb5a   :  { %19207 = vmatpush3.bf16.xpose.msk.msra.mxu0 %vm23653_vm5, %v19205_v4  ;;  %7056 = vst.msk [vmem:[#allocation3 + $0x231] sm:$0xff] %vm1356_vm2, %v6624_v32  ;;  %v6626_v35 = vpop.f32.mrb[117].mxu0  ;;  %v7460_v11 = vld [vmem:[#allocation3 + $0x219] sm:$0xff]  ;;  %v19229_v12 = vpack.c.bf16 %v7451_v53, %v7450_v18 }
 0xb5b   :  { %6888 = vmatmul.mubr.f32.gmra.mrb[222].mxu0 %v6252_v10  ;;  %v6268_v4 = vld [vmem:[%s25720_s11 + $0x710] sm:$0xff]  ;;  %v6271_v10 = vld [vmem:[%s25720_s11 + $0x728] sm:$0xff]  ;;  %v6270_v35 = vld [vmem:[%s25720_s11 + $0x720] sm:$0xff] }
 0xb5c   :  { %6892 = vmatprep.mubr.f32.mxu0 %v6255_v31 }
 0xb5d   :  { %v7222_v58 = vld [vmem:[#allocation3 + $0x227] sm:$0x1]  ;;  %v6629_v17 = vpop.f32.mrb[118].mxu0 }
 0xb5e   :  { %v7461_v22 = vld [vmem:[#allocation3 + $0x221] sm:$0xff]  ;;  %7256 = vst.msk [vmem:[#allocation3 + $0x229] sm:$0x1] %vm2034_vm4, %v7222_v58  ;;  %v6631_v19 = vpop.f32.mrb[119].mxu0 }
 0xb5f   :  { %7057 = vst.msk [vmem:[#allocation3 + $0x239] sm:$0xff] %vm1356_vm2, %v6629_v17  ;;  %6893 = vmatmul.mubr.f32.gmra.mrb[224].mxu0 %v6254_v6  ;;  %v19208_v37 = vpack.c.bf16 %v7461_v22, %v7460_v11  ;;  %v6273_v6 = vld [vmem:[%s25720_s11 + $0x738] sm:$0xff] }
 0xb60   :  { %6897 = vmatprep.mubr.f32.mxu0 %v6257_v61  ;;  %v7453_v61 = vld [vmem:[#allocation3 + $0x1d1] sm:$0xff] }
 0xb61   :  { %19210 = vmatprep.subr.msk.bf16.mxu0 %vm23653_vm5, %v19208_v37  ;;  %v7155_v45 = vld [vmem:[#allocation3 + $0x232] sm:$0x1]  ;;  %v6634_v48 = vpop.f32.mrb[120].mxu0  ;;  %v7452_v37 = vld [vmem:[#allocation3 + $0x1c9] sm:$0xff] }
 0xb62   :  { %19213 = vmatpush3.bf16.xpose.msk.msra.mxu0 %vm23653_vm5, %v19211_v63  ;;  %7189 = vst.msk [vmem:[#allocation3 + $0x230] sm:$0x1] %vm2034_vm4, %v7155_v45  ;;  %v6636_v16 = vpop.f32.mrb[121].mxu0  ;;  %v7462_v7 = vld [vmem:[#allocation3 + $0x231] sm:$0xff]  ;;  %v19235_v19 = vpack.c.bf16 %v7453_v61, %v7452_v37  ;;  %v6272_v63 = vld [vmem:[%s25720_s11 + $0x730] sm:$0xff]  ;;  %v6293_v61 = vld [vmem:[%s25720_s11 + $0x7d8] sm:$0xff] }
 0xb63   :  { %6898 = vmatmul.mubr.f32.gmra.mrb[226].mxu0 %v6256_v28  ;;  %7058 = vst.msk [vmem:[#allocation3 + $0x241] sm:$0xff] %vm1356_vm2, %v6634_v48  ;;  %v6275_v28 = vld [vmem:[%s25720_s11 + $0x748] sm:$0xff]  ;;  %v6274_v16 = vld [vmem:[%s25720_s11 + $0x740] sm:$0xff] }
 0xb64   :  { %6902 = vmatprep.mubr.f32.mxu0 %v6259_v49 }
 0xb65   :  { %v6639_v21 = vpop.f32.mrb[122].mxu0 }
 0xb66   :  { %v7463_v26 = vld [vmem:[#allocation3 + $0x239] sm:$0xff]  ;;  %7059 = vst.msk [vmem:[#allocation3 + $0x249] sm:$0xff] %vm1356_vm2, %v6639_v21  ;;  %v6641_v33 = vpop.f32.mrb[123].mxu0 }
 0xb67   :  { %6903 = vmatmul.mubr.f32.gmra.mrb[228].mxu0 %v6258_v41  ;;  %v19214_v14 = vpack.c.bf16 %v7463_v26, %v7462_v7  ;;  %v6277_v41 = vld [vmem:[%s25720_s11 + $0x758] sm:$0xff]  ;;  %v6276_v21 = vld [vmem:[%s25720_s11 + $0x750] sm:$0xff]  ;;  %v6279_v7 = vld [vmem:[%s25720_s11 + $0x768] sm:$0xff] }
 0xb68   :  { %6907 = vmatprep.mubr.f32.mxu0 %v6261_v23  ;;  %v6281_v33 = vld [vmem:[%s25720_s11 + $0x778] sm:$0xff] }
 0xb69   :  { %19216 = vmatprep.subr.msk.bf16.mxu0 %vm23653_vm5, %v19214_v14  ;;  %v6644_v44 = vpop.f32.mrb[124].mxu0 }
 0xb6a   :  { %19219 = vmatpush3.bf16.xpose.msk.msra.mxu0 %vm23653_vm5, %v19217_v46  ;;  %7060 = vst.msk [vmem:[#allocation3 + $0x259] sm:$0xff] %vm1356_vm2, %v6644_v44  ;;  %v6646_v54 = vpop.f32.mrb[125].mxu0  ;;  %v7464_v20 = vld [vmem:[#allocation3 + $0x241] sm:$0xff] }
 0xb6b   :  { %6908 = vmatmul.mubr.f32.gmra.mrb[230].mxu0 %v6260_v59  ;;  %v6280_v44 = vld [vmem:[%s25720_s11 + $0x770] sm:$0xff]  ;;  %v6283_v54 = vld [vmem:[%s25720_s11 + $0x788] sm:$0xff] }
 0xb6c   :  { %6912 = vmatprep.mubr.f32.mxu0 %v6263_v13 }
 0xb6d   :  { %v7223_v30 = vld [vmem:[#allocation3 + $0x24f] sm:$0x1]  ;;  %v6649_v52 = vpop.f32.mrb[126].mxu0 }
 0xb6e   :  { %v7465_v27 = vld [vmem:[#allocation3 + $0x249] sm:$0xff]  ;;  %7257 = vst.msk [vmem:[#allocation3 + $0x251] sm:$0x1] %vm2034_vm4, %v7223_v30  ;;  %v6651_v8 = vpop.f32.mrb[127].mxu0 }
 0xb6f   :  { %7061 = vst.msk [vmem:[#allocation3 + $0x261] sm:$0xff] %vm1356_vm2, %v6649_v52  ;;  %6913 = vmatmul.mubr.f32.gmra.mrb[232].mxu0 %v6262_v24  ;;  %v19220_v60 = vpack.c.bf16 %v7465_v27, %v7464_v20  ;;  %v6282_v30 = vld [vmem:[%s25720_s11 + $0x780] sm:$0xff]  ;;  %v6285_v52 = vld [vmem:[%s25720_s11 + $0x798] sm:$0xff] }
 0xb70   :  { %6917 = vmatprep.mubr.f32.mxu0 %v6265_v55 }
 0xb71   :  { %19222 = vmatprep.subr.msk.bf16.mxu0 %vm23653_vm5, %v19220_v60  ;;  %v7156_v9 = vld [vmem:[#allocation3 + $0x25a] sm:$0x1]  ;;  %v6654_v43 = vpop.f32.mrb[128].mxu0  ;;  %v6284_v60 = vld [vmem:[%s25720_s11 + $0x790] sm:$0xff] }
 0xb72   :  { %19225 = vmatpush3.bf16.xpose.msk.msra.mxu0 %vm23653_vm5, %v19223_v2  ;;  %7190 = vst.msk [vmem:[#allocation3 + $0x258] sm:$0x1] %vm2034_vm4, %v7156_v9  ;;  %v6656_v34 = vpop.f32.mrb[129].mxu0  ;;  %v7466_v5 = vld [vmem:[#allocation3 + $0x259] sm:$0xff] }
 0xb73   :  { %6918 = vmatmul.mubr.f32.gmra.mrb[234].mxu0 %v6264_v1  ;;  %7062 = vst.msk [vmem:[#allocation3 + $0x269] sm:$0xff] %vm1356_vm2, %v6654_v43  ;;  %v6286_v1 = vld [vmem:[%s25720_s11 + $0x7a0] sm:$0xff] }
 0xb74   :  { %6922 = vmatprep.mubr.f32.mxu0 %v6267_v62  ;;  %v6289_v62 = vld [vmem:[%s25720_s11 + $0x7b8] sm:$0xff] }
 0xb75   :  { %v6659_v39 = vpop.f32.mrb[130].mxu0 }
 0xb76   :  { %v7467_v50 = vld [vmem:[#allocation3 + $0x261] sm:$0xff]  ;;  %7063 = vst.msk [vmem:[#allocation3 + $0x271] sm:$0xff] %vm1356_vm2, %v6659_v39  ;;  %v6661_v0 = vpop.f32.mrb[131].mxu0 }
 0xb77   :  { %6923 = vmatmul.mubr.f32.gmra.mrb[236].mxu0 %v6266_v57  ;;  %v19226_v40 = vpack.c.bf16 %v7467_v50, %v7466_v5  ;;  %v6288_v57 = vld [vmem:[%s25720_s11 + $0x7b0] sm:$0xff] }
 0xb78   :  { %6927 = vmatprep.mubr.f32.mxu0 %v6269_v47 }
 0xb79   :  { %19228 = vmatprep.subr.msk.bf16.mxu0 %vm23653_vm5, %v19226_v40  ;;  %v6664_v31 = vpop.f32.mrb[132].mxu0 }
 0xb7a   :  { %19231 = vmatpush3.bf16.xpose.msk.msra.mxu0 %vm23653_vm5, %v19229_v12  ;;  %7064 = vst.msk [vmem:[#allocation3 + $0x281] sm:$0xff] %vm1356_vm2, %v6664_v31  ;;  %v6666_v32 = vpop.f32.mrb[133].mxu0  ;;  %v7468_v58 = vld [vmem:[#allocation3 + $0x269] sm:$0xff] }
 0xb7b   :  { %6928 = vmatmul.mubr.f32.gmra.mrb[238].mxu0 %v6268_v4  ;;  %v6290_v31 = vld [vmem:[%s25720_s11 + $0x7c0] sm:$0xff] }
 0xb7c   :  { %6932 = vmatprep.mubr.f32.mxu0 %v6271_v10  ;;  %v6291_v10 = vld [vmem:[%s25720_s11 + $0x7c8] sm:$0xff] }
 0xb7d   :  { %v7224_v36 = vld [vmem:[#allocation3 + $0x277] sm:$0x1]  ;;  %v6669_v11 = vpop.f32.mrb[134].mxu0 }
 0xb7e   :  { %v7469_v17 = vld [vmem:[#allocation3 + $0x271] sm:$0xff]  ;;  %7258 = vst.msk [vmem:[#allocation3 + $0x279] sm:$0x1] %vm2034_vm4, %v7224_v36  ;;  %v6671_v51 = vpop.f32.mrb[135].mxu0  ;;  %v6292_v36 = vld [vmem:[%s25720_s11 + $0x7d0] sm:$0xff] }
 0xb7f   :  { %6933 = vmatmul.mubr.f32.gmra.mrb[240].mxu0 %v6270_v35  ;;  %v19232_v22 = vpack.c.bf16 %v7469_v17, %v7468_v58  ;;  %7065 = vst.msk [vmem:[#allocation3 + $0x289] sm:$0xff] %vm1356_vm2, %v6669_v11  ;;  %v6295_v11 = vld [vmem:[%s25720_s11 + $0x7e8] sm:$0xff] }
 0xb80   :  { %6937 = vmatprep.mubr.f32.mxu0 %v6273_v6 }
 0xb81   :  { %19234 = vmatprep.subr.msk.bf16.mxu0 %vm23653_vm5, %v19232_v22  ;;  %v7157_v49 = vld [vmem:[#allocation3 + $0x282] sm:$0x1]  ;;  %v6674_v45 = vpop.f32.mrb[136].mxu0  ;;  %v6294_v22 = vld [vmem:[%s25720_s11 + $0x7e0] sm:$0xff] }
 0xb82   :  { %19237 = vmatpush3.bf16.xpose.msk.msra.mxu0 %vm23653_vm5, %v19235_v19  ;;  %7191 = vst.msk [vmem:[#allocation3 + $0x280] sm:$0x1] %vm2034_vm4, %v7157_v49  ;;  %v6676_v48 = vpop.f32.mrb[137].mxu0  ;;  %v6297_v19 = vld [vmem:[%s25720_s11 + $0x7f8] sm:$0xff] }
 0xb83   :  { %6938 = vmatmul.mubr.f32.gmra.mrb[242].mxu0 %v6272_v63  ;;  %7066 = vst.msk [vmem:[#allocation3 + $0x291] sm:$0xff] %vm1356_vm2, %v6674_v45  ;;  %v6296_v63 = vld [vmem:[%s25720_s11 + $0x7f0] sm:$0xff] }
 0xb84   :  { %6942 = vmatprep.mubr.f32.mxu0 %v6275_v28 }
 0xb85   :  { %v6679_v23 = vpop.f32.mrb[138].mxu0 }
 0xb86   :  { %7067 = vst.msk [vmem:[#allocation3 + $0x299] sm:$0xff] %vm1356_vm2, %v6679_v23  ;;  %v6681_v25 = vpop.f32.mrb[139].mxu0  ;;  %v7471_v23 = vld [vmem:[#allocation3 + $0x289] sm:$0xff] }
 0xb87   :  { %6943 = vmatmul.mubr.f32.gmra.mrb[244].mxu0 %v6274_v16 }
 0xb88   :  { %6947 = vmatprep.mubr.f32.mxu0 %v6277_v41 }
 0xb89   :  { %v6684_v26 = vpop.f32.mrb[140].mxu0 }
 0xb8a   :  { %7068 = vst.msk [vmem:[#allocation3 + $0x2a9] sm:$0xff] %vm1356_vm2, %v6684_v26  ;;  %v6686_v14 = vpop.f32.mrb[141].mxu0 }
 0xb8b   :  { %6948 = vmatmul.mubr.f32.gmra.mrb[246].mxu0 %v6276_v21  ;;  %v7470_v14 = vld [vmem:[#allocation3 + $0x281] sm:$0xff] }
 0xb8c   :  { %6952 = vmatprep.mubr.f32.mxu0 %v6279_v7 }
 0xb8d   :  { %v7225_v46 = vld [vmem:[#allocation3 + $0x29f] sm:$0x1]  ;;  %v6689_v59 = vpop.f32.mrb[142].mxu0 }
 0xb8e   :  { %7259 = vst.msk [vmem:[#allocation3 + $0x2a1] sm:$0x1] %vm2034_vm4, %v7225_v46  ;;  %v6691_v13 = vpop.f32.mrb[143].mxu0 }
 0xb8f   :  { %6953 = vmatmul.mubr.f32.gmra.mrb[248].mxu0 %v6278_v15  ;;  %7069 = vst.msk [vmem:[#allocation3 + $0x2b1] sm:$0xff] %vm1356_vm2, %v6689_v59  ;;  %v7473_v13 = vld [vmem:[#allocation3 + $0x299] sm:$0xff] }
 0xb90   :  { %6957 = vmatprep.mubr.f32.mxu0 %v6281_v33  ;;  %v19241_v33 = vpack.c.bf16 %v7471_v23, %v7470_v14 }
 0xb91   :  { %v7158_v24 = vld [vmem:[#allocation3 + $0x2aa] sm:$0x1]  ;;  %v6694_v55 = vpop.f32.mrb[144].mxu0 }
 0xb92   :  { %7192 = vst.msk [vmem:[#allocation3 + $0x2a8] sm:$0x1] %vm2034_vm4, %v7158_v24  ;;  %v6696_v29 = vpop.f32.mrb[145].mxu0 }
 0xb93   :  { %6958 = vmatmul.mubr.f32.gmra.mrb[250].mxu0 %v6280_v44  ;;  %7070 = vst.msk [vmem:[#allocation3 + $0x2b9] sm:$0xff] %vm1356_vm2, %v6694_v55 }
 0xb94   :  { %6962 = vmatprep.mubr.f32.mxu0 %v6283_v54 }
 0xb95   :  { %v6699_v20 = vpop.f32.mrb[146].mxu0 }
 0xb96   :  { %7071 = vst.msk [vmem:[#allocation3 + $0x2c1] sm:$0xff] %vm1356_vm2, %v6699_v20  ;;  %v6701_v27 = vpop.f32.mrb[147].mxu0 }
 0xb97   :  { %6963 = vmatmul.mubr.f32.gmra.mrb[252].mxu0 %v6282_v30  ;;  %v7472_v30 = vld [vmem:[#allocation3 + $0x291] sm:$0xff] }
 0xb98   :  { %6967 = vmatprep.mubr.f32.mxu0 %v6285_v52  ;;  %v19247_v20 = vpack.c.bf16 %v7473_v13, %v7472_v30  ;;  %v7293_v30 = vld [vmem:[#allocation3 + $0xa0] sm:$0xff] }
 0xb99   :  { %v6704_v8 = vpop.f32.mrb[148].mxu0 }
 0xb9a   :  { %7072 = vst.msk [vmem:[#allocation3 + $0x2d1] sm:$0xff] %vm1356_vm2, %v6704_v8  ;;  %v6706_v2 = vpop.f32.mrb[149].mxu0  ;;  %v7475_v8 = vld [vmem:[#allocation3 + $0x2b1] sm:$0xff] }
 0xb9b   :  { %6968 = vmatmul.mubr.f32.gmra.mrb[254].mxu0 %v6284_v60 }
 0xb9c   :  { %6972 = vmatprep.mubr.f32.mxu0 %v6287_v56 }
 0xb9d   :  { %v7226_v9 = vld [vmem:[#allocation3 + $0x2c7] sm:$0x1]  ;;  %v6709_v43 = vpop.f32.mrb[150].mxu0 }
 0xb9e   :  { %7260 = vst.msk [vmem:[#allocation3 + $0x2c9] sm:$0x1] %vm2034_vm4, %v7226_v9  ;;  %v6711_v34 = vpop.f32.mrb[151].mxu0 }
 0xb9f   :  { %6973 = vmatmul.mubr.f32.gmra.mrb[0].mxu0 %v6286_v1  ;;  %7073 = vst.msk [vmem:[#allocation3 + $0x2d9] sm:$0xff] %vm1356_vm2, %v6709_v43  ;;  %v7474_v43 = vld [vmem:[#allocation3 + $0x2a9] sm:$0xff] }
 0xba0   :  { %6977 = vmatprep.mubr.f32.mxu0 %v6289_v62 }
 0xba1   :  { %v7159_v47 = vld [vmem:[#allocation3 + $0x2d2] sm:$0x1]  ;;  %v6714_v53 = vpop.f32.mrb[152].mxu0 }
 0xba2   :  { %7193 = vst.msk [vmem:[#allocation3 + $0x2d0] sm:$0x1] %vm2034_vm4, %v7159_v47  ;;  %v6716_v39 = vpop.f32.mrb[153].mxu0 }
 0xba3   :  { %6978 = vmatmul.mubr.f32.gmra.mrb[2].mxu0 %v6288_v57  ;;  %7074 = vst.msk [vmem:[#allocation3 + $0x2e1] sm:$0xff] %vm1356_vm2, %v6714_v53  ;;  %v19253_v57 = vpack.c.bf16 %v7475_v8, %v7474_v43  ;;  %v7477_v39 = vld [vmem:[#allocation3 + $0x2c1] sm:$0xff] }
 0xba4   :  { %6982 = vmatprep.mubr.f32.mxu0 %v6291_v10 }
 0xba5   :  { %v6719_v5 = vpop.f32.mrb[154].mxu0 }
 0xba6   :  { %7075 = vst.msk [vmem:[#allocation3 + $0x2e9] sm:$0xff] %vm1356_vm2, %v6719_v5  ;;  %v6721_v50 = vpop.f32.mrb[155].mxu0 }
 0xba7   :  { %6983 = vmatmul.mubr.f32.gmra.mrb[4].mxu0 %v6290_v31 }
 0xba8   :  { %6987 = vmatprep.mubr.f32.mxu0 %v6293_v61 }
 0xba9   :  { %v6724_v40 = vpop.f32.mrb[156].mxu0 }
 0xbaa   :  { %7076 = vst.msk [vmem:[#allocation3 + $0x2f9] sm:$0xff] %vm1356_vm2, %v6724_v40  ;;  %v6726_v18 = vpop.f32.mrb[157].mxu0 }
 0xbab   :  { %6988 = vmatmul.mubr.f32.gmra.mrb[6].mxu0 %v6292_v36 }
 0xbac   :  { %6992 = vmatprep.mubr.f32.mxu0 %v6295_v11  ;;  %v7478_v11 = vld [vmem:[#allocation3 + $0x2d1] sm:$0xff] }
 0xbad   :  { %v7227_v0 = vld [vmem:[#allocation3 + $0x2ef] sm:$0x1]  ;;  %v6729_v12 = vpop.f32.mrb[158].mxu0 }
 0xbae   :  { %7261 = vst.msk [vmem:[#allocation3 + $0x2f1] sm:$0x1] %vm2034_vm4, %v7227_v0  ;;  %v6731_v4 = vpop.f32.mrb[159].mxu0 }
 0xbaf   :  { %7077 = vst.msk [vmem:[#allocation3 + $0x301] sm:$0xff] %vm1356_vm2, %v6729_v12  ;;  %6993 = vmatmul.mubr.f32.gmra.mrb[8].mxu0 %v6294_v22  ;;  %v7476_v12 = vld [vmem:[#allocation3 + $0x2b9] sm:$0xff] }
 0xbb0   :  { %6997 = vmatprep.mubr.f32.mxu0 %v6297_v19  ;;  %v19259_v10 = vpack.c.bf16 %v7477_v39, %v7476_v12 }
 0xbb1   :  { %v7160_v32 = vld [vmem:[#allocation3 + $0x2fa] sm:$0x1]  ;;  %v6734_v35 = vpop.f32.mrb[160].mxu0 }
 0xbb2   :  { %7194 = vst.msk [vmem:[#allocation3 + $0x2f8] sm:$0x1] %vm2034_vm4, %v7160_v32  ;;  %v6736_v6 = vpop.f32.mrb[161].mxu0  ;;  %v7482_v13 = vld [vmem:[#allocation3 + $0x2f9] sm:$0xff] }
 0xbb3   :  { %7078 = vst.msk [vmem:[#allocation3 + $0x309] sm:$0xff] %vm1356_vm2, %v6734_v35  ;;  %6998 = vmatmul.mubr.f32.gmra.mrb[10].mxu0 %v6296_v63  ;;  %v7479_v6 = vld [vmem:[#allocation3 + $0x2d9] sm:$0xff]  ;;  %v7481_v63 = vld [vmem:[#allocation3 + $0x2e9] sm:$0xff] }
 0xbb4   :  { %17072 = vmatprep.mubr.msk.f32.mxu0 %vm1356_vm2, %v23944_v3 }
 0xbb5   :  { %v6739_v58 = vpop.f32.mrb[162].mxu0 }
 0xbb6   :  { %7079 = vst.msk [vmem:[#allocation3 + $0x311] sm:$0xff] %vm1356_vm2, %v6739_v58  ;;  %v6741_v17 = vpop.f32.mrb[163].mxu0  ;;  %v7483_v14 = vld [vmem:[#allocation3 + $0x301] sm:$0xff] }
 0xbb7   :  { %17073 = vmatmul.mubr.msk.f32.vlgmr.msra.gmra.mrb[12].mxu0 %vm1356_vm2, %v23944_v3 }
 0xbb8   :  { %17140 = vmatprep.mubr.msk.f32.mxu0 %vm1356_vm2, %v23944_v3 }
 0xbb9   :  { %v6744_v37 = vpop.f32.mrb[164].mxu0 }
 0xbba   :  { %7080 = vst.msk [vmem:[#allocation3 + $0x321] sm:$0xff] %vm1356_vm2, %v6744_v37  ;;  %v6746_v51 = vpop.f32.mrb[165].mxu0  ;;  %v19265_v37 = vpack.c.bf16 %v7479_v6, %v7478_v11  ;;  %v7484_v8 = vld [vmem:[#allocation3 + $0x309] sm:$0xff] }
 0xbbd   :  { %v7228_v28 = vld [vmem:[#allocation3 + $0x317] sm:$0x1]  ;;  %v6749_v49 = vpop.f32.mrb[166].mxu0 }
 0xbbe   :  { %7262 = vst.msk [vmem:[#allocation3 + $0x319] sm:$0x1] %vm2034_vm4, %v7228_v28  ;;  %v6751_v45 = vpop.f32.mrb[167].mxu0 }
 0xbbf   :  { %7081 = vst.msk [vmem:[#allocation3 + $0x329] sm:$0xff] %vm1356_vm2, %v6749_v49 }
 0xbc1   :  { %v7161_v48 = vld [vmem:[#allocation3 + $0x322] sm:$0x1]  ;;  %v6754_v16 = vpop.f32.mrb[168].mxu0 }
 0xbc2   :  { %7195 = vst.msk [vmem:[#allocation3 + $0x320] sm:$0x1] %vm2034_vm4, %v7161_v48  ;;  %v6756_v41 = vpop.f32.mrb[169].mxu0  ;;  %v7486_v21 = vld [vmem:[#allocation3 + $0x321] sm:$0xff] }
 0xbc3   :  { %7082 = vst.msk [vmem:[#allocation3 + $0x331] sm:$0xff] %vm1356_vm2, %v6754_v16  ;;  %v7480_v41 = vld [vmem:[#allocation3 + $0x2e1] sm:$0xff] }
 0xbc5   :  { %v6759_v25 = vpop.f32.mrb[170].mxu0 }
 0xbc6   :  { %v7487_v7 = vld [vmem:[#allocation3 + $0x329] sm:$0xff]  ;;  %7083 = vst.msk [vmem:[#allocation3 + $0x339] sm:$0xff] %vm1356_vm2, %v6759_v25  ;;  %v6761_v15 = vpop.f32.mrb[171].mxu0  ;;  %v19271_v25 = vpack.c.bf16 %v7481_v63, %v7480_v41 }
 0xbc7   :  { %v19238_v26 = vpack.c.bf16 %v7487_v7, %v7486_v21 }
 0xbc9   :  { %19240 = vmatprep.subr.msk.bf16.mxu1 %vm23653_vm5, %v19238_v26  ;;  %v6764_v46 = vpop.f32.mrb[172].mxu0 }
 0xbca   :  { %19243 = vmatpush3.bf16.xpose.msk.msra.mxu1 %vm23653_vm5, %v19241_v33  ;;  %7084 = vst.msk [vmem:[#allocation3 + $0x349] sm:$0xff] %vm1356_vm2, %v6764_v46  ;;  %v6766_v59 = vpop.f32.mrb[173].mxu0  ;;  %v7488_v24 = vld [vmem:[#allocation3 + $0x331] sm:$0xff] }
 0xbcd   :  { %v7229_v44 = vld [vmem:[#allocation3 + $0x33f] sm:$0x1]  ;;  %v6769_v54 = vpop.f32.mrb[174].mxu0 }
 0xbce   :  { %v7489_v55 = vld [vmem:[#allocation3 + $0x339] sm:$0xff]  ;;  %7263 = vst.msk [vmem:[#allocation3 + $0x341] sm:$0x1] %vm2034_vm4, %v7229_v44  ;;  %v6771_v52 = vpop.f32.mrb[175].mxu0 }
 0xbcf   :  { %7085 = vst.msk [vmem:[#allocation3 + $0x351] sm:$0xff] %vm1356_vm2, %v6769_v54  ;;  %v19244_v29 = vpack.c.bf16 %v7489_v55, %v7488_v24  ;;  %v19277_v54 = vpack.c.bf16 %v7483_v14, %v7482_v13  ;;  %v7283_v14 = vld [vmem:[#allocation3 + $0x38] sm:$0xff] }
 0xbd1   :  { %19246 = vmatprep.subr.msk.bf16.mxu1 %vm23653_vm5, %v19244_v29  ;;  %v7162_v27 = vld [vmem:[#allocation3 + $0x34a] sm:$0x1]  ;;  %v6774_v60 = vpop.f32.mrb[176].mxu0  ;;  %v7485_v29 = vld [vmem:[#allocation3 + $0x311] sm:$0xff] }
 0xbd2   :  { %19249 = vmatpush3.bf16.xpose.msk.msra.mxu1 %vm23653_vm5, %v19247_v20  ;;  %7196 = vst.msk [vmem:[#allocation3 + $0x348] sm:$0x1] %vm2034_vm4, %v7162_v27  ;;  %v6776_v56 = vpop.f32.mrb[177].mxu0  ;;  %v7490_v1 = vld [vmem:[#allocation3 + $0x349] sm:$0xff] }
 0xbd3   :  { %7086 = vst.msk [vmem:[#allocation3 + $0x359] sm:$0xff] %vm1356_vm2, %v6774_v60 }
 0xbd5   :  { %v6779_v2 = vpop.f32.mrb[178].mxu0 }
 0xbd6   :  { %v7491_v62 = vld [vmem:[#allocation3 + $0x351] sm:$0xff]  ;;  %7087 = vst.msk [vmem:[#allocation3 + $0x361] sm:$0xff] %vm1356_vm2, %v6779_v2  ;;  %v6781_v34 = vpop.f32.mrb[179].mxu0 }
 0xbd7   :  { %v19250_v9 = vpack.c.bf16 %v7491_v62, %v7490_v1  ;;  %v19283_v1 = vpack.c.bf16 %v7485_v29, %v7484_v8  ;;  %v7294_v62 = vld [vmem:[#allocation3 + $0xa8] sm:$0xff] }
 0xbd9   :  { %19252 = vmatprep.subr.msk.bf16.mxu1 %vm23653_vm5, %v19250_v9  ;;  %v6784_v47 = vpop.f32.mrb[180].mxu0  ;;  %v19334_v9 = vpack.c.bf16 %v7294_v62, %v7293_v30  ;;  %v7286_v30 = vld [vmem:[#allocation3 + $0x58] sm:$0xff] }
 0xbda   :  { %19255 = vmatpush3.bf16.xpose.msk.msra.mxu1 %vm23653_vm5, %v19253_v57  ;;  %7088 = vst.msk [vmem:[#allocation3 + $0x371] sm:$0xff] %vm1356_vm2, %v6784_v47  ;;  %v6786_v53 = vpop.f32.mrb[181].mxu0  ;;  %v7492_v40 = vld [vmem:[#allocation3 + $0x359] sm:$0xff] }
 0xbdb   :  { %v7277_v47 = vld [vmem:[#allocation3] sm:$0xff]  ;;  %v7296_v53 = vld [vmem:[#allocation3 + $0xb8] sm:$0xff] }
 0xbdc   :  { %v7305_v62 = vld [vmem:[#allocation3 + $0x118] sm:$0xff] }
 0xbdd   :  { %v7230_v5 = vld [vmem:[#allocation3 + $0x367] sm:$0x1]  ;;  %v6789_v50 = vpop.f32.mrb[182].mxu0 }
 0xbde   :  { %v7493_v18 = vld [vmem:[#allocation3 + $0x361] sm:$0xff]  ;;  %7264 = vst.msk [vmem:[#allocation3 + $0x369] sm:$0x1] %vm2034_vm4, %v7230_v5  ;;  %v6791_v4 = vpop.f32.mrb[183].mxu0 }
 0xbdf   :  { %7089 = vst.msk [vmem:[#allocation3 + $0x379] sm:$0xff] %vm1356_vm2, %v6789_v50  ;;  %v19256_v0 = vpack.c.bf16 %v7493_v18, %v7492_v40  ;;  %v7278_v5 = vld [vmem:[#allocation3 + $0x8] sm:$0xff]  ;;  %v24247_v40 = vld [vmem:[%s25723_s7] sm:$0x3] }
 0xbe0   :  { %v19337_v18 = vpack.c.bf16 %v7278_v5, %v7277_v47  ;;  %v7306_v47 = vld [vmem:[#allocation3 + $0x120] sm:$0xff] }
 0xbe1   :  { %19258 = vmatprep.subr.msk.bf16.mxu1 %vm23653_vm5, %v19256_v0  ;;  %v7163_v31 = vld [vmem:[#allocation3 + $0x372] sm:$0x1]  ;;  %v6794_v32 = vpop.f32.mrb[184].mxu0 }
 0xbe2   :  { %19261 = vmatpush3.bf16.xpose.msk.msra.mxu1 %vm23653_vm5, %v19259_v10  ;;  %7197 = vst.msk [vmem:[#allocation3 + $0x370] sm:$0x1] %vm2034_vm4, %v7163_v31  ;;  %v6796_v35 = vpop.f32.mrb[185].mxu0  ;;  %v7494_v36 = vld [vmem:[#allocation3 + $0x371] sm:$0xff] }
 0xbe3   :  { %7090 = vst.msk [vmem:[#allocation3 + $0x381] sm:$0xff] %vm1356_vm2, %v6794_v32  ;;  %v7295_v0 = vld [vmem:[#allocation3 + $0xb0] sm:$0xff]  ;;  %v7280_v31 = vld [vmem:[#allocation3 + $0x18] sm:$0xff]  ;;  %v7297_v32 = vld [vmem:[#allocation3 + $0xc8] sm:$0xff] }
 0xbe4   :  { %v19340_v12 = vpack.c.bf16 %v7296_v53, %v7295_v0  ;;  %v19370_v53 = vpack.c.bf16 %v7306_v47, %v7305_v62  ;;  %v7362_v62 = vld [vmem:[#allocation3 + $0x350] sm:$0xff] }
 0xbe5   :  { %v6799_v61 = vpop.f32.mrb[186].mxu0 }
 0xbe6   :  { %v7495_v58 = vld [vmem:[#allocation3 + $0x379] sm:$0xff]  ;;  %7091 = vst.msk [vmem:[#allocation3 + $0x389] sm:$0xff] %vm1356_vm2, %v6799_v61  ;;  %v6801_v22 = vpop.f32.mrb[187].mxu0  ;;  %v7279_v61 = vld [vmem:[#allocation3 + $0x10] sm:$0xff] }
 0xbe7   :  { %v19262_v17 = vpack.c.bf16 %v7495_v58, %v7494_v36  ;;  %v19343_v36 = vpack.c.bf16 %v7280_v31, %v7279_v61  ;;  %v7298_v58 = vld [vmem:[#allocation3 + $0xd0] sm:$0xff] }
 0xbe9   :  { %19264 = vmatprep.subr.msk.bf16.mxu1 %vm23653_vm5, %v19262_v17  ;;  %v6804_v51 = vpop.f32.mrb[188].mxu0  ;;  %v19346_v17 = vpack.c.bf16 %v7298_v58, %v7297_v32  ;;  %v7307_v32 = vld [vmem:[#allocation3 + $0x128] sm:$0xff] }
 0xbea   :  { %19267 = vmatpush3.bf16.xpose.msk.msra.mxu1 %vm23653_vm5, %v19265_v37  ;;  %7092 = vst.msk [vmem:[#allocation3 + $0x399] sm:$0xff] %vm1356_vm2, %v6804_v51  ;;  %v6806_v19 = vpop.f32.mrb[189].mxu0  ;;  %v7496_v45 = vld [vmem:[#allocation3 + $0x381] sm:$0xff] }
 0xbeb   :  { %v7281_v51 = vld [vmem:[#allocation3 + $0x28] sm:$0xff]  ;;  %v7300_v19 = vld [vmem:[#allocation3 + $0xe0] sm:$0xff] }
 0xbed   :  { %v7231_v28 = vld [vmem:[#allocation3 + $0x38f] sm:$0x1]  ;;  %v6809_v49 = vpop.f32.mrb[190].mxu0 }
 0xbee   :  { %v7497_v48 = vld [vmem:[#allocation3 + $0x389] sm:$0xff]  ;;  %7265 = vst.msk [vmem:[#allocation3 + $0x391] sm:$0x1] %vm2034_vm4, %v7231_v28  ;;  %v6811_v23 = vpop.f32.mrb[191].mxu0 }
 0xbef   :  { %7093 = vst.msk [vmem:[#allocation3 + $0x3a1] sm:$0xff] %vm1356_vm2, %v6809_v49  ;;  %v19268_v16 = vpack.c.bf16 %v7497_v48, %v7496_v45  ;;  %v7282_v28 = vld [vmem:[#allocation3 + $0x30] sm:$0xff]  ;;  %v7299_v48 = vld [vmem:[#allocation3 + $0xd8] sm:$0xff] }
 0xbf0   :  { %v19349_v45 = vpack.c.bf16 %v7282_v28, %v7281_v51  ;;  %v7358_v51 = vld [vmem:[#allocation3 + $0x328] sm:$0xff] }
 0xbf1   :  { %19270 = vmatprep.subr.msk.bf16.mxu1 %vm23653_vm5, %v19268_v16  ;;  %v7164_v21 = vld [vmem:[#allocation3 + $0x39a] sm:$0x1]  ;;  %v6814_v7 = vpop.f32.mrb[192].mxu0  ;;  %v19352_v16 = vpack.c.bf16 %v7300_v19, %v7299_v48  ;;  %v7341_v48 = vld [vmem:[#allocation3 + $0x280] sm:$0xff] }
 0xbf2   :  { %19273 = vmatpush3.bf16.xpose.msk.msra.mxu1 %vm23653_vm5, %v19271_v25  ;;  %7198 = vst.msk [vmem:[#allocation3 + $0x398] sm:$0x1] %vm2034_vm4, %v7164_v21  ;;  %v6816_v26 = vpop.f32.mrb[193].mxu0  ;;  %v7498_v33 = vld [vmem:[#allocation3 + $0x399] sm:$0xff]  ;;  %v7301_v21 = vld [vmem:[#allocation3 + $0xf0] sm:$0xff] }
 0xbf3   :  { %7094 = vst.msk [vmem:[#allocation3 + $0x3a9] sm:$0xff] %vm1356_vm2, %v6814_v7  ;;  %v7284_v25 = vld [vmem:[#allocation3 + $0x40] sm:$0xff] }
 0xbf5   :  { %v6819_v15 = vpop.f32.mrb[194].mxu0 }
 0xbf6   :  { %v7499_v46 = vld [vmem:[#allocation3 + $0x3a1] sm:$0xff]  ;;  %7095 = vst.msk [vmem:[#allocation3 + $0x3b1] sm:$0xff] %vm1356_vm2, %v6819_v15  ;;  %v6821_v44 = vpop.f32.mrb[195].mxu0 }
 0xbf7   :  { %v19274_v59 = vpack.c.bf16 %v7499_v46, %v7498_v33  ;;  %v19355_v33 = vpack.c.bf16 %v7284_v25, %v7283_v14  ;;  %v7302_v46 = vld [vmem:[#allocation3 + $0xf8] sm:$0xff] }
 0xbf8   :  { %v7360_v25 = vld [vmem:[#allocation3 + $0x338] sm:$0xff] }
 0xbf9   :  { %19276 = vmatprep.subr.msk.bf16.mxu1 %vm23653_vm5, %v19274_v59  ;;  %v6824_v24 = vpop.f32.mrb[196].mxu0  ;;  %v19358_v59 = vpack.c.bf16 %v7302_v46, %v7301_v21  ;;  %v7359_v46 = vld [vmem:[#allocation3 + $0x330] sm:$0xff] }
 0xbfa   :  { %19279 = vmatpush3.bf16.xpose.msk.msra.mxu1 %vm23653_vm5, %v19277_v54  ;;  %7096 = vst.msk [vmem:[#allocation3 + $0x3c1] sm:$0xff] %vm1356_vm2, %v6824_v24  ;;  %v6826_v55 = vpop.f32.mrb[197].mxu0  ;;  %v7500_v20 = vld [vmem:[#allocation3 + $0x3a9] sm:$0xff] }
 0xbfb   :  { %v7285_v24 = vld [vmem:[#allocation3 + $0x50] sm:$0xff]  ;;  %v7304_v55 = vld [vmem:[#allocation3 + $0x108] sm:$0xff] }
 0xbfd   :  { %v7232_v52 = vld [vmem:[#allocation3 + $0x3b7] sm:$0x1]  ;;  %v6829_v60 = vpop.f32.mrb[198].mxu0 }
 0xbfe   :  { %v7501_v27 = vld [vmem:[#allocation3 + $0x3b1] sm:$0xff]  ;;  %7266 = vst.msk [vmem:[#allocation3 + $0x3b9] sm:$0x1] %vm2034_vm4, %v7232_v52  ;;  %v6831_v2 = vpop.f32.mrb[199].mxu0 }
 0xbff   :  { %v19280_v56 = vpack.c.bf16 %v7501_v27, %v7500_v20  ;;  %7097 = vst.msk [vmem:[#allocation3 + $0x3c9] sm:$0xff] %vm1356_vm2, %v6829_v60  ;;  %v19361_v20 = vpack.c.bf16 %v7286_v30, %v7285_v24  ;;  %v7303_v27 = vld [vmem:[#allocation3 + $0x100] sm:$0xff]  ;;  %v7288_v2 = vld [vmem:[#allocation3 + $0x68] sm:$0xff]  ;;  %v7344_v24 = vld [vmem:[#allocation3 + $0x298] sm:$0xff] }
 0xc00   :  { %v19364_v60 = vpack.c.bf16 %v7304_v55, %v7303_v27  ;;  %v7361_v55 = vld [vmem:[#allocation3 + $0x348] sm:$0xff] }
 0xc01   :  { %19282 = vmatprep.subr.msk.bf16.mxu1 %vm23653_vm5, %v19280_v56  ;;  %v7165_v43 = vld [vmem:[#allocation3 + $0x3c2] sm:$0x1]  ;;  %v6834_v34 = vpop.f32.mrb[200].mxu0 }
 0xc02   :  { %19285 = vmatpush3.bf16.xpose.msk.msra.mxu1 %vm23653_vm5, %v19283_v1  ;;  %7199 = vst.msk [vmem:[#allocation3 + $0x3c0] sm:$0x1] %vm2034_vm4, %v7165_v43  ;;  %v6836_v57 = vpop.f32.mrb[201].mxu0  ;;  %v7287_v43 = vld [vmem:[#allocation3 + $0x60] sm:$0xff] }
 0xc03   :  { %19336 = vmatprep.subr.msk.bf16.mxu1 %vm23653_vm5, %v19334_v9  ;;  %7098 = vst.msk [vmem:[#allocation3 + $0x3d1] sm:$0xff] %vm1356_vm2, %v6834_v34  ;;  %v19367_v57 = vpack.c.bf16 %v7288_v2, %v7287_v43 }
 0xc05   :  { %v6839_v39 = vpop.f32.mrb[202].mxu0 }
 0xc06   :  { %7099 = vst.msk [vmem:[#allocation3 + $0x3d9] sm:$0xff] %vm1356_vm2, %v6839_v39  ;;  %v6841_v50 = vpop.f32.mrb[203].mxu0 }
 0xc09   :  { %17107 = vmatmul.mubr.msk.f32.vlgmr.msra.gmra.mrb[78].mxu1 %vm1356_vm2, %v23944_v3  ;;  %v6844_v4 = vpop.f32.mrb[204].mxu0 }
 0xc0a   :  { %19339 = vmatpush3.bf16.xpose.msk.msra.mxu1 %vm23653_vm5, %v19337_v18  ;;  %17174 = vmatprep.mubr.msk.f32.mxu1 %vm1356_vm2, %v24247_v40  ;;  %7100 = vst.msk [vmem:[#allocation3 + $0x3e9] sm:$0xff] %vm1356_vm2, %v6844_v4  ;;  %v6846_v10 = vpop.f32.mrb[205].mxu0  ;;  %v7289_v18 = vld [vmem:[#allocation3 + $0x78] sm:$0xff]  ;;  %v7290_v4 = vld [vmem:[#allocation3 + $0x80] sm:$0xff] }
 0xc0b   :  { %19342 = vmatprep.subr.msk.bf16.mxu1 %vm23653_vm5, %v19340_v12  ;;  %v7308_v12 = vld [vmem:[#allocation3 + $0x130] sm:$0xff]  ;;  %v19373_v31 = vpack.c.bf16 %v7290_v4, %v7289_v18  ;;  %v7364_v18 = vld [vmem:[#allocation3 + $0x360] sm:$0xff] }
 0xc0c   :  { %v7346_v4 = vld [vmem:[#allocation3 + $0x2b0] sm:$0xff] }
 0xc0d   :  { %v7233_v35 = vld [vmem:[#allocation3 + $0x3df] sm:$0x1]  ;;  %v6849_v6 = vpop.f32.mrb[206].mxu0 }
 0xc0e   :  { %7267 = vst.msk [vmem:[#allocation3 + $0x3e1] sm:$0x1] %vm2034_vm4, %v7233_v35  ;;  %v6851_v3 = vpop.f32.mrb[207].mxu0  ;;  %v19376_v35 = vpack.c.bf16 %v7308_v12, %v7307_v32 }
 0xc0f   :  { %7101 = vst.msk [vmem:[#allocation3 + $0x3f1] sm:$0xff] %vm1356_vm2, %v6849_v6  ;;  %v7292_v3 = vld [vmem:[#allocation3 + $0x90] sm:$0xff] }
 0xc11   :  { %v7166_v11 = vld [vmem:[#allocation3 + $0x3ea] sm:$0x1]  ;;  %v6854_v22 = vpop.f32.mrb[208].mxu0 }
 0xc12   :  { %19345 = vmatpush3.bf16.xpose.msk.msra.mxu1 %vm23653_vm5, %v19343_v36  ;;  %7200 = vst.msk [vmem:[#allocation3 + $0x3e8] sm:$0x1] %vm2034_vm4, %v7166_v11  ;;  %v6856_v37 = vpop.f32.mrb[209].mxu0  ;;  %v7291_v11 = vld [vmem:[#allocation3 + $0x88] sm:$0xff] }
 0xc13   :  { %19348 = vmatprep.subr.msk.bf16.mxu1 %vm23653_vm5, %v19346_v17  ;;  %7102 = vst.msk [vmem:[#allocation3 + $0x3f9] sm:$0xff] %vm1356_vm2, %v6854_v22  ;;  %v7357_v17 = vld [vmem:[#allocation3 + $0x320] sm:$0xff]  ;;  %v19379_v37 = vpack.c.bf16 %v7292_v3, %v7291_v11  ;;  %v7506_v12 = vld [vmem:[#allocation3 + $0x3e9] sm:$0xff] }
 0xc14   :  { %v19430_v19 = vpack.c.bf16 %v7358_v51, %v7357_v17  ;;  %v7365_v17 = vld [vmem:[#allocation3 + $0x370] sm:$0xff] }
 0xc15   :  { %v6859_v63 = vpop.f32.mrb[210].mxu0 }
 0xc16   :  { %7103 = vst.msk [vmem:[#allocation3 + $0x401] sm:$0xff] %vm1356_vm2, %v6859_v63  ;;  %v6861_v49 = vpop.f32.mrb[211].mxu0  ;;  %v7507_v47 = vld [vmem:[#allocation3 + $0x3f1] sm:$0xff] }
 0xc19   :  { %v6864_v41 = vpop.f32.mrb[212].mxu0 }
 0xc1a   :  { %19351 = vmatpush3.bf16.xpose.msk.msra.mxu1 %vm23653_vm5, %v19349_v45  ;;  %7104 = vst.msk [vmem:[#allocation3 + $0x411] sm:$0xff] %vm1356_vm2, %v6864_v41  ;;  %v6866_v23 = vpop.f32.mrb[213].mxu0  ;;  %v7503_v45 = vld [vmem:[#allocation3 + $0x3c9] sm:$0xff] }
 0xc1b   :  { %19354 = vmatprep.subr.msk.bf16.mxu1 %vm23653_vm5, %v19352_v16 }
 0xc1d   :  { %v7234_v7 = vld [vmem:[#allocation3 + $0x407] sm:$0x1] }
 0xc1e   :  { %v6869_v26 = vpop.f32.mrb[214].mxu0  ;;  %7268 = vst.msk [vmem:[#allocation3 + $0x409] sm:$0x1] %vm2034_vm4, %v7234_v7  ;;  %v7502_v7 = vld [vmem:[#allocation3 + $0x3c1] sm:$0xff] }
 0xc1f   :  { %7105 = vst.msk [vmem:[#allocation3 + $0x419] sm:$0xff] %vm1356_vm2, %v6869_v26  ;;  %v6871_v15 = vpop.f32.mrb[215].mxu0  ;;  %v7342_v26 = vld [vmem:[#allocation3 + $0x288] sm:$0xff] }
 0xc20   :  { %v19289_v15 = vpack.c.bf16 %v7503_v45, %v7502_v7 }
 0xc21   :  { %v7167_v13 = vld [vmem:[#allocation3 + $0x412] sm:$0x1] }
 0xc22   :  { %19357 = vmatpush3.bf16.xpose.msk.msra.mxu1 %vm23653_vm5, %v19355_v33  ;;  %v6874_v44 = vpop.f32.mrb[216].mxu0  ;;  %7201 = vst.msk [vmem:[#allocation3 + $0x410] sm:$0x1] %vm2034_vm4, %v7167_v13  ;;  %v19433_v33 = vpack.c.bf16 %v7342_v26, %v7341_v48  ;;  %v7349_v26 = vld [vmem:[#allocation3 + $0x2d0] sm:$0xff] }
 0xc23   :  { %19360 = vmatprep.subr.msk.bf16.mxu1 %vm23653_vm5, %v19358_v59  ;;  %7106 = vst.msk [vmem:[#allocation3 + $0x421] sm:$0xff] %vm1356_vm2, %v6874_v44  ;;  %v6876_v54 = vpop.f32.mrb[217].mxu0  ;;  %v19436_v59 = vpack.c.bf16 %v7360_v25, %v7359_v46  ;;  %v7368_v46 = vld [vmem:[#allocation3 + $0x388] sm:$0xff] }
 0xc24   :  { %v7505_v54 = vld [vmem:[#allocation3 + $0x3d9] sm:$0xff] }
 0xc26   :  { %v6879_v29 = vpop.f32.mrb[218].mxu0  ;;  %v7511_v7 = vld [vmem:[#allocation3 + $0x419] sm:$0xff] }
 0xc27   :  { %7107 = vst.msk [vmem:[#allocation3 + $0x429] sm:$0xff] %vm1356_vm2, %v6879_v29  ;;  %v6881_v52 = vpop.f32.mrb[219].mxu0 }
 0xc2a   :  { %19363 = vmatpush3.bf16.xpose.msk.msra.mxu1 %vm23653_vm5, %v19361_v20  ;;  %v6884_v56 = vpop.f32.mrb[220].mxu0 }
 0xc2b   :  { %19366 = vmatprep.subr.msk.bf16.mxu1 %vm23653_vm5, %v19364_v60  ;;  %7108 = vst.msk [vmem:[#allocation3 + $0x439] sm:$0xff] %vm1356_vm2, %v6884_v56  ;;  %v6886_v8 = vpop.f32.mrb[221].mxu0  ;;  %v7504_v60 = vld [vmem:[#allocation3 + $0x3d1] sm:$0xff] }
 0xc2c   :  { %v7343_v56 = vld [vmem:[#allocation3 + $0x290] sm:$0xff]  ;;  %v19295_v2 = vpack.c.bf16 %v7505_v54, %v7504_v60  ;;  %v7352_v60 = vld [vmem:[#allocation3 + $0x2e8] sm:$0xff] }
 0xc2e   :  { %v7235_v1 = vld [vmem:[#allocation3 + $0x42f] sm:$0x1]  ;;  %v6889_v9 = vpop.f32.mrb[222].mxu0 }
 0xc2f   :  { %7269 = vst.msk [vmem:[#allocation3 + $0x431] sm:$0x1] %vm2034_vm4, %v7235_v1  ;;  %v6891_v34 = vpop.f32.mrb[223].mxu0  ;;  %v19439_v1 = vpack.c.bf16 %v7344_v24, %v7343_v56  ;;  %v7369_v56 = vld [vmem:[#allocation3 + $0x398] sm:$0xff] }
 0xc30   :  { %7109 = vst.msk [vmem:[#allocation3 + $0x441] sm:$0xff] %vm1356_vm2, %v6889_v9  ;;  %v19442_v9 = vpack.c.bf16 %v7362_v62, %v7361_v55 }
 0xc32   :  { %19369 = vmatpush3.bf16.xpose.msk.msra.mxu1 %vm23653_vm5, %v19367_v57  ;;  %v7168_v39 = vld [vmem:[#allocation3 + $0x43a] sm:$0x1]  ;;  %v6894_v5 = vpop.f32.mrb[224].mxu0 }
 0xc33   :  { %19372 = vmatprep.subr.msk.bf16.mxu1 %vm23653_vm5, %v19370_v53  ;;  %7202 = vst.msk [vmem:[#allocation3 + $0x438] sm:$0x1] %vm2034_vm4, %v7168_v39  ;;  %v6896_v50 = vpop.f32.mrb[225].mxu0  ;;  %v7345_v53 = vld [vmem:[#allocation3 + $0x2a8] sm:$0xff] }
 0xc34   :  { %7110 = vst.msk [vmem:[#allocation3 + $0x449] sm:$0xff] %vm1356_vm2, %v6894_v5  ;;  %v19445_v32 = vpack.c.bf16 %v7346_v4, %v7345_v53 }
 0xc36   :  { %v6899_v0 = vpop.f32.mrb[226].mxu0 }
 0xc37   :  { %7111 = vst.msk [vmem:[#allocation3 + $0x451] sm:$0xff] %vm1356_vm2, %v6899_v0  ;;  %v6901_v10 = vpop.f32.mrb[227].mxu0  ;;  %v7515_v4 = vld [vmem:[#allocation3 + $0x441] sm:$0xff] }
 0xc3a   :  { %19375 = vmatpush3.bf16.xpose.msk.msra.mxu1 %vm23653_vm5, %v19373_v31  ;;  %v6904_v6 = vpop.f32.mrb[228].mxu0  ;;  %v19301_v31 = vpack.c.bf16 %v7507_v47, %v7506_v12 }
 0xc3b   :  { %19378 = vmatprep.subr.msk.bf16.mxu1 %vm23653_vm5, %v19376_v35  ;;  %7112 = vst.msk [vmem:[#allocation3 + $0x461] sm:$0xff] %vm1356_vm2, %v6904_v6  ;;  %v6906_v61 = vpop.f32.mrb[229].mxu0  ;;  %v7363_v35 = vld [vmem:[#allocation3 + $0x358] sm:$0xff] }
 0xc3c   :  { %v19448_v6 = vpack.c.bf16 %v7364_v18, %v7363_v35 }
 0xc3e   :  { %v7236_v36 = vld [vmem:[#allocation3 + $0x457] sm:$0x1]  ;;  %v6909_v58 = vpop.f32.mrb[230].mxu0 }
 0xc3f   :  { %7270 = vst.msk [vmem:[#allocation3 + $0x459] sm:$0x1] %vm2034_vm4, %v7236_v36  ;;  %v6911_v22 = vpop.f32.mrb[231].mxu0  ;;  %v7509_v36 = vld [vmem:[#allocation3 + $0x401] sm:$0xff] }
 0xc40   :  { %7113 = vst.msk [vmem:[#allocation3 + $0x469] sm:$0xff] %vm1356_vm2, %v6909_v58  ;;  %v7348_v58 = vld [vmem:[#allocation3 + $0x2c0] sm:$0xff] }
 0xc42   :  { %v7169_v63 = vld [vmem:[#allocation3 + $0x462] sm:$0x1]  ;;  %19381 = vmatpush3.bf16.xpose.msk.msra.mxu1 %vm23653_vm5, %v19379_v37  ;;  %v6914_v28 = vpop.f32.mrb[232].mxu0 }
 0xc43   :  { %7203 = vst.msk [vmem:[#allocation3 + $0x460] sm:$0x1] %vm2034_vm4, %v7169_v63  ;;  %v6916_v49 = vpop.f32.mrb[233].mxu0  ;;  %19432 = vmatprep.subr.msk.bf16.mxu1 %vm23653_vm5, %v19430_v19  ;;  %v7518_v41 = vld [vmem:[#allocation3 + $0x461] sm:$0xff]  ;;  %v7508_v63 = vld [vmem:[#allocation3 + $0x3f9] sm:$0xff] }
 0xc44   :  { %7114 = vst.msk [vmem:[#allocation3 + $0x471] sm:$0xff] %vm1356_vm2, %v6914_v28  ;;  %v7347_v28 = vld [vmem:[#allocation3 + $0x2b8] sm:$0xff]  ;;  %v19307_v45 = vpack.c.bf16 %v7509_v36, %v7508_v63  ;;  %v7354_v36 = vld [vmem:[#allocation3 + $0x300] sm:$0xff] }
 0xc45   :  { %v19451_v48 = vpack.c.bf16 %v7348_v58, %v7347_v28  ;;  %v7517_v28 = vld [vmem:[#allocation3 + $0x451] sm:$0xff] }
 0xc46   :  { %v6919_v16 = vpop.f32.mrb[234].mxu0 }
 0xc47   :  { %v7519_v23 = vld [vmem:[#allocation3 + $0x469] sm:$0xff]  ;;  %7115 = vst.msk [vmem:[#allocation3 + $0x479] sm:$0xff] %vm1356_vm2, %v6919_v16  ;;  %v6921_v14 = vpop.f32.mrb[235].mxu0  ;;  %v7366_v16 = vld [vmem:[#allocation3 + $0x378] sm:$0xff] }
 0xc48   :  { %v19286_v21 = vpack.c.bf16 %v7519_v23, %v7518_v41  ;;  %v19454_v41 = vpack.c.bf16 %v7366_v16, %v7365_v17 }
 0xc49   :  { %17175 = vmatmul.mubr.msk.f32.vlgmr.msra.gmra.mrb[76].mxu1 %vm1356_vm2, %v24247_v40 }
 0xc4a   :  { %19288 = vmatprep.subr.msk.bf16.mxu0 %vm23653_vm5, %v19286_v21  ;;  %19435 = vmatpush3.bf16.xpose.msk.msra.mxu1 %vm23653_vm5, %v19433_v33  ;;  %v6924_v13 = vpop.f32.mrb[236].mxu0 }
 0xc4b   :  { %19291 = vmatpush3.bf16.xpose.msk.msra.mxu0 %vm23653_vm5, %v19289_v15  ;;  %7116 = vst.msk [vmem:[#allocation3 + $0x489] sm:$0xff] %vm1356_vm2, %v6924_v13  ;;  %v6926_v44 = vpop.f32.mrb[237].mxu0  ;;  %19438 = vmatprep.subr.msk.bf16.mxu1 %vm23653_vm5, %v19436_v59  ;;  %v7520_v52 = vld [vmem:[#allocation3 + $0x471] sm:$0xff] }
 0xc4c   :  { %17242 = vmatprep.mubr.msk.f32.mxu1 %vm1356_vm2, %v24247_v40  ;;  %v7510_v13 = vld [vmem:[#allocation3 + $0x411] sm:$0xff] }
 0xc4d   :  { %v7350_v44 = vld [vmem:[#allocation3 + $0x2d8] sm:$0xff]  ;;  %v19313_v24 = vpack.c.bf16 %v7511_v7, %v7510_v13 }
 0xc4e   :  { %v7237_v29 = vld [vmem:[#allocation3 + $0x47f] sm:$0x1]  ;;  %v6929_v30 = vpop.f32.mrb[238].mxu0  ;;  %v19457_v55 = vpack.c.bf16 %v7350_v44, %v7349_v26  ;;  %v7326_v26 = vld [vmem:[#allocation3 + $0x1e8] sm:$0xff] }
 0xc4f   :  { %v7521_v20 = vld [vmem:[#allocation3 + $0x479] sm:$0xff]  ;;  %7271 = vst.msk [vmem:[#allocation3 + $0x481] sm:$0x1] %vm2034_vm4, %v7237_v29  ;;  %v6931_v8 = vpop.f32.mrb[239].mxu0 }
 0xc50   :  { %7117 = vst.msk [vmem:[#allocation3 + $0x491] sm:$0xff] %vm1356_vm2, %v6929_v30  ;;  %v19292_v27 = vpack.c.bf16 %v7521_v20, %v7520_v52  ;;  %v7367_v29 = vld [vmem:[#allocation3 + $0x380] sm:$0xff]  ;;  %v7328_v13 = vld [vmem:[#allocation3 + $0x1f8] sm:$0xff] }
 0xc51   :  { %v24359_v30 = vpack.c.bf16 %v7368_v46, %v7367_v29  ;;  %v7309_v46 = vld [vmem:[#allocation3 + $0x140] sm:$0xff] }
 0xc52   :  { %19294 = vmatprep.subr.msk.bf16.mxu0 %vm23653_vm5, %v19292_v27  ;;  %v7170_v43 = vld [vmem:[#allocation3 + $0x48a] sm:$0x1]  ;;  %19441 = vmatpush3.bf16.xpose.msk.msra.mxu1 %vm23653_vm5, %v19439_v1  ;;  %v6934_v34 = vpop.f32.mrb[240].mxu0  ;;  %v8897_v44 = vld [vmem:[#allocation3 + $0xba] sm:$0xff] }
 0xc53   :  { %19297 = vmatpush3.bf16.xpose.msk.msra.mxu0 %vm23653_vm5, %v19295_v2  ;;  %7204 = vst.msk [vmem:[#allocation3 + $0x488] sm:$0x1] %vm2034_vm4, %v7170_v43  ;;  %v6936_v57 = vpop.f32.mrb[241].mxu0  ;;  %19444 = vmatprep.subr.msk.bf16.mxu1 %vm23653_vm5, %v19442_v9  ;;  %v7522_v5 = vld [vmem:[#allocation3 + $0x489] sm:$0xff]  ;;  %v7512_v43 = vld [vmem:[#allocation3 + $0x421] sm:$0xff] }
 0xc54   :  { %7118 = vst.msk [vmem:[#allocation3 + $0x499] sm:$0xff] %vm1356_vm2, %v6934_v34  ;;  %v7513_v27 = vld [vmem:[#allocation3 + $0x429] sm:$0xff]  ;;  %v7351_v34 = vld [vmem:[#allocation3 + $0x2e0] sm:$0xff] }
 0xc55   :  { %v19319_v47 = vpack.c.bf16 %v7513_v27, %v7512_v43  ;;  %v24373_v53 = vpack.c.bf16 %v7352_v60, %v7351_v34  ;;  %v21285_v27 = vld [vmem:[%s25723_s7 + $0x2] sm:$0x3]  ;;  %v7329_v43 = vld [vmem:[#allocation3 + $0x208] sm:$0xff] }
 0xc56   :  { %v6939_v39 = vpop.f32.mrb[242].mxu0  ;;  %v8899_v34 = vld [vmem:[#allocation3 + $0xd2] sm:$0xff] }
 0xc57   :  { %v7523_v50 = vld [vmem:[#allocation3 + $0x491] sm:$0xff]  ;;  %7119 = vst.msk [vmem:[#allocation3 + $0x4a1] sm:$0xff] %vm1356_vm2, %v6939_v39  ;;  %v6941_v10 = vpop.f32.mrb[243].mxu0  ;;  %v7370_v39 = vld [vmem:[#allocation3 + $0x3a0] sm:$0xff] }
 0xc58   :  { %v19298_v0 = vpack.c.bf16 %v7523_v50, %v7522_v5  ;;  %v24377_v5 = vpack.c.bf16 %v7370_v39, %v7369_v56  ;;  %v7353_v10 = vld [vmem:[#allocation3 + $0x2f8] sm:$0xff] }
 0xc5a   :  { %19300 = vmatprep.subr.msk.bf16.mxu0 %vm23653_vm5, %v19298_v0  ;;  %19447 = vmatpush3.bf16.xpose.msk.msra.mxu1 %vm23653_vm5, %v19445_v32  ;;  %v6944_v61 = vpop.f32.mrb[244].mxu0 }
 0xc5b   :  { %19303 = vmatpush3.bf16.xpose.msk.msra.mxu0 %vm23653_vm5, %v19301_v31  ;;  %7120 = vst.msk [vmem:[#allocation3 + $0x4b1] sm:$0xff] %vm1356_vm2, %v6944_v61  ;;  %v6946_v3 = vpop.f32.mrb[245].mxu0  ;;  %19450 = vmatprep.subr.msk.bf16.mxu1 %vm23653_vm5, %v19448_v6  ;;  %v7524_v37 = vld [vmem:[#allocation3 + $0x499] sm:$0xff]  ;;  %v7372_v6 = vld [vmem:[#allocation3 + $0x3b0] sm:$0xff] }
 0xc5c   :  { %v7514_v3 = vld [vmem:[#allocation3 + $0x439] sm:$0xff] }
 0xc5d   :  { %v19325_v17 = vpack.c.bf16 %v7515_v4, %v7514_v3  ;;  %v7313_v3 = vld [vmem:[#allocation3 + $0x168] sm:$0xff] }
 0xc5e   :  { %v7238_v11 = vld [vmem:[#allocation3 + $0x4a7] sm:$0x1]  ;;  %v6949_v22 = vpop.f32.mrb[246].mxu0 }
 0xc5f   :  { %v7525_v51 = vld [vmem:[#allocation3 + $0x4a1] sm:$0xff]  ;;  %7272 = vst.msk [vmem:[#allocation3 + $0x4a9] sm:$0x1] %vm2034_vm4, %v7238_v11  ;;  %v6951_v49 = vpop.f32.mrb[247].mxu0  ;;  %v24393_v11 = vpack.c.bf16 %v7354_v36, %v7353_v10  ;;  %v8883_v36 = vld [vmem:[#allocation3 + $0x32] sm:$0xff] }
 0xc60   :  { %7121 = vst.msk [vmem:[#allocation3 + $0x4b9] sm:$0xff] %vm1356_vm2, %v6949_v22  ;;  %v19304_v19 = vpack.c.bf16 %v7525_v51, %v7524_v37  ;;  %v7371_v22 = vld [vmem:[#allocation3 + $0x3a8] sm:$0xff]  ;;  %v7325_v51 = vld [vmem:[#allocation3 + $0x1e0] sm:$0xff]  ;;  %v7356_v49 = vld [vmem:[#allocation3 + $0x310] sm:$0xff] }
 0xc61   :  { %v24397_v37 = vpack.c.bf16 %v7372_v6, %v7371_v22  ;;  %v8901_v22 = vld [vmem:[#allocation3 + $0xe2] sm:$0xff] }
 0xc62   :  { %19306 = vmatprep.subr.msk.bf16.mxu0 %vm23653_vm5, %v19304_v19  ;;  %v7171_v23 = vld [vmem:[#allocation3 + $0x4b2] sm:$0x1]  ;;  %19453 = vmatpush3.bf16.xpose.msk.msra.mxu1 %vm23653_vm5, %v19451_v48  ;;  %v6954_v25 = vpop.f32.mrb[248].mxu0  ;;  %v8895_v19 = vld [vmem:[#allocation3 + $0xaa] sm:$0xff] }
 0xc63   :  { %19309 = vmatpush3.bf16.xpose.msk.msra.mxu0 %vm23653_vm5, %v19307_v45  ;;  %7205 = vst.msk [vmem:[#allocation3 + $0x4b0] sm:$0x1] %vm2034_vm4, %v7171_v23  ;;  %v6956_v21 = vpop.f32.mrb[249].mxu0  ;;  %19456 = vmatprep.subr.msk.bf16.mxu1 %vm23653_vm5, %v19454_v41  ;;  %v7526_v15 = vld [vmem:[#allocation3 + $0x4b1] sm:$0xff]  ;;  %v7516_v23 = vld [vmem:[#allocation3 + $0x449] sm:$0xff] }
 0xc64   :  { %7122 = vst.msk [vmem:[#allocation3 + $0x4c1] sm:$0xff] %vm1356_vm2, %v6954_v25  ;;  %v7355_v25 = vld [vmem:[#allocation3 + $0x308] sm:$0xff]  ;;  %v19331_v21 = vpack.c.bf16 %v7517_v28, %v7516_v23  ;;  %v7316_v23 = vld [vmem:[#allocation3 + $0x180] sm:$0xff] }
 0xc65   :  { %v24409_v7 = vpack.c.bf16 %v7356_v49, %v7355_v25  ;;  %v7331_v49 = vld [vmem:[#allocation3 + $0x218] sm:$0xff]  ;;  %v8885_v25 = vld [vmem:[#allocation3 + $0x42] sm:$0xff] }
 0xc66   :  { %v6959_v14 = vpop.f32.mrb[250].mxu0 }
 0xc67   :  { %v7527_v33 = vld [vmem:[#allocation3 + $0x4b9] sm:$0xff]  ;;  %7123 = vst.msk [vmem:[#allocation3 + $0x4c9] sm:$0xff] %vm1356_vm2, %v6959_v14  ;;  %v6961_v54 = vpop.f32.mrb[251].mxu0  ;;  %v8894_v14 = vld [vmem:[#allocation3 + $0xa2] sm:$0xff] }
 0xc68   :  { %v19310_v59 = vpack.c.bf16 %v7527_v33, %v7526_v15  ;;  %v19382_v15 = vpack.c.bf16 %v7326_v26, %v7325_v51  ;;  %v19526_v33 = vpack.c.bf16 %v8895_v19, %v8894_v14  ;;  %v7310_v54 = vld [vmem:[#allocation3 + $0x148] sm:$0xff]  ;;  %v7314_v51 = vld [vmem:[#allocation3 + $0x170] sm:$0xff]  ;;  %v8903_v26 = vld [vmem:[#allocation3 + $0xfa] sm:$0xff] }
 0xc69   :  { %v8882_v19 = vld [vmem:[#allocation3 + $0x2a] sm:$0xff]  ;;  %v7315_v14 = vld [vmem:[#allocation3 + $0x178] sm:$0xff] }
 0xc6a   :  { %19312 = vmatprep.subr.msk.bf16.mxu0 %vm23653_vm5, %v19310_v59  ;;  %19459 = vmatpush3.bf16.xpose.msk.msra.mxu1 %vm23653_vm5, %v19457_v55  ;;  %v6964_v52 = vpop.f32.mrb[252].mxu0  ;;  %v8879_v59 = vld [vmem:[#allocation3 + $0xa] sm:$0xff]  ;;  %v24422_v55 = vpack.c.bf16 %v7310_v54, %v7309_v46  ;;  %v19541_v28 = vpack.c.bf16 %v8883_v36, %v8882_v19 }
 0xc6b   :  { %19315 = vmatpush3.bf16.xpose.msk.msra.mxu0 %vm23653_vm5, %v19313_v24  ;;  %7124 = vst.msk [vmem:[#allocation3 + $0x4d9] sm:$0xff] %vm1356_vm2, %v6964_v52  ;;  %7137 = vst.msk [vmem:[#allocation3 + $0x529] sm:$0xff] %vm1356_vm2, %v6964_v52  ;;  %v6966_v20 = vpop.f32.mrb[253].mxu0  ;;  %19462 = vmatprep.subr.msk.bf16.mxu1 %vm23653_vm5, %v24359_v30  ;;  %v7528_v1 = vld [vmem:[#allocation3 + $0x4c1] sm:$0xff]  ;;  %v7327_v52 = vld [vmem:[#allocation3 + $0x1f0] sm:$0xff] }
 0xc6c   :  { %v8878_v24 = vld [vmem:[#allocation3 + $0x2] sm:$0xff]  ;;  %v8896_v20 = vld [vmem:[#allocation3 + $0xb2] sm:$0xff]  ;;  %v19388_v60 = vpack.c.bf16 %v7328_v13, %v7327_v52 }
 0xc6d   :  { %v19529_v29 = vpack.c.bf16 %v8879_v59, %v8878_v24  ;;  %v19532_v56 = vpack.c.bf16 %v8897_v44, %v8896_v20  ;;  %v7334_v59 = vld [vmem:[#allocation3 + $0x238] sm:$0xff]  ;;  %v7317_v24 = vld [vmem:[#allocation3 + $0x190] sm:$0xff]  ;;  %v7336_v52 = vld [vmem:[#allocation3 + $0x248] sm:$0xff] }
 0xc6e   :  { %v7239_v8 = vld [vmem:[#allocation3 + $0x4cf] sm:$0x1]  ;;  %v6969_v2 = vpop.f32.mrb[254].mxu0  ;;  %v8902_v13 = vld [vmem:[#allocation3 + $0xf2] sm:$0xff] }
 0xc6f   :  { %v7529_v62 = vld [vmem:[#allocation3 + $0x4c9] sm:$0xff]  ;;  %7273 = vst.msk [vmem:[#allocation3 + $0x4d1] sm:$0x1] %vm2034_vm4, %v7239_v8  ;;  %v6971_v57 = vpop.f32.mrb[255].mxu0  ;;  %v24433_v8 = vld [vmem:[%s25723_s7 + $0x4] sm:$0x3]  ;;  %v19550_v54 = vpack.c.bf16 %v8903_v26, %v8902_v13 }
 0xc70   :  { %7125 = vst.msk [vmem:[#allocation3 + $0x4e1] sm:$0xff] %vm1356_vm2, %v6969_v2  ;;  %7138 = vst.msk [vmem:[#allocation3 + $0x531] sm:$0xff] %vm1356_vm2, %v6969_v2  ;;  %v19316_v9 = vpack.c.bf16 %v7529_v62, %v7528_v1  ;;  %v7312_v1 = vld [vmem:[#allocation3 + $0x158] sm:$0xff]  ;;  %v7311_v57 = vld [vmem:[#allocation3 + $0x150] sm:$0xff] }
 0xc71   :  { %v8881_v62 = vld [vmem:[#allocation3 + $0x1a] sm:$0xff]  ;;  %v24449_v39 = vpack.c.bf16 %v7312_v1, %v7311_v57  ;;  %v8905_v20 = vld [vmem:[#allocation3 + $0x10a] sm:$0xff] }
 0xc72   :  { %19318 = vmatprep.subr.msk.bf16.mxu0 %vm23653_vm5, %v19316_v9  ;;  %v7172_v50 = vld [vmem:[#allocation3 + $0x4da] sm:$0x1]  ;;  %v7174_v18 = vld [vmem:[#allocation3 + $0x52a] sm:$0x1]  ;;  %19465 = vmatpush3.bf16.xpose.msk.msra.mxu1 %vm23653_vm5, %v24373_v53  ;;  %v6974_v0 = vpop.f32.mrb[0].mxu0  ;;  %v7335_v1 = vld [vmem:[#allocation3 + $0x240] sm:$0xff] }
 0xc73   :  { %19321 = vmatpush3.bf16.xpose.msk.msra.mxu0 %vm23653_vm5, %v19319_v47  ;;  %7206 = vst.msk [vmem:[#allocation3 + $0x4d8] sm:$0x1] %vm2034_vm4, %v7172_v50  ;;  %7208 = vst.msk [vmem:[#allocation3 + $0x528] sm:$0x1] %vm2034_vm4, %v7174_v18  ;;  %v6976_v12 = vpop.f32.mrb[1].mxu0  ;;  %19468 = vmatprep.subr.msk.bf16.mxu1 %vm23653_vm5, %v24377_v5  ;;  %v7530_v32 = vld [vmem:[#allocation3 + $0x4d9] sm:$0xff] }
 0xc74   :  { %7126 = vst.msk [vmem:[#allocation3 + $0x4e9] sm:$0xff] %vm1356_vm2, %v6974_v0  ;;  %7139 = vst.msk [vmem:[#allocation3 + $0x539] sm:$0xff] %vm1356_vm2, %v6974_v0  ;;  %v8880_v47 = vld [vmem:[#allocation3 + $0x12] sm:$0xff]  ;;  %v8898_v0 = vld [vmem:[#allocation3 + $0xca] sm:$0xff] }
 0xc75   :  { %v19535_v50 = vpack.c.bf16 %v8881_v62, %v8880_v47  ;;  %v7330_v18 = vld [vmem:[#allocation3 + $0x210] sm:$0xff]  ;;  %v19538_v10 = vpack.c.bf16 %v8899_v34, %v8898_v0  ;;  %v8904_v62 = vld [vmem:[#allocation3 + $0x102] sm:$0xff]  ;;  %v7337_v47 = vld [vmem:[#allocation3 + $0x258] sm:$0xff] }
 0xc76   :  { %v6979_v31 = vpop.f32.mrb[2].mxu0  ;;  %v24451_v4 = vpack.c.bf16 %v7330_v18, %v7329_v43  ;;  %v19556_v43 = vpack.c.bf16 %v8905_v20, %v8904_v62  ;;  %v7320_v34 = vld [vmem:[#allocation3 + $0x1a8] sm:$0xff]  ;;  %v7319_v18 = vld [vmem:[#allocation3 + $0x1a0] sm:$0xff]  ;;  %v7340_v36 = vld [vmem:[#allocation3 + $0x270] sm:$0xff] }
 0xc77   :  { %v7531_v35 = vld [vmem:[#allocation3 + $0x4e1] sm:$0xff]  ;;  %7127 = vst.msk [vmem:[#allocation3 + $0x4f1] sm:$0xff] %vm1356_vm2, %v6979_v31  ;;  %7140 = vst.msk [vmem:[#allocation3 + $0x541] sm:$0xff] %vm1356_vm2, %v6979_v31  ;;  %v6981_v58 = vpop.f32.mrb[3].mxu0  ;;  %v8889_v57 = vld [vmem:[#allocation3 + $0x6a] sm:$0xff] }
 0xc78   :  { %v19322_v61 = vpack.c.bf16 %v7531_v35, %v7530_v32  ;;  %v8888_v0 = vld [vmem:[#allocation3 + $0x62] sm:$0xff]  ;;  %v8961_v20 = vld [vmem:[#allocation3 + $0x33a] sm:$0xff] }
 0xc79   :  { %v7323_v26 = vld [vmem:[#allocation3 + $0x1c8] sm:$0xff] }
 0xc7a   :  { %19324 = vmatprep.subr.msk.bf16.mxu0 %vm23653_vm5, %v19322_v61  ;;  %19471 = vmatpush3.bf16.xpose.msk.msra.mxu1 %vm23653_vm5, %v24393_v11  ;;  %v6984_v2 = vpop.f32.mrb[4].mxu0  ;;  %v7390_v13 = vld [vmem:[#allocation3 + $0x468] sm:$0xff] }
 0xc7b   :  { %19327 = vmatpush3.bf16.xpose.msk.msra.mxu0 %vm23653_vm5, %v19325_v17  ;;  %19474 = vmatprep.subr.msk.bf16.mxu1 %vm23653_vm5, %v24397_v37  ;;  %v7532_v63 = vld [vmem:[#allocation3 + $0x4e9] sm:$0xff]  ;;  %7128 = vst.msk [vmem:[#allocation3 + $0x501] sm:$0xff] %vm1356_vm2, %v6984_v2  ;;  %v6986_v9 = vpop.f32.mrb[5].mxu0  ;;  %v7332_v17 = vld [vmem:[#allocation3 + $0x220] sm:$0xff] }
 0xc7c   :  { %v24498_v9 = vpack.c.bf16 %v7336_v52, %v7335_v1  ;;  %v8943_v52 = vld [vmem:[#allocation3 + $0x28a] sm:$0xff] }
 0xc7e   :  { %v7240_v45 = vld [vmem:[#allocation3 + $0x4f7] sm:$0x1]  ;;  %v7242_v48 = vld [vmem:[#allocation3 + $0x547] sm:$0x1]  ;;  %v6989_v12 = vpop.f32.mrb[6].mxu0 }
 0xc7f   :  { %v7533_v16 = vld [vmem:[#allocation3 + $0x4f1] sm:$0xff]  ;;  %7274 = vst.msk [vmem:[#allocation3 + $0x4f9] sm:$0x1] %vm2034_vm4, %v7240_v45  ;;  %7276 = vst.msk [vmem:[#allocation3 + $0x549] sm:$0x1] %vm2034_vm4, %v7242_v48  ;;  %v6991_v31 = vpop.f32.mrb[7].mxu0  ;;  %v24469_v48 = vpack.c.bf16 %v7332_v17, %v7331_v49 }
 0xc80   :  { %v19328_v41 = vpack.c.bf16 %v7533_v16, %v7532_v63  ;;  %7129 = vst.msk [vmem:[#allocation3 + $0x509] sm:$0xff] %vm1356_vm2, %v6989_v12  ;;  %v24467_v63 = vpack.c.bf16 %v7314_v51, %v7313_v3  ;;  %v8900_v45 = vld [vmem:[#allocation3 + $0xda] sm:$0xff]  ;;  %v24510_v12 = vpack.c.bf16 %v7320_v34, %v7319_v18  ;;  %v8891_v3 = vld [vmem:[#allocation3 + $0x82] sm:$0xff]  ;;  %v8908_v49 = vld [vmem:[#allocation3 + $0x12a] sm:$0xff] }
 0xc81   :  { %v19544_v16 = vpack.c.bf16 %v8901_v22, %v8900_v45  ;;  %v7338_v31 = vld [vmem:[#allocation3 + $0x260] sm:$0xff]  ;;  %v7391_v34 = vld [vmem:[#allocation3 + $0x470] sm:$0xff] }
 0xc82   :  { %19330 = vmatprep.subr.msk.bf16.mxu0 %vm23653_vm5, %v19328_v41  ;;  %19477 = vmatpush3.bf16.xpose.msk.msra.mxu1 %vm23653_vm5, %v24409_v7  ;;  %v6994_v32 = vpop.f32.mrb[8].mxu0  ;;  %v7173_v6 = vld [vmem:[#allocation3 + $0x502] sm:$0x1]  ;;  %v8890_v22 = vld [vmem:[#allocation3 + $0x7a] sm:$0xff] }
 0xc83   :  { %19333 = vmatpush3.bf16.xpose.msk.msra.mxu0 %vm23653_vm5, %v19331_v21  ;;  %19528 = vmatprep.subr.msk.bf16.mxu1 %vm23653_vm5, %v19526_v33  ;;  %7130 = vst.msk [vmem:[#allocation3 + $0x511] sm:$0xff] %vm1356_vm2, %v6994_v32  ;;  %v6996_v35 = vpop.f32.mrb[9].mxu0  ;;  %v7333_v21 = vld [vmem:[#allocation3 + $0x230] sm:$0xff]  ;;  %v24482_v33 = vpack.c.bf16 %v7316_v23, %v7315_v14  ;;  %v8906_v32 = vld [vmem:[#allocation3 + $0x11a] sm:$0xff]  ;;  %v19565_v19 = vpack.c.bf16 %v8891_v3, %v8890_v22 }
 0xc84   :  { %19384 = vmatprep.subr.msk.bf16.mxu0 %vm23653_vm5, %v19382_v15  ;;  %7207 = vst.msk [vmem:[#allocation3 + $0x500] sm:$0x1] %vm2034_vm4, %v7173_v6  ;;  %v8884_v15 = vld [vmem:[#allocation3 + $0x3a] sm:$0xff]  ;;  %v24484_v44 = vpack.c.bf16 %v7334_v59, %v7333_v21  ;;  %v24512_v35 = vpack.c.bf16 %v7338_v31, %v7337_v47  ;;  %v8893_v23 = vld [vmem:[#allocation3 + $0x92] sm:$0xff]  ;;  %v8892_v14 = vld [vmem:[#allocation3 + $0x8a] sm:$0xff] }
 0xc85   :  { %v19547_v46 = vpack.c.bf16 %v8885_v25, %v8884_v15  ;;  %v7322_v17 = vld [vmem:[#allocation3 + $0x1c0] sm:$0xff]  ;;  %v8959_v25 = vld [vmem:[#allocation3 + $0x32a] sm:$0xff]  ;;  %v8947_v22 = vld [vmem:[#allocation3 + $0x2b2] sm:$0xff] }
 0xc86   :  { %v6999_v61 = vpop.f32.mrb[10].mxu0  ;;  %v7389_v21 = vld [vmem:[#allocation3 + $0x460] sm:$0xff]  ;;  %v7375_v31 = vld [vmem:[#allocation3 + $0x3d0] sm:$0xff] }
 0xc87   :  { %7131 = vst.msk [vmem:[#allocation3 + $0x519] sm:$0xff] %vm1356_vm2, %v6999_v61  ;;  %v7001_v58 = vpop.f32.mrb[11].mxu0  ;;  %v7321_v61 = vld [vmem:[#allocation3 + $0x1b8] sm:$0xff]  ;;  %v8958_v59 = vld [vmem:[#allocation3 + $0x322] sm:$0xff]  ;;  %v8962_v3 = vld [vmem:[#allocation3 + $0x34a] sm:$0xff] }
 0xc88   :  { %v8909_v58 = vld [vmem:[#allocation3 + $0x132] sm:$0xff]  ;;  %v24524_v51 = vpack.c.bf16 %v7322_v17, %v7321_v61  ;;  %v8945_v18 = vld [vmem:[#allocation3 + $0x29a] sm:$0xff] }
 0xc89   :  { %17243 = vmatmul.mubr.msk.f32.vlgmr.msra.gmra.mrb[78].mxu1 %vm1356_vm2, %v24247_v40 }
 0xc8a   :  { %17141 = vmatmul.mubr.msk.f32.vlgmr.msra.gmra.mrb[14].mxu0 %vm1356_vm2, %v21285_v27  ;;  %19531 = vmatpush3.bf16.xpose.msk.msra.mxu1 %vm23653_vm5, %v19529_v29  ;;  %v8887_v29 = vld [vmem:[#allocation3 + $0x5a] sm:$0xff] }
 0xc8b   :  { %19387 = vmatpush3.bf16.xpose.msk.msra.mxu0 %vm23653_vm5, %v24422_v55  ;;  %19534 = vmatprep.subr.msk.bf16.mxu1 %vm23653_vm5, %v19532_v56  ;;  %v7318_v27 = vld [vmem:[#allocation3 + $0x198] sm:$0xff] }
 0xc8c   :  { %19390 = vmatprep.subr.msk.bf16.mxu0 %vm23653_vm5, %v19388_v60  ;;  %17208 = vmatprep.mubr.msk.f32.mxu0 %vm1356_vm2, %v24247_v40  ;;  %v8886_v60 = vld [vmem:[#allocation3 + $0x52] sm:$0xff]  ;;  %v24496_v56 = vpack.c.bf16 %v7318_v27, %v7317_v24  ;;  %v19478_v24 = vpack.c.bf16 %v7390_v13, %v7389_v21  ;;  %v8967_v13 = vld [vmem:[#allocation3 + $0x37a] sm:$0xff] }
 0xc8d   :  { %17310 = vmatprep.mubr.msk.f32.mxu1 %vm1356_vm2, %v24433_v8  ;;  %v19553_v2 = vpack.c.bf16 %v8887_v29, %v8886_v60  ;;  %v7373_v29 = vld [vmem:[#allocation3 + $0x3c0] sm:$0xff]  ;;  %v7392_v27 = vld [vmem:[#allocation3 + $0x478] sm:$0xff]  ;;  %v7374_v60 = vld [vmem:[#allocation3 + $0x3c8] sm:$0xff] }
 0xc8e   :  { %v7241_v41 = vld [vmem:[#allocation3 + $0x51f] sm:$0x1]  ;;  %v24549_v1 = vpack.c.bf16 %v7374_v60, %v7373_v29  ;;  %v19484_v47 = vpack.c.bf16 %v7392_v27, %v7391_v34  ;;  %v8966_v27 = vld [vmem:[#allocation3 + $0x372] sm:$0xff] }
 0xc8f   :  { %7275 = vst.msk [vmem:[#allocation3 + $0x521] sm:$0x1] %vm2034_vm4, %v7241_v41  ;;  %v7324_v41 = vld [vmem:[#allocation3 + $0x1d0] sm:$0xff]  ;;  %v7395_v21 = vld [vmem:[#allocation3 + $0x498] sm:$0xff] }
 0xc90   :  { %v24538_v15 = vpack.c.bf16 %v7324_v41, %v7323_v26  ;;  %v8948_v29 = vld [vmem:[#allocation3 + $0x2ba] sm:$0xff] }
 0xc91   :  { %v7398_v60 = vld [vmem:[#allocation3 + $0x4b8] sm:$0xff] }
 0xc92   :  { %19537 = vmatpush3.bf16.xpose.msk.msra.mxu1 %vm23653_vm5, %v19535_v50  ;;  %v8907_v50 = vld [vmem:[#allocation3 + $0x122] sm:$0xff]  ;;  %v8951_v34 = vld [vmem:[#allocation3 + $0x2da] sm:$0xff] }
 0xc93   :  { %19393 = vmatpush3.bf16.xpose.msk.msra.mxu0 %vm23653_vm5, %v24449_v39  ;;  %19540 = vmatprep.subr.msk.bf16.mxu1 %vm23653_vm5, %v19538_v10  ;;  %v19559_v10 = vpack.c.bf16 %v8889_v57, %v8888_v0  ;;  %v19562_v6 = vpack.c.bf16 %v8907_v50, %v8906_v32  ;;  %v7376_v50 = vld [vmem:[#allocation3 + $0x3d8] sm:$0xff] }
 0xc94   :  { %19396 = vmatprep.subr.msk.bf16.mxu0 %vm23653_vm5, %v24451_v4  ;;  %v8963_v0 = vld [vmem:[#allocation3 + $0x352] sm:$0xff] }
 0xc95   :  { %v8944_v32 = vld [vmem:[#allocation3 + $0x292] sm:$0xff] }
 0xc96   :  { %v19631_v61 = vpack.c.bf16 %v8945_v18, %v8944_v32  ;;  %v8950_v18 = vld [vmem:[#allocation3 + $0x2d2] sm:$0xff]  ;;  %v7399_v32 = vld [vmem:[#allocation3 + $0x4c0] sm:$0xff] }
 0xc9a   :  { %19543 = vmatpush3.bf16.xpose.msk.msra.mxu1 %vm23653_vm5, %v19541_v28  ;;  %v7339_v28 = vld [vmem:[#allocation3 + $0x268] sm:$0xff] }
 0xc9b   :  { %19399 = vmatpush3.bf16.xpose.msk.msra.mxu0 %vm23653_vm5, %v24467_v63  ;;  %19546 = vmatprep.subr.msk.bf16.mxu1 %vm23653_vm5, %v19544_v16  ;;  %v24526_v45 = vpack.c.bf16 %v7340_v36, %v7339_v28  ;;  %v19568_v16 = vpack.c.bf16 %v8909_v58, %v8908_v49  ;;  %v7394_v36 = vld [vmem:[#allocation3 + $0x490] sm:$0xff]  ;;  %v19634_v58 = vpack.c.bf16 %v8963_v0, %v8962_v3  ;;  %v7396_v28 = vld [vmem:[#allocation3 + $0x4a0] sm:$0xff] }
 0xc9c   :  { %19402 = vmatprep.subr.msk.bf16.mxu0 %vm23653_vm5, %v24469_v48  ;;  %v7378_v49 = vld [vmem:[#allocation3 + $0x3f0] sm:$0xff] }
 0xca2   :  { %19549 = vmatpush3.bf16.xpose.msk.msra.mxu1 %vm23653_vm5, %v19547_v46  ;;  %v19571_v46 = vpack.c.bf16 %v8893_v23, %v8892_v14  ;;  %v24584_v14 = vpack.c.bf16 %v7396_v28, %v7395_v21  ;;  %v8952_v28 = vld [vmem:[#allocation3 + $0x2e2] sm:$0xff] }
 0xca3   :  { %19405 = vmatpush3.bf16.xpose.msk.msra.mxu0 %vm23653_vm5, %v24482_v33  ;;  %19552 = vmatprep.subr.msk.bf16.mxu1 %vm23653_vm5, %v19550_v54  ;;  %v19622_v54 = vpack.c.bf16 %v8959_v25, %v8958_v59  ;;  %v8964_v25 = vld [vmem:[#allocation3 + $0x35a] sm:$0xff]  ;;  %v8949_v59 = vld [vmem:[#allocation3 + $0x2c2] sm:$0xff] }
 0xca4   :  { %19408 = vmatprep.subr.msk.bf16.mxu0 %vm23653_vm5, %v24484_v44 }
 0xcaa   :  { %19555 = vmatpush3.bf16.xpose.msk.msra.mxu1 %vm23653_vm5, %v19553_v2  ;;  %v8942_v2 = vld [vmem:[#allocation3 + $0x282] sm:$0xff] }
 0xcab   :  { %19411 = vmatpush3.bf16.xpose.msk.msra.mxu0 %vm23653_vm5, %v24496_v56  ;;  %19558 = vmatprep.subr.msk.bf16.mxu1 %vm23653_vm5, %v19556_v43  ;;  %v19625_v62 = vpack.c.bf16 %v8943_v52, %v8942_v2  ;;  %v8960_v43 = vld [vmem:[#allocation3 + $0x332] sm:$0xff]  ;;  %v19646_v2 = vpack.c.bf16 %v8967_v13, %v8966_v27 }
 0xcac   :  { %19414 = vmatprep.subr.msk.bf16.mxu0 %vm23653_vm5, %v24498_v9  ;;  %v19628_v57 = vpack.c.bf16 %v8961_v20, %v8960_v43  ;;  %v19643_v20 = vpack.c.bf16 %v8949_v59, %v8948_v29  ;;  %v7381_v43 = vld [vmem:[#allocation3 + $0x410] sm:$0xff]  ;;  %v8955_v59 = vld [vmem:[#allocation3 + $0x302] sm:$0xff]  ;;  %v8954_v29 = vld [vmem:[#allocation3 + $0x2fa] sm:$0xff] }
 0xcad   :  { %v8973_v13 = vld [vmem:[#allocation3 + $0x3b2] sm:$0xff]  ;;  %v19661_v27 = vpack.c.bf16 %v8955_v59, %v8954_v29 }
 0xcb2   :  { %19561 = vmatpush3.bf16.xpose.msk.msra.mxu1 %vm23653_vm5, %v19559_v10  ;;  %v7393_v10 = vld [vmem:[#allocation3 + $0x488] sm:$0xff] }
 0xcb3   :  { %19417 = vmatpush3.bf16.xpose.msk.msra.mxu0 %vm23653_vm5, %v24510_v12  ;;  %19564 = vmatprep.subr.msk.bf16.mxu1 %vm23653_vm5, %v19562_v6  ;;  %v24568_v6 = vpack.c.bf16 %v7376_v50, %v7375_v31  ;;  %v24570_v17 = vpack.c.bf16 %v7394_v36, %v7393_v10  ;;  %v7382_v50 = vld [vmem:[#allocation3 + $0x418] sm:$0xff]  ;;  %v19649_v10 = vpack.c.bf16 %v8951_v34, %v8950_v18  ;;  %v8968_v31 = vld [vmem:[#allocation3 + $0x382] sm:$0xff] }
 0xcb4   :  { %19420 = vmatprep.subr.msk.bf16.mxu0 %vm23653_vm5, %v24512_v35  ;;  %v24610_v0 = vpack.c.bf16 %v7382_v50, %v7381_v43  ;;  %v7384_v36 = vld [vmem:[#allocation3 + $0x428] sm:$0xff] }
 0xcb5   :  { %v8927_v50 = vld [vmem:[#allocation3 + $0x1ea] sm:$0xff] }
 0xcb6   :  { %v9703_v18 = vld [vmem:[#allocation3 + $0xc8] sm:$0xff] }
 0xcba   :  { %19567 = vmatpush3.bf16.xpose.msk.msra.mxu1 %vm23653_vm5, %v19565_v19  ;;  %v8965_v19 = vld [vmem:[#allocation3 + $0x362] sm:$0xff] }
 0xcbb   :  { %19423 = vmatpush3.bf16.xpose.msk.msra.mxu0 %vm23653_vm5, %v24524_v51  ;;  %19570 = vmatprep.subr.msk.bf16.mxu1 %vm23653_vm5, %v19568_v16  ;;  %v8946_v16 = vld [vmem:[#allocation3 + $0x2aa] sm:$0xff]  ;;  %v19640_v26 = vpack.c.bf16 %v8965_v19, %v8964_v25  ;;  %v7383_v19 = vld [vmem:[#allocation3 + $0x420] sm:$0xff] }
 0xcbc   :  { %19426 = vmatprep.subr.msk.bf16.mxu0 %vm23653_vm5, %v24526_v45  ;;  %v19637_v23 = vpack.c.bf16 %v8947_v22, %v8946_v16  ;;  %v7401_v22 = vld [vmem:[#allocation3 + $0x4d8] sm:$0xff]  ;;  %v7402_v25 = vld [vmem:[#allocation3 + $0x4e0] sm:$0xff] }
 0xcc2   :  { %19573 = vmatpush3.bf16.xpose.msk.msra.mxu1 %vm23653_vm5, %v19571_v46  ;;  %v7380_v46 = vld [vmem:[#allocation3 + $0x400] sm:$0xff] }
 0xcc3   :  { %19429 = vmatpush3.bf16.xpose.msk.msra.mxu0 %vm23653_vm5, %v24538_v15  ;;  %19624 = vmatprep.subr.msk.bf16.mxu1 %vm23653_vm5, %v19622_v54  ;;  %v7397_v54 = vld [vmem:[#allocation3 + $0x4b0] sm:$0xff] }
 0xcc4   :  { %19480 = vmatprep.subr.msk.bf16.mxu0 %vm23653_vm5, %v19478_v24  ;;  %v7379_v24 = vld [vmem:[#allocation3 + $0x3f8] sm:$0xff] }
 0xcc5   :  { %v24596_v52 = vpack.c.bf16 %v7380_v46, %v7379_v24  ;;  %v7385_v46 = vld [vmem:[#allocation3 + $0x438] sm:$0xff]  ;;  %v7386_v24 = vld [vmem:[#allocation3 + $0x440] sm:$0xff] }
 0xcc9   :  { %17311 = vmatmul.mubr.msk.f32.vlgmr.msra.gmra.mrb[76].mxu1 %vm1356_vm2, %v24433_v8 }
 0xcca   :  { %17209 = vmatmul.mubr.msk.f32.vlgmr.msra.gmra.mrb[12].mxu0 %vm1356_vm2, %v24247_v40  ;;  %19627 = vmatpush3.bf16.xpose.msk.msra.mxu1 %vm23653_vm5, %v19625_v62  ;;  %v24598_v62 = vpack.c.bf16 %v7398_v60, %v7397_v54  ;;  %v7404_v54 = vld [vmem:[#allocation3 + $0x4f0] sm:$0xff] }
 0xccb   :  { %19483 = vmatpush3.bf16.xpose.msk.msra.mxu0 %vm23653_vm5, %v24549_v1  ;;  %19630 = vmatprep.subr.msk.bf16.mxu1 %vm23653_vm5, %v19628_v57  ;;  %v8969_v57 = vld [vmem:[#allocation3 + $0x38a] sm:$0xff] }
 0xccc   :  { %19486 = vmatprep.subr.msk.bf16.mxu0 %vm23653_vm5, %v19484_v47  ;;  %17276 = vmatprep.mubr.msk.f32.mxu0 %vm1356_vm2, %v24247_v40  ;;  %v7377_v40 = vld [vmem:[#allocation3 + $0x3e8] sm:$0xff] }
 0xccd   :  { %17378 = vmatprep.mubr.msk.f32.mxu1 %vm1356_vm2, %v24433_v8  ;;  %v24582_v41 = vpack.c.bf16 %v7378_v49, %v7377_v40  ;;  %v7400_v47 = vld [vmem:[#allocation3 + $0x4c8] sm:$0xff]  ;;  %v24624_v49 = vpack.c.bf16 %v7384_v36, %v7383_v19 }
 0xcce   :  { %v24612_v3 = vpack.c.bf16 %v7400_v47, %v7399_v32  ;;  %v8971_v40 = vld [vmem:[#allocation3 + $0x3a2] sm:$0xff]  ;;  %v8972_v60 = vld [vmem:[#allocation3 + $0x3aa] sm:$0xff]  ;;  %v8957_v47 = vld [vmem:[#allocation3 + $0x312] sm:$0xff] }
 0xccf   :  { %v19664_v43 = vpack.c.bf16 %v8973_v13, %v8972_v60  ;;  %v8926_v36 = vld [vmem:[#allocation3 + $0x1e2] sm:$0xff]  ;;  %v8911_v19 = vld [vmem:[#allocation3 + $0x14a] sm:$0xff]  ;;  %v8928_v13 = vld [vmem:[#allocation3 + $0x1f2] sm:$0xff] }
 0xcd0   :  { %v24672_v60 = vld [vmem:[%s25723_s7 + $0x6] sm:$0x3] }
 0xcd2   :  { %19633 = vmatpush3.bf16.xpose.msk.msra.mxu1 %vm23653_vm5, %v19631_v61  ;;  %v19652_v61 = vpack.c.bf16 %v8969_v57, %v8968_v31  ;;  %v7388_v57 = vld [vmem:[#allocation3 + $0x450] sm:$0xff] }
 0xcd3   :  { %19489 = vmatpush3.bf16.xpose.msk.msra.mxu0 %vm23653_vm5, %v24568_v6  ;;  %19636 = vmatprep.subr.msk.bf16.mxu1 %vm23653_vm5, %v19634_v58  ;;  %v8953_v58 = vld [vmem:[#allocation3 + $0x2ea] sm:$0xff] }
 0xcd4   :  { %19492 = vmatprep.subr.msk.bf16.mxu0 %vm23653_vm5, %v24570_v17  ;;  %v19655_v16 = vpack.c.bf16 %v8953_v58, %v8952_v28  ;;  %v8956_v31 = vld [vmem:[#allocation3 + $0x30a] sm:$0xff] }
 0xcd5   :  { %v9704_v58 = vld [vmem:[#allocation3 + $0xd0] sm:$0xff]  ;;  %v9687_v28 = vld [vmem:[#allocation3 + $0x28] sm:$0xff] }
 0xcda   :  { %19639 = vmatpush3.bf16.xpose.msk.msra.mxu1 %vm23653_vm5, %v19637_v23  ;;  %v8970_v23 = vld [vmem:[#allocation3 + $0x39a] sm:$0xff] }
 0xcdb   :  { %19495 = vmatpush3.bf16.xpose.msk.msra.mxu0 %vm23653_vm5, %v24582_v41  ;;  %19642 = vmatprep.subr.msk.bf16.mxu1 %vm23653_vm5, %v19640_v26  ;;  %v19658_v21 = vpack.c.bf16 %v8971_v40, %v8970_v23  ;;  %v24626_v26 = vpack.c.bf16 %v7402_v25, %v7401_v22  ;;  %v19574_v40 = vpack.c.bf16 %v8927_v50, %v8926_v36  ;;  %v9706_v23 = vld [vmem:[#allocation3 + $0xe0] sm:$0xff]  ;;  %v8912_v50 = vld [vmem:[#allocation3 + $0x152] sm:$0xff] }
 0xcdc   :  { %19498 = vmatprep.subr.msk.bf16.mxu0 %vm23653_vm5, %v24584_v14  ;;  %v19718_v22 = vpack.c.bf16 %v9704_v58, %v9703_v18  ;;  %v8910_v25 = vld [vmem:[#allocation3 + $0x142] sm:$0xff]  ;;  %v9689_v18 = vld [vmem:[#allocation3 + $0x38] sm:$0xff] }
 0xcdd   :  { %v9708_v36 = vld [vmem:[#allocation3 + $0xf8] sm:$0xff] }
 0xce2   :  { %19645 = vmatpush3.bf16.xpose.msk.msra.mxu1 %vm23653_vm5, %v19643_v20  ;;  %v24638_v20 = vpack.c.bf16 %v7386_v24, %v7385_v46  ;;  %v19577_v46 = vpack.c.bf16 %v8911_v19, %v8910_v25  ;;  %v21286_v24 = vld [vmem:[%s25723_s7] sm:$0x3]  ;;  %v9692_v25 = vld [vmem:[#allocation3 + $0x58] sm:$0xff] }
 0xce3   :  { %19501 = vmatpush3.bf16.xpose.msk.msra.mxu0 %vm23653_vm5, %v24596_v52  ;;  %19648 = vmatprep.subr.msk.bf16.mxu1 %vm23653_vm5, %v19646_v2  ;;  %v7403_v2 = vld [vmem:[#allocation3 + $0x4e8] sm:$0xff]  ;;  %v9691_v19 = vld [vmem:[#allocation3 + $0x50] sm:$0xff] }
 0xce4   :  { %19504 = vmatprep.subr.msk.bf16.mxu0 %vm23653_vm5, %v24598_v62  ;;  %v24640_v34 = vpack.c.bf16 %v7404_v54, %v7403_v2  ;;  %v9705_v54 = vld [vmem:[#allocation3 + $0xd8] sm:$0xff] }
 0xce5   :  { %v8913_v2 = vld [vmem:[#allocation3 + $0x15a] sm:$0xff] }
 0xcea   :  { %19651 = vmatpush3.bf16.xpose.msk.msra.mxu1 %vm23653_vm5, %v19649_v10  ;;  %v7387_v10 = vld [vmem:[#allocation3 + $0x448] sm:$0xff] }
 0xceb   :  { %19507 = vmatpush3.bf16.xpose.msk.msra.mxu0 %vm23653_vm5, %v24610_v0  ;;  %19654 = vmatprep.subr.msk.bf16.mxu1 %vm23653_vm5, %v19652_v61  ;;  %v24652_v32 = vpack.c.bf16 %v7388_v57, %v7387_v10  ;;  %v19667_v61 = vpack.c.bf16 %v8957_v47, %v8956_v31  ;;  %v8931_v57 = vld [vmem:[#allocation3 + $0x212] sm:$0xff]  ;;  %v19583_v10 = vpack.c.bf16 %v8913_v2, %v8912_v50  ;;  %v8935_v2 = vld [vmem:[#allocation3 + $0x23a] sm:$0xff] }
 0xcec   :  { %19510 = vmatprep.subr.msk.bf16.mxu0 %vm23653_vm5, %v24612_v3  ;;  %v9707_v47 = vld [vmem:[#allocation3 + $0xf0] sm:$0xff] }
 0xcf2   :  { %19657 = vmatpush3.bf16.xpose.msk.msra.mxu1 %vm23653_vm5, %v19655_v16  ;;  %v8929_v16 = vld [vmem:[#allocation3 + $0x1fa] sm:$0xff] }
 0xcf3   :  { %19513 = vmatpush3.bf16.xpose.msk.msra.mxu0 %vm23653_vm5, %v24624_v49  ;;  %19660 = vmatprep.subr.msk.bf16.mxu1 %vm23653_vm5, %v19658_v21  ;;  %v9688_v21 = vld [vmem:[#allocation3 + $0x30] sm:$0xff]  ;;  %v19580_v29 = vpack.c.bf16 %v8929_v16, %v8928_v13  ;;  %v9710_v16 = vld [vmem:[#allocation3 + $0x108] sm:$0xff]  ;;  %v9709_v13 = vld [vmem:[#allocation3 + $0x100] sm:$0xff] }
 0xcf4   :  { %19516 = vmatprep.subr.msk.bf16.mxu0 %vm23653_vm5, %v24626_v26  ;;  %v19721_v59 = vpack.c.bf16 %v9688_v21, %v9687_v28  ;;  %v8933_v28 = vld [vmem:[#allocation3 + $0x222] sm:$0xff] }
 0xcfa   :  { %19663 = vmatpush3.bf16.xpose.msk.msra.mxu1 %vm23653_vm5, %v19661_v27  ;;  %v19724_v27 = vpack.c.bf16 %v9706_v23, %v9705_v54  ;;  %v8914_v23 = vld [vmem:[#allocation3 + $0x16a] sm:$0xff] }
 0xcfb   :  { %19519 = vmatpush3.bf16.xpose.msk.msra.mxu0 %vm23653_vm5, %v24638_v20  ;;  %19666 = vmatprep.subr.msk.bf16.mxu1 %vm23653_vm5, %v19664_v43  ;;  %v9690_v43 = vld [vmem:[#allocation3 + $0x40] sm:$0xff] }
 0xcfc   :  { %19522 = vmatprep.subr.msk.bf16.mxu0 %vm23653_vm5, %v24640_v34  ;;  %v19727_v31 = vpack.c.bf16 %v9690_v43, %v9689_v18  ;;  %v9711_v43 = vld [vmem:[#allocation3 + $0x118] sm:$0xff] }
 0xd02   :  { %19669 = vmatpush3.bf16.xpose.msk.msra.mxu1 %vm23653_vm5, %v19667_v61  ;;  %v8930_v61 = vld [vmem:[#allocation3 + $0x20a] sm:$0xff] }
 0xd03   :  { %19525 = vmatpush3.bf16.xpose.msk.msra.mxu0 %vm23653_vm5, %v24652_v32  ;;  %19720 = vmatprep.subr.msk.bf16.mxu1 %vm23653_vm5, %v19718_v22  ;;  %v19586_v58 = vpack.c.bf16 %v8931_v57, %v8930_v61  ;;  %v8915_v22 = vld [vmem:[#allocation3 + $0x172] sm:$0xff]  ;;  %v8916_v57 = vld [vmem:[#allocation3 + $0x17a] sm:$0xff] }
 0xd04   :  { %19576 = vmatprep.subr.msk.bf16.mxu0 %vm23653_vm5, %v19574_v40  ;;  %v19730_v40 = vpack.c.bf16 %v9708_v36, %v9707_v47  ;;  %v19589_v21 = vpack.c.bf16 %v8915_v22, %v8914_v23  ;;  %v9693_v47 = vld [vmem:[#allocation3 + $0x60] sm:$0xff]  ;;  %v8937_v22 = vld [vmem:[#allocation3 + $0x24a] sm:$0xff] }
 0xd09   :  { %17379 = vmatmul.mubr.msk.f32.vlgmr.msra.gmra.mrb[78].mxu1 %vm1356_vm2, %v24433_v8 }
 0xd0a   :  { %17277 = vmatmul.mubr.msk.f32.vlgmr.msra.gmra.mrb[14].mxu0 %vm1356_vm2, %v21286_v24  ;;  %19723 = vmatpush3.bf16.xpose.msk.msra.mxu1 %vm23653_vm5, %v19721_v59  ;;  %v8932_v59 = vld [vmem:[#allocation3 + $0x21a] sm:$0xff]  ;;  %v19736_v24 = vpack.c.bf16 %v9710_v16, %v9709_v13 }
 0xd0b   :  { %19579 = vmatpush3.bf16.xpose.msk.msra.mxu0 %vm23653_vm5, %v19577_v46  ;;  %19726 = vmatprep.subr.msk.bf16.mxu1 %vm23653_vm5, %v19724_v27  ;;  %v19733_v46 = vpack.c.bf16 %v9692_v25, %v9691_v19  ;;  %v19592_v54 = vpack.c.bf16 %v8933_v28, %v8932_v59  ;;  %v9694_v27 = vld [vmem:[#allocation3 + $0x68] sm:$0xff]  ;;  %v9714_v19 = vld [vmem:[#allocation3 + $0x130] sm:$0xff]  ;;  %v9696_v16 = vld [vmem:[#allocation3 + $0x80] sm:$0xff] }
 0xd0c   :  { %19582 = vmatprep.subr.msk.bf16.mxu0 %vm23653_vm5, %v19580_v29  ;;  %17344 = vmatprep.mubr.msk.f32.mxu0 %vm1356_vm2, %v24433_v8  ;;  %v8917_v29 = vld [vmem:[#allocation3 + $0x182] sm:$0xff]  ;;  %v19739_v18 = vpack.c.bf16 %v9694_v27, %v9693_v47  ;;  %v8918_v28 = vld [vmem:[#allocation3 + $0x192] sm:$0xff]  ;;  %v8938_v47 = vld [vmem:[#allocation3 + $0x25a] sm:$0xff] }
 0xd0d   :  { %17446 = vmatprep.mubr.msk.f32.mxu1 %vm1356_vm2, %v24672_v60  ;;  %v19595_v50 = vpack.c.bf16 %v8917_v29, %v8916_v57  ;;  %v8939_v29 = vld [vmem:[#allocation3 + $0x262] sm:$0xff] }
 0xd0e   :  { %v8920_v27 = vld [vmem:[#allocation3 + $0x1a2] sm:$0xff] }
 0xd12   :  { %19729 = vmatpush3.bf16.xpose.msk.msra.mxu1 %vm23653_vm5, %v19727_v31  ;;  %v9712_v31 = vld [vmem:[#allocation3 + $0x120] sm:$0xff] }
 0xd13   :  { %19585 = vmatpush3.bf16.xpose.msk.msra.mxu0 %vm23653_vm5, %v19583_v10  ;;  %19732 = vmatprep.subr.msk.bf16.mxu1 %vm23653_vm5, %v19730_v40  ;;  %v8934_v10 = vld [vmem:[#allocation3 + $0x232] sm:$0xff]  ;;  %v19742_v36 = vpack.c.bf16 %v9712_v31, %v9711_v43 }
 0xd14   :  { %19588 = vmatprep.subr.msk.bf16.mxu0 %vm23653_vm5, %v19586_v58  ;;  %v19598_v61 = vpack.c.bf16 %v8935_v2, %v8934_v10  ;;  %v8919_v58 = vld [vmem:[#allocation3 + $0x19a] sm:$0xff]  ;;  %v9697_v2 = vld [vmem:[#allocation3 + $0x88] sm:$0xff]  ;;  %v8941_v31 = vld [vmem:[#allocation3 + $0x272] sm:$0xff] }
 0xd15   :  { %v9695_v40 = vld [vmem:[#allocation3 + $0x78] sm:$0xff]  ;;  %v19601_v23 = vpack.c.bf16 %v8919_v58, %v8918_v28  ;;  %v9699_v10 = vld [vmem:[#allocation3 + $0xa0] sm:$0xff] }
 0xd16   :  { %v19745_v25 = vpack.c.bf16 %v9696_v16, %v9695_v40  ;;  %v9702_v28 = vld [vmem:[#allocation3 + $0xb8] sm:$0xff]  ;;  %v8991_v16 = vld [vmem:[#allocation3 + $0x46a] sm:$0xff] }
 0xd1a   :  { %19735 = vmatpush3.bf16.xpose.msk.msra.mxu1 %vm23653_vm5, %v19733_v46  ;;  %v9713_v46 = vld [vmem:[#allocation3 + $0x128] sm:$0xff] }
 0xd1b   :  { %19591 = vmatpush3.bf16.xpose.msk.msra.mxu0 %vm23653_vm5, %v19589_v21  ;;  %19738 = vmatprep.subr.msk.bf16.mxu1 %vm23653_vm5, %v19736_v24  ;;  %v8936_v21 = vld [vmem:[#allocation3 + $0x242] sm:$0xff]  ;;  %v19748_v13 = vpack.c.bf16 %v9714_v19, %v9713_v46  ;;  %v9698_v24 = vld [vmem:[#allocation3 + $0x90] sm:$0xff] }
 0xd1c   :  { %19594 = vmatprep.subr.msk.bf16.mxu0 %vm23653_vm5, %v19592_v54  ;;  %v19604_v59 = vpack.c.bf16 %v8937_v22, %v8936_v21  ;;  %v8921_v54 = vld [vmem:[#allocation3 + $0x1aa] sm:$0xff]  ;;  %v19751_v57 = vpack.c.bf16 %v9698_v24, %v9697_v2  ;;  %v8993_v2 = vld [vmem:[#allocation3 + $0x47a] sm:$0xff] }
 0xd1d   :  { %v19607_v43 = vpack.c.bf16 %v8921_v54, %v8920_v27  ;;  %v8940_v22 = vld [vmem:[#allocation3 + $0x26a] sm:$0xff] }
 0xd1e   :  { %v19616_v19 = vpack.c.bf16 %v8941_v31, %v8940_v22  ;;  %v9701_v21 = vld [vmem:[#allocation3 + $0xb0] sm:$0xff]  ;;  %v9751_v27 = vld [vmem:[#allocation3 + $0x2a8] sm:$0xff]  ;;  %v9769_v31 = vld [vmem:[#allocation3 + $0x358] sm:$0xff] }
 0xd1f   :  { %v9768_v54 = vld [vmem:[#allocation3 + $0x350] sm:$0xff] }
 0xd20   :  { %v8995_v22 = vld [vmem:[#allocation3 + $0x492] sm:$0xff] }
 0xd22   :  { %19741 = vmatpush3.bf16.xpose.msk.msra.mxu1 %vm23653_vm5, %v19739_v18  ;;  %v8923_v18 = vld [vmem:[#allocation3 + $0x1c2] sm:$0xff] }
 0xd23   :  { %19597 = vmatpush3.bf16.xpose.msk.msra.mxu0 %vm23653_vm5, %v19595_v50  ;;  %19744 = vmatprep.subr.msk.bf16.mxu1 %vm23653_vm5, %v19742_v36  ;;  %v19610_v50 = vpack.c.bf16 %v8939_v29, %v8938_v47  ;;  %v9700_v36 = vld [vmem:[#allocation3 + $0xa8] sm:$0xff]  ;;  %v9752_v47 = vld [vmem:[#allocation3 + $0x2b0] sm:$0xff] }
 0xd24   :  { %19600 = vmatprep.subr.msk.bf16.mxu0 %vm23653_vm5, %v19598_v61  ;;  %v8922_v61 = vld [vmem:[#allocation3 + $0x1ba] sm:$0xff]  ;;  %v19757_v40 = vpack.c.bf16 %v9700_v36, %v9699_v10  ;;  %v8992_v10 = vld [vmem:[#allocation3 + $0x472] sm:$0xff] }
 0xd25   :  { %v19613_v58 = vpack.c.bf16 %v8923_v18, %v8922_v61  ;;  %v19817_v18 = vpack.c.bf16 %v9752_v47, %v9751_v27  ;;  %v19676_v61 = vpack.c.bf16 %v8993_v2, %v8992_v10  ;;  %v8981_v47 = vld [vmem:[#allocation3 + $0x402] sm:$0xff] }
 0xd2a   :  { %19747 = vmatpush3.bf16.xpose.msk.msra.mxu1 %vm23653_vm5, %v19745_v25  ;;  %v8924_v25 = vld [vmem:[#allocation3 + $0x1ca] sm:$0xff] }
 0xd2b   :  { %19603 = vmatpush3.bf16.xpose.msk.msra.mxu0 %vm23653_vm5, %v19601_v23  ;;  %19750 = vmatprep.subr.msk.bf16.mxu1 %vm23653_vm5, %v19748_v13  ;;  %v9767_v23 = vld [vmem:[#allocation3 + $0x348] sm:$0xff] }
 0xd2c   :  { %19606 = vmatprep.subr.msk.bf16.mxu0 %vm23653_vm5, %v19604_v59  ;;  %v19763_v59 = vpack.c.bf16 %v9702_v28, %v9701_v21  ;;  %v8990_v13 = vld [vmem:[#allocation3 + $0x462] sm:$0xff]  ;;  %v19814_v29 = vpack.c.bf16 %v9768_v54, %v9767_v23  ;;  %v9753_v28 = vld [vmem:[#allocation3 + $0x2b8] sm:$0xff]  ;;  %v9755_v54 = vld [vmem:[#allocation3 + $0x2d0] sm:$0xff] }
 0xd2d   :  { %v19670_v24 = vpack.c.bf16 %v8991_v16, %v8990_v13  ;;  %v9772_v21 = vld [vmem:[#allocation3 + $0x378] sm:$0xff] }
 0xd2e   :  { %v8979_v13 = vld [vmem:[#allocation3 + $0x3f2] sm:$0xff] }
 0xd32   :  { %19753 = vmatpush3.bf16.xpose.msk.msra.mxu1 %vm23653_vm5, %v19751_v57  ;;  %v8974_v57 = vld [vmem:[#allocation3 + $0x3c2] sm:$0xff] }
 0xd33   :  { %19609 = vmatpush3.bf16.xpose.msk.msra.mxu0 %vm23653_vm5, %v19607_v43  ;;  %19756 = vmatprep.subr.msk.bf16.mxu1 %vm23653_vm5, %v24422_v55  ;;  %v8925_v55 = vld [vmem:[#allocation3 + $0x1d2] sm:$0xff]  ;;  %v9770_v43 = vld [vmem:[#allocation3 + $0x360] sm:$0xff] }
 0xd34   :  { %19612 = vmatprep.subr.msk.bf16.mxu0 %vm23653_vm5, %v19610_v50  ;;  %v19619_v46 = vpack.c.bf16 %v8925_v55, %v8924_v25  ;;  %v19820_v36 = vpack.c.bf16 %v9770_v43, %v9769_v31  ;;  %v8976_v55 = vld [vmem:[#allocation3 + $0x3d2] sm:$0xff]  ;;  %v8994_v25 = vld [vmem:[#allocation3 + $0x48a] sm:$0xff]  ;;  %v8996_v43 = vld [vmem:[#allocation3 + $0x49a] sm:$0xff] }
 0xd35   :  { %v8998_v31 = vld [vmem:[#allocation3 + $0x4b2] sm:$0xff] }
 0xd3a   :  { %19759 = vmatpush3.bf16.xpose.msk.msra.mxu1 %vm23653_vm5, %v19757_v40  ;;  %v9754_v40 = vld [vmem:[#allocation3 + $0x2c0] sm:$0xff] }
 0xd3b   :  { %19615 = vmatpush3.bf16.xpose.msk.msra.mxu0 %vm23653_vm5, %v19613_v58  ;;  %19762 = vmatprep.subr.msk.bf16.mxu1 %vm23653_vm5, %v24449_v39  ;;  %v8975_v39 = vld [vmem:[#allocation3 + $0x3ca] sm:$0xff]  ;;  %v8977_v58 = vld [vmem:[#allocation3 + $0x3da] sm:$0xff]  ;;  %v19823_v23 = vpack.c.bf16 %v9754_v40, %v9753_v28 }
 0xd3c   :  { %19618 = vmatprep.subr.msk.bf16.mxu0 %vm23653_vm5, %v19616_v19  ;;  %v19673_v50 = vpack.c.bf16 %v8975_v39, %v8974_v57  ;;  %v9771_v19 = vld [vmem:[#allocation3 + $0x370] sm:$0xff]  ;;  %v19679_v16 = vpack.c.bf16 %v8977_v58, %v8976_v55  ;;  %v9756_v39 = vld [vmem:[#allocation3 + $0x2d8] sm:$0xff]  ;;  %v8984_v55 = vld [vmem:[#allocation3 + $0x422] sm:$0xff] }
 0xd3d   :  { %v19829_v2 = vpack.c.bf16 %v9756_v39, %v9755_v54  ;;  %v8982_v58 = vld [vmem:[#allocation3 + $0x412] sm:$0xff]  ;;  %v9004_v54 = vld [vmem:[#allocation3 + $0x4ea] sm:$0xff] }
 0xd3e   :  { %v8988_v39 = vld [vmem:[#allocation3 + $0x44a] sm:$0xff] }
 0xd42   :  { %19765 = vmatpush3.bf16.xpose.msk.msra.mxu1 %vm23653_vm5, %v19763_v59  ;;  %v19826_v59 = vpack.c.bf16 %v9772_v21, %v9771_v19  ;;  %v8986_v21 = vld [vmem:[#allocation3 + $0x43a] sm:$0xff] }
 0xd43   :  { %19621 = vmatpush3.bf16.xpose.msk.msra.mxu0 %vm23653_vm5, %v19619_v46  ;;  %19816 = vmatprep.subr.msk.bf16.mxu1 %vm23653_vm5, %v19814_v29  ;;  %v19682_v46 = vpack.c.bf16 %v8995_v22, %v8994_v25  ;;  %v8978_v29 = vld [vmem:[#allocation3 + $0x3ea] sm:$0xff]  ;;  %v9000_v22 = vld [vmem:[#allocation3 + $0x4c2] sm:$0xff]  ;;  %v9005_v25 = vld [vmem:[#allocation3 + $0x4f2] sm:$0xff] }
 0xd44   :  { %19672 = vmatprep.subr.msk.bf16.mxu0 %vm23653_vm5, %v19670_v24  ;;  %v8997_v24 = vld [vmem:[#allocation3 + $0x4a2] sm:$0xff]  ;;  %v19685_v27 = vpack.c.bf16 %v8979_v13, %v8978_v29  ;;  %v10513_v29 = vld [vmem:[#allocation3 + $0xd1] sm:$0xff] }
 0xd45   :  { %v19688_v57 = vpack.c.bf16 %v8997_v24, %v8996_v43  ;;  %v19712_v24 = vpack.c.bf16 %v9005_v25, %v9004_v54 }
 0xd49   :  { %17447 = vmatmul.mubr.msk.f32.vlgmr.msra.gmra.mrb[76].mxu1 %vm1356_vm2, %v24672_v60 }
 0xd4a   :  { %17345 = vmatmul.mubr.msk.f32.vlgmr.msra.gmra.mrb[12].mxu0 %vm1356_vm2, %v24433_v8  ;;  %19819 = vmatpush3.bf16.xpose.msk.msra.mxu1 %vm23653_vm5, %v19817_v18  ;;  %v8980_v18 = vld [vmem:[#allocation3 + $0x3fa] sm:$0xff] }
 0xd4b   :  { %19675 = vmatpush3.bf16.xpose.msk.msra.mxu0 %vm23653_vm5, %v19673_v50  ;;  %19822 = vmatprep.subr.msk.bf16.mxu1 %vm23653_vm5, %v19820_v36  ;;  %v8999_v50 = vld [vmem:[#allocation3 + $0x4ba] sm:$0xff]  ;;  %v19691_v10 = vpack.c.bf16 %v8981_v47, %v8980_v18  ;;  %v9001_v36 = vld [vmem:[#allocation3 + $0x4ca] sm:$0xff] }
 0xd4c   :  { %19678 = vmatprep.subr.msk.bf16.mxu0 %vm23653_vm5, %v19676_v61  ;;  %17412 = vmatprep.mubr.msk.f32.mxu0 %vm1356_vm2, %v24433_v8  ;;  %v19694_v61 = vpack.c.bf16 %v8999_v50, %v8998_v31  ;;  %v19700_v19 = vpack.c.bf16 %v9001_v36, %v9000_v22  ;;  %v10515_v50 = vld [vmem:[#allocation3 + $0xe1] sm:$0xff]  ;;  %v10496_v18 = vld [vmem:[#allocation3 + $0x29] sm:$0xff]  ;;  %v10514_v31 = vld [vmem:[#allocation3 + $0xd9] sm:$0xff] }
 0xd4d   :  { %17514 = vmatprep.mubr.msk.f32.mxu1 %vm1356_vm2, %v24672_v60  ;;  %v10498_v36 = vld [vmem:[#allocation3 + $0x39] sm:$0xff]  ;;  %v10519_v22 = vld [vmem:[#allocation3 + $0x109] sm:$0xff] }
 0xd52   :  { %19825 = vmatpush3.bf16.xpose.msk.msra.mxu1 %vm23653_vm5, %v19823_v23 }
 0xd53   :  { %19681 = vmatpush3.bf16.xpose.msk.msra.mxu0 %vm23653_vm5, %v19679_v16  ;;  %19828 = vmatprep.subr.msk.bf16.mxu1 %vm23653_vm5, %v19826_v59  ;;  %v9002_v16 = vld [vmem:[#allocation3 + $0x4da] sm:$0xff] }
 0xd54   :  { %19684 = vmatprep.subr.msk.bf16.mxu0 %vm23653_vm5, %v19682_v46  ;;  %v9764_v46 = vld [vmem:[#allocation3 + $0x328] sm:$0xff] }
 0xd5a   :  { %19831 = vmatpush3.bf16.xpose.msk.msra.mxu1 %vm23653_vm5, %v19829_v2 }
 0xd5b   :  { %19687 = vmatpush3.bf16.xpose.msk.msra.mxu0 %vm23653_vm5, %v19685_v27  ;;  %19834 = vmatprep.subr.msk.bf16.mxu1 %vm23653_vm5, %v24359_v30  ;;  %v8983_v30 = vld [vmem:[#allocation3 + $0x41a] sm:$0xff]  ;;  %v9765_v27 = vld [vmem:[#allocation3 + $0x330] sm:$0xff] }
 0xd5c   :  { %19690 = vmatprep.subr.msk.bf16.mxu0 %vm23653_vm5, %v19688_v57  ;;  %v19697_v40 = vpack.c.bf16 %v8983_v30, %v8982_v58  ;;  %v10512_v57 = vld [vmem:[#allocation3 + $0xc9] sm:$0xff]  ;;  %v24832_v30 = vld [vmem:[%s25723_s7 + $0x8] sm:$0x3] }
 0xd5d   :  { %v19910_v47 = vpack.c.bf16 %v10513_v29, %v10512_v57  ;;  %v10516_v58 = vld [vmem:[#allocation3 + $0xf1] sm:$0xff] }
 0xd62   :  { %19837 = vmatpush3.bf16.xpose.msk.msra.mxu1 %vm23653_vm5, %v24373_v53  ;;  %v8985_v53 = vld [vmem:[#allocation3 + $0x42a] sm:$0xff] }
 0xd63   :  { %19693 = vmatpush3.bf16.xpose.msk.msra.mxu0 %vm23653_vm5, %v19691_v10  ;;  %19840 = vmatprep.subr.msk.bf16.mxu1 %vm23653_vm5, %v24377_v5  ;;  %v9003_v5 = vld [vmem:[#allocation3 + $0x4e2] sm:$0xff]  ;;  %v19703_v28 = vpack.c.bf16 %v8985_v53, %v8984_v55 }
 0xd64   :  { %19696 = vmatprep.subr.msk.bf16.mxu0 %vm23653_vm5, %v19694_v61  ;;  %v19706_v23 = vpack.c.bf16 %v9003_v5, %v9002_v16  ;;  %v19916_v61 = vpack.c.bf16 %v10515_v50, %v10514_v31  ;;  %v10518_v5 = vld [vmem:[#allocation3 + $0x101] sm:$0xff]  ;;  %v10526_v50 = vld [vmem:[#allocation3 + $0x151] sm:$0xff]  ;;  %v10511_v31 = vld [vmem:[#allocation3 + $0xb9] sm:$0xff] }
 0xd65   :  { %v19928_v55 = vpack.c.bf16 %v10519_v22, %v10518_v5  ;;  %v10579_v22 = vld [vmem:[#allocation3 + $0x361] sm:$0xff]  ;;  %v10578_v5 = vld [vmem:[#allocation3 + $0x359] sm:$0xff] }
 0xd6a   :  { %19843 = vmatpush3.bf16.xpose.msk.msra.mxu1 %vm23653_vm5, %v24393_v11  ;;  %v8987_v11 = vld [vmem:[#allocation3 + $0x442] sm:$0xff] }
 0xd6b   :  { %19699 = vmatpush3.bf16.xpose.msk.msra.mxu0 %vm23653_vm5, %v19697_v40  ;;  %19846 = vmatprep.subr.msk.bf16.mxu1 %vm23653_vm5, %v24397_v37  ;;  %v9763_v37 = vld [vmem:[#allocation3 + $0x320] sm:$0xff]  ;;  %v19709_v59 = vpack.c.bf16 %v8987_v11, %v8986_v21  ;;  %v10522_v21 = vld [vmem:[#allocation3 + $0x129] sm:$0xff] }
 0xd6c   :  { %19702 = vmatprep.subr.msk.bf16.mxu0 %vm23653_vm5, %v19700_v19  ;;  %v19853_v13 = vpack.c.bf16 %v9764_v46, %v9763_v37  ;;  %v10500_v19 = vld [vmem:[#allocation3 + $0x51] sm:$0xff]  ;;  %v10504_v37 = vld [vmem:[#allocation3 + $0x79] sm:$0xff] }
 0xd72   :  { %19849 = vmatpush3.bf16.xpose.msk.msra.mxu1 %vm23653_vm5, %v24409_v7  ;;  %v8989_v7 = vld [vmem:[#allocation3 + $0x452] sm:$0xff] }
 0xd73   :  { %19705 = vmatpush3.bf16.xpose.msk.msra.mxu0 %vm23653_vm5, %v19703_v28  ;;  %19852 = vmatprep.subr.msk.bf16.mxu1 %vm23653_vm5, %v24549_v1  ;;  %v9766_v1 = vld [vmem:[#allocation3 + $0x338] sm:$0xff]  ;;  %v19715_v2 = vpack.c.bf16 %v8989_v7, %v8988_v39  ;;  %v10502_v28 = vld [vmem:[#allocation3 + $0x61] sm:$0xff] }
 0xd74   :  { %19708 = vmatprep.subr.msk.bf16.mxu0 %vm23653_vm5, %v19706_v23  ;;  %v19859_v43 = vpack.c.bf16 %v9766_v1, %v9765_v27  ;;  %v10520_v23 = vld [vmem:[#allocation3 + $0x119] sm:$0xff]  ;;  %v10524_v7 = vld [vmem:[#allocation3 + $0x141] sm:$0xff] }
 0xd75   :  { %v9750_v39 = vld [vmem:[#allocation3 + $0x298] sm:$0xff] }
 0xd76   :  { %v10527_v27 = vld [vmem:[#allocation3 + $0x159] sm:$0xff] }
 0xd7a   :  { %19855 = vmatpush3.bf16.xpose.msk.msra.mxu1 %vm23653_vm5, %v19853_v13  ;;  %v10506_v13 = vld [vmem:[#allocation3 + $0x89] sm:$0xff] }
 0xd7b   :  { %19711 = vmatpush3.bf16.xpose.msk.msra.mxu0 %vm23653_vm5, %v19709_v59  ;;  %19858 = vmatprep.subr.msk.bf16.mxu1 %vm23653_vm5, %v24568_v6  ;;  %v10497_v6 = vld [vmem:[#allocation3 + $0x31] sm:$0xff]  ;;  %v10525_v59 = vld [vmem:[#allocation3 + $0x149] sm:$0xff] }
 0xd7c   :  { %19714 = vmatprep.subr.msk.bf16.mxu0 %vm23653_vm5, %v19712_v24  ;;  %v19913_v10 = vpack.c.bf16 %v10497_v6, %v10496_v18  ;;  %v9748_v24 = vld [vmem:[#allocation3 + $0x288] sm:$0xff]  ;;  %v19946_v29 = vpack.c.bf16 %v10525_v59, %v10524_v7  ;;  %v9749_v6 = vld [vmem:[#allocation3 + $0x290] sm:$0xff]  ;;  %v19952_v18 = vpack.c.bf16 %v10527_v27, %v10526_v50  ;;  %v10591_v27 = vld [vmem:[#allocation3 + $0x3d9] sm:$0xff] }
 0xd7d   :  { %v9812_v7 = vld [vmem:[#allocation3 + $0x508] sm:$0xff] }
 0xd82   :  { %19861 = vmatpush3.bf16.xpose.msk.msra.mxu1 %vm23653_vm5, %v19859_v43  ;;  %v10508_v43 = vld [vmem:[#allocation3 + $0xa1] sm:$0xff] }
 0xd83   :  { %19717 = vmatpush3.bf16.xpose.msk.msra.mxu0 %vm23653_vm5, %v19715_v2  ;;  %19912 = vmatprep.subr.msk.bf16.mxu1 %vm23653_vm5, %v19910_v47  ;;  %v9732_v2 = vld [vmem:[#allocation3 + $0x1e8] sm:$0xff] }
 0xd84   :  { %19768 = vmatprep.subr.msk.bf16.mxu0 %vm23653_vm5, %v24451_v4  ;;  %v10517_v4 = vld [vmem:[#allocation3 + $0xf9] sm:$0xff] }
 0xd85   :  { %v19922_v40 = vpack.c.bf16 %v10517_v4, %v10516_v58  ;;  %v10510_v4 = vld [vmem:[#allocation3 + $0xb1] sm:$0xff]  ;;  %v10576_v58 = vld [vmem:[#allocation3 + $0x349] sm:$0xff] }
 0xd89   :  { %17515 = vmatmul.mubr.msk.f32.vlgmr.msra.gmra.mrb[78].mxu1 %vm1356_vm2, %v24672_v60 }
 0xd8a   :  { %17413 = vmatmul.mubr.msk.f32.vlgmr.msra.gmra.mrb[14].mxu0 %vm1356_vm2, %v24433_v8  ;;  %19915 = vmatpush3.bf16.xpose.msk.msra.mxu1 %vm23653_vm5, %v19913_v10  ;;  %v10499_v8 = vld [vmem:[#allocation3 + $0x41] sm:$0xff]  ;;  %v9734_v10 = vld [vmem:[#allocation3 + $0x1f8] sm:$0xff] }
 0xd8b   :  { %19771 = vmatpush3.bf16.xpose.msk.msra.mxu0 %vm23653_vm5, %v24467_v63  ;;  %19918 = vmatprep.subr.msk.bf16.mxu1 %vm23653_vm5, %v19916_v61  ;;  %v19919_v63 = vpack.c.bf16 %v10499_v8, %v10498_v36  ;;  %v10577_v61 = vld [vmem:[#allocation3 + $0x351] sm:$0xff] }
 0xd8c   :  { %19774 = vmatprep.subr.msk.bf16.mxu0 %vm23653_vm5, %v24469_v48  ;;  %17480 = vmatprep.mubr.msk.f32.mxu0 %vm1356_vm2, %v24672_v60  ;;  %v10501_v48 = vld [vmem:[#allocation3 + $0x59] sm:$0xff]  ;;  %v9733_v8 = vld [vmem:[#allocation3 + $0x1f0] sm:$0xff] }
 0xd8d   :  { %17582 = vmatprep.mubr.msk.f32.mxu1 %vm1356_vm2, %v24832_v30  ;;  %v19925_v53 = vpack.c.bf16 %v10501_v48, %v10500_v19  ;;  %v19811_v36 = vpack.c.bf16 %v9734_v10, %v9733_v8  ;;  %v10561_v48 = vld [vmem:[#allocation3 + $0x2b1] sm:$0xff]  ;;  %v10560_v19 = vld [vmem:[#allocation3 + $0x2a9] sm:$0xff] }
 0xd8e   :  { %v9798_v10 = vld [vmem:[#allocation3 + $0x478] sm:$0xff] }
 0xd8f   :  { %v11322_v8 = vld [vmem:[#allocation3 + $0xd2] sm:$0xff] }
 0xd92   :  { %19921 = vmatpush3.bf16.xpose.msk.msra.mxu1 %vm23653_vm5, %v19919_v63  ;;  %v19955_v63 = vpack.c.bf16 %v10511_v31, %v10510_v4  ;;  %v10575_v31 = vld [vmem:[#allocation3 + $0x339] sm:$0xff]  ;;  %v9797_v4 = vld [vmem:[#allocation3 + $0x470] sm:$0xff] }
 0xd93   :  { %19777 = vmatpush3.bf16.xpose.msk.msra.mxu0 %vm23653_vm5, %v24482_v33  ;;  %19924 = vmatprep.subr.msk.bf16.mxu1 %vm23653_vm5, %v19922_v40  ;;  %v10503_v33 = vld [vmem:[#allocation3 + $0x69] sm:$0xff]  ;;  %v20006_v40 = vpack.c.bf16 %v10577_v61, %v10576_v58  ;;  %v10545_v61 = vld [vmem:[#allocation3 + $0x211] sm:$0xff] }
 0xd94   :  { %19780 = vmatprep.subr.msk.bf16.mxu0 %vm23653_vm5, %v24484_v44  ;;  %v10521_v44 = vld [vmem:[#allocation3 + $0x121] sm:$0xff]  ;;  %v19931_v16 = vpack.c.bf16 %v10503_v33, %v10502_v28  ;;  %v10581_v33 = vld [vmem:[#allocation3 + $0x379] sm:$0xff]  ;;  %v10580_v28 = vld [vmem:[#allocation3 + $0x371] sm:$0xff] }
 0xd95   :  { %v19934_v11 = vpack.c.bf16 %v10521_v44, %v10520_v23  ;;  %v10562_v44 = vld [vmem:[#allocation3 + $0x2b9] sm:$0xff]  ;;  %v10583_v23 = vld [vmem:[#allocation3 + $0x389] sm:$0xff] }
 0xd9a   :  { %19927 = vmatpush3.bf16.xpose.msk.msra.mxu1 %vm23653_vm5, %v19925_v53  ;;  %v20009_v53 = vpack.c.bf16 %v10561_v48, %v10560_v19  ;;  %v11321_v48 = vld [vmem:[#allocation3 + $0xca] sm:$0xff] }
 0xd9b   :  { %19783 = vmatpush3.bf16.xpose.msk.msra.mxu0 %vm23653_vm5, %v24496_v56  ;;  %19930 = vmatprep.subr.msk.bf16.mxu1 %vm23653_vm5, %v19928_v55  ;;  %v10505_v56 = vld [vmem:[#allocation3 + $0x81] sm:$0xff]  ;;  %v20012_v55 = vpack.c.bf16 %v10579_v22, %v10578_v5  ;;  %v20102_v19 = vpack.c.bf16 %v11322_v8, %v11321_v48  ;;  %v11306_v5 = vld [vmem:[#allocation3 + $0x32] sm:$0xff]  ;;  %v11331_v48 = vld [vmem:[#allocation3 + $0x12a] sm:$0xff] }
 0xd9c   :  { %19786 = vmatprep.subr.msk.bf16.mxu0 %vm23653_vm5, %v24498_v9  ;;  %v10523_v9 = vld [vmem:[#allocation3 + $0x131] sm:$0xff]  ;;  %v19937_v25 = vpack.c.bf16 %v10505_v56, %v10504_v37 }
 0xd9d   :  { %v19940_v46 = vpack.c.bf16 %v10523_v9, %v10522_v21  ;;  %v10582_v9 = vld [vmem:[#allocation3 + $0x381] sm:$0xff]  ;;  %v11332_v8 = vld [vmem:[#allocation3 + $0x132] sm:$0xff] }
 0xd9e   :  { %v20024_v37 = vpack.c.bf16 %v10583_v23, %v10582_v9  ;;  %v11308_v9 = vld [vmem:[#allocation3 + $0x42] sm:$0xff] }
 0xda2   :  { %19933 = vmatpush3.bf16.xpose.msk.msra.mxu1 %vm23653_vm5, %v19931_v16  ;;  %v20018_v16 = vpack.c.bf16 %v10581_v33, %v10580_v28  ;;  %v10528_v33 = vld [vmem:[#allocation3 + $0x169] sm:$0xff] }
 0xda3   :  { %19789 = vmatpush3.bf16.xpose.msk.msra.mxu0 %vm23653_vm5, %v24510_v12  ;;  %19936 = vmatprep.subr.msk.bf16.mxu1 %vm23653_vm5, %v19934_v11  ;;  %v10507_v12 = vld [vmem:[#allocation3 + $0x91] sm:$0xff] }
 0xda4   :  { %19792 = vmatprep.subr.msk.bf16.mxu0 %vm23653_vm5, %v24512_v35  ;;  %v9747_v35 = vld [vmem:[#allocation3 + $0x280] sm:$0xff]  ;;  %v19943_v54 = vpack.c.bf16 %v10507_v12, %v10506_v13  ;;  %v10564_v11 = vld [vmem:[#allocation3 + $0x2d1] sm:$0xff]  ;;  %v10586_v13 = vld [vmem:[#allocation3 + $0x3a9] sm:$0xff] }
 0xda5   :  { %v19802_v1 = vpack.c.bf16 %v9748_v24, %v9747_v35  ;;  %v10568_v35 = vld [vmem:[#allocation3 + $0x2f9] sm:$0xff] }
 0xda6   :  { %v9811_v24 = vld [vmem:[#allocation3 + $0x500] sm:$0xff] }
 0xdaa   :  { %19939 = vmatpush3.bf16.xpose.msk.msra.mxu1 %vm23653_vm5, %v19937_v25  ;;  %v10566_v25 = vld [vmem:[#allocation3 + $0x2e1] sm:$0xff] }
 0xdab   :  { %19795 = vmatpush3.bf16.xpose.msk.msra.mxu0 %vm23653_vm5, %v24524_v51  ;;  %19942 = vmatprep.subr.msk.bf16.mxu1 %vm23653_vm5, %v19940_v46  ;;  %v9731_v51 = vld [vmem:[#allocation3 + $0x1e0] sm:$0xff] }
 0xdac   :  { %19798 = vmatprep.subr.msk.bf16.mxu0 %vm23653_vm5, %v24526_v45  ;;  %v10509_v45 = vld [vmem:[#allocation3 + $0xa9] sm:$0xff]  ;;  %v19805_v57 = vpack.c.bf16 %v9732_v2, %v9731_v51  ;;  %v10584_v46 = vld [vmem:[#allocation3 + $0x399] sm:$0xff]  ;;  %v10588_v51 = vld [vmem:[#allocation3 + $0x3c1] sm:$0xff] }
 0xdad   :  { %v19949_v47 = vpack.c.bf16 %v10509_v45, %v10508_v43  ;;  %v9813_v2 = vld [vmem:[#allocation3 + $0x510] sm:$0xff]  ;;  %v9814_v43 = vld [vmem:[#allocation3 + $0x518] sm:$0xff] }
 0xdb2   :  { %19945 = vmatpush3.bf16.xpose.msk.msra.mxu1 %vm23653_vm5, %v19943_v54 }
 0xdb3   :  { %19801 = vmatpush3.bf16.xpose.msk.msra.mxu0 %vm23653_vm5, %v24538_v15  ;;  %19948 = vmatprep.subr.msk.bf16.mxu1 %vm23653_vm5, %v19946_v29  ;;  %v19808_v15 = vpack.c.bf16 %v9750_v39, %v9749_v6  ;;  %v19898_v39 = vpack.c.bf16 %v9812_v7, %v9811_v24  ;;  %v11309_v24 = vld [vmem:[#allocation3 + $0x52] sm:$0xff] }
 0xdb4   :  { %19804 = vmatprep.subr.msk.bf16.mxu0 %vm23653_vm5, %v19802_v1  ;;  %v10570_v1 = vld [vmem:[#allocation3 + $0x309] sm:$0xff] }
 0xdba   :  { %19951 = vmatpush3.bf16.xpose.msk.msra.mxu1 %vm23653_vm5, %v19949_v47  ;;  %v10572_v47 = vld [vmem:[#allocation3 + $0x321] sm:$0xff] }
 0xdbb   :  { %19807 = vmatpush3.bf16.xpose.msk.msra.mxu0 %vm23653_vm5, %v19805_v57  ;;  %19954 = vmatprep.subr.msk.bf16.mxu1 %vm23653_vm5, %v19952_v18  ;;  %v9796_v57 = vld [vmem:[#allocation3 + $0x468] sm:$0xff]  ;;  %v19904_v18 = vpack.c.bf16 %v9814_v43, %v9813_v2 }
 0xdbc   :  { %19810 = vmatprep.subr.msk.bf16.mxu0 %vm23653_vm5, %v19808_v15  ;;  %v10590_v15 = vld [vmem:[#allocation3 + $0x3d1] sm:$0xff]  ;;  %v11330_v2 = vld [vmem:[#allocation3 + $0x122] sm:$0xff] }
 0xdbd   :  { %v10534_v43 = vld [vmem:[#allocation3 + $0x1a1] sm:$0xff] }
 0xdc2   :  { %19957 = vmatpush3.bf16.xpose.msk.msra.mxu1 %vm23653_vm5, %v19955_v63  ;;  %v19907_v63 = vpack.c.bf16 %v9798_v10, %v9797_v4  ;;  %v10537_v10 = vld [vmem:[#allocation3 + $0x1c1] sm:$0xff]  ;;  %v10536_v4 = vld [vmem:[#allocation3 + $0x1b9] sm:$0xff] }
 0xdc3   :  { %19813 = vmatpush3.bf16.xpose.msk.msra.mxu0 %vm23653_vm5, %v19811_v36  ;;  %20008 = vmatprep.subr.msk.bf16.mxu1 %vm23653_vm5, %v20006_v40  ;;  %v10574_v36 = vld [vmem:[#allocation3 + $0x331] sm:$0xff]  ;;  %v10544_v40 = vld [vmem:[#allocation3 + $0x209] sm:$0xff] }
 0xdc4   :  { %19864 = vmatprep.subr.msk.bf16.mxu0 %vm23653_vm5, %v24570_v17  ;;  %v10563_v17 = vld [vmem:[#allocation3 + $0x2c1] sm:$0xff]  ;;  %v20051_v58 = vpack.c.bf16 %v10575_v31, %v10574_v36  ;;  %v19958_v22 = vpack.c.bf16 %v10545_v61, %v10544_v40  ;;  %v10555_v61 = vld [vmem:[#allocation3 + $0x271] sm:$0xff]  ;;  %v10554_v40 = vld [vmem:[#allocation3 + $0x269] sm:$0xff] }
 0xdc5   :  { %v11314_v31 = vld [vmem:[#allocation3 + $0x82] sm:$0xff]  ;;  %v11313_v36 = vld [vmem:[#allocation3 + $0x7a] sm:$0xff] }
 0xdc9   :  { %17583 = vmatmul.mubr.msk.f32.vlgmr.msra.gmra.mrb[76].mxu1 %vm1356_vm2, %v24832_v30 }
 0xdca   :  { %17481 = vmatmul.mubr.msk.f32.vlgmr.msra.gmra.mrb[12].mxu0 %vm1356_vm2, %v24672_v60  ;;  %20011 = vmatpush3.bf16.xpose.msk.msra.mxu1 %vm23653_vm5, %v20009_v53  ;;  %v10529_v53 = vld [vmem:[#allocation3 + $0x171] sm:$0xff] }
 0xdcb   :  { %19867 = vmatpush3.bf16.xpose.msk.msra.mxu0 %vm23653_vm5, %v24582_v41  ;;  %20014 = vmatprep.subr.msk.bf16.mxu1 %vm23653_vm5, %v20012_v55  ;;  %v20015_v41 = vpack.c.bf16 %v10563_v17, %v10562_v44  ;;  %v10547_v55 = vld [vmem:[#allocation3 + $0x221] sm:$0xff]  ;;  %v11305_v44 = vld [vmem:[#allocation3 + $0x2a] sm:$0xff] }
 0xdcc   :  { %19870 = vmatprep.subr.msk.bf16.mxu0 %vm23653_vm5, %v24584_v14  ;;  %17548 = vmatprep.mubr.msk.f32.mxu0 %vm1356_vm2, %v24672_v60  ;;  %v10565_v14 = vld [vmem:[#allocation3 + $0x2d9] sm:$0xff]  ;;  %v11324_v17 = vld [vmem:[#allocation3 + $0xe2] sm:$0xff]  ;;  %v20105_v28 = vpack.c.bf16 %v11306_v5, %v11305_v44  ;;  %v11315_v44 = vld [vmem:[#allocation3 + $0x8a] sm:$0xff] }
 0xdcd   :  { %17650 = vmatprep.mubr.msk.f32.mxu1 %vm1356_vm2, %v24832_v30  ;;  %v20021_v56 = vpack.c.bf16 %v10565_v14, %v10564_v11  ;;  %v11323_v14 = vld [vmem:[#allocation3 + $0xda] sm:$0xff]  ;;  %v11316_v5 = vld [vmem:[#allocation3 + $0x92] sm:$0xff] }
 0xdce   :  { %v20108_v11 = vpack.c.bf16 %v11324_v17, %v11323_v14  ;;  %v11334_v17 = vld [vmem:[#allocation3 + $0x14a] sm:$0xff]  ;;  %v11333_v14 = vld [vmem:[#allocation3 + $0x142] sm:$0xff] }
 0xdd2   :  { %20017 = vmatpush3.bf16.xpose.msk.msra.mxu1 %vm23653_vm5, %v20015_v41  ;;  %v19961_v41 = vpack.c.bf16 %v10529_v53, %v10528_v33  ;;  %v10539_v53 = vld [vmem:[#allocation3 + $0x1d1] sm:$0xff]  ;;  %v10538_v33 = vld [vmem:[#allocation3 + $0x1c9] sm:$0xff] }
 0xdd3   :  { %19873 = vmatpush3.bf16.xpose.msk.msra.mxu0 %vm23653_vm5, %v24596_v52  ;;  %20020 = vmatprep.subr.msk.bf16.mxu1 %vm23653_vm5, %v20018_v16  ;;  %v10567_v52 = vld [vmem:[#allocation3 + $0x2e9] sm:$0xff]  ;;  %v10546_v16 = vld [vmem:[#allocation3 + $0x219] sm:$0xff] }
 0xdd4   :  { %19876 = vmatprep.subr.msk.bf16.mxu0 %vm23653_vm5, %v24598_v62  ;;  %v10585_v62 = vld [vmem:[#allocation3 + $0x3a1] sm:$0xff]  ;;  %v20027_v21 = vpack.c.bf16 %v10567_v52, %v10566_v25  ;;  %v19964_v23 = vpack.c.bf16 %v10547_v55, %v10546_v16  ;;  %v10557_v55 = vld [vmem:[#allocation3 + $0x289] sm:$0xff] }
 0xdd5   :  { %v20030_v12 = vpack.c.bf16 %v10585_v62, %v10584_v46  ;;  %v11326_v52 = vld [vmem:[#allocation3 + $0xfa] sm:$0xff] }
 0xdd6   :  { %v10530_v62 = vld [vmem:[#allocation3 + $0x179] sm:$0xff]  ;;  %v10556_v16 = vld [vmem:[#allocation3 + $0x281] sm:$0xff] }
 0xdd7   :  { %v11307_v25 = vld [vmem:[#allocation3 + $0x3a] sm:$0xff] }
 0xdd8   :  { %v20111_v46 = vpack.c.bf16 %v11308_v9, %v11307_v25  ;;  %v11318_v9 = vld [vmem:[#allocation3 + $0xaa] sm:$0xff]  ;;  %v11317_v25 = vld [vmem:[#allocation3 + $0xa2] sm:$0xff] }
 0xdda   :  { %20023 = vmatpush3.bf16.xpose.msk.msra.mxu1 %vm23653_vm5, %v20021_v56  ;;  %v25004_v56 = vld [vmem:[%s25723_s7 + $0xa] sm:$0x3] }
 0xddb   :  { %19879 = vmatpush3.bf16.xpose.msk.msra.mxu0 %vm23653_vm5, %v24610_v0  ;;  %20026 = vmatprep.subr.msk.bf16.mxu1 %vm23653_vm5, %v20024_v37  ;;  %v10569_v0 = vld [vmem:[#allocation3 + $0x301] sm:$0xff]  ;;  %v10549_v37 = vld [vmem:[#allocation3 + $0x239] sm:$0xff] }
 0xddc   :  { %19882 = vmatprep.subr.msk.bf16.mxu0 %vm23653_vm5, %v24612_v3  ;;  %v10587_v3 = vld [vmem:[#allocation3 + $0x3b1] sm:$0xff]  ;;  %v20033_v59 = vpack.c.bf16 %v10569_v0, %v10568_v35 }
 0xddd   :  { %v20036_v54 = vpack.c.bf16 %v10587_v3, %v10586_v13  ;;  %v11325_v0 = vld [vmem:[#allocation3 + $0xf2] sm:$0xff]  ;;  %v11310_v13 = vld [vmem:[#allocation3 + $0x5a] sm:$0xff] }
 0xdde   :  { %v20114_v35 = vpack.c.bf16 %v11326_v52, %v11325_v0  ;;  %v11336_v52 = vld [vmem:[#allocation3 + $0x15a] sm:$0xff]  ;;  %v11335_v0 = vld [vmem:[#allocation3 + $0x152] sm:$0xff] }
 0xde2   :  { %20029 = vmatpush3.bf16.xpose.msk.msra.mxu1 %vm23653_vm5, %v20027_v21 }
 0xde3   :  { %19885 = vmatpush3.bf16.xpose.msk.msra.mxu0 %vm23653_vm5, %v24624_v49  ;;  %20032 = vmatprep.subr.msk.bf16.mxu1 %vm23653_vm5, %v20030_v12  ;;  %v10571_v49 = vld [vmem:[#allocation3 + $0x311] sm:$0xff] }
 0xde4   :  { %19888 = vmatprep.subr.msk.bf16.mxu0 %vm23653_vm5, %v24626_v26  ;;  %v10589_v26 = vld [vmem:[#allocation3 + $0x3c9] sm:$0xff]  ;;  %v20039_v29 = vpack.c.bf16 %v10571_v49, %v10570_v1  ;;  %v10548_v12 = vld [vmem:[#allocation3 + $0x231] sm:$0xff]  ;;  %v20117_v1 = vpack.c.bf16 %v11310_v13, %v11309_v24  ;;  %v11320_v13 = vld [vmem:[#allocation3 + $0xba] sm:$0xff] }
 0xde5   :  { %v20042_v45 = vpack.c.bf16 %v10589_v26, %v10588_v51  ;;  %v19970_v3 = vpack.c.bf16 %v10549_v37, %v10548_v12  ;;  %v11328_v49 = vld [vmem:[#allocation3 + $0x10a] sm:$0xff]  ;;  %v11327_v51 = vld [vmem:[#allocation3 + $0x102] sm:$0xff]  ;;  %v10559_v37 = vld [vmem:[#allocation3 + $0x299] sm:$0xff] }
 0xde6   :  { %v10532_v26 = vld [vmem:[#allocation3 + $0x191] sm:$0xff] }
 0xde7   :  { %v10558_v12 = vld [vmem:[#allocation3 + $0x291] sm:$0xff] }
 0xde8   :  { %v11319_v24 = vld [vmem:[#allocation3 + $0xb2] sm:$0xff] }
 0xdea   :  { %20035 = vmatpush3.bf16.xpose.msk.msra.mxu1 %vm23653_vm5, %v20033_v59  ;;  %v10533_v59 = vld [vmem:[#allocation3 + $0x199] sm:$0xff] }
 0xdeb   :  { %19891 = vmatpush3.bf16.xpose.msk.msra.mxu0 %vm23653_vm5, %v24638_v20  ;;  %20038 = vmatprep.subr.msk.bf16.mxu1 %vm23653_vm5, %v20036_v54  ;;  %v9795_v20 = vld [vmem:[#allocation3 + $0x460] sm:$0xff]  ;;  %v10551_v54 = vld [vmem:[#allocation3 + $0x249] sm:$0xff]  ;;  %v19973_v7 = vpack.c.bf16 %v10533_v59, %v10532_v26  ;;  %v10542_v26 = vld [vmem:[#allocation3 + $0x1f1] sm:$0xff] }
 0xdec   :  { %19894 = vmatprep.subr.msk.bf16.mxu0 %vm23653_vm5, %v24640_v34  ;;  %v10573_v34 = vld [vmem:[#allocation3 + $0x329] sm:$0xff]  ;;  %v19901_v6 = vpack.c.bf16 %v9796_v57, %v9795_v20  ;;  %v10543_v59 = vld [vmem:[#allocation3 + $0x1f9] sm:$0xff] }
 0xded   :  { %v20045_v50 = vpack.c.bf16 %v10573_v34, %v10572_v47  ;;  %v10535_v20 = vld [vmem:[#allocation3 + $0x1a9] sm:$0xff] }
 0xdee   :  { %v11312_v34 = vld [vmem:[#allocation3 + $0x6a] sm:$0xff]  ;;  %v11311_v57 = vld [vmem:[#allocation3 + $0x62] sm:$0xff]  ;;  %v19979_v47 = vpack.c.bf16 %v10535_v20, %v10534_v43 }
 0xdef   :  { %v10593_v20 = vld [vmem:[#allocation3 + $0x3f1] sm:$0xff]  ;;  %v10592_v43 = vld [vmem:[#allocation3 + $0x3e9] sm:$0xff] }
 0xdf2   :  { %20041 = vmatpush3.bf16.xpose.msk.msra.mxu1 %vm23653_vm5, %v20039_v29  ;;  %v10550_v29 = vld [vmem:[#allocation3 + $0x241] sm:$0xff] }
 0xdf3   :  { %19897 = vmatpush3.bf16.xpose.msk.msra.mxu0 %vm23653_vm5, %v24652_v32  ;;  %20044 = vmatprep.subr.msk.bf16.mxu1 %vm23653_vm5, %v20042_v45  ;;  %v20048_v32 = vpack.c.bf16 %v10591_v27, %v10590_v15  ;;  %v19976_v45 = vpack.c.bf16 %v10551_v54, %v10550_v29  ;;  %v10553_v27 = vld [vmem:[#allocation3 + $0x261] sm:$0xff]  ;;  %v10609_v54 = vld [vmem:[#allocation3 + $0x491] sm:$0xff]  ;;  %v10608_v29 = vld [vmem:[#allocation3 + $0x489] sm:$0xff] }
 0xdf4   :  { %19900 = vmatprep.subr.msk.bf16.mxu0 %vm23653_vm5, %v19898_v39  ;;  %v20120_v39 = vpack.c.bf16 %v11328_v49, %v11327_v51  ;;  %v11329_v15 = vld [vmem:[#allocation3 + $0x11a] sm:$0xff]  ;;  %v11386_v49 = vld [vmem:[#allocation3 + $0x352] sm:$0xff]  ;;  %v11385_v51 = vld [vmem:[#allocation3 + $0x34a] sm:$0xff] }
 0xdfa   :  { %20047 = vmatpush3.bf16.xpose.msk.msra.mxu1 %vm23653_vm5, %v20045_v50  ;;  %v10552_v50 = vld [vmem:[#allocation3 + $0x259] sm:$0xff] }
 0xdfb   :  { %19903 = vmatpush3.bf16.xpose.msk.msra.mxu0 %vm23653_vm5, %v19901_v6  ;;  %20050 = vmatprep.subr.msk.bf16.mxu1 %vm23653_vm5, %v20048_v32  ;;  %v20123_v6 = vpack.c.bf16 %v11312_v34, %v11311_v57  ;;  %v19982_v32 = vpack.c.bf16 %v10553_v27, %v10552_v50  ;;  %v11370_v34 = vld [vmem:[#allocation3 + $0x2b2] sm:$0xff]  ;;  %v10611_v27 = vld [vmem:[#allocation3 + $0x4a1] sm:$0xff]  ;;  %v11369_v57 = vld [vmem:[#allocation3 + $0x2aa] sm:$0xff] }
 0xdfc   :  { %19906 = vmatprep.subr.msk.bf16.mxu0 %vm23653_vm5, %v19904_v18  ;;  %v20126_v18 = vpack.c.bf16 %v11330_v2, %v11329_v15  ;;  %v11388_v2 = vld [vmem:[#allocation3 + $0x362] sm:$0xff]  ;;  %v10610_v50 = vld [vmem:[#allocation3 + $0x499] sm:$0xff] }
 0xdfd   :  { %v11387_v15 = vld [vmem:[#allocation3 + $0x35a] sm:$0xff] }
 0xe02   :  { %20053 = vmatpush3.bf16.xpose.msk.msra.mxu1 %vm23653_vm5, %v20051_v58  ;;  %v20129_v58 = vpack.c.bf16 %v11314_v31, %v11313_v36  ;;  %v11372_v31 = vld [vmem:[#allocation3 + $0x2c2] sm:$0xff]  ;;  %v11371_v36 = vld [vmem:[#allocation3 + $0x2ba] sm:$0xff] }
 0xe03   :  { %19909 = vmatpush3.bf16.xpose.msk.msra.mxu0 %vm23653_vm5, %v19907_v63  ;;  %20104 = vmatprep.subr.msk.bf16.mxu1 %vm23653_vm5, %v20102_v19  ;;  %v19985_v63 = vpack.c.bf16 %v10537_v10, %v10536_v4  ;;  %v20132_v19 = vpack.c.bf16 %v11332_v8, %v11331_v48  ;;  %v10595_v10 = vld [vmem:[#allocation3 + $0x401] sm:$0xff]  ;;  %v10594_v4 = vld [vmem:[#allocation3 + $0x3f9] sm:$0xff] }
 0xe04   :  { %19960 = vmatprep.subr.msk.bf16.mxu0 %vm23653_vm5, %v19958_v22  ;;  %v19988_v22 = vpack.c.bf16 %v10555_v61, %v10554_v40  ;;  %v10613_v61 = vld [vmem:[#allocation3 + $0x4b9] sm:$0xff]  ;;  %v10612_v40 = vld [vmem:[#allocation3 + $0x4b1] sm:$0xff] }
 0xe05   :  { %v11390_v8 = vld [vmem:[#allocation3 + $0x37a] sm:$0xff]  ;;  %v11389_v48 = vld [vmem:[#allocation3 + $0x372] sm:$0xff] }
 0xe09   :  { %17651 = vmatmul.mubr.msk.f32.vlgmr.msra.gmra.mrb[78].mxu1 %vm1356_vm2, %v24832_v30 }
 0xe0a   :  { %17549 = vmatmul.mubr.msk.f32.vlgmr.msra.gmra.mrb[14].mxu0 %vm1356_vm2, %v24672_v60  ;;  %20107 = vmatpush3.bf16.xpose.msk.msra.mxu1 %vm23653_vm5, %v20105_v28  ;;  %v10531_v60 = vld [vmem:[#allocation3 + $0x181] sm:$0xff]  ;;  %v20135_v28 = vpack.c.bf16 %v11316_v5, %v11315_v44  ;;  %v11373_v44 = vld [vmem:[#allocation3 + $0x2d2] sm:$0xff] }
 0xe0b   :  { %19963 = vmatpush3.bf16.xpose.msk.msra.mxu0 %vm23653_vm5, %v19961_v41  ;;  %20110 = vmatprep.subr.msk.bf16.mxu1 %vm23653_vm5, %v20108_v11  ;;  %v19967_v21 = vpack.c.bf16 %v10531_v60, %v10530_v62  ;;  %v19991_v41 = vpack.c.bf16 %v10539_v53, %v10538_v33  ;;  %v20138_v11 = vpack.c.bf16 %v11334_v17, %v11333_v14  ;;  %v10541_v60 = vld [vmem:[#allocation3 + $0x1e9] sm:$0xff]  ;;  %v10540_v62 = vld [vmem:[#allocation3 + $0x1e1] sm:$0xff]  ;;  %v10597_v53 = vld [vmem:[#allocation3 + $0x419] sm:$0xff] }
 0xe0c   :  { %19966 = vmatprep.subr.msk.bf16.mxu0 %vm23653_vm5, %v19964_v23  ;;  %17616 = vmatprep.mubr.msk.f32.mxu0 %vm1356_vm2, %v24832_v30  ;;  %v19994_v23 = vpack.c.bf16 %v10557_v55, %v10556_v16  ;;  %v11374_v5 = vld [vmem:[#allocation3 + $0x2da] sm:$0xff]  ;;  %v10615_v55 = vld [vmem:[#allocation3 + $0x4c9] sm:$0xff]  ;;  %v10596_v33 = vld [vmem:[#allocation3 + $0x411] sm:$0xff] }
 0xe0d   :  { %17718 = vmatprep.mubr.msk.f32.mxu1 %vm1356_vm2, %v25004_v56  ;;  %v11392_v17 = vld [vmem:[#allocation3 + $0x38a] sm:$0xff]  ;;  %v10614_v16 = vld [vmem:[#allocation3 + $0x4c1] sm:$0xff] }
 0xe0e   :  { %v11391_v14 = vld [vmem:[#allocation3 + $0x382] sm:$0xff] }
 0xe12   :  { %20113 = vmatpush3.bf16.xpose.msk.msra.mxu1 %vm23653_vm5, %v20111_v46  ;;  %v20141_v46 = vpack.c.bf16 %v11318_v9, %v11317_v25  ;;  %v11376_v9 = vld [vmem:[#allocation3 + $0x2ea] sm:$0xff]  ;;  %v11375_v25 = vld [vmem:[#allocation3 + $0x2e2] sm:$0xff] }
 0xe13   :  { %19969 = vmatpush3.bf16.xpose.msk.msra.mxu0 %vm23653_vm5, %v19967_v21  ;;  %20116 = vmatprep.subr.msk.bf16.mxu1 %vm23653_vm5, %v20114_v35  ;;  %v19997_v21 = vpack.c.bf16 %v10541_v60, %v10540_v62  ;;  %v20144_v35 = vpack.c.bf16 %v11336_v52, %v11335_v0  ;;  %v10599_v60 = vld [vmem:[#allocation3 + $0x429] sm:$0xff]  ;;  %v10598_v62 = vld [vmem:[#allocation3 + $0x421] sm:$0xff] }
 0xe14   :  { %19972 = vmatprep.subr.msk.bf16.mxu0 %vm23653_vm5, %v19970_v3  ;;  %v20000_v3 = vpack.c.bf16 %v10559_v37, %v10558_v12  ;;  %v10617_v37 = vld [vmem:[#allocation3 + $0x4e1] sm:$0xff]  ;;  %v10616_v12 = vld [vmem:[#allocation3 + $0x4d9] sm:$0xff] }
 0xe15   :  { %v11394_v52 = vld [vmem:[#allocation3 + $0x3a2] sm:$0xff]  ;;  %v11393_v0 = vld [vmem:[#allocation3 + $0x39a] sm:$0xff] }
 0xe1a   :  { %20119 = vmatpush3.bf16.xpose.msk.msra.mxu1 %vm23653_vm5, %v20117_v1  ;;  %v20147_v1 = vpack.c.bf16 %v11320_v13, %v11319_v24  ;;  %v11378_v13 = vld [vmem:[#allocation3 + $0x302] sm:$0xff]  ;;  %v11377_v24 = vld [vmem:[#allocation3 + $0x2fa] sm:$0xff] }
 0xe1b   :  { %19975 = vmatpush3.bf16.xpose.msk.msra.mxu0 %vm23653_vm5, %v19973_v7  ;;  %20122 = vmatprep.subr.msk.bf16.mxu1 %vm23653_vm5, %v20120_v39  ;;  %v20003_v7 = vpack.c.bf16 %v10543_v59, %v10542_v26  ;;  %v20198_v39 = vpack.c.bf16 %v11386_v49, %v11385_v51  ;;  %v10601_v59 = vld [vmem:[#allocation3 + $0x441] sm:$0xff]  ;;  %v11396_v49 = vld [vmem:[#allocation3 + $0x3b2] sm:$0xff]  ;;  %v11395_v51 = vld [vmem:[#allocation3 + $0x3aa] sm:$0xff] }
 0xe1c   :  { %19978 = vmatprep.subr.msk.bf16.mxu0 %vm23653_vm5, %v19976_v45  ;;  %v20054_v45 = vpack.c.bf16 %v10609_v54, %v10608_v29  ;;  %v10619_v54 = vld [vmem:[#allocation3 + $0x4f1] sm:$0xff]  ;;  %v10600_v26 = vld [vmem:[#allocation3 + $0x439] sm:$0xff]  ;;  %v10618_v29 = vld [vmem:[#allocation3 + $0x4e9] sm:$0xff] }
 0xe22   :  { %20125 = vmatpush3.bf16.xpose.msk.msra.mxu1 %vm23653_vm5, %v20123_v6  ;;  %v20201_v6 = vpack.c.bf16 %v11370_v34, %v11369_v57  ;;  %v11380_v34 = vld [vmem:[#allocation3 + $0x312] sm:$0xff]  ;;  %v10602_v57 = vld [vmem:[#allocation3 + $0x449] sm:$0xff] }
 0xe23   :  { %19981 = vmatpush3.bf16.xpose.msk.msra.mxu0 %vm23653_vm5, %v19979_v47  ;;  %20128 = vmatprep.subr.msk.bf16.mxu1 %vm23653_vm5, %v20126_v18  ;;  %v20057_v47 = vpack.c.bf16 %v10593_v20, %v10592_v43  ;;  %v20204_v18 = vpack.c.bf16 %v11388_v2, %v11387_v15  ;;  %v10603_v20 = vld [vmem:[#allocation3 + $0x451] sm:$0xff]  ;;  %v10621_v2 = vld [vmem:[#allocation3 + $0x509] sm:$0xff] }
 0xe24   :  { %19984 = vmatprep.subr.msk.bf16.mxu0 %vm23653_vm5, %v19982_v32  ;;  %v20060_v32 = vpack.c.bf16 %v10611_v27, %v10610_v50  ;;  %v10620_v27 = vld [vmem:[#allocation3 + $0x501] sm:$0xff]  ;;  %v11398_v43 = vld [vmem:[#allocation3 + $0x3ca] sm:$0xff] }
 0xe25   :  { %v11397_v15 = vld [vmem:[#allocation3 + $0x3c2] sm:$0xff] }
 0xe2a   :  { %20131 = vmatpush3.bf16.xpose.msk.msra.mxu1 %vm23653_vm5, %v20129_v58  ;;  %v20207_v58 = vpack.c.bf16 %v11372_v31, %v11371_v36  ;;  %v11382_v31 = vld [vmem:[#allocation3 + $0x32a] sm:$0xff]  ;;  %v10604_v36 = vld [vmem:[#allocation3 + $0x461] sm:$0xff] }
 0xe2b   :  { %19987 = vmatpush3.bf16.xpose.msk.msra.mxu0 %vm23653_vm5, %v19985_v63  ;;  %20134 = vmatprep.subr.msk.bf16.mxu1 %vm23653_vm5, %v20132_v19  ;;  %v20063_v63 = vpack.c.bf16 %v10595_v10, %v10594_v4  ;;  %v20210_v19 = vpack.c.bf16 %v11390_v8, %v11389_v48  ;;  %v10605_v10 = vld [vmem:[#allocation3 + $0x469] sm:$0xff]  ;;  %v10623_v8 = vld [vmem:[#allocation3 + $0x519] sm:$0xff] }
 0xe2c   :  { %19990 = vmatprep.subr.msk.bf16.mxu0 %vm23653_vm5, %v19988_v22  ;;  %v20066_v22 = vpack.c.bf16 %v10613_v61, %v10612_v40  ;;  %v10622_v61 = vld [vmem:[#allocation3 + $0x511] sm:$0xff]  ;;  %v11400_v4 = vld [vmem:[#allocation3 + $0x3da] sm:$0xff] }
 0xe2d   :  { %v11399_v48 = vld [vmem:[#allocation3 + $0x3d2] sm:$0xff] }
 0xe32   :  { %20137 = vmatpush3.bf16.xpose.msk.msra.mxu1 %vm23653_vm5, %v20135_v28  ;;  %v20213_v28 = vpack.c.bf16 %v11374_v5, %v11373_v44  ;;  %v11384_v5 = vld [vmem:[#allocation3 + $0x33a] sm:$0xff]  ;;  %v11383_v44 = vld [vmem:[#allocation3 + $0x332] sm:$0xff] }
 0xe33   :  { %19993 = vmatpush3.bf16.xpose.msk.msra.mxu0 %vm23653_vm5, %v19991_v41  ;;  %20140 = vmatprep.subr.msk.bf16.mxu1 %vm23653_vm5, %v20138_v11  ;;  %v20069_v41 = vpack.c.bf16 %v10597_v53, %v10596_v33  ;;  %v20216_v11 = vpack.c.bf16 %v11392_v17, %v11391_v14  ;;  %v10607_v53 = vld [vmem:[#allocation3 + $0x479] sm:$0xff]  ;;  %v12131_v17 = vld [vmem:[#allocation3 + $0xf0] sm:$0xff] }
 0xe34   :  { %19996 = vmatprep.subr.msk.bf16.mxu0 %vm23653_vm5, %v19994_v23  ;;  %v20072_v23 = vpack.c.bf16 %v10615_v55, %v10614_v16  ;;  %v11354_v55 = vld [vmem:[#allocation3 + $0x212] sm:$0xff]  ;;  %v11353_v16 = vld [vmem:[#allocation3 + $0x20a] sm:$0xff] }
 0xe35   :  { %v10606_v33 = vld [vmem:[#allocation3 + $0x471] sm:$0xff] }
 0xe36   :  { %v12132_v14 = vld [vmem:[#allocation3 + $0xf8] sm:$0xff] }
 0xe3a   :  { %20143 = vmatpush3.bf16.xpose.msk.msra.mxu1 %vm23653_vm5, %v20141_v46  ;;  %v20219_v46 = vpack.c.bf16 %v11376_v9, %v11375_v25  ;;  %v12115_v9 = vld [vmem:[#allocation3 + $0x50] sm:$0xff]  ;;  %v12116_v25 = vld [vmem:[#allocation3 + $0x58] sm:$0xff] }
 0xe3b   :  { %19999 = vmatpush3.bf16.xpose.msk.msra.mxu0 %vm23653_vm5, %v19997_v21  ;;  %20146 = vmatprep.subr.msk.bf16.mxu1 %vm23653_vm5, %v20144_v35  ;;  %v20075_v21 = vpack.c.bf16 %v10599_v60, %v10598_v62  ;;  %v20222_v35 = vpack.c.bf16 %v11394_v52, %v11393_v0  ;;  %v11338_v60 = vld [vmem:[#allocation3 + $0x172] sm:$0xff]  ;;  %v12134_v52 = vld [vmem:[#allocation3 + $0x108] sm:$0xff]  ;;  %v12133_v0 = vld [vmem:[#allocation3 + $0x100] sm:$0xff] }
 0xe3c   :  { %20002 = vmatprep.subr.msk.bf16.mxu0 %vm23653_vm5, %v20000_v3  ;;  %v20078_v3 = vpack.c.bf16 %v10617_v37, %v10616_v12  ;;  %v11356_v37 = vld [vmem:[#allocation3 + $0x222] sm:$0xff]  ;;  %v11337_v62 = vld [vmem:[#allocation3 + $0x16a] sm:$0xff]  ;;  %v11355_v12 = vld [vmem:[#allocation3 + $0x21a] sm:$0xff] }
 0xe42   :  { %20149 = vmatpush3.bf16.xpose.msk.msra.mxu1 %vm23653_vm5, %v20147_v1  ;;  %v20225_v1 = vpack.c.bf16 %v11378_v13, %v11377_v24  ;;  %v12118_v13 = vld [vmem:[#allocation3 + $0x68] sm:$0xff]  ;;  %v12117_v24 = vld [vmem:[#allocation3 + $0x60] sm:$0xff] }
 0xe43   :  { %20005 = vmatpush3.bf16.xpose.msk.msra.mxu0 %vm23653_vm5, %v20003_v7  ;;  %20200 = vmatprep.subr.msk.bf16.mxu1 %vm23653_vm5, %v20198_v39  ;;  %v20081_v7 = vpack.c.bf16 %v10601_v59, %v10600_v26  ;;  %v20228_v39 = vpack.c.bf16 %v11396_v49, %v11395_v51  ;;  %v25153_v59 = vld [vmem:[%s25723_s7 + $0xc] sm:$0x3]  ;;  %v12136_v51 = vld [vmem:[#allocation3 + $0x120] sm:$0xff] }
 0xe44   :  { %20056 = vmatprep.subr.msk.bf16.mxu0 %vm23653_vm5, %v20054_v45  ;;  %v20084_v45 = vpack.c.bf16 %v10619_v54, %v10618_v29  ;;  %v11358_v54 = vld [vmem:[#allocation3 + $0x23a] sm:$0xff]  ;;  %v11357_v29 = vld [vmem:[#allocation3 + $0x232] sm:$0xff] }
 0xe45   :  { %v12135_v49 = vld [vmem:[#allocation3 + $0x118] sm:$0xff] }
 0xe46   :  { %v11339_v26 = vld [vmem:[#allocation3 + $0x17a] sm:$0xff] }
 0xe49   :  { %17719 = vmatmul.mubr.msk.f32.vlgmr.msra.gmra.mrb[76].mxu1 %vm1356_vm2, %v25004_v56 }
 0xe4a   :  { %17617 = vmatmul.mubr.msk.f32.vlgmr.msra.gmra.mrb[12].mxu0 %vm1356_vm2, %v24832_v30  ;;  %20203 = vmatpush3.bf16.xpose.msk.msra.mxu1 %vm23653_vm5, %v20201_v6  ;;  %v20087_v6 = vpack.c.bf16 %v10603_v20, %v10602_v57  ;;  %v11342_v20 = vld [vmem:[#allocation3 + $0x19a] sm:$0xff] }
 0xe4b   :  { %20059 = vmatpush3.bf16.xpose.msk.msra.mxu0 %vm23653_vm5, %v20057_v47  ;;  %20206 = vmatprep.subr.msk.bf16.mxu1 %vm23653_vm5, %v20204_v18  ;;  %v11379_v47 = vld [vmem:[#allocation3 + $0x30a] sm:$0xff]  ;;  %v20234_v18 = vpack.c.bf16 %v11398_v43, %v11397_v15  ;;  %v11341_v43 = vld [vmem:[#allocation3 + $0x192] sm:$0xff]  ;;  %v12120_v57 = vld [vmem:[#allocation3 + $0x80] sm:$0xff] }
 0xe4c   :  { %20062 = vmatprep.subr.msk.bf16.mxu0 %vm23653_vm5, %v20060_v32  ;;  %17684 = vmatprep.mubr.msk.f32.mxu0 %vm1356_vm2, %v24832_v30  ;;  %v20231_v50 = vpack.c.bf16 %v11380_v34, %v11379_v47  ;;  %v20090_v32 = vpack.c.bf16 %v10621_v2, %v10620_v27  ;;  %v12119_v34 = vld [vmem:[#allocation3 + $0x78] sm:$0xff]  ;;  %v11360_v27 = vld [vmem:[#allocation3 + $0x24a] sm:$0xff]  ;;  %v20165_v47 = vpack.c.bf16 %v11342_v20, %v11341_v43 }
 0xe4d   :  { %17786 = vmatprep.mubr.msk.f32.mxu1 %vm1356_vm2, %v25004_v56  ;;  %v12138_v2 = vld [vmem:[#allocation3 + $0x130] sm:$0xff]  ;;  %v12137_v15 = vld [vmem:[#allocation3 + $0x128] sm:$0xff]  ;;  %v11352_v20 = vld [vmem:[#allocation3 + $0x1fa] sm:$0xff] }
 0xe4e   :  { %v11351_v43 = vld [vmem:[#allocation3 + $0x1f2] sm:$0xff] }
 0xe52   :  { %20209 = vmatpush3.bf16.xpose.msk.msra.mxu1 %vm23653_vm5, %v20207_v58  ;;  %v20093_v58 = vpack.c.bf16 %v10605_v10, %v10604_v36  ;;  %v11344_v10 = vld [vmem:[#allocation3 + $0x1aa] sm:$0xff] }
 0xe53   :  { %20065 = vmatpush3.bf16.xpose.msk.msra.mxu0 %vm23653_vm5, %v20063_v63  ;;  %20212 = vmatprep.subr.msk.bf16.mxu1 %vm23653_vm5, %v20210_v19  ;;  %v11381_v63 = vld [vmem:[#allocation3 + $0x322] sm:$0xff]  ;;  %v20240_v19 = vpack.c.bf16 %v11400_v4, %v11399_v48 }
 0xe54   :  { %20068 = vmatprep.subr.msk.bf16.mxu0 %vm23653_vm5, %v20066_v22  ;;  %v20237_v40 = vpack.c.bf16 %v11382_v31, %v11381_v63  ;;  %v20096_v22 = vpack.c.bf16 %v10623_v8, %v10622_v61  ;;  %v12122_v31 = vld [vmem:[#allocation3 + $0x90] sm:$0xff]  ;;  %v11362_v61 = vld [vmem:[#allocation3 + $0x262] sm:$0xff] }
 0xe55   :  { %v12139_v8 = vld [vmem:[#allocation3 + $0x140] sm:$0xff]  ;;  %v12121_v36 = vld [vmem:[#allocation3 + $0x88] sm:$0xff] }
 0xe56   :  { %v11343_v4 = vld [vmem:[#allocation3 + $0x1a2] sm:$0xff] }
 0xe57   :  { %v20171_v63 = vpack.c.bf16 %v11344_v10, %v11343_v4  ;;  %v12140_v48 = vld [vmem:[#allocation3 + $0x148] sm:$0xff]  ;;  %v11402_v10 = vld [vmem:[#allocation3 + $0x3f2] sm:$0xff] }
 0xe58   :  { %v11401_v4 = vld [vmem:[#allocation3 + $0x3ea] sm:$0xff] }
 0xe5a   :  { %20215 = vmatpush3.bf16.xpose.msk.msra.mxu1 %vm23653_vm5, %v20213_v28  ;;  %v20243_v28 = vpack.c.bf16 %v11384_v5, %v11383_v44  ;;  %v12123_v5 = vld [vmem:[#allocation3 + $0xa0] sm:$0xff]  ;;  %v12124_v44 = vld [vmem:[#allocation3 + $0xa8] sm:$0xff] }
 0xe5b   :  { %20071 = vmatpush3.bf16.xpose.msk.msra.mxu0 %vm23653_vm5, %v20069_v41  ;;  %20218 = vmatprep.subr.msk.bf16.mxu1 %vm23653_vm5, %v20216_v11  ;;  %v20099_v41 = vpack.c.bf16 %v10607_v53, %v10606_v33  ;;  %v20294_v11 = vpack.c.bf16 %v12132_v14, %v12131_v17  ;;  %v11346_v53 = vld [vmem:[#allocation3 + $0x1c2] sm:$0xff]  ;;  %v12142_v17 = vld [vmem:[#allocation3 + $0x158] sm:$0xff]  ;;  %v12141_v14 = vld [vmem:[#allocation3 + $0x150] sm:$0xff] }
 0xe5c   :  { %20074 = vmatprep.subr.msk.bf16.mxu0 %vm23653_vm5, %v20072_v23  ;;  %v20150_v23 = vpack.c.bf16 %v11354_v55, %v11353_v16  ;;  %v11364_v55 = vld [vmem:[#allocation3 + $0x272] sm:$0xff]  ;;  %v11345_v33 = vld [vmem:[#allocation3 + $0x1ba] sm:$0xff]  ;;  %v11363_v16 = vld [vmem:[#allocation3 + $0x26a] sm:$0xff] }
 0xe62   :  { %20221 = vmatpush3.bf16.xpose.msk.msra.mxu1 %vm23653_vm5, %v20219_v46  ;;  %v20297_v46 = vpack.c.bf16 %v12116_v25, %v12115_v9  ;;  %v12126_v9 = vld [vmem:[#allocation3 + $0xb8] sm:$0xff]  ;;  %v12125_v25 = vld [vmem:[#allocation3 + $0xb0] sm:$0xff] }
 0xe63   :  { %20077 = vmatpush3.bf16.xpose.msk.msra.mxu0 %vm23653_vm5, %v20075_v21  ;;  %20224 = vmatprep.subr.msk.bf16.mxu1 %vm23653_vm5, %v20222_v35  ;;  %v20153_v21 = vpack.c.bf16 %v11338_v60, %v11337_v62  ;;  %v20300_v35 = vpack.c.bf16 %v12134_v52, %v12133_v0  ;;  %v11348_v60 = vld [vmem:[#allocation3 + $0x1d2] sm:$0xff]  ;;  %v12143_v52 = vld [vmem:[#allocation3 + $0x168] sm:$0xff] }
 0xe64   :  { %20080 = vmatprep.subr.msk.bf16.mxu0 %vm23653_vm5, %v20078_v3  ;;  %v20156_v3 = vpack.c.bf16 %v11356_v37, %v11355_v12  ;;  %v11366_v37 = vld [vmem:[#allocation3 + $0x28a] sm:$0xff]  ;;  %v11365_v12 = vld [vmem:[#allocation3 + $0x282] sm:$0xff] }
 0xe65   :  { %v11347_v62 = vld [vmem:[#allocation3 + $0x1ca] sm:$0xff] }
 0xe66   :  { %v12144_v0 = vld [vmem:[#allocation3 + $0x170] sm:$0xff] }
 0xe6a   :  { %20227 = vmatpush3.bf16.xpose.msk.msra.mxu1 %vm23653_vm5, %v20225_v1  ;;  %v20303_v1 = vpack.c.bf16 %v12118_v13, %v12117_v24  ;;  %v12127_v13 = vld [vmem:[#allocation3 + $0xc8] sm:$0xff]  ;;  %v12128_v24 = vld [vmem:[#allocation3 + $0xd0] sm:$0xff] }
 0xe6b   :  { %20083 = vmatpush3.bf16.xpose.msk.msra.mxu0 %vm23653_vm5, %v20081_v7  ;;  %20230 = vmatprep.subr.msk.bf16.mxu1 %vm23653_vm5, %v20228_v39  ;;  %v20306_v39 = vpack.c.bf16 %v12136_v51, %v12135_v49  ;;  %v12146_v49 = vld [vmem:[#allocation3 + $0x180] sm:$0xff]  ;;  %v12145_v51 = vld [vmem:[#allocation3 + $0x178] sm:$0xff] }
 0xe6c   :  { %20086 = vmatprep.subr.msk.bf16.mxu0 %vm23653_vm5, %v20084_v45  ;;  %v20162_v45 = vpack.c.bf16 %v11358_v54, %v11357_v29  ;;  %v11368_v54 = vld [vmem:[#allocation3 + $0x29a] sm:$0xff]  ;;  %v11367_v29 = vld [vmem:[#allocation3 + $0x292] sm:$0xff] }
 0xe72   :  { %20233 = vmatpush3.bf16.xpose.msk.msra.mxu1 %vm23653_vm5, %v20231_v50  ;;  %v11359_v50 = vld [vmem:[#allocation3 + $0x242] sm:$0xff] }
 0xe73   :  { %20089 = vmatpush3.bf16.xpose.msk.msra.mxu0 %vm23653_vm5, %v20087_v6  ;;  %20236 = vmatprep.subr.msk.bf16.mxu1 %vm23653_vm5, %v20234_v18  ;;  %v20309_v6 = vpack.c.bf16 %v12120_v57, %v12119_v34  ;;  %v20312_v18 = vpack.c.bf16 %v12138_v2, %v12137_v15  ;;  %v12130_v34 = vld [vmem:[#allocation3 + $0xe0] sm:$0xff]  ;;  %v12195_v2 = vld [vmem:[#allocation3 + $0x370] sm:$0xff]  ;;  %v12129_v57 = vld [vmem:[#allocation3 + $0xd8] sm:$0xff] }
 0xe74   :  { %20092 = vmatprep.subr.msk.bf16.mxu0 %vm23653_vm5, %v20090_v32  ;;  %v20168_v32 = vpack.c.bf16 %v11360_v27, %v11359_v50  ;;  %v11418_v27 = vld [vmem:[#allocation3 + $0x492] sm:$0xff]  ;;  %v11417_v50 = vld [vmem:[#allocation3 + $0x48a] sm:$0xff] }
 0xe75   :  { %v12196_v15 = vld [vmem:[#allocation3 + $0x378] sm:$0xff] }
 0xe7a   :  { %20239 = vmatpush3.bf16.xpose.msk.msra.mxu1 %vm23653_vm5, %v20237_v40  ;;  %v11361_v40 = vld [vmem:[#allocation3 + $0x25a] sm:$0xff] }
 0xe7b   :  { %20095 = vmatpush3.bf16.xpose.msk.msra.mxu0 %vm23653_vm5, %v20093_v58  ;;  %20242 = vmatprep.subr.msk.bf16.mxu1 %vm23653_vm5, %v20240_v19  ;;  %v20315_v58 = vpack.c.bf16 %v12122_v31, %v12121_v36  ;;  %v20318_v19 = vpack.c.bf16 %v12140_v48, %v12139_v8  ;;  %v12179_v31 = vld [vmem:[#allocation3 + $0x2d0] sm:$0xff]  ;;  %v12198_v8 = vld [vmem:[#allocation3 + $0x388] sm:$0xff]  ;;  %v12180_v36 = vld [vmem:[#allocation3 + $0x2d8] sm:$0xff] }
 0xe7c   :  { %20098 = vmatprep.subr.msk.bf16.mxu0 %vm23653_vm5, %v20096_v22  ;;  %v20174_v22 = vpack.c.bf16 %v11362_v61, %v11361_v40  ;;  %v11420_v61 = vld [vmem:[#allocation3 + $0x4a2] sm:$0xff]  ;;  %v11419_v40 = vld [vmem:[#allocation3 + $0x49a] sm:$0xff] }
 0xe7d   :  { %v12197_v48 = vld [vmem:[#allocation3 + $0x380] sm:$0xff] }
 0xe82   :  { %20245 = vmatpush3.bf16.xpose.msk.msra.mxu1 %vm23653_vm5, %v20243_v28  ;;  %v20321_v28 = vpack.c.bf16 %v12124_v44, %v12123_v5  ;;  %v12182_v5 = vld [vmem:[#allocation3 + $0x2e8] sm:$0xff]  ;;  %v12181_v44 = vld [vmem:[#allocation3 + $0x2e0] sm:$0xff] }
 0xe83   :  { %20101 = vmatpush3.bf16.xpose.msk.msra.mxu0 %vm23653_vm5, %v20099_v41  ;;  %20296 = vmatprep.subr.msk.bf16.mxu1 %vm23653_vm5, %v20294_v11  ;;  %v20177_v41 = vpack.c.bf16 %v11346_v53, %v11345_v33  ;;  %v20324_v11 = vpack.c.bf16 %v12142_v17, %v12141_v14  ;;  %v11404_v53 = vld [vmem:[#allocation3 + $0x402] sm:$0xff]  ;;  %v12199_v17 = vld [vmem:[#allocation3 + $0x398] sm:$0xff] }
 0xe84   :  { %20152 = vmatprep.subr.msk.bf16.mxu0 %vm23653_vm5, %v20150_v23  ;;  %v20180_v23 = vpack.c.bf16 %v11364_v55, %v11363_v16  ;;  %v11422_v55 = vld [vmem:[#allocation3 + $0x4ba] sm:$0xff]  ;;  %v11421_v16 = vld [vmem:[#allocation3 + $0x4b2] sm:$0xff] }
 0xe85   :  { %v11403_v33 = vld [vmem:[#allocation3 + $0x3fa] sm:$0xff] }
 0xe86   :  { %v12200_v14 = vld [vmem:[#allocation3 + $0x3a0] sm:$0xff] }
 0xe89   :  { %17787 = vmatmul.mubr.msk.f32.vlgmr.msra.gmra.mrb[78].mxu1 %vm1356_vm2, %v25004_v56 }
 0xe8a   :  { %17685 = vmatmul.mubr.msk.f32.vlgmr.msra.gmra.mrb[14].mxu0 %vm1356_vm2, %v24832_v30  ;;  %20299 = vmatpush3.bf16.xpose.msk.msra.mxu1 %vm23653_vm5, %v20297_v46  ;;  %v11340_v30 = vld [vmem:[#allocation3 + $0x182] sm:$0xff]  ;;  %v20327_v46 = vpack.c.bf16 %v12126_v9, %v12125_v25  ;;  %v11424_v9 = vld [vmem:[#allocation3 + $0x4ca] sm:$0xff] }
 0xe8b   :  { %20155 = vmatpush3.bf16.xpose.msk.msra.mxu0 %vm23653_vm5, %v20153_v21  ;;  %20302 = vmatprep.subr.msk.bf16.mxu1 %vm23653_vm5, %v20300_v35  ;;  %v20159_v7 = vpack.c.bf16 %v11340_v30, %v11339_v26  ;;  %v20183_v21 = vpack.c.bf16 %v11348_v60, %v11347_v62  ;;  %v20330_v35 = vpack.c.bf16 %v12144_v0, %v12143_v52  ;;  %v11350_v30 = vld [vmem:[#allocation3 + $0x1ea] sm:$0xff]  ;;  %v11349_v26 = vld [vmem:[#allocation3 + $0x1e2] sm:$0xff]  ;;  %v12183_v60 = vld [vmem:[#allocation3 + $0x2f8] sm:$0xff] }
 0xe8c   :  { %20158 = vmatprep.subr.msk.bf16.mxu0 %vm23653_vm5, %v20156_v3  ;;  %17752 = vmatprep.mubr.msk.f32.mxu0 %vm1356_vm2, %v25004_v56  ;;  %v20186_v3 = vpack.c.bf16 %v11366_v37, %v11365_v12  ;;  %v12202_v37 = vld [vmem:[#allocation3 + $0x3b0] sm:$0xff]  ;;  %v12184_v62 = vld [vmem:[#allocation3 + $0x300] sm:$0xff]  ;;  %v12201_v12 = vld [vmem:[#allocation3 + $0x3a8] sm:$0xff] }
 0xe8d   :  { %17854 = vmatprep.mubr.msk.f32.mxu1 %vm1356_vm2, %v25153_v59  ;;  %v11405_v52 = vld [vmem:[#allocation3 + $0x412] sm:$0xff] }
 0xe92   :  { %20305 = vmatpush3.bf16.xpose.msk.msra.mxu1 %vm23653_vm5, %v20303_v1  ;;  %v20333_v1 = vpack.c.bf16 %v12128_v24, %v12127_v13  ;;  %v11426_v13 = vld [vmem:[#allocation3 + $0x4e2] sm:$0xff] }
 0xe93   :  { %20161 = vmatpush3.bf16.xpose.msk.msra.mxu0 %vm23653_vm5, %v20159_v7  ;;  %20308 = vmatprep.subr.msk.bf16.mxu1 %vm23653_vm5, %v20306_v39  ;;  %v20189_v7 = vpack.c.bf16 %v11350_v30, %v11349_v26  ;;  %v20336_v39 = vpack.c.bf16 %v12146_v49, %v12145_v51  ;;  %v12186_v30 = vld [vmem:[#allocation3 + $0x310] sm:$0xff]  ;;  %v11407_v49 = vld [vmem:[#allocation3 + $0x422] sm:$0xff] }
 0xe94   :  { %20164 = vmatprep.subr.msk.bf16.mxu0 %vm23653_vm5, %v20162_v45  ;;  %v20192_v45 = vpack.c.bf16 %v11368_v54, %v11367_v29  ;;  %v12203_v54 = vld [vmem:[#allocation3 + $0x3c0] sm:$0xff]  ;;  %v12185_v26 = vld [vmem:[#allocation3 + $0x308] sm:$0xff] }
 0xe95   :  { %v12204_v29 = vld [vmem:[#allocation3 + $0x3c8] sm:$0xff] }
 0xe9a   :  { %20311 = vmatpush3.bf16.xpose.msk.msra.mxu1 %vm23653_vm5, %v20309_v6  ;;  %v20339_v6 = vpack.c.bf16 %v12130_v34, %v12129_v57  ;;  %v11428_v34 = vld [vmem:[#allocation3 + $0x4f2] sm:$0xff] }
 0xe9b   :  { %20167 = vmatpush3.bf16.xpose.msk.msra.mxu0 %vm23653_vm5, %v20165_v47  ;;  %20314 = vmatprep.subr.msk.bf16.mxu1 %vm23653_vm5, %v20312_v18  ;;  %v20195_v47 = vpack.c.bf16 %v11352_v20, %v11351_v43  ;;  %v20390_v18 = vpack.c.bf16 %v12196_v15, %v12195_v2  ;;  %v12187_v20 = vld [vmem:[#allocation3 + $0x320] sm:$0xff]  ;;  %v12188_v43 = vld [vmem:[#allocation3 + $0x328] sm:$0xff] }
 0xe9c   :  { %20170 = vmatprep.subr.msk.bf16.mxu0 %vm23653_vm5, %v20168_v32  ;;  %v20246_v32 = vpack.c.bf16 %v11418_v27, %v11417_v50  ;;  %v12206_v27 = vld [vmem:[#allocation3 + $0x3d8] sm:$0xff]  ;;  %v12205_v50 = vld [vmem:[#allocation3 + $0x3d0] sm:$0xff] }
 0xe9d   :  { %v11409_v2 = vld [vmem:[#allocation3 + $0x43a] sm:$0xff] }
 0xea2   :  { %20317 = vmatpush3.bf16.xpose.msk.msra.mxu1 %vm23653_vm5, %v20315_v58  ;;  %v20393_v58 = vpack.c.bf16 %v12180_v36, %v12179_v31  ;;  %v11429_v31 = vld [vmem:[#allocation3 + $0x502] sm:$0xff]  ;;  %v12189_v36 = vld [vmem:[#allocation3 + $0x330] sm:$0xff] }
 0xea3   :  { %20173 = vmatpush3.bf16.xpose.msk.msra.mxu0 %vm23653_vm5, %v20171_v63  ;;  %20320 = vmatprep.subr.msk.bf16.mxu1 %vm23653_vm5, %v20318_v19  ;;  %v20249_v63 = vpack.c.bf16 %v11402_v10, %v11401_v4  ;;  %v20396_v19 = vpack.c.bf16 %v12198_v8, %v12197_v48  ;;  %v12190_v10 = vld [vmem:[#allocation3 + $0x338] sm:$0xff]  ;;  %v12207_v8 = vld [vmem:[#allocation3 + $0x3e8] sm:$0xff] }
 0xea4   :  { %20176 = vmatprep.subr.msk.bf16.mxu0 %vm23653_vm5, %v20174_v22  ;;  %v20252_v22 = vpack.c.bf16 %v11420_v61, %v11419_v40  ;;  %v11430_v61 = vld [vmem:[#allocation3 + $0x50a] sm:$0xff] }
 0xea5   :  { %v11411_v4 = vld [vmem:[#allocation3 + $0x44a] sm:$0xff]  ;;  %v20282_v48 = vpack.c.bf16 %v11430_v61, %v11429_v31  ;;  %v12929_v31 = vld [vmem:[#allocation3 + $0x81] sm:$0xff] }
 0xea6   :  { %v12208_v40 = vld [vmem:[#allocation3 + $0x3f0] sm:$0xff] }
 0xea7   :  { %v12170_v61 = vld [vmem:[#allocation3 + $0x270] sm:$0xff] }
 0xeaa   :  { %20323 = vmatpush3.bf16.xpose.msk.msra.mxu1 %vm23653_vm5, %v20321_v28  ;;  %v20399_v28 = vpack.c.bf16 %v12182_v5, %v12181_v44  ;;  %v11431_v5 = vld [vmem:[#allocation3 + $0x512] sm:$0xff] }
 0xeab   :  { %20179 = vmatpush3.bf16.xpose.msk.msra.mxu0 %vm23653_vm5, %v20177_v41  ;;  %20326 = vmatprep.subr.msk.bf16.mxu1 %vm23653_vm5, %v20324_v11  ;;  %v20255_v41 = vpack.c.bf16 %v11404_v53, %v11403_v33  ;;  %v20402_v11 = vpack.c.bf16 %v12200_v14, %v12199_v17  ;;  %v12191_v53 = vld [vmem:[#allocation3 + $0x348] sm:$0xff]  ;;  %v12210_v17 = vld [vmem:[#allocation3 + $0x400] sm:$0xff]  ;;  %v12192_v44 = vld [vmem:[#allocation3 + $0x350] sm:$0xff] }
 0xeac   :  { %20182 = vmatprep.subr.msk.bf16.mxu0 %vm23653_vm5, %v20180_v23  ;;  %v20258_v23 = vpack.c.bf16 %v11422_v55, %v11421_v16  ;;  %v11432_v55 = vld [vmem:[#allocation3 + $0x51a] sm:$0xff]  ;;  %v11413_v33 = vld [vmem:[#allocation3 + $0x462] sm:$0xff] }
 0xead   :  { %v12209_v16 = vld [vmem:[#allocation3 + $0x3f8] sm:$0xff]  ;;  %v20288_v14 = vpack.c.bf16 %v11432_v55, %v11431_v5  ;;  %v12171_v55 = vld [vmem:[#allocation3 + $0x280] sm:$0xff] }
 0xeae   :  { %v12931_v5 = vld [vmem:[#allocation3 + $0x91] sm:$0xff] }
 0xeb2   :  { %20329 = vmatpush3.bf16.xpose.msk.msra.mxu1 %vm23653_vm5, %v20327_v46  ;;  %v11423_v46 = vld [vmem:[#allocation3 + $0x4c2] sm:$0xff] }
 0xeb3   :  { %20185 = vmatpush3.bf16.xpose.msk.msra.mxu0 %vm23653_vm5, %v20183_v21  ;;  %20332 = vmatprep.subr.msk.bf16.mxu1 %vm23653_vm5, %v20330_v35  ;;  %v20405_v21 = vpack.c.bf16 %v12184_v62, %v12183_v60  ;;  %v20264_v0 = vpack.c.bf16 %v11424_v9, %v11423_v46  ;;  %v11408_v35 = vld [vmem:[#allocation3 + $0x42a] sm:$0xff]  ;;  %v12941_v9 = vld [vmem:[#allocation3 + $0xf9] sm:$0xff] }
 0xeb4   :  { %20188 = vmatprep.subr.msk.bf16.mxu0 %vm23653_vm5, %v20186_v3  ;;  %v20408_v3 = vpack.c.bf16 %v12202_v37, %v12201_v12  ;;  %v20267_v24 = vpack.c.bf16 %v11408_v35, %v11407_v49  ;;  %v12163_v60 = vld [vmem:[#allocation3 + $0x230] sm:$0xff]  ;;  %v12925_v35 = vld [vmem:[#allocation3 + $0x59] sm:$0xff] }
 0xeb5   :  { %v11415_v37 = vld [vmem:[#allocation3 + $0x472] sm:$0xff] }
 0xeb6   :  { %v12940_v46 = vld [vmem:[#allocation3 + $0xf1] sm:$0xff] }
 0xeb7   :  { %v12924_v49 = vld [vmem:[#allocation3 + $0x51] sm:$0xff] }
 0xeba   :  { %20335 = vmatpush3.bf16.xpose.msk.msra.mxu1 %vm23653_vm5, %v20333_v1  ;;  %v11425_v1 = vld [vmem:[#allocation3 + $0x4da] sm:$0xff] }
 0xebb   :  { %20191 = vmatpush3.bf16.xpose.msk.msra.mxu0 %vm23653_vm5, %v20189_v7  ;;  %20338 = vmatprep.subr.msk.bf16.mxu1 %vm23653_vm5, %v20336_v39  ;;  %v20411_v7 = vpack.c.bf16 %v12186_v30, %v12185_v26  ;;  %v20270_v51 = vpack.c.bf16 %v11426_v13, %v11425_v1  ;;  %v11410_v39 = vld [vmem:[#allocation3 + $0x442] sm:$0xff] }
 0xebc   :  { %20194 = vmatprep.subr.msk.bf16.mxu0 %vm23653_vm5, %v20192_v45  ;;  %v20414_v45 = vpack.c.bf16 %v12204_v29, %v12203_v54  ;;  %v20273_v57 = vpack.c.bf16 %v11410_v39, %v11409_v2  ;;  %v12166_v30 = vld [vmem:[#allocation3 + $0x248] sm:$0xff]  ;;  %v12148_v54 = vld [vmem:[#allocation3 + $0x198] sm:$0xff] }
 0xebd   :  { %v12943_v13 = vld [vmem:[#allocation3 + $0x109] sm:$0xff]  ;;  %v12942_v1 = vld [vmem:[#allocation3 + $0x101] sm:$0xff]  ;;  %v21287_v29 = vld [vmem:[%s25723_s7 + $0xa] sm:$0x3] }
 0xebe   :  { %v25304_v39 = vld [vmem:[%s25723_s7 + $0xe] sm:$0x3]  ;;  %v12945_v2 = vld [vmem:[#allocation3 + $0x121] sm:$0xff] }
 0xec2   :  { %20341 = vmatpush3.bf16.xpose.msk.msra.mxu1 %vm23653_vm5, %v20339_v6  ;;  %v11427_v6 = vld [vmem:[#allocation3 + $0x4ea] sm:$0xff] }
 0xec3   :  { %20197 = vmatpush3.bf16.xpose.msk.msra.mxu0 %vm23653_vm5, %v20195_v47  ;;  %20392 = vmatprep.subr.msk.bf16.mxu1 %vm23653_vm5, %v20390_v18  ;;  %v20417_v47 = vpack.c.bf16 %v12188_v43, %v12187_v20  ;;  %v20276_v15 = vpack.c.bf16 %v11428_v34, %v11427_v6  ;;  %v11412_v18 = vld [vmem:[#allocation3 + $0x452] sm:$0xff]  ;;  %v12150_v20 = vld [vmem:[#allocation3 + $0x1a8] sm:$0xff]  ;;  %v12149_v43 = vld [vmem:[#allocation3 + $0x1a0] sm:$0xff] }
 0xec4   :  { %20248 = vmatprep.subr.msk.bf16.mxu0 %vm23653_vm5, %v20246_v32  ;;  %v20420_v32 = vpack.c.bf16 %v12206_v27, %v12205_v50  ;;  %v12927_v34 = vld [vmem:[#allocation3 + $0x69] sm:$0xff]  ;;  %v12167_v27 = vld [vmem:[#allocation3 + $0x258] sm:$0xff]  ;;  %v12168_v50 = vld [vmem:[#allocation3 + $0x260] sm:$0xff] }
 0xec9   :  { %17855 = vmatmul.mubr.msk.f32.vlgmr.msra.gmra.mrb[76].mxu1 %vm1356_vm2, %v25153_v59 }
 0xeca   :  { %17753 = vmatmul.mubr.msk.f32.vlgmr.msra.gmra.mrb[12].mxu0 %vm1356_vm2, %v25004_v56  ;;  %20395 = vmatpush3.bf16.xpose.msk.msra.mxu1 %vm23653_vm5, %v20393_v58  ;;  %v20423_v58 = vpack.c.bf16 %v12190_v10, %v12189_v36  ;;  %v12151_v10 = vld [vmem:[#allocation3 + $0x1b8] sm:$0xff] }
 0xecb   :  { %20251 = vmatpush3.bf16.xpose.msk.msra.mxu0 %vm23653_vm5, %v20249_v63  ;;  %20398 = vmatprep.subr.msk.bf16.mxu1 %vm23653_vm5, %v20396_v19  ;;  %v20279_v63 = vpack.c.bf16 %v11412_v18, %v11411_v4  ;;  %v11414_v19 = vld [vmem:[#allocation3 + $0x46a] sm:$0xff]  ;;  %v12152_v4 = vld [vmem:[#allocation3 + $0x1c0] sm:$0xff] }
 0xecc   :  { %20254 = vmatprep.subr.msk.bf16.mxu0 %vm23653_vm5, %v20252_v22  ;;  %17820 = vmatprep.mubr.msk.f32.mxu0 %vm1356_vm2, %v25004_v56  ;;  %v11406_v56 = vld [vmem:[#allocation3 + $0x41a] sm:$0xff]  ;;  %v20426_v22 = vpack.c.bf16 %v12208_v40, %v12207_v8  ;;  %v12947_v8 = vld [vmem:[#allocation3 + $0x131] sm:$0xff]  ;;  %v12169_v40 = vld [vmem:[#allocation3 + $0x268] sm:$0xff] }
 0xecd   :  { %17922 = vmatprep.mubr.msk.f32.mxu1 %vm1356_vm2, %v25153_v59  ;;  %v20261_v25 = vpack.c.bf16 %v11406_v56, %v11405_v52  ;;  %v12194_v56 = vld [vmem:[#allocation3 + $0x360] sm:$0xff]  ;;  %v12193_v52 = vld [vmem:[#allocation3 + $0x358] sm:$0xff] }
 0xece   :  { %v12928_v36 = vld [vmem:[#allocation3 + $0x79] sm:$0xff] }
 0xed2   :  { %20401 = vmatpush3.bf16.xpose.msk.msra.mxu1 %vm23653_vm5, %v20399_v28  ;;  %v20429_v28 = vpack.c.bf16 %v12192_v44, %v12191_v53  ;;  %v12154_v53 = vld [vmem:[#allocation3 + $0x1d0] sm:$0xff] }
 0xed3   :  { %20257 = vmatpush3.bf16.xpose.msk.msra.mxu0 %vm23653_vm5, %v20255_v41  ;;  %20404 = vmatprep.subr.msk.bf16.mxu1 %vm23653_vm5, %v20402_v11  ;;  %v20285_v41 = vpack.c.bf16 %v11414_v19, %v11413_v33  ;;  %v11416_v11 = vld [vmem:[#allocation3 + $0x47a] sm:$0xff]  ;;  %v12153_v33 = vld [vmem:[#allocation3 + $0x1c8] sm:$0xff] }
 0xed4   :  { %20260 = vmatprep.subr.msk.bf16.mxu0 %vm23653_vm5, %v20258_v23  ;;  %v20432_v23 = vpack.c.bf16 %v12210_v17, %v12209_v16  ;;  %v20291_v62 = vpack.c.bf16 %v11416_v11, %v11415_v37  ;;  %v12949_v17 = vld [vmem:[#allocation3 + $0x149] sm:$0xff]  ;;  %v12951_v37 = vld [vmem:[#allocation3 + $0x159] sm:$0xff] }
 0xed5   :  { %v12930_v44 = vld [vmem:[#allocation3 + $0x89] sm:$0xff] }
 0xed6   :  { %v12172_v16 = vld [vmem:[#allocation3 + $0x288] sm:$0xff] }
 0xeda   :  { %20407 = vmatpush3.bf16.xpose.msk.msra.mxu1 %vm23653_vm5, %v20405_v21  ;;  %v12164_v21 = vld [vmem:[#allocation3 + $0x238] sm:$0xff] }
 0xedb   :  { %20263 = vmatpush3.bf16.xpose.msk.msra.mxu0 %vm23653_vm5, %v20261_v25  ;;  %20410 = vmatprep.subr.msk.bf16.mxu1 %vm23653_vm5, %v20408_v3  ;;  %v20435_v25 = vpack.c.bf16 %v12194_v56, %v12193_v52  ;;  %v20342_v12 = vpack.c.bf16 %v12164_v21, %v12163_v60  ;;  %v12147_v3 = vld [vmem:[#allocation3 + $0x190] sm:$0xff]  ;;  %v12155_v56 = vld [vmem:[#allocation3 + $0x1e0] sm:$0xff]  ;;  %v12156_v52 = vld [vmem:[#allocation3 + $0x1e8] sm:$0xff] }
 0xedc   :  { %20266 = vmatprep.subr.msk.bf16.mxu0 %vm23653_vm5, %v20264_v0  ;;  %v20486_v0 = vpack.c.bf16 %v12941_v9, %v12940_v46  ;;  %v20345_v26 = vpack.c.bf16 %v12148_v54, %v12147_v3  ;;  %v12933_v60 = vld [vmem:[#allocation3 + $0xa9] sm:$0xff]  ;;  %v12174_v9 = vld [vmem:[#allocation3 + $0x298] sm:$0xff] }
 0xedd   :  { %v12173_v46 = vld [vmem:[#allocation3 + $0x290] sm:$0xff] }
 0xede   :  { %v12953_v54 = vld [vmem:[#allocation3 + $0x171] sm:$0xff] }
 0xee2   :  { %20413 = vmatpush3.bf16.xpose.msk.msra.mxu1 %vm23653_vm5, %v20411_v7  ;;  %v12165_v7 = vld [vmem:[#allocation3 + $0x240] sm:$0xff] }
 0xee3   :  { %20269 = vmatpush3.bf16.xpose.msk.msra.mxu0 %vm23653_vm5, %v20267_v24  ;;  %20416 = vmatprep.subr.msk.bf16.mxu1 %vm23653_vm5, %v20414_v45  ;;  %v20489_v24 = vpack.c.bf16 %v12925_v35, %v12924_v49  ;;  %v20492_v45 = vpack.c.bf16 %v12943_v13, %v12942_v1  ;;  %v12158_v35 = vld [vmem:[#allocation3 + $0x1f8] sm:$0xff]  ;;  %v12175_v13 = vld [vmem:[#allocation3 + $0x2a8] sm:$0xff]  ;;  %v12157_v49 = vld [vmem:[#allocation3 + $0x1f0] sm:$0xff] }
 0xee4   :  { %20272 = vmatprep.subr.msk.bf16.mxu0 %vm23653_vm5, %v20270_v51  ;;  %v20348_v51 = vpack.c.bf16 %v12166_v30, %v12165_v7  ;;  %v12935_v30 = vld [vmem:[#allocation3 + $0xb9] sm:$0xff]  ;;  %v12176_v1 = vld [vmem:[#allocation3 + $0x2b0] sm:$0xff] }
 0xeea   :  { %20419 = vmatpush3.bf16.xpose.msk.msra.mxu1 %vm23653_vm5, %v20417_v47  ;;  %v20351_v47 = vpack.c.bf16 %v12150_v20, %v12149_v43  ;;  %v12159_v20 = vld [vmem:[#allocation3 + $0x208] sm:$0xff]  ;;  %v12160_v43 = vld [vmem:[#allocation3 + $0x210] sm:$0xff] }
 0xeeb   :  { %20275 = vmatpush3.bf16.xpose.msk.msra.mxu0 %vm23653_vm5, %v20273_v57  ;;  %20422 = vmatprep.subr.msk.bf16.mxu1 %vm23653_vm5, %v20420_v32  ;;  %v12926_v57 = vld [vmem:[#allocation3 + $0x61] sm:$0xff]  ;;  %v20354_v32 = vpack.c.bf16 %v12168_v50, %v12167_v27  ;;  %v12177_v50 = vld [vmem:[#allocation3 + $0x2b8] sm:$0xff] }
 0xeec   :  { %20278 = vmatprep.subr.msk.bf16.mxu0 %vm23653_vm5, %v20276_v15  ;;  %v20495_v6 = vpack.c.bf16 %v12927_v34, %v12926_v57  ;;  %v12944_v15 = vld [vmem:[#allocation3 + $0x119] sm:$0xff]  ;;  %v12937_v34 = vld [vmem:[#allocation3 + $0xd1] sm:$0xff]  ;;  %v12936_v57 = vld [vmem:[#allocation3 + $0xc9] sm:$0xff] }
 0xeed   :  { %v20498_v18 = vpack.c.bf16 %v12945_v2, %v12944_v15  ;;  %v12178_v27 = vld [vmem:[#allocation3 + $0x2c0] sm:$0xff] }
 0xeee   :  { %v12955_v2 = vld [vmem:[#allocation3 + $0x181] sm:$0xff]  ;;  %v12954_v15 = vld [vmem:[#allocation3 + $0x179] sm:$0xff] }
 0xef2   :  { %20425 = vmatpush3.bf16.xpose.msk.msra.mxu1 %vm23653_vm5, %v20423_v58  ;;  %v20501_v58 = vpack.c.bf16 %v12929_v31, %v12928_v36  ;;  %v12939_v31 = vld [vmem:[#allocation3 + $0xe1] sm:$0xff]  ;;  %v12938_v36 = vld [vmem:[#allocation3 + $0xd9] sm:$0xff] }
 0xef3   :  { %20281 = vmatpush3.bf16.xpose.msk.msra.mxu0 %vm23653_vm5, %v20279_v63  ;;  %20428 = vmatprep.subr.msk.bf16.mxu1 %vm23653_vm5, %v20426_v22  ;;  %v20357_v63 = vpack.c.bf16 %v12152_v4, %v12151_v10  ;;  %v20360_v22 = vpack.c.bf16 %v12170_v61, %v12169_v40  ;;  %v12162_v10 = vld [vmem:[#allocation3 + $0x220] sm:$0xff]  ;;  %v12227_v61 = vld [vmem:[#allocation3 + $0x4b0] sm:$0xff]  ;;  %v12161_v4 = vld [vmem:[#allocation3 + $0x218] sm:$0xff] }
 0xef4   :  { %20284 = vmatprep.subr.msk.bf16.mxu0 %vm23653_vm5, %v20282_v48  ;;  %v12946_v48 = vld [vmem:[#allocation3 + $0x129] sm:$0xff]  ;;  %v12228_v40 = vld [vmem:[#allocation3 + $0x4b8] sm:$0xff] }
 0xef5   :  { %v20504_v19 = vpack.c.bf16 %v12947_v8, %v12946_v48  ;;  %v13005_v8 = vld [vmem:[#allocation3 + $0x379] sm:$0xff]  ;;  %v13004_v48 = vld [vmem:[#allocation3 + $0x371] sm:$0xff] }
 0xefa   :  { %20431 = vmatpush3.bf16.xpose.msk.msra.mxu1 %vm23653_vm5, %v20429_v28  ;;  %v20507_v28 = vpack.c.bf16 %v12931_v5, %v12930_v44  ;;  %v12989_v5 = vld [vmem:[#allocation3 + $0x2d9] sm:$0xff]  ;;  %v12988_v44 = vld [vmem:[#allocation3 + $0x2d1] sm:$0xff] }
 0xefb   :  { %20287 = vmatpush3.bf16.xpose.msk.msra.mxu0 %vm23653_vm5, %v20285_v41  ;;  %20434 = vmatprep.subr.msk.bf16.mxu1 %vm23653_vm5, %v20432_v23  ;;  %v20363_v41 = vpack.c.bf16 %v12154_v53, %v12153_v33  ;;  %v20366_v23 = vpack.c.bf16 %v12172_v16, %v12171_v55  ;;  %v12211_v53 = vld [vmem:[#allocation3 + $0x410] sm:$0xff]  ;;  %v12230_v55 = vld [vmem:[#allocation3 + $0x4c8] sm:$0xff]  ;;  %v12212_v33 = vld [vmem:[#allocation3 + $0x418] sm:$0xff] }
 0xefc   :  { %20290 = vmatprep.subr.msk.bf16.mxu0 %vm23653_vm5, %v20288_v14  ;;  %v12948_v14 = vld [vmem:[#allocation3 + $0x141] sm:$0xff] }
 0xefd   :  { %v20510_v11 = vpack.c.bf16 %v12949_v17, %v12948_v14  ;;  %v13007_v17 = vld [vmem:[#allocation3 + $0x389] sm:$0xff]  ;;  %v12229_v16 = vld [vmem:[#allocation3 + $0x4c0] sm:$0xff] }
 0xefe   :  { %v13006_v14 = vld [vmem:[#allocation3 + $0x381] sm:$0xff] }
 0xf02   :  { %20437 = vmatpush3.bf16.xpose.msk.msra.mxu1 %vm23653_vm5, %v20435_v25  ;;  %v20369_v25 = vpack.c.bf16 %v12156_v52, %v12155_v56  ;;  %v12214_v56 = vld [vmem:[#allocation3 + $0x428] sm:$0xff]  ;;  %v12213_v52 = vld [vmem:[#allocation3 + $0x420] sm:$0xff] }
 0xf03   :  { %20293 = vmatpush3.bf16.xpose.msk.msra.mxu0 %vm23653_vm5, %v20291_v62  ;;  %20488 = vmatprep.subr.msk.bf16.mxu1 %vm23653_vm5, %v20486_v0  ;;  %v12932_v62 = vld [vmem:[#allocation3 + $0xa1] sm:$0xff]  ;;  %v20372_v0 = vpack.c.bf16 %v12174_v9, %v12173_v46  ;;  %v12231_v9 = vld [vmem:[#allocation3 + $0x4d8] sm:$0xff] }
 0xf04   :  { %20344 = vmatprep.subr.msk.bf16.mxu0 %vm23653_vm5, %v20342_v12  ;;  %v20513_v21 = vpack.c.bf16 %v12933_v60, %v12932_v62  ;;  %v12950_v12 = vld [vmem:[#allocation3 + $0x151] sm:$0xff]  ;;  %v12991_v60 = vld [vmem:[#allocation3 + $0x2e9] sm:$0xff]  ;;  %v12990_v62 = vld [vmem:[#allocation3 + $0x2e1] sm:$0xff] }
 0xf05   :  { %v20516_v3 = vpack.c.bf16 %v12951_v37, %v12950_v12  ;;  %v13009_v37 = vld [vmem:[#allocation3 + $0x3a1] sm:$0xff]  ;;  %v13008_v12 = vld [vmem:[#allocation3 + $0x399] sm:$0xff] }
 0xf06   :  { %v12232_v46 = vld [vmem:[#allocation3 + $0x4e0] sm:$0xff] }
 0xf09   :  { %17923 = vmatmul.mubr.msk.f32.vlgmr.msra.gmra.mrb[78].mxu1 %vm1356_vm2, %v25153_v59 }
 0xf0a   :  { %17821 = vmatmul.mubr.msk.f32.vlgmr.msra.gmra.mrb[14].mxu0 %vm1356_vm2, %v21287_v29  ;;  %20491 = vmatpush3.bf16.xpose.msk.msra.mxu1 %vm23653_vm5, %v20489_v24  ;;  %v20375_v24 = vpack.c.bf16 %v12158_v35, %v12157_v49  ;;  %v12952_v29 = vld [vmem:[#allocation3 + $0x169] sm:$0xff]  ;;  %v12993_v35 = vld [vmem:[#allocation3 + $0x301] sm:$0xff]  ;;  %v12992_v49 = vld [vmem:[#allocation3 + $0x2f9] sm:$0xff] }
 0xf0b   :  { %20347 = vmatpush3.bf16.xpose.msk.msra.mxu0 %vm23653_vm5, %v20345_v26  ;;  %20494 = vmatprep.subr.msk.bf16.mxu1 %vm23653_vm5, %v20492_v45  ;;  %v12934_v26 = vld [vmem:[#allocation3 + $0xb1] sm:$0xff]  ;;  %v20522_v45 = vpack.c.bf16 %v12953_v54, %v12952_v29  ;;  %v12216_v54 = vld [vmem:[#allocation3 + $0x440] sm:$0xff] }
 0xf0c   :  { %20350 = vmatprep.subr.msk.bf16.mxu0 %vm23653_vm5, %v20348_v51  ;;  %17888 = vmatprep.mubr.msk.f32.mxu0 %vm1356_vm2, %v25153_v59  ;;  %v20519_v7 = vpack.c.bf16 %v12935_v30, %v12934_v26  ;;  %v20378_v51 = vpack.c.bf16 %v12176_v1, %v12175_v13  ;;  %v12234_v30 = vld [vmem:[#allocation3 + $0x4f0] sm:$0xff] }
 0xf0d   :  { %17990 = vmatprep.mubr.msk.f32.mxu1 %vm1356_vm2, %v25304_v39  ;;  %v13011_v13 = vld [vmem:[#allocation3 + $0x3b1] sm:$0xff]  ;;  %v13010_v1 = vld [vmem:[#allocation3 + $0x3a9] sm:$0xff] }
 0xf12   :  { %20497 = vmatpush3.bf16.xpose.msk.msra.mxu1 %vm23653_vm5, %v20495_v6  ;;  %v20525_v6 = vpack.c.bf16 %v12937_v34, %v12936_v57  ;;  %v12235_v34 = vld [vmem:[#allocation3 + $0x500] sm:$0xff]  ;;  %v12994_v57 = vld [vmem:[#allocation3 + $0x309] sm:$0xff] }
 0xf13   :  { %20353 = vmatpush3.bf16.xpose.msk.msra.mxu0 %vm23653_vm5, %v20351_v47  ;;  %20500 = vmatprep.subr.msk.bf16.mxu1 %vm23653_vm5, %v20498_v18  ;;  %v20381_v47 = vpack.c.bf16 %v12160_v43, %v12159_v20  ;;  %v20528_v18 = vpack.c.bf16 %v12955_v2, %v12954_v15  ;;  %v12995_v20 = vld [vmem:[#allocation3 + $0x311] sm:$0xff]  ;;  %v13013_v2 = vld [vmem:[#allocation3 + $0x3c9] sm:$0xff] }
 0xf14   :  { %20356 = vmatprep.subr.msk.bf16.mxu0 %vm23653_vm5, %v20354_v32  ;;  %v20384_v32 = vpack.c.bf16 %v12178_v27, %v12177_v50  ;;  %v12236_v27 = vld [vmem:[#allocation3 + $0x508] sm:$0xff] }
 0xf15   :  { %v12217_v43 = vld [vmem:[#allocation3 + $0x448] sm:$0xff]  ;;  %v20462_v15 = vpack.c.bf16 %v12236_v27, %v12235_v34  ;;  %v12956_v27 = vld [vmem:[#allocation3 + $0x191] sm:$0xff] }
 0xf16   :  { %v13012_v50 = vld [vmem:[#allocation3 + $0x3c1] sm:$0xff]  ;;  %v13752_v34 = vld [vmem:[#allocation3 + $0x10a] sm:$0xff] }
 0xf1a   :  { %20503 = vmatpush3.bf16.xpose.msk.msra.mxu1 %vm23653_vm5, %v20501_v58  ;;  %v20531_v58 = vpack.c.bf16 %v12939_v31, %v12938_v36  ;;  %v12237_v31 = vld [vmem:[#allocation3 + $0x510] sm:$0xff]  ;;  %v12996_v36 = vld [vmem:[#allocation3 + $0x321] sm:$0xff] }
 0xf1b   :  { %20359 = vmatpush3.bf16.xpose.msk.msra.mxu0 %vm23653_vm5, %v20357_v63  ;;  %20506 = vmatprep.subr.msk.bf16.mxu1 %vm23653_vm5, %v20504_v19  ;;  %v20387_v63 = vpack.c.bf16 %v12162_v10, %v12161_v4  ;;  %v20582_v19 = vpack.c.bf16 %v13005_v8, %v13004_v48  ;;  %v12997_v10 = vld [vmem:[#allocation3 + $0x329] sm:$0xff]  ;;  %v13015_v8 = vld [vmem:[#allocation3 + $0x3d9] sm:$0xff] }
 0xf1c   :  { %20362 = vmatprep.subr.msk.bf16.mxu0 %vm23653_vm5, %v20360_v22  ;;  %v20438_v22 = vpack.c.bf16 %v12228_v40, %v12227_v61  ;;  %v12238_v61 = vld [vmem:[#allocation3 + $0x518] sm:$0xff]  ;;  %v12220_v4 = vld [vmem:[#allocation3 + $0x468] sm:$0xff] }
 0xf1d   :  { %v13014_v40 = vld [vmem:[#allocation3 + $0x3d1] sm:$0xff]  ;;  %v20468_v48 = vpack.c.bf16 %v12238_v61, %v12237_v31  ;;  %v12977_v61 = vld [vmem:[#allocation3 + $0x261] sm:$0xff] }
 0xf1e   :  { %v13736_v31 = vld [vmem:[#allocation3 + $0x6a] sm:$0xff] }
 0xf22   :  { %20509 = vmatpush3.bf16.xpose.msk.msra.mxu1 %vm23653_vm5, %v20507_v28  ;;  %v20585_v28 = vpack.c.bf16 %v12989_v5, %v12988_v44  ;;  %v12239_v5 = vld [vmem:[#allocation3 + $0x528] sm:$0xff] }
 0xf23   :  { %20365 = vmatpush3.bf16.xpose.msk.msra.mxu0 %vm23653_vm5, %v20363_v41  ;;  %20512 = vmatprep.subr.msk.bf16.mxu1 %vm23653_vm5, %v20510_v11  ;;  %v20441_v41 = vpack.c.bf16 %v12212_v33, %v12211_v53  ;;  %v20588_v11 = vpack.c.bf16 %v13007_v17, %v13006_v14  ;;  %v12999_v53 = vld [vmem:[#allocation3 + $0x339] sm:$0xff]  ;;  %v12221_v17 = vld [vmem:[#allocation3 + $0x470] sm:$0xff] }
 0xf24   :  { %20368 = vmatprep.subr.msk.bf16.mxu0 %vm23653_vm5, %v20366_v23  ;;  %v20444_v23 = vpack.c.bf16 %v12230_v55, %v12229_v16  ;;  %v13017_v55 = vld [vmem:[#allocation3 + $0x3f1] sm:$0xff]  ;;  %v13016_v16 = vld [vmem:[#allocation3 + $0x3e9] sm:$0xff] }
 0xf25   :  { %v12998_v33 = vld [vmem:[#allocation3 + $0x331] sm:$0xff] }
 0xf2a   :  { %20515 = vmatpush3.bf16.xpose.msk.msra.mxu1 %vm23653_vm5, %v20513_v21  ;;  %v20591_v21 = vpack.c.bf16 %v12991_v60, %v12990_v62  ;;  %v12242_v60 = vld [vmem:[#allocation3 + $0x540] sm:$0xff] }
 0xf2b   :  { %20371 = vmatpush3.bf16.xpose.msk.msra.mxu0 %vm23653_vm5, %v20369_v25  ;;  %20518 = vmatprep.subr.msk.bf16.mxu1 %vm23653_vm5, %v20516_v3  ;;  %v20447_v25 = vpack.c.bf16 %v12214_v56, %v12213_v52  ;;  %v20594_v3 = vpack.c.bf16 %v13009_v37, %v13008_v12  ;;  %v13001_v56 = vld [vmem:[#allocation3 + $0x351] sm:$0xff]  ;;  %v13000_v52 = vld [vmem:[#allocation3 + $0x349] sm:$0xff] }
 0xf2c   :  { %20374 = vmatprep.subr.msk.bf16.mxu0 %vm23653_vm5, %v20372_v0  ;;  %v20450_v0 = vpack.c.bf16 %v12232_v46, %v12231_v9  ;;  %v13019_v9 = vld [vmem:[#allocation3 + $0x401] sm:$0xff]  ;;  %v12224_v37 = vld [vmem:[#allocation3 + $0x490] sm:$0xff]  ;;  %v13018_v46 = vld [vmem:[#allocation3 + $0x3f9] sm:$0xff] }
 0xf32   :  { %20521 = vmatpush3.bf16.xpose.msk.msra.mxu1 %vm23653_vm5, %v20519_v7  ;;  %v12233_v7 = vld [vmem:[#allocation3 + $0x4e8] sm:$0xff] }
 0xf33   :  { %20377 = vmatpush3.bf16.xpose.msk.msra.mxu0 %vm23653_vm5, %v20375_v24  ;;  %20524 = vmatprep.subr.msk.bf16.mxu1 %vm23653_vm5, %v20522_v45  ;;  %v20597_v24 = vpack.c.bf16 %v12993_v35, %v12992_v49  ;;  %v20456_v29 = vpack.c.bf16 %v12234_v30, %v12233_v7  ;;  %v12218_v45 = vld [vmem:[#allocation3 + $0x450] sm:$0xff]  ;;  %v12973_v35 = vld [vmem:[#allocation3 + $0x239] sm:$0xff] }
 0xf34   :  { %20380 = vmatprep.subr.msk.bf16.mxu0 %vm23653_vm5, %v20378_v51  ;;  %v20600_v51 = vpack.c.bf16 %v13011_v13, %v13010_v1  ;;  %v13750_v30 = vld [vmem:[#allocation3 + $0xfa] sm:$0xff]  ;;  %v13749_v7 = vld [vmem:[#allocation3 + $0xf2] sm:$0xff] }
 0xf35   :  { %v12225_v13 = vld [vmem:[#allocation3 + $0x498] sm:$0xff] }
 0xf3a   :  { %20527 = vmatpush3.bf16.xpose.msk.msra.mxu1 %vm23653_vm5, %v20525_v6  ;;  %v20603_v6 = vpack.c.bf16 %v12995_v20, %v12994_v57  ;;  %v12975_v20 = vld [vmem:[#allocation3 + $0x249] sm:$0xff] }
 0xf3b   :  { %20383 = vmatpush3.bf16.xpose.msk.msra.mxu0 %vm23653_vm5, %v20381_v47  ;;  %20530 = vmatprep.subr.msk.bf16.mxu1 %vm23653_vm5, %v20528_v18  ;;  %v20459_v47 = vpack.c.bf16 %v12218_v45, %v12217_v43  ;;  %v12219_v18 = vld [vmem:[#allocation3 + $0x460] sm:$0xff] }
 0xf3c   :  { %20386 = vmatprep.subr.msk.bf16.mxu0 %vm23653_vm5, %v20384_v32  ;;  %v20606_v32 = vpack.c.bf16 %v13013_v2, %v13012_v50  ;;  %v13734_v45 = vld [vmem:[#allocation3 + $0x5a] sm:$0xff]  ;;  %v13733_v2 = vld [vmem:[#allocation3 + $0x52] sm:$0xff] }
 0xf3d   :  { %v20681_v57 = vpack.c.bf16 %v13734_v45, %v13733_v2  ;;  %v21288_v50 = vld [vmem:[%s25723_s7 + $0xc] sm:$0x3]  ;;  %v12966_v2 = vld [vmem:[#allocation3 + $0x1f1] sm:$0xff] }
 0xf3e   :  { %v12967_v45 = vld [vmem:[#allocation3 + $0x1f9] sm:$0xff] }
 0xf42   :  { %20533 = vmatpush3.bf16.xpose.msk.msra.mxu1 %vm23653_vm5, %v20531_v58  ;;  %v20609_v58 = vpack.c.bf16 %v12997_v10, %v12996_v36  ;;  %v12959_v10 = vld [vmem:[#allocation3 + $0x1a9] sm:$0xff] }
 0xf43   :  { %20389 = vmatpush3.bf16.xpose.msk.msra.mxu0 %vm23653_vm5, %v20387_v63  ;;  %20584 = vmatprep.subr.msk.bf16.mxu1 %vm23653_vm5, %v20582_v19  ;;  %v20465_v63 = vpack.c.bf16 %v12220_v4, %v12219_v18  ;;  %v12222_v19 = vld [vmem:[#allocation3 + $0x478] sm:$0xff]  ;;  %v25455_v18 = vld [vmem:[%s25723_s7 + $0x10] sm:$0x3]  ;;  %v13735_v36 = vld [vmem:[#allocation3 + $0x62] sm:$0xff] }
 0xf44   :  { %20440 = vmatprep.subr.msk.bf16.mxu0 %vm23653_vm5, %v20438_v22  ;;  %v20612_v22 = vpack.c.bf16 %v13015_v8, %v13014_v40  ;;  %v20471_v44 = vpack.c.bf16 %v12222_v19, %v12221_v17  ;;  %v13754_v8 = vld [vmem:[#allocation3 + $0x122] sm:$0xff]  ;;  %v12976_v40 = vld [vmem:[#allocation3 + $0x259] sm:$0xff] }
 0xf45   :  { %v12958_v4 = vld [vmem:[#allocation3 + $0x1a1] sm:$0xff]  ;;  %v13756_v17 = vld [vmem:[#allocation3 + $0x132] sm:$0xff] }
 0xf49   :  { %17991 = vmatmul.mubr.msk.f32.vlgmr.msra.gmra.mrb[76].mxu1 %vm1356_vm2, %v25304_v39 }
 0xf4a   :  { %17889 = vmatmul.mubr.msk.f32.vlgmr.msra.gmra.mrb[12].mxu0 %vm1356_vm2, %v25153_v59  ;;  %20587 = vmatpush3.bf16.xpose.msk.msra.mxu1 %vm23653_vm5, %v20585_v28  ;;  %v12240_v28 = vld [vmem:[#allocation3 + $0x530] sm:$0xff] }
 0xf4b   :  { %20443 = vmatpush3.bf16.xpose.msk.msra.mxu0 %vm23653_vm5, %v20441_v41  ;;  %20590 = vmatprep.subr.msk.bf16.mxu1 %vm23653_vm5, %v20588_v11  ;;  %v20615_v41 = vpack.c.bf16 %v12999_v53, %v12998_v33  ;;  %v20474_v14 = vpack.c.bf16 %v12240_v28, %v12239_v5  ;;  %v12223_v11 = vld [vmem:[#allocation3 + $0x488] sm:$0xff]  ;;  %v12960_v33 = vld [vmem:[#allocation3 + $0x1b9] sm:$0xff] }
 0xf4c   :  { %20446 = vmatprep.subr.msk.bf16.mxu0 %vm23653_vm5, %v20444_v23  ;;  %17956 = vmatprep.mubr.msk.f32.mxu0 %vm1356_vm2, %v25153_v59  ;;  %v12215_v59 = vld [vmem:[#allocation3 + $0x438] sm:$0xff]  ;;  %v20618_v23 = vpack.c.bf16 %v13017_v55, %v13016_v16  ;;  %v20477_v62 = vpack.c.bf16 %v12224_v37, %v12223_v11  ;;  %v12961_v53 = vld [vmem:[#allocation3 + $0x1c1] sm:$0xff]  ;;  %v12978_v16 = vld [vmem:[#allocation3 + $0x269] sm:$0xff] }
 0xf4d   :  { %18058 = vmatprep.mubr.msk.f32.mxu1 %vm1356_vm2, %v25304_v39  ;;  %v20453_v26 = vpack.c.bf16 %v12216_v54, %v12215_v59  ;;  %v13003_v59 = vld [vmem:[#allocation3 + $0x361] sm:$0xff]  ;;  %v13002_v54 = vld [vmem:[#allocation3 + $0x359] sm:$0xff]  ;;  %v12979_v55 = vld [vmem:[#allocation3 + $0x271] sm:$0xff] }
 0xf4e   :  { %v13738_v5 = vld [vmem:[#allocation3 + $0x82] sm:$0xff]  ;;  %v13758_v37 = vld [vmem:[#allocation3 + $0x14a] sm:$0xff] }
 0xf52   :  { %20593 = vmatpush3.bf16.xpose.msk.msra.mxu1 %vm23653_vm5, %v20591_v21  ;;  %v12241_v21 = vld [vmem:[#allocation3 + $0x538] sm:$0xff] }
 0xf53   :  { %20449 = vmatpush3.bf16.xpose.msk.msra.mxu0 %vm23653_vm5, %v20447_v25  ;;  %20596 = vmatprep.subr.msk.bf16.mxu1 %vm23653_vm5, %v20594_v3  ;;  %v20621_v25 = vpack.c.bf16 %v13001_v56, %v13000_v52  ;;  %v20480_v12 = vpack.c.bf16 %v12242_v60, %v12241_v21  ;;  %v12226_v3 = vld [vmem:[#allocation3 + $0x4a0] sm:$0xff]  ;;  %v12963_v56 = vld [vmem:[#allocation3 + $0x1d1] sm:$0xff]  ;;  %v12962_v52 = vld [vmem:[#allocation3 + $0x1c9] sm:$0xff] }
 0xf54   :  { %20452 = vmatprep.subr.msk.bf16.mxu0 %vm23653_vm5, %v20450_v0  ;;  %v20624_v0 = vpack.c.bf16 %v13019_v9, %v13018_v46  ;;  %v20483_v49 = vpack.c.bf16 %v12226_v3, %v12225_v13  ;;  %v13740_v60 = vld [vmem:[#allocation3 + $0x92] sm:$0xff]  ;;  %v12981_v9 = vld [vmem:[#allocation3 + $0x289] sm:$0xff]  ;;  %v12980_v46 = vld [vmem:[#allocation3 + $0x281] sm:$0xff] }
 0xf55   :  { %v13760_v13 = vld [vmem:[#allocation3 + $0x15a] sm:$0xff] }
 0xf5a   :  { %20599 = vmatpush3.bf16.xpose.msk.msra.mxu1 %vm23653_vm5, %v20597_v24  ;;  %v12972_v24 = vld [vmem:[#allocation3 + $0x231] sm:$0xff] }
 0xf5b   :  { %20455 = vmatpush3.bf16.xpose.msk.msra.mxu0 %vm23653_vm5, %v20453_v26  ;;  %20602 = vmatprep.subr.msk.bf16.mxu1 %vm23653_vm5, %v20600_v51  ;;  %v20627_v26 = vpack.c.bf16 %v13003_v59, %v13002_v54  ;;  %v20534_v1 = vpack.c.bf16 %v12973_v35, %v12972_v24  ;;  %v12957_v51 = vld [vmem:[#allocation3 + $0x199] sm:$0xff]  ;;  %v12965_v59 = vld [vmem:[#allocation3 + $0x1e9] sm:$0xff]  ;;  %v12964_v54 = vld [vmem:[#allocation3 + $0x1e1] sm:$0xff] }
 0xf5c   :  { %20458 = vmatprep.subr.msk.bf16.mxu0 %vm23653_vm5, %v20456_v29  ;;  %v20678_v29 = vpack.c.bf16 %v13750_v30, %v13749_v7  ;;  %v20537_v43 = vpack.c.bf16 %v12957_v51, %v12956_v27  ;;  %v13742_v35 = vld [vmem:[#allocation3 + $0xaa] sm:$0xff]  ;;  %v12983_v30 = vld [vmem:[#allocation3 + $0x299] sm:$0xff] }
 0xf5d   :  { %v12982_v7 = vld [vmem:[#allocation3 + $0x291] sm:$0xff] }
 0xf5e   :  { %v13762_v27 = vld [vmem:[#allocation3 + $0x172] sm:$0xff] }
 0xf62   :  { %20605 = vmatpush3.bf16.xpose.msk.msra.mxu1 %vm23653_vm5, %v20603_v6  ;;  %v13751_v6 = vld [vmem:[#allocation3 + $0x102] sm:$0xff] }
 0xf63   :  { %20461 = vmatpush3.bf16.xpose.msk.msra.mxu0 %vm23653_vm5, %v20459_v47  ;;  %20608 = vmatprep.subr.msk.bf16.mxu1 %vm23653_vm5, %v20606_v32  ;;  %v12974_v47 = vld [vmem:[#allocation3 + $0x241] sm:$0xff]  ;;  %v20684_v32 = vpack.c.bf16 %v13752_v34, %v13751_v6  ;;  %v12985_v34 = vld [vmem:[#allocation3 + $0x2b1] sm:$0xff]  ;;  %v12984_v6 = vld [vmem:[#allocation3 + $0x2a9] sm:$0xff] }
 0xf64   :  { %20464 = vmatprep.subr.msk.bf16.mxu0 %vm23653_vm5, %v20462_v15  ;;  %v20540_v15 = vpack.c.bf16 %v12975_v20, %v12974_v47  ;;  %v13744_v20 = vld [vmem:[#allocation3 + $0xba] sm:$0xff] }
 0xf6a   :  { %20611 = vmatpush3.bf16.xpose.msk.msra.mxu1 %vm23653_vm5, %v20609_v58  ;;  %v20687_v58 = vpack.c.bf16 %v13736_v31, %v13735_v36  ;;  %v13746_v31 = vld [vmem:[#allocation3 + $0xd2] sm:$0xff]  ;;  %v13745_v36 = vld [vmem:[#allocation3 + $0xca] sm:$0xff] }
 0xf6b   :  { %20467 = vmatpush3.bf16.xpose.msk.msra.mxu0 %vm23653_vm5, %v20465_v63  ;;  %20614 = vmatprep.subr.msk.bf16.mxu1 %vm23653_vm5, %v20612_v22  ;;  %v20543_v63 = vpack.c.bf16 %v12959_v10, %v12958_v4  ;;  %v20546_v22 = vpack.c.bf16 %v12977_v61, %v12976_v40  ;;  %v12969_v10 = vld [vmem:[#allocation3 + $0x211] sm:$0xff]  ;;  %v12987_v61 = vld [vmem:[#allocation3 + $0x2c1] sm:$0xff]  ;;  %v12968_v4 = vld [vmem:[#allocation3 + $0x209] sm:$0xff] }
 0xf6c   :  { %20470 = vmatprep.subr.msk.bf16.mxu0 %vm23653_vm5, %v20468_v48  ;;  %v13753_v48 = vld [vmem:[#allocation3 + $0x11a] sm:$0xff] }
 0xf6d   :  { %v20690_v19 = vpack.c.bf16 %v13754_v8, %v13753_v48  ;;  %v13764_v8 = vld [vmem:[#allocation3 + $0x182] sm:$0xff]  ;;  %v12986_v40 = vld [vmem:[#allocation3 + $0x2b9] sm:$0xff] }
 0xf6e   :  { %v13763_v48 = vld [vmem:[#allocation3 + $0x17a] sm:$0xff] }
 0xf72   :  { %20617 = vmatpush3.bf16.xpose.msk.msra.mxu1 %vm23653_vm5, %v20615_v41  ;;  %v20549_v41 = vpack.c.bf16 %v12961_v53, %v12960_v33  ;;  %v12971_v53 = vld [vmem:[#allocation3 + $0x221] sm:$0xff]  ;;  %v12970_v33 = vld [vmem:[#allocation3 + $0x219] sm:$0xff] }
 0xf73   :  { %20473 = vmatpush3.bf16.xpose.msk.msra.mxu0 %vm23653_vm5, %v20471_v44  ;;  %20620 = vmatprep.subr.msk.bf16.mxu1 %vm23653_vm5, %v20618_v23  ;;  %v13737_v44 = vld [vmem:[#allocation3 + $0x7a] sm:$0xff]  ;;  %v20552_v23 = vpack.c.bf16 %v12979_v55, %v12978_v16  ;;  %v13036_v16 = vld [vmem:[#allocation3 + $0x4b1] sm:$0xff] }
 0xf74   :  { %20476 = vmatprep.subr.msk.bf16.mxu0 %vm23653_vm5, %v20474_v14  ;;  %v20693_v28 = vpack.c.bf16 %v13738_v5, %v13737_v44  ;;  %v13755_v14 = vld [vmem:[#allocation3 + $0x12a] sm:$0xff]  ;;  %v13748_v5 = vld [vmem:[#allocation3 + $0xe2] sm:$0xff]  ;;  %v13037_v55 = vld [vmem:[#allocation3 + $0x4b9] sm:$0xff] }
 0xf75   :  { %v20696_v11 = vpack.c.bf16 %v13756_v17, %v13755_v14  ;;  %v13814_v17 = vld [vmem:[#allocation3 + $0x37a] sm:$0xff]  ;;  %v13813_v14 = vld [vmem:[#allocation3 + $0x372] sm:$0xff] }
 0xf76   :  { %v13747_v44 = vld [vmem:[#allocation3 + $0xda] sm:$0xff] }
 0xf7a   :  { %20623 = vmatpush3.bf16.xpose.msk.msra.mxu1 %vm23653_vm5, %v20621_v25  ;;  %v20555_v25 = vpack.c.bf16 %v12963_v56, %v12962_v52  ;;  %v13021_v56 = vld [vmem:[#allocation3 + $0x419] sm:$0xff]  ;;  %v13020_v52 = vld [vmem:[#allocation3 + $0x411] sm:$0xff] }
 0xf7b   :  { %20479 = vmatpush3.bf16.xpose.msk.msra.mxu0 %vm23653_vm5, %v20477_v62  ;;  %20626 = vmatprep.subr.msk.bf16.mxu1 %vm23653_vm5, %v20624_v0  ;;  %v13739_v62 = vld [vmem:[#allocation3 + $0x8a] sm:$0xff]  ;;  %v20558_v0 = vpack.c.bf16 %v12981_v9, %v12980_v46  ;;  %v13038_v46 = vld [vmem:[#allocation3 + $0x4c1] sm:$0xff] }
 0xf7c   :  { %20482 = vmatprep.subr.msk.bf16.mxu0 %vm23653_vm5, %v20480_v12  ;;  %v20699_v21 = vpack.c.bf16 %v13740_v60, %v13739_v62  ;;  %v13757_v12 = vld [vmem:[#allocation3 + $0x142] sm:$0xff]  ;;  %v13798_v60 = vld [vmem:[#allocation3 + $0x2da] sm:$0xff]  ;;  %v13797_v62 = vld [vmem:[#allocation3 + $0x2d2] sm:$0xff] }
 0xf7d   :  { %v20702_v3 = vpack.c.bf16 %v13758_v37, %v13757_v12  ;;  %v13039_v9 = vld [vmem:[#allocation3 + $0x4c9] sm:$0xff] }
 0xf7e   :  { %v13816_v37 = vld [vmem:[#allocation3 + $0x38a] sm:$0xff]  ;;  %v13815_v12 = vld [vmem:[#allocation3 + $0x382] sm:$0xff] }
 0xf82   :  { %20629 = vmatpush3.bf16.xpose.msk.msra.mxu1 %vm23653_vm5, %v20627_v26  ;;  %v20561_v26 = vpack.c.bf16 %v12965_v59, %v12964_v54  ;;  %v13023_v59 = vld [vmem:[#allocation3 + $0x429] sm:$0xff]  ;;  %v13022_v54 = vld [vmem:[#allocation3 + $0x421] sm:$0xff] }
 0xf83   :  { %20485 = vmatpush3.bf16.xpose.msk.msra.mxu0 %vm23653_vm5, %v20483_v49  ;;  %20680 = vmatprep.subr.msk.bf16.mxu1 %vm23653_vm5, %v20678_v29  ;;  %v13741_v49 = vld [vmem:[#allocation3 + $0xa2] sm:$0xff]  ;;  %v20564_v29 = vpack.c.bf16 %v12983_v30, %v12982_v7  ;;  %v13040_v7 = vld [vmem:[#allocation3 + $0x4d9] sm:$0xff] }
 0xf84   :  { %20536 = vmatprep.subr.msk.bf16.mxu0 %vm23653_vm5, %v20534_v1  ;;  %v20705_v24 = vpack.c.bf16 %v13742_v35, %v13741_v49  ;;  %v13759_v1 = vld [vmem:[#allocation3 + $0x152] sm:$0xff]  ;;  %v13800_v35 = vld [vmem:[#allocation3 + $0x2ea] sm:$0xff]  ;;  %v13041_v30 = vld [vmem:[#allocation3 + $0x4e1] sm:$0xff] }
 0xf85   :  { %v20708_v51 = vpack.c.bf16 %v13760_v13, %v13759_v1  ;;  %v13818_v13 = vld [vmem:[#allocation3 + $0x3a2] sm:$0xff]  ;;  %v13817_v1 = vld [vmem:[#allocation3 + $0x39a] sm:$0xff] }
 0xf86   :  { %v13799_v49 = vld [vmem:[#allocation3 + $0x2e2] sm:$0xff] }
 0xf89   :  { %18059 = vmatmul.mubr.msk.f32.vlgmr.msra.gmra.mrb[78].mxu1 %vm1356_vm2, %v25304_v39 }
 0xf8a   :  { %17957 = vmatmul.mubr.msk.f32.vlgmr.msra.gmra.mrb[14].mxu0 %vm1356_vm2, %v21288_v50  ;;  %20683 = vmatpush3.bf16.xpose.msk.msra.mxu1 %vm23653_vm5, %v20681_v57  ;;  %v20567_v57 = vpack.c.bf16 %v12967_v45, %v12966_v2  ;;  %v13761_v50 = vld [vmem:[#allocation3 + $0x16a] sm:$0xff]  ;;  %v13802_v45 = vld [vmem:[#allocation3 + $0x302] sm:$0xff]  ;;  %v13801_v2 = vld [vmem:[#allocation3 + $0x2fa] sm:$0xff] }
 0xf8b   :  { %20539 = vmatpush3.bf16.xpose.msk.msra.mxu0 %vm23653_vm5, %v20537_v43  ;;  %20686 = vmatprep.subr.msk.bf16.mxu1 %vm23653_vm5, %v20684_v32  ;;  %v13743_v43 = vld [vmem:[#allocation3 + $0xb2] sm:$0xff]  ;;  %v20714_v32 = vpack.c.bf16 %v13762_v27, %v13761_v50 }
 0xf8c   :  { %20542 = vmatprep.subr.msk.bf16.mxu0 %vm23653_vm5, %v20540_v15  ;;  %18126 = vmatprep.mubr.msk.f32.mxu1 %vm1356_vm2, %v25455_v18  ;;  %v20711_v47 = vpack.c.bf16 %v13744_v20, %v13743_v43  ;;  %v20570_v15 = vpack.c.bf16 %v12985_v34, %v12984_v6  ;;  %v13043_v20 = vld [vmem:[#allocation3 + $0x4f1] sm:$0xff]  ;;  %v13024_v27 = vld [vmem:[#allocation3 + $0x439] sm:$0xff] }
 0xf8d   :  { %18024 = vmatprep.mubr.msk.f32.mxu0 %vm1356_vm2, %v25304_v39  ;;  %v13820_v34 = vld [vmem:[#allocation3 + $0x3b2] sm:$0xff]  ;;  %v13819_v6 = vld [vmem:[#allocation3 + $0x3aa] sm:$0xff] }
 0xf92   :  { %20689 = vmatpush3.bf16.xpose.msk.msra.mxu1 %vm23653_vm5, %v20687_v58  ;;  %v20717_v58 = vpack.c.bf16 %v13746_v31, %v13745_v36  ;;  %v13044_v31 = vld [vmem:[#allocation3 + $0x501] sm:$0xff]  ;;  %v13803_v36 = vld [vmem:[#allocation3 + $0x30a] sm:$0xff] }
 0xf93   :  { %20545 = vmatpush3.bf16.xpose.msk.msra.mxu0 %vm23653_vm5, %v20543_v63  ;;  %20692 = vmatprep.subr.msk.bf16.mxu1 %vm23653_vm5, %v20690_v19  ;;  %v20573_v63 = vpack.c.bf16 %v12969_v10, %v12968_v4  ;;  %v20720_v19 = vpack.c.bf16 %v13764_v8, %v13763_v48  ;;  %v13804_v10 = vld [vmem:[#allocation3 + $0x312] sm:$0xff]  ;;  %v13822_v8 = vld [vmem:[#allocation3 + $0x3ca] sm:$0xff] }
 0xf94   :  { %20548 = vmatprep.subr.msk.bf16.mxu0 %vm23653_vm5, %v20546_v22  ;;  %v20576_v22 = vpack.c.bf16 %v12987_v61, %v12986_v40  ;;  %v13045_v61 = vld [vmem:[#allocation3 + $0x509] sm:$0xff] }
 0xf95   :  { %v13026_v4 = vld [vmem:[#allocation3 + $0x449] sm:$0xff]  ;;  %v20654_v48 = vpack.c.bf16 %v13045_v61, %v13044_v31 }
 0xf96   :  { %v13821_v40 = vld [vmem:[#allocation3 + $0x3c2] sm:$0xff]  ;;  %v13768_v61 = vld [vmem:[#allocation3 + $0x1aa] sm:$0xff] }
 0xf9a   :  { %20695 = vmatpush3.bf16.xpose.msk.msra.mxu1 %vm23653_vm5, %v20693_v28  ;;  %v20723_v28 = vpack.c.bf16 %v13748_v5, %v13747_v44  ;;  %v13046_v5 = vld [vmem:[#allocation3 + $0x511] sm:$0xff]  ;;  %v13805_v44 = vld [vmem:[#allocation3 + $0x322] sm:$0xff] }
 0xf9b   :  { %20551 = vmatpush3.bf16.xpose.msk.msra.mxu0 %vm23653_vm5, %v20549_v41  ;;  %20698 = vmatprep.subr.msk.bf16.mxu1 %vm23653_vm5, %v20696_v11  ;;  %v20579_v41 = vpack.c.bf16 %v12971_v53, %v12970_v33  ;;  %v20774_v11 = vpack.c.bf16 %v13814_v17, %v13813_v14  ;;  %v13806_v53 = vld [vmem:[#allocation3 + $0x32a] sm:$0xff]  ;;  %v13824_v17 = vld [vmem:[#allocation3 + $0x3da] sm:$0xff] }
 0xf9c   :  { %20554 = vmatprep.subr.msk.bf16.mxu0 %vm23653_vm5, %v20552_v23  ;;  %v20630_v23 = vpack.c.bf16 %v13037_v55, %v13036_v16  ;;  %v13047_v55 = vld [vmem:[#allocation3 + $0x519] sm:$0xff]  ;;  %v13028_v33 = vld [vmem:[#allocation3 + $0x461] sm:$0xff] }
 0xf9d   :  { %v13823_v16 = vld [vmem:[#allocation3 + $0x3d2] sm:$0xff]  ;;  %v20660_v14 = vpack.c.bf16 %v13047_v55, %v13046_v5 }
 0xf9e   :  { %v13772_v55 = vld [vmem:[#allocation3 + $0x1d2] sm:$0xff] }
 0xfa2   :  { %20701 = vmatpush3.bf16.xpose.msk.msra.mxu1 %vm23653_vm5, %v20699_v21  ;;  %v20777_v21 = vpack.c.bf16 %v13798_v60, %v13797_v62  ;;  %v13049_v60 = vld [vmem:[#allocation3 + $0x531] sm:$0xff] }
 0xfa3   :  { %20557 = vmatpush3.bf16.xpose.msk.msra.mxu0 %vm23653_vm5, %v20555_v25  ;;  %20704 = vmatprep.subr.msk.bf16.mxu1 %vm23653_vm5, %v20702_v3  ;;  %v20633_v25 = vpack.c.bf16 %v13021_v56, %v13020_v52  ;;  %v20780_v3 = vpack.c.bf16 %v13816_v37, %v13815_v12  ;;  %v13808_v56 = vld [vmem:[#allocation3 + $0x33a] sm:$0xff]  ;;  %v13030_v37 = vld [vmem:[#allocation3 + $0x471] sm:$0xff] }
 0xfa4   :  { %20560 = vmatprep.subr.msk.bf16.mxu0 %vm23653_vm5, %v20558_v0  ;;  %v20636_v0 = vpack.c.bf16 %v13039_v9, %v13038_v46  ;;  %v13826_v9 = vld [vmem:[#allocation3 + $0x3f2] sm:$0xff]  ;;  %v13825_v46 = vld [vmem:[#allocation3 + $0x3ea] sm:$0xff] }
 0xfa5   :  { %v13807_v52 = vld [vmem:[#allocation3 + $0x332] sm:$0xff] }
 0xfaa   :  { %20707 = vmatpush3.bf16.xpose.msk.msra.mxu1 %vm23653_vm5, %v20705_v24  ;;  %v20783_v24 = vpack.c.bf16 %v13800_v35, %v13799_v49  ;;  %v13051_v35 = vld [vmem:[#allocation3 + $0x541] sm:$0xff] }
 0xfab   :  { %20563 = vmatpush3.bf16.xpose.msk.msra.mxu0 %vm23653_vm5, %v20561_v26  ;;  %20710 = vmatprep.subr.msk.bf16.mxu1 %vm23653_vm5, %v20708_v51  ;;  %v20639_v26 = vpack.c.bf16 %v13023_v59, %v13022_v54  ;;  %v20786_v51 = vpack.c.bf16 %v13818_v13, %v13817_v1  ;;  %v13810_v59 = vld [vmem:[#allocation3 + $0x352] sm:$0xff]  ;;  %v13032_v13 = vld [vmem:[#allocation3 + $0x489] sm:$0xff] }
 0xfac   :  { %20566 = vmatprep.subr.msk.bf16.mxu0 %vm23653_vm5, %v20564_v29  ;;  %v20642_v29 = vpack.c.bf16 %v13041_v30, %v13040_v7  ;;  %v13828_v30 = vld [vmem:[#allocation3 + $0x402] sm:$0xff]  ;;  %v13809_v54 = vld [vmem:[#allocation3 + $0x34a] sm:$0xff]  ;;  %v13827_v7 = vld [vmem:[#allocation3 + $0x3fa] sm:$0xff] }
 0xfb2   :  { %20713 = vmatpush3.bf16.xpose.msk.msra.mxu1 %vm23653_vm5, %v20711_v47  ;;  %v13042_v47 = vld [vmem:[#allocation3 + $0x4e9] sm:$0xff] }
 0xfb3   :  { %20569 = vmatpush3.bf16.xpose.msk.msra.mxu0 %vm23653_vm5, %v20567_v57  ;;  %20716 = vmatprep.subr.msk.bf16.mxu1 %vm23653_vm5, %v20714_v32  ;;  %v20789_v57 = vpack.c.bf16 %v13802_v45, %v13801_v2  ;;  %v20648_v50 = vpack.c.bf16 %v13043_v20, %v13042_v47  ;;  %v13027_v32 = vld [vmem:[#allocation3 + $0x451] sm:$0xff]  ;;  %v13782_v45 = vld [vmem:[#allocation3 + $0x23a] sm:$0xff] }
 0xfb4   :  { %20572 = vmatprep.subr.msk.bf16.mxu0 %vm23653_vm5, %v20570_v15  ;;  %v20792_v15 = vpack.c.bf16 %v13820_v34, %v13819_v6  ;;  %v13034_v20 = vld [vmem:[#allocation3 + $0x499] sm:$0xff]  ;;  %v13784_v6 = vld [vmem:[#allocation3 + $0x24a] sm:$0xff] }
 0xfb5   :  { %v13811_v34 = vld [vmem:[#allocation3 + $0x35a] sm:$0xff] }
 0xfb6   :  { %v13766_v47 = vld [vmem:[#allocation3 + $0x19a] sm:$0xff] }
 0xfba   :  { %20719 = vmatpush3.bf16.xpose.msk.msra.mxu1 %vm23653_vm5, %v20717_v58  ;;  %v20795_v58 = vpack.c.bf16 %v13804_v10, %v13803_v36  ;;  %v21289_v10 = vld [vmem:[%s25723_s7 + $0xe] sm:$0x3] }
 0xfbb   :  { %20575 = vmatpush3.bf16.xpose.msk.msra.mxu0 %vm23653_vm5, %v20573_v63  ;;  %20722 = vmatprep.subr.msk.bf16.mxu1 %vm23653_vm5, %v20720_v19  ;;  %v20651_v63 = vpack.c.bf16 %v13027_v32, %v13026_v4  ;;  %v13029_v19 = vld [vmem:[#allocation3 + $0x469] sm:$0xff] }
 0xfbc   :  { %20578 = vmatprep.subr.msk.bf16.mxu0 %vm23653_vm5, %v20576_v22  ;;  %v20798_v22 = vpack.c.bf16 %v13822_v8, %v13821_v40  ;;  %v13783_v32 = vld [vmem:[#allocation3 + $0x242] sm:$0xff] }
 0xfbd   :  { %v20732_v31 = vpack.c.bf16 %v13784_v6, %v13783_v32  ;;  %v13786_v8 = vld [vmem:[#allocation3 + $0x262] sm:$0xff]  ;;  %v13852_v6 = vld [vmem:[#allocation3 + $0x4f2] sm:$0xff]  ;;  %v13851_v32 = vld [vmem:[#allocation3 + $0x4ea] sm:$0xff] }
 0xfbe   :  { %v13767_v4 = vld [vmem:[#allocation3 + $0x1a2] sm:$0xff] }
 0xfbf   :  { %v20735_v36 = vpack.c.bf16 %v13768_v61, %v13767_v4  ;;  %v13770_v40 = vld [vmem:[#allocation3 + $0x1c2] sm:$0xff]  ;;  %v13835_v4 = vld [vmem:[#allocation3 + $0x44a] sm:$0xff] }
 0xfc0   :  { %v13853_v61 = vld [vmem:[#allocation3 + $0x502] sm:$0xff] }
 0xfc2   :  { %20725 = vmatpush3.bf16.xpose.msk.msra.mxu1 %vm23653_vm5, %v20723_v28  ;;  %v20801_v28 = vpack.c.bf16 %v13806_v53, %v13805_v44  ;;  %v13787_v53 = vld [vmem:[#allocation3 + $0x26a] sm:$0xff] }
 0xfc3   :  { %20581 = vmatpush3.bf16.xpose.msk.msra.mxu0 %vm23653_vm5, %v20579_v41  ;;  %20776 = vmatprep.subr.msk.bf16.mxu1 %vm23653_vm5, %v20774_v11  ;;  %v20657_v41 = vpack.c.bf16 %v13029_v19, %v13028_v33  ;;  %v13031_v11 = vld [vmem:[#allocation3 + $0x479] sm:$0xff]  ;;  %v13771_v33 = vld [vmem:[#allocation3 + $0x1ca] sm:$0xff] }
 0xfc4   :  { %20632 = vmatprep.subr.msk.bf16.mxu0 %vm23653_vm5, %v20630_v23  ;;  %v20804_v23 = vpack.c.bf16 %v13824_v17, %v13823_v16  ;;  %v20663_v62 = vpack.c.bf16 %v13031_v11, %v13030_v37  ;;  %v13790_v17 = vld [vmem:[#allocation3 + $0x28a] sm:$0xff]  ;;  %v20747_v44 = vpack.c.bf16 %v13772_v55, %v13771_v33  ;;  %v13794_v37 = vld [vmem:[#allocation3 + $0x2b2] sm:$0xff] }
 0xfc5   :  { %v13774_v16 = vld [vmem:[#allocation3 + $0x1ea] sm:$0xff]  ;;  %v13858_v55 = vld [vmem:[#allocation3 + $0x532] sm:$0xff] }
 0xfc9   :  { %18127 = vmatmul.mubr.msk.f32.vlgmr.msra.gmra.mrb[76].mxu1 %vm1356_vm2, %v25455_v18 }
 0xfca   :  { %18025 = vmatmul.mubr.msk.f32.vlgmr.msra.gmra.mrb[12].mxu0 %vm1356_vm2, %v25304_v39  ;;  %20779 = vmatpush3.bf16.xpose.msk.msra.mxu1 %vm23653_vm5, %v20777_v21  ;;  %v13048_v21 = vld [vmem:[#allocation3 + $0x529] sm:$0xff] }
 0xfcb   :  { %20635 = vmatpush3.bf16.xpose.msk.msra.mxu0 %vm23653_vm5, %v20633_v25  ;;  %20782 = vmatprep.subr.msk.bf16.mxu1 %vm23653_vm5, %v20780_v3  ;;  %v20807_v25 = vpack.c.bf16 %v13808_v56, %v13807_v52  ;;  %v20666_v12 = vpack.c.bf16 %v13049_v60, %v13048_v21  ;;  %v13033_v3 = vld [vmem:[#allocation3 + $0x491] sm:$0xff] }
 0xfcc   :  { %20638 = vmatprep.subr.msk.bf16.mxu0 %vm23653_vm5, %v20636_v0  ;;  %18194 = vmatprep.mubr.msk.f32.mxu1 %vm1356_vm2, %v25455_v18  ;;  %v20810_v0 = vpack.c.bf16 %v13826_v9, %v13825_v46  ;;  %v20669_v49 = vpack.c.bf16 %v13033_v3, %v13032_v13  ;;  %v13791_v56 = vld [vmem:[#allocation3 + $0x292] sm:$0xff]  ;;  %v13776_v9 = vld [vmem:[#allocation3 + $0x1fa] sm:$0xff] }
 0xfcd   :  { %18092 = vmatprep.mubr.msk.f32.mxu0 %vm1356_vm2, %v25304_v39  ;;  %v13025_v39 = vld [vmem:[#allocation3 + $0x441] sm:$0xff]  ;;  %v13775_v52 = vld [vmem:[#allocation3 + $0x1f2] sm:$0xff] }
 0xfce   :  { %v20645_v43 = vpack.c.bf16 %v13025_v39, %v13024_v27  ;;  %v13812_v39 = vld [vmem:[#allocation3 + $0x362] sm:$0xff]  ;;  %v13778_v46 = vld [vmem:[#allocation3 + $0x212] sm:$0xff]  ;;  %v13846_v13 = vld [vmem:[#allocation3 + $0x4ba] sm:$0xff] }
 0xfcf   :  { %v20819_v2 = vpack.c.bf16 %v13812_v39, %v13811_v34  ;;  %v13847_v39 = vld [vmem:[#allocation3 + $0x4c2] sm:$0xff] }
 0xfd0   :  { %v13850_v34 = vld [vmem:[#allocation3 + $0x4e2] sm:$0xff] }
 0xfd2   :  { %20785 = vmatpush3.bf16.xpose.msk.msra.mxu1 %vm23653_vm5, %v20783_v24  ;;  %v13050_v24 = vld [vmem:[#allocation3 + $0x539] sm:$0xff] }
 0xfd3   :  { %20641 = vmatpush3.bf16.xpose.msk.msra.mxu0 %vm23653_vm5, %v20639_v26  ;;  %20788 = vmatprep.subr.msk.bf16.mxu1 %vm23653_vm5, %v20786_v51  ;;  %v20813_v26 = vpack.c.bf16 %v13810_v59, %v13809_v54  ;;  %v20672_v1 = vpack.c.bf16 %v13051_v35, %v13050_v24  ;;  %v13035_v51 = vld [vmem:[#allocation3 + $0x4a1] sm:$0xff] }
 0xfd4   :  { %20644 = vmatprep.subr.msk.bf16.mxu0 %vm23653_vm5, %v20642_v29  ;;  %v20816_v29 = vpack.c.bf16 %v13828_v30, %v13827_v7  ;;  %v20675_v27 = vpack.c.bf16 %v13035_v51, %v13034_v20  ;;  %v13795_v59 = vld [vmem:[#allocation3 + $0x2ba] sm:$0xff]  ;;  %v13780_v30 = vld [vmem:[#allocation3 + $0x222] sm:$0xff]  ;;  %v13832_v20 = vld [vmem:[#allocation3 + $0x42a] sm:$0xff] }
 0xfd5   :  { %v13779_v54 = vld [vmem:[#allocation3 + $0x21a] sm:$0xff] }
 0xfd6   :  { %v13830_v7 = vld [vmem:[#allocation3 + $0x41a] sm:$0xff] }
 0xfda   :  { %20791 = vmatpush3.bf16.xpose.msk.msra.mxu1 %vm23653_vm5, %v20789_v57 }
 0xfdb   :  { %20647 = vmatpush3.bf16.xpose.msk.msra.mxu0 %vm23653_vm5, %v20645_v43  ;;  %20794 = vmatprep.subr.msk.bf16.mxu1 %vm23653_vm5, %v20792_v15  ;;  %v13781_v43 = vld [vmem:[#allocation3 + $0x232] sm:$0xff] }
 0xfdc   :  { %20650 = vmatprep.subr.msk.bf16.mxu0 %vm23653_vm5, %v20648_v50  ;;  %v20726_v57 = vpack.c.bf16 %v13782_v45, %v13781_v43  ;;  %v13765_v50 = vld [vmem:[#allocation3 + $0x192] sm:$0xff]  ;;  %v13849_v43 = vld [vmem:[#allocation3 + $0x4da] sm:$0xff] }
 0xfdd   :  { %v20729_v15 = vpack.c.bf16 %v13766_v47, %v13765_v50  ;;  %v13834_v47 = vld [vmem:[#allocation3 + $0x442] sm:$0xff]  ;;  %v13833_v50 = vld [vmem:[#allocation3 + $0x43a] sm:$0xff] }
 0xfe2   :  { %20797 = vmatpush3.bf16.xpose.msk.msra.mxu1 %vm23653_vm5, %v20795_v58 }
 0xfe3   :  { %20653 = vmatpush3.bf16.xpose.msk.msra.mxu0 %vm23653_vm5, %v20651_v63  ;;  %20800 = vmatprep.subr.msk.bf16.mxu1 %vm23653_vm5, %v20798_v22  ;;  %v13785_v63 = vld [vmem:[#allocation3 + $0x25a] sm:$0xff] }
 0xfe4   :  { %20656 = vmatprep.subr.msk.bf16.mxu0 %vm23653_vm5, %v20654_v48  ;;  %v20738_v58 = vpack.c.bf16 %v13786_v8, %v13785_v63  ;;  %v13788_v48 = vld [vmem:[#allocation3 + $0x272] sm:$0xff]  ;;  %v13769_v22 = vld [vmem:[#allocation3 + $0x1ba] sm:$0xff]  ;;  %v13854_v8 = vld [vmem:[#allocation3 + $0x50a] sm:$0xff] }
 0xfe5   :  { %v20741_v19 = vpack.c.bf16 %v13770_v40, %v13769_v22  ;;  %v20744_v5 = vpack.c.bf16 %v13788_v48, %v13787_v53  ;;  %v20846_v63 = vpack.c.bf16 %v13854_v8, %v13853_v61  ;;  %v13855_v40 = vld [vmem:[#allocation3 + $0x512] sm:$0xff]  ;;  %v13856_v48 = vld [vmem:[#allocation3 + $0x51a] sm:$0xff]  ;;  %v13837_v22 = vld [vmem:[#allocation3 + $0x462] sm:$0xff] }
 0xfe6   :  { %v20852_v53 = vpack.c.bf16 %v13856_v48, %v13855_v40 }
 0xfea   :  { %20803 = vmatpush3.bf16.xpose.msk.msra.mxu1 %vm23653_vm5, %v20801_v28 }
 0xfeb   :  { %20659 = vmatpush3.bf16.xpose.msk.msra.mxu0 %vm23653_vm5, %v20657_v41  ;;  %20806 = vmatprep.subr.msk.bf16.mxu1 %vm23653_vm5, %v20804_v23  ;;  %v13789_v41 = vld [vmem:[#allocation3 + $0x282] sm:$0xff] }
 0xfec   :  { %20662 = vmatprep.subr.msk.bf16.mxu0 %vm23653_vm5, %v20660_v14  ;;  %v20750_v28 = vpack.c.bf16 %v13790_v17, %v13789_v41  ;;  %v13792_v14 = vld [vmem:[#allocation3 + $0x29a] sm:$0xff]  ;;  %v13773_v23 = vld [vmem:[#allocation3 + $0x1e2] sm:$0xff]  ;;  %v13839_v17 = vld [vmem:[#allocation3 + $0x472] sm:$0xff] }
 0xfed   :  { %v20753_v11 = vpack.c.bf16 %v13774_v16, %v13773_v23  ;;  %v20756_v60 = vpack.c.bf16 %v13792_v14, %v13791_v56  ;;  %v13860_v16 = vld [vmem:[#allocation3 + $0x542] sm:$0xff]  ;;  %v13841_v14 = vld [vmem:[#allocation3 + $0x48a] sm:$0xff] }
 0xff2   :  { %20809 = vmatpush3.bf16.xpose.msk.msra.mxu1 %vm23653_vm5, %v20807_v25  ;;  %v13793_v25 = vld [vmem:[#allocation3 + $0x2aa] sm:$0xff] }
 0xff3   :  { %20665 = vmatpush3.bf16.xpose.msk.msra.mxu0 %vm23653_vm5, %v20663_v62  ;;  %20812 = vmatprep.subr.msk.bf16.mxu1 %vm23653_vm5, %v20810_v0  ;;  %v20759_v62 = vpack.c.bf16 %v13776_v9, %v13775_v52  ;;  %v20762_v21 = vpack.c.bf16 %v13794_v37, %v13793_v25  ;;  %v13777_v0 = vld [vmem:[#allocation3 + $0x20a] sm:$0xff]  ;;  %v13843_v9 = vld [vmem:[#allocation3 + $0x49a] sm:$0xff] }
 0xff4   :  { %20668 = vmatprep.subr.msk.bf16.mxu0 %vm23653_vm5, %v20666_v12  ;;  %v13796_v12 = vld [vmem:[#allocation3 + $0x2c2] sm:$0xff]  ;;  %v20765_v3 = vpack.c.bf16 %v13778_v46, %v13777_v0 }
 0xff5   :  { %v20768_v35 = vpack.c.bf16 %v13796_v12, %v13795_v59 }
 0xffa   :  { %20815 = vmatpush3.bf16.xpose.msk.msra.mxu1 %vm23653_vm5, %v20813_v26  ;;  %v13845_v26 = vld [vmem:[#allocation3 + $0x4b2] sm:$0xff] }
 0xffb   :  { %20671 = vmatpush3.bf16.xpose.msk.msra.mxu0 %vm23653_vm5, %v20669_v49  ;;  %20818 = vmatprep.subr.msk.bf16.mxu1 %vm23653_vm5, %v20816_v29  ;;  %v20771_v49 = vpack.c.bf16 %v13780_v30, %v13779_v54  ;;  %v20822_v24 = vpack.c.bf16 %v13846_v13, %v13845_v26  ;;  %v13829_v29 = vld [vmem:[#allocation3 + $0x412] sm:$0xff] }
 0xffc   :  { %20674 = vmatprep.subr.msk.bf16.mxu0 %vm23653_vm5, %v20672_v1  ;;  %v13848_v1 = vld [vmem:[#allocation3 + $0x4ca] sm:$0xff]  ;;  %v20825_v51 = vpack.c.bf16 %v13830_v7, %v13829_v29 }
 0xffd   :  { %v20828_v45 = vpack.c.bf16 %v13848_v1, %v13847_v39 }
0x1002   :  { %20821 = vmatpush3.bf16.xpose.msk.msra.mxu1 %vm23653_vm5, %v20819_v2 }
0x1003   :  { %20677 = vmatpush3.bf16.xpose.msk.msra.mxu0 %vm23653_vm5, %v20675_v27  ;;  %18972 = vmatprep.subr.mxu1 %v25874_v42  ;;  %v13831_v27 = vld [vmem:[#allocation3 + $0x422] sm:$0xff] }
0x1004   :  { %20728 = vmatprep.subr.msk.bf16.mxu0 %vm23653_vm5, %v20726_v57  ;;  %v20831_v2 = vpack.c.bf16 %v13832_v20, %v13831_v27  ;;  %v20834_v57 = vpack.c.bf16 %v13850_v34, %v13849_v43  ;;  %v21293_v34 = vmov 0  }
0x1005   :  { %21261 = vset.pattern.permute.xlu0 %v21293_v34  ;;  %21262 = vset.pattern.permute.xlu1 %v21293_v34 }
0x1009   :  { %18195 = vmatmul.mubr.msk.f32.vlgmr.msra.gmra.mrb[78].mxu1 %vm1356_vm2, %v25455_v18 }
0x100a   :  { %18093 = vmatmul.mubr.msk.f32.vlgmr.msra.gmra.mrb[14].mxu0 %vm1356_vm2, %v21289_v10  ;;  %18974 = vmatprep.mubr.msk.f32.mxu1 %vm21291_vm1, %v25874_v42  ;;  %v20840_v10 = vpack.c.bf16 %v13852_v6, %v13851_v32 }
0x100b   :  { %20731 = vmatpush3.bf16.xpose.msk.msra.mxu0 %vm23653_vm5, %v20729_v15  ;;  %18160 = vmatprep.mubr.msk.f32.mxu0 %vm1356_vm2, %v25455_v18  ;;  %v20837_v15 = vpack.c.bf16 %v13834_v47, %v13833_v50 }
0x100c   :  { %20734 = vmatprep.subr.msk.bf16.mxu0 %vm23653_vm5, %v20732_v31  ;;  %v13836_v31 = vld [vmem:[#allocation3 + $0x452] sm:$0xff] }
0x1013   :  { %20737 = vmatpush3.bf16.xpose.msk.msra.mxu0 %vm23653_vm5, %v20735_v36  ;;  %v20843_v36 = vpack.c.bf16 %v13836_v31, %v13835_v4 }
0x1014   :  { %20740 = vmatprep.subr.msk.bf16.mxu0 %vm23653_vm5, %v20738_v58  ;;  %v13838_v58 = vld [vmem:[#allocation3 + $0x46a] sm:$0xff] }
0x101b   :  { %20743 = vmatpush3.bf16.xpose.msk.msra.mxu0 %vm23653_vm5, %v20741_v19  ;;  %v20849_v19 = vpack.c.bf16 %v13838_v58, %v13837_v22 }
0x101c   :  { %20746 = vmatprep.subr.msk.bf16.mxu0 %vm23653_vm5, %v20744_v5  ;;  %v13840_v5 = vld [vmem:[#allocation3 + $0x47a] sm:$0xff] }
0x101d   :  { %v20855_v33 = vpack.c.bf16 %v13840_v5, %v13839_v17 }
0x1023   :  { %20749 = vmatpush3.bf16.xpose.msk.msra.mxu0 %vm23653_vm5, %v20747_v44  ;;  %v13857_v44 = vld [vmem:[#allocation3 + $0x52a] sm:$0xff] }
0x1024   :  { %20752 = vmatprep.subr.msk.bf16.mxu0 %vm23653_vm5, %v20750_v28  ;;  %v20858_v41 = vpack.c.bf16 %v13858_v55, %v13857_v44  ;;  %v13842_v28 = vld [vmem:[#allocation3 + $0x492] sm:$0xff] }
0x1025   :  { %v20861_v23 = vpack.c.bf16 %v13842_v28, %v13841_v14 }
0x102b   :  { %20755 = vmatpush3.bf16.xpose.msk.msra.mxu0 %vm23653_vm5, %v20753_v11  ;;  %v13859_v11 = vld [vmem:[#allocation3 + $0x53a] sm:$0xff] }
0x102c   :  { %20758 = vmatprep.subr.msk.bf16.mxu0 %vm23653_vm5, %v20756_v60  ;;  %v20864_v56 = vpack.c.bf16 %v13860_v16, %v13859_v11  ;;  %v13844_v60 = vld [vmem:[#allocation3 + $0x4a2] sm:$0xff] }
0x102d   :  { %v20867_v37 = vpack.c.bf16 %v13844_v60, %v13843_v9  ;;  %v14767_v9 = vld [vmem:[%s25725_s8] sm:$0x3] }
0x1033   :  { %20761 = vmatpush3.bf16.xpose.msk.msra.mxu0 %vm23653_vm5, %v20759_v62 }
0x1034   :  { %20764 = vmatprep.subr.msk.bf16.mxu0 %vm23653_vm5, %v20762_v21 }
0x103b   :  { %20767 = vmatpush3.bf16.xpose.msk.msra.mxu0 %vm23653_vm5, %v20765_v3 }
0x103c   :  { %20770 = vmatprep.subr.msk.bf16.mxu0 %vm23653_vm5, %v20768_v35 }
0x1043   :  { %20773 = vmatpush3.bf16.xpose.msk.msra.mxu0 %vm23653_vm5, %v20771_v49 }
0x1044   :  { %20824 = vmatprep.subr.msk.bf16.mxu0 %vm23653_vm5, %v20822_v24 }
0x104a   :  { %18161 = vmatmul.mubr.msk.f32.vlgmr.msra.gmra.mrb[12].mxu0 %vm1356_vm2, %v25455_v18 }
0x104b   :  { %20827 = vmatpush3.bf16.xpose.msk.msra.mxu0 %vm23653_vm5, %v20825_v51  ;;  %18228 = vmatprep.mubr.msk.f32.mxu0 %vm1356_vm2, %v25455_v18 }
0x104c   :  { %20830 = vmatprep.subr.msk.bf16.mxu0 %vm23653_vm5, %v20828_v45  ;;  %v14560_v45 = vld [vmem:[%s25724_s13] sm:$0x3] }
0x1053   :  { %20833 = vmatpush3.bf16.xpose.msk.msra.mxu0 %vm23653_vm5, %v20831_v2 }
0x1054   :  { %20836 = vmatprep.subr.msk.bf16.mxu0 %vm23653_vm5, %v20834_v57 }
0x105b   :  { %20839 = vmatpush3.bf16.xpose.msk.msra.mxu0 %vm23653_vm5, %v20837_v15 }
0x105c   :  { %20842 = vmatprep.subr.msk.bf16.mxu0 %vm23653_vm5, %v20840_v10 }
0x1063   :  { %20845 = vmatpush3.bf16.xpose.msk.msra.mxu0 %vm23653_vm5, %v20843_v36 }
0x1064   :  { %20848 = vmatprep.subr.msk.bf16.mxu0 %vm23653_vm5, %v20846_v63 }
0x106b   :  { %20851 = vmatpush3.bf16.xpose.msk.msra.mxu0 %vm23653_vm5, %v20849_v19 }
0x106c   :  { %20854 = vmatprep.subr.msk.bf16.mxu0 %vm23653_vm5, %v20852_v53 }
0x1073   :  { %20857 = vmatpush3.bf16.xpose.msk.msra.mxu0 %vm23653_vm5, %v20855_v33 }
0x1074   :  { %20860 = vmatprep.subr.msk.bf16.mxu0 %vm23653_vm5, %v20858_v41 }
0x107b   :  { %20863 = vmatpush3.bf16.xpose.msk.msra.mxu0 %vm23653_vm5, %v20861_v23 }
0x107c   :  { %20866 = vmatprep.subr.msk.bf16.mxu0 %vm23653_vm5, %v20864_v56 }
0x1083   :  { %20869 = vmatpush3.bf16.xpose.msk.msra.mxu0 %vm23653_vm5, %v20867_v37 }
0x108a   :  { %18229 = vmatmul.mubr.msk.f32.vlgmr.msra.gmra.mrb[14].mxu0 %vm1356_vm2, %v25455_v18 }
0x109c   :  { %v14316_v52 = vpop.f32.mrb[76].mxu1 }
0x109d   :  { %v14543_v62 = vsel %vm14542_vm6, %v14316_v52, 0.0  ;;  %v14318_v25 = vpop.f32.mrb[77].mxu1 }
0x109e   :  { %v14544_v21 = vsel %vm14542_vm6, %v14318_v25, 0.0 }
0x109f   :  { %v14545_v46 = vadd.f32 %v14544_v21, %v14543_v62 }
0x10dc   :  { %v14458_v12 = vpop.f32.mrb[78].mxu1 }
0x10dd   :  { %v14460_v0 = vpop.f32.mrb[79].mxu1  ;;  %v14550_v18 = vsel %vm14542_vm6, %v14458_v12, 0.0 }
0x10de   :  { %v14552_v49 = vsel %vm14542_vm6, %v14460_v0, 0.0 }
0x111d   :  { %v14387_v3 = vpop.f32.mrb[12].mxu0 }
0x111e   :  { %v14546_v59 = vsel %vm14542_vm6, %v14387_v3, 0.0  ;;  %v14389_v35 = vpop.f32.mrb[13].mxu0 }
0x111f   :  { %v14547_v30 = vadd.f32 %v14546_v59, %v14545_v46  ;;  %v14548_v38 = vsel %vm14542_vm6, %v14389_v35, 0.0  ;;  %v14781_v46 = vld [vmem:[%s25726_s9] sm:$0x3] }
0x1121   :  { %v14549_v13 = vadd.f32 %v14548_v38, %v14547_v30 }
0x1123   :  { %v14551_v54 = vadd.f32 %v14550_v18, %v14549_v13 }
0x1125   :  { %v14553_v26 = vadd.f32 %v14552_v49, %v14551_v54 }
0x115d   :  { %v14529_v24 = vpop.f32.mrb[14].mxu0 }
0x115e   :  { %v14554_v7 = vsel %vm14542_vm6, %v14529_v24, 0.0  ;;  %v14531_v1 = vpop.f32.mrb[15].mxu0 }
0x115f   :  { %v14556_v29 = vsel %vm14542_vm6, %v14531_v1, 0.0  ;;  %v14555_v51 = vadd.f32 %v14554_v7, %v14553_v26 }
0x1161   :  { %v14557_v39 = vadd.f32 %v14556_v29, %v14555_v51 }
0x1163   :  { %14558 = vadd.xlane.f32.xlu0 %v14557_v39 }
0x11f0   :  { %v14559_v20 = vpop.xlane.xlu0 %14558 }
0x11f1   :  { %18973 = vmatpush3.msk.msra.mxu1 %vm14542_vm6, %v14559_v20 }
0x11f2   :  { %18975 = vmatmul.mubr.msk.f32.vlgmr.msra.gmra.mrb[80].mxu1 %vm14561_vm7, %v14560_v45  ;;  %18977 = vmatprep.subr.mxu1 %v25874_v42 }
0x11f3   :  { %18979 = vmatprep.mubr.msk.f32.mxu1 %vm21291_vm1, %v25874_v42 }
0x12c5   :  { %v14634_v27 = vpop.f32.mrb[80].mxu1 }
0x12c6   :  { %v14639_v2 = vmul.f32 0.00048828125, %v14634_v27  ;;  %v18976_v43 = vpop.f32.mrb[81].mxu1 }
0x12c8   :  { %14642 = vperm.xlu0 %21261, %v14639_v2  }
0x1347   :  { %v14643_v57 = vpop.permute.xlu0 %14642 }
0x1348   :  { %v14645_v47 = vsub.f32 %v14316_v52, %v14643_v57  ;;  %v14646_v6 = vsub.f32 %v14318_v25, %v14643_v57  ;;  %v14647_v50 = vsub.f32 %v14387_v3, %v14643_v57  ;;  %v14648_v15 = vsub.f32 %v14389_v35, %v14643_v57 }
0x1349   :  { %v14649_v32 = vsub.f32 %v14458_v12, %v14643_v57  ;;  %v14650_v8 = vsub.f32 %v14460_v0, %v14643_v57  ;;  %v14651_v58 = vsub.f32 %v14529_v24, %v14643_v57  ;;  %v14652_v19 = vsub.f32 %v14531_v1, %v14643_v57 }
0x134a   :  { %v14653_v10 = vmul.f32 %v14645_v47, %v14645_v47  ;;  %v14654_v31 = vmul.f32 %v14646_v6, %v14646_v6  ;;  %v14655_v61 = vmul.f32 %v14647_v50, %v14647_v50  ;;  %v14656_v4 = vmul.f32 %v14648_v15, %v14648_v15 }
0x134b   :  { %v14657_v40 = vmul.f32 %v14649_v32, %v14649_v32  ;;  %v14658_v53 = vmul.f32 %v14650_v8, %v14650_v8  ;;  %v14659_v17 = vmul.f32 %v14651_v58, %v14651_v58  ;;  %v14660_v41 = vmul.f32 %v14652_v19, %v14652_v19 }
0x134c   :  { %v14661_v42 = vsel %vm14542_vm6, %v14653_v10, 0.0  ;;  %v14662_v36 = vsel %vm14542_vm6, %v14654_v31, 0.0  ;;  %v14664_v48 = vsel %vm14542_vm6, %v14655_v61, 0.0  ;;  %v14666_v5 = vsel %vm14542_vm6, %v14656_v4, 0.0  ;;  %v25878_v31 = vld [vmem:[#allocation4_spill] sm:$0xff] }
0x134d   :  { %v14663_v63 = vadd.f32 %v14662_v36, %v14661_v42  ;;  %v14668_v33 = vsel %vm14542_vm6, %v14657_v40, 0.0  ;;  %v14670_v28 = vsel %vm14542_vm6, %v14658_v53, 0.0  ;;  %v14672_v14 = vsel %vm14542_vm6, %v14659_v17, 0.0 }
0x134e   :  { %v14674_v11 = vsel %vm14542_vm6, %v14660_v41, 0.0 }
0x134f   :  { %v14665_v22 = vadd.f32 %v14664_v48, %v14663_v63 }
0x1351   :  { %v14667_v55 = vadd.f32 %v14666_v5, %v14665_v22 }
0x1353   :  { %v14669_v44 = vadd.f32 %v14668_v33, %v14667_v55 }
0x1355   :  { %v14671_v16 = vadd.f32 %v14670_v28, %v14669_v44 }
0x1357   :  { %v14673_v23 = vadd.f32 %v14672_v14, %v14671_v16 }
0x1359   :  { %v14675_v56 = vadd.f32 %v14674_v11, %v14673_v23 }
0x135b   :  { %14676 = vadd.xlane.f32.xlu1 %v14675_v56 }
0x136c   :  { %14770 = vperm.xlu1 %21262, %v14767_v9  }
0x13e8   :  { %v14677_v60 = vpop.xlane.xlu1 %14676 }
0x13e9   :  { %18978 = vmatpush3.msk.msra.mxu1 %vm14542_vm6, %v14677_v60 }
0x13ea   :  { %18980 = vmatmul.mubr.msk.f32.vlgmr.msra.gmra.mrb[82].mxu1 %vm14561_vm7, %v14560_v45 }
0x13ec   :  { %v14771_v12 = vpop.permute.xlu1 %14770 }
0x14bd   :  { %v14747_v37 = vpop.f32.mrb[82].mxu1 }
0x14be   :  { %v14751_v52 = vmul.f32 0.00048828125, %v14747_v37  ;;  %v18981_v62 = vpop.f32.mrb[83].mxu1 }
0x14c0   :  { %v14752_v25 = vadd.f32 0.001, %v14751_v52 }
0x14c2   :  { %21267 = vrsqrt.f32 %v14752_v25 }
0x14cc   :  { %v21268_v21 = vpop.eup %21267 }
0x14cd   :  { %14756 = vperm.xlu1 %21262, %v21268_v21  }
0x14d1   :  { %14784 = vperm.xlu1 %21262, %v14781_v46  }
0x154c   :  { %v14757_v0 = vpop.permute.xlu1 %14756 }
0x154d   :  { %v14759_v3 = vmul.f32 %v14757_v0, %v14645_v47  ;;  %v14760_v59 = vmul.f32 %v14757_v0, %v14646_v6  ;;  %v14761_v35 = vmul.f32 %v14757_v0, %v14647_v50  ;;  %v14762_v30 = vmul.f32 %v14757_v0, %v14648_v15 }
0x154e   :  { %v14763_v38 = vmul.f32 %v14757_v0, %v14649_v32  ;;  %v14764_v13 = vmul.f32 %v14757_v0, %v14650_v8  ;;  %v14765_v18 = vmul.f32 %v14757_v0, %v14651_v58  ;;  %v14766_v54 = vmul.f32 %v14757_v0, %v14652_v19 }
0x154f   :  { %v14773_v49 = vmul.f32 %v14771_v12, %v14759_v3  ;;  %v14774_v26 = vmul.f32 %v14771_v12, %v14760_v59  ;;  %v14775_v24 = vmul.f32 %v14771_v12, %v14761_v35  ;;  %v14776_v7 = vmul.f32 %v14771_v12, %v14762_v30 }
0x1550   :  { %v14777_v1 = vmul.f32 %v14771_v12, %v14763_v38  ;;  %v14778_v29 = vmul.f32 %v14771_v12, %v14764_v13  ;;  %v14785_v51 = vpop.permute.xlu1 %14784  ;;  %v14779_v39 = vmul.f32 %v14771_v12, %v14765_v18  ;;  %v14780_v27 = vmul.f32 %v14771_v12, %v14766_v54 }
0x1551   :  { %v14787_v45 = vadd.f32 %v14785_v51, %v14773_v49  ;;  %v14788_v20 = vadd.f32 %v14785_v51, %v14774_v26  ;;  %v14789_v34 = vadd.f32 %v14785_v51, %v14775_v24  ;;  %v14790_v2 = vadd.f32 %v14785_v51, %v14776_v7 }
0x1552   :  { %v14791_v43 = vadd.f32 %v14785_v51, %v14777_v1  ;;  %v14792_v57 = vadd.f32 %v14785_v51, %v14778_v29  ;;  %v21294_v47 = vmov 1983009808   ;;  %v14793_v50 = vadd.f32 %v14785_v51, %v14779_v39 }
0x1553   :  { %21269 = vtanh.f32 %v14787_v45  ;;  %v14814_v6 = vunpack.c.l.s4 %v21294_v47  ;;  %v14794_v15 = vadd.f32 %v14785_v51, %v14780_v27 }
0x1554   :  { %21271 = vtanh.f32 %v14788_v20 }
0x1555   :  { %21273 = vtanh.f32 %v14789_v34  ;;  %v14815_v32 = vunpack.c.0.s8 %v14814_v6 }
0x1556   :  { %21275 = vtanh.f32 %v14790_v2 }
0x1557   :  { %21277 = vtanh.f32 %v14791_v43  ;;  %v14818_v61 = vsub.s32 %v14815_v32, %v25878_v31 }
0x1558   :  { %21279 = vtanh.f32 %v14792_v57 }
0x1559   :  { %21281 = vtanh.f32 %v14793_v50 }
0x155a   :  { %21283 = vtanh.f32 %v14794_v15 }
0x155d   :  { %v21270_v10 = vpop.eup %21269 }
0x155e   :  { %v21272_v8 = vpop.eup %21271 }
0x155f   :  { %v21274_v4 = vpop.eup %21273  ;;  %v14811_v42 = vcombine.low %v21270_v10, %v21272_v8 }
0x1560   :  { %v21276_v36 = vpop.eup %21275 }
0x1561   :  { %v21278_v63 = vpop.eup %21277  ;;  %v14812_v58 = vcombine.low %v21274_v4, %v21276_v36  ;;  %v14819_v40 = vrot.slane %v14811_v42, %v14818_v61 }
0x1562   :  { %v21280_v48 = vpop.eup %21279 }
0x1563   :  { %v21282_v22 = vpop.eup %21281  ;;  %v14826_v19 = vrot.slane %v14812_v58, %v14818_v61  ;;  %v14828_v53 = vcombine.low %v21278_v63, %v21280_v48 }
0x1564   :  { %v21284_v5 = vpop.eup %21283 }
0x1565   :  { %v14827_v55 = vcombine.low %v14819_v40, %v14826_v19  ;;  %v14829_v17 = vcombine.low %v21282_v22, %v21284_v5  ;;  %v14836_v33 = vrot.slane %v14828_v53, %v14818_v61 }
0x1567   :  { %v14843_v44 = vrot.slane %v14829_v17, %v14818_v61  ;;  %14847 = vst [vmem:[%s25727_s14] sm:$0xff] %v14827_v55 }
0x1569   :  { %v14844_v41 = vcombine.low %v14836_v33, %v14843_v44 }
0x156b   :  { %14848 = vst [vmem:[%s25727_s14 + $0x8] sm:$0xff] %v14844_v41 }

</bundles_post_ra>
